<compile_context>
chip_gen: v7x
topology: tpu7x:2x2x1
jax: 0.10.0
libtpu: 0.0.40
codegen_flags: <defaults>
</compile_context>

<pallas_src>
import functools

import jax
import jax.numpy as jnp
from jax.experimental import pallas as pl
from jax.experimental.pallas import tpu as pltpu

NB = 2  # number of ResBlocks


# ----------------------------------------------------------------------------
# Weight prep: HWIO (3,3,Cin,Cout) -> im2col matrix (Cout, 9*Cin)
# column order: tap t = dy*3+dx major, ci minor (matches patch construction)
# ----------------------------------------------------------------------------
def _prep_w(w_hwio):
    kh, kw, cin, cout = w_hwio.shape
    return jnp.transpose(w_hwio, (3, 0, 1, 2)).reshape(cout, kh * kw * cin)


def _default_tap_dtype(mxu_dtype):
    """Taps are shifted/masked on the VPU: build them in f32 on pre-v6 chips
    (no bf16 VPU datapath), in mxu_dtype (bf16) on v6e/v7x to halve traffic."""
    if jnp.dtype(mxu_dtype) == jnp.dtype(jnp.float32):
        return jnp.float32
    try:
        kind = jax.devices()[0].device_kind.lower()
    except Exception:
        kind = ""
    if any(v in kind for v in ("v2", "v3", "v4", "v5")):
        return jnp.float32
    return mxu_dtype


def _pick_images_per_step(n_images, hw, requested=None):
    """Fold several images into one grid step (amortize per-step overhead),
    but keep >= 2 grid steps when possible so both v7x TensorCores get work."""
    if requested is not None:
        if n_images % requested:
            raise ValueError("images_per_step must divide the batch size")
        return requested
    max_lanes = 4096  # keeps the (9F, B*HW) bf16 patches scratch ~2.3 MiB at F=32
    divs = [d for d in range(1, n_images + 1)
            if n_images % d == 0 and d * hw <= max_lanes]
    if not divs:
        return 1
    pref = [d for d in divs if n_images // d >= 2]
    return max(pref) if pref else max(divs)


# ----------------------------------------------------------------------------
# Fused LAT kernel (whole network, B images per grid step)
# ----------------------------------------------------------------------------
def _make_lat_kernel(H, W, B, Cin, F, mxu_dtype, tap_dtype, out_dtype):
    HW = H * W
    BHW = B * HW

    def kernel(x_ref, wh_ref, bh_ref, wb_ref, wt_ref, bt_ref, alphas_ref,
               o_ref, patches_ref):
        # ---- border / image-boundary masks (built once, amortized over B) ----
        flat = jax.lax.broadcasted_iota(jnp.int32, (1, BHW), 1)
        col = flat % W
        pix = flat % HW
        mask_x0 = col == 0            # taps reading x-1 invalid at x == 0
        mask_xl = col == (W - 1)      # taps reading x+1 invalid at x == W-1
        mask_y0 = pix < W             # taps reading y-1: first row of each image
        mask_yl = pix >= (HW - W)     # taps reading y+1: last  row of each image
        # (row masks also stop roll wrap-around leaking between adjacent images)

        tap_mask = {}
        for dy in range(3):
            for dx in range(3):
                m = None
                if dx == 0:
                    m = mask_x0
                elif dx == 2:
                    m = mask_xl
                if dy == 0:
                    m = mask_y0 if m is None else jnp.logical_or(m, mask_y0)
                elif dy == 2:
                    m = mask_yl if m is None else jnp.logical_or(m, mask_yl)
                tap_mask[(dy, dx)] = m

        def tap(xf, dy, dx):
            """Zero-padded (dy-1, dx-1)-shifted view of xf (C, BHW): XLU lane
            rotation + border mask (no concat-with-zeros copies)."""
            k = (dy - 1) * W + (dx - 1)
            s = xf if k == 0 else pltpu.roll(xf, shift=(-k) % BHW, axis=1)
            m = tap_mask[(dy, dx)]
            return s if m is None else jnp.where(m, 0.0, s)

        def conv3x3_mxu(feat, w2d):
            """feat (Cin, BHW) f32, w2d (Cout, 9*Cin) -> (Cout, BHW) f32.
            One im2col matmul, K = 9*Cin, lane-dense N = B*HW; taps written
            straight into the VMEM patches scratch."""
            cin = feat.shape[0]
            xf = feat.astype(tap_dtype)
            for dy in range(3):
                for dx in range(3):
                    t = dy * 3 + dx
                    patches_ref[t * cin:(t + 1) * cin, :] = (
                        tap(xf, dy, dx).astype(mxu_dtype))
            return jnp.dot(w2d, patches_ref[:9 * cin, :],
                           preferred_element_type=jnp.float32)

        def conv3x3_vpu(feat, w2d):
            """Cin==1 degenerate conv (K=9): 9 broadcast FMAs on the VPU (f32)."""
            xf = feat.astype(jnp.float32)
            w = w2d.astype(jnp.float32)                       # (Cout, 9)
            acc = w[:, 0:1] * tap(xf, 0, 0)
            for t in range(1, 9):
                acc = acc + w[:, t:t + 1] * tap(xf, t // 3, t % 3)
            return acc

        a_head = alphas_ref[0]        # SMEM scalars (free scalar-path reads)
        a_tail = alphas_ref[1]

        x = x_ref[...].astype(jnp.float32)                    # (Cin, B*HW)

        # --- convhead: conv + bias + PReLU ---------------------------------
        if Cin == 1:
            f = conv3x3_vpu(x, wh_ref[...])
        else:
            f = conv3x3_mxu(x, wh_ref[...].astype(mxu_dtype))
        f = f + bh_ref[...].astype(jnp.float32)
        f = jnp.where(f >= 0.0, f, a_head * f)

        # --- convbody: NB x (conv -> LeakyReLU(0.2) -> conv -> +identity) ---
        for i in range(NB):
            r = conv3x3_mxu(f, wb_ref[2 * i])
            r = jnp.where(r >= 0.0, r, 0.2 * r)
            r = conv3x3_mxu(r, wb_ref[2 * i + 1])
            f = f + r

        # --- convtail: conv + bias + PReLU (M=1 matmul, runs once) ----------
        y = conv3x3_mxu(f, wt_ref[...])
        y = y + bt_ref[...].astype(jnp.float32)
        y = jnp.where(y >= 0.0, y, a_tail * y)
        o_ref[...] = y.astype(out_dtype)

    return kernel


def lat_forward(x_nchw, p, *, mxu_dtype=jnp.bfloat16, tap_dtype=None,
                images_per_step=None):
    """LAT forward. x_nchw: (N, Cin, H, W) -> (N, Cin, H, W)."""
    N, Cin, H, W = x_nchw.shape
    F = p["w_head"].shape[-1]
    HW = H * W
    B = _pick_images_per_step(N, HW, images_per_step)
    BHW = B * HW
    if tap_dtype is None:
        tap_dtype = _default_tap_dtype(mxu_dtype)

    # channels-major, lane-dense layout: (Cin, N*HW); images contiguous in lanes
    x2d = jnp.transpose(x_nchw, (1, 0, 2, 3)).reshape(Cin, N * HW)

    wh = _prep_w(p["w_head"]).astype(jnp.float32)             # (F, 9*Cin) f32 VPU path
    bh = p["b_head"].reshape(F, 1).astype(jnp.float32)
    wb = jnp.stack([_prep_w(p[f"w{i}_{j}"]).astype(mxu_dtype)
                    for i in range(NB) for j in (1, 2)])      # (2*NB, F, 9*F)
    wt = _prep_w(p["w_tail"]).astype(mxu_dtype)               # (Cin, 9*F)
    bt = p["b_tail"].reshape(Cin, 1).astype(jnp.float32)
    alphas = jnp.array([p["a_head"], p["a_tail"]], jnp.float32)

    kernel = _make_lat_kernel(H, W, B, Cin, F, mxu_dtype, tap_dtype,
                              x_nchw.dtype)
    out2d = pl.pallas_call(
        kernel,
        out_shape=jax.ShapeDtypeStruct((Cin, N * HW), x_nchw.dtype),
        grid=(N // B,),
        in_specs=[
            pl.BlockSpec((Cin, BHW), lambda n: (0, n)),            # x
            pl.BlockSpec(wh.shape, lambda n: (0, 0)),              # w_head (f32)
            pl.BlockSpec(bh.shape, lambda n: (0, 0)),              # b_head
            pl.BlockSpec(wb.shape, lambda n: (0, 0, 0)),           # body ws
            pl.BlockSpec(wt.shape, lambda n: (0, 0)),              # w_tail
            pl.BlockSpec(bt.shape, lambda n: (0, 0)),              # b_tail
            pl.BlockSpec(memory_space=pltpu.MemorySpace.SMEM),     # alphas
        ],
        out_specs=pl.BlockSpec((Cin, BHW), lambda n: (0, n)),
        scratch_shapes=[pltpu.VMEM((9 * max(F, Cin), BHW), mxu_dtype)],
        compiler_params=pltpu.CompilerParams(
            dimension_semantics=("parallel",)),
    )(x2d, wh, bh, wb, wt, bt, alphas)
    return jnp.transpose(out2d.reshape(Cin, N, H, W), (1, 0, 2, 3))


# ----------------------------------------------------------------------------
# Pure-JAX reference (NCHW)
# ----------------------------------------------------------------------------
def _ref_conv3x3(x, w, b=None, act=None, alpha=None, residual=None):
    y = jax.lax.conv_general_dilated(
        x, w, (1, 1), "SAME", dimension_numbers=("NCHW", "HWIO", "NCHW"))
    if b is not None:
        y = y + b.reshape(1, -1, 1, 1)
    if act == "prelu":
        y = jnp.where(y >= 0.0, y, alpha * y)
    elif act == "lrelu":
        y = jnp.where(y >= 0.0, y, 0.2 * y)
    if residual is not None:
        y = y + residual
    return y


def lat_forward_ref(x_nchw, p):
    f = _ref_conv3x3(x_nchw, p["w_head"], b=p["b_head"], act="prelu",
                     alpha=p["a_head"])
    for i in range(NB):
        r = _ref_conv3x3(f, p[f"w{i}_1"], act="lrelu")
        f = _ref_conv3x3(r, p[f"w{i}_2"], residual=f)
    f = _ref_conv3x3(f, p["w_tail"], b=p["b_tail"], act="prelu",
                     alpha=p["a_tail"])
    return f


# ----------------------------------------------------------------------------
# Deterministic parameter init (synthetic — matches module shapes, not a ckpt)
# ----------------------------------------------------------------------------
def init_params(key, in_ch=1, num_features=32):
    ks = jax.random.split(key, 2 + 2 * NB)
    p = {}

    def _w(k, shape):
        fan_in = shape[0] * shape[1] * shape[2]
        return jax.random.normal(k, shape, jnp.float32) / jnp.sqrt(fan_in)

    p["w_head"] = _w(ks[0], (3, 3, in_ch, num_features))
    p["b_head"] = jnp.zeros((num_features,), jnp.float32)
    p["a_head"] = 0.05  # PReLU slope (single shared parameter)
    for i in range(NB):
        p[f"w{i}_1"] = _w(ks[1 + 2 * i], (3, 3, num_features, num_features))
        p[f"w{i}_2"] = _w(ks[2 + 2 * i], (3, 3, num_features, num_features))
    p["w_tail"] = _w(ks[-1], (3, 3, num_features, in_ch))
    p["b_tail"] = jnp.zeros((in_ch,), jnp.float32)
    p["a_tail"] = 0.05
    return p


if __name__ == "__main__":
    key = jax.random.PRNGKey(0)
    k_x, k_p = jax.random.split(key)

    N, C, H, W = 4, 1, 16, 16                       # PyTorch NCHW input shape
    x_nchw = jax.random.normal(k_x, (N, C, H, W), jnp.float32)
    params = init_params(k_p, in_ch=C, num_features=32)

    ref = lat_forward_ref(x_nchw, params)

    # strict numerics check: f32 MXU operands (B=2 images folded per grid step)
    fwd_f32 = jax.jit(functools.partial(lat_forward, mxu_dtype=jnp.float32))
    out = jax.block_until_ready(fwd_f32(x_nchw, params))
    assert out.shape == (N, C, H, W), out.shape
    assert jnp.allclose(out, ref, rtol=1e-4, atol=1e-4), (
        float(jnp.max(jnp.abs(out - ref))))

    # optimized path: bf16 MXU operands, f32 accumulate
    fwd_bf16 = jax.jit(functools.partial(lat_forward, mxu_dtype=jnp.bfloat16))
    out_bf16 = jax.block_until_ready(fwd_bf16(x_nchw, params))
    assert jnp.allclose(out_bf16, ref, rtol=5e-2, atol=5e-2), (
        float(jnp.max(jnp.abs(out_bf16 - ref))))

    # one image per step (exercises B=1 path / 4 grid steps) — same numerics
    fwd_b1 = jax.jit(functools.partial(lat_forward, mxu_dtype=jnp.float32,
                                       images_per_step=1))
    out_b1 = jax.block_until_ready(fwd_b1(x_nchw, params))
    assert jnp.allclose(out_b1, ref, rtol=1e-4, atol=1e-4)

    print("KERNEL_OK")
</pallas_src>

<mosaic_0001>
module attributes {stable_mosaic.version = 11 : i64} {
  func.func @kernel(%arg0: i32, %arg1: memref<1x512xf32, #tpu.memory_space<vmem>>, %arg2: memref<32x9xf32, #tpu.memory_space<vmem>>, %arg3: memref<32x1xf32, #tpu.memory_space<vmem>>, %arg4: memref<4x32x288xf32, #tpu.memory_space<vmem>>, %arg5: memref<1x288xf32, #tpu.memory_space<vmem>>, %arg6: memref<1x1xf32, #tpu.memory_space<vmem>>, %arg7: memref<2xf32, #tpu.memory_space<smem>>, %arg8: memref<1x512xf32, #tpu.memory_space<vmem>>, %arg9: memref<288x512xf32, #tpu.memory_space<vmem>>) attributes {dimension_semantics = [#tpu.dimension_semantics<parallel>], iteration_bounds = array<i64: 2>, scalar_prefetch = 0 : i64, scratch_operands = 1 : i64, tpu.core_type = #tpu.core_type<tc>, window_params = [{transform_indices = @transform_0, window_bounds = array<i64: 1, 512>}, {pipeline_mode = #tpu.pipeline_mode<synchronous>, transform_indices = @transform_1, window_bounds = array<i64: 32, 9>}, {pipeline_mode = #tpu.pipeline_mode<synchronous>, transform_indices = @transform_2, window_bounds = array<i64: 32, 1>}, {pipeline_mode = #tpu.pipeline_mode<synchronous>, transform_indices = @transform_3, window_bounds = array<i64: 4, 32, 288>}, {pipeline_mode = #tpu.pipeline_mode<synchronous>, transform_indices = @transform_4, window_bounds = array<i64: 1, 288>}, {pipeline_mode = #tpu.pipeline_mode<synchronous>, transform_indices = @transform_5, window_bounds = array<i64: 1, 1>}, {transform_indices = @transform_6, window_bounds = array<i64: 2>}, {transform_indices = @transform_7, window_bounds = array<i64: 1, 512>}]} {
    %0 = tpu.iota {dimensions = array<i32: 1>} : vector<1x512xi32>
    %c16_i32 = arith.constant 16 : i32
    %c0_i32 = arith.constant 0 : i32
    %1 = arith.cmpi eq, %c16_i32, %c0_i32 : i32
    %c1_i32 = arith.constant 1 : i32
    %2 = arith.select %1, %c1_i32, %c16_i32 : i32
    %3 = vector.broadcast %2 : i32 to vector<1x512xi32>
    %4 = arith.remsi %0, %3 : vector<1x512xi32>
    %c0_i32_0 = arith.constant 0 : i32
    %5 = vector.broadcast %c0_i32_0 : i32 to vector<1x512xi32>
    %6 = arith.cmpi ne, %4, %5 : vector<1x512xi32>
    %c0_i32_1 = arith.constant 0 : i32
    %7 = vector.broadcast %c0_i32_1 : i32 to vector<1x512xi32>
    %8 = arith.cmpi slt, %4, %7 : vector<1x512xi32>
    %c0_i32_2 = arith.constant 0 : i32
    %9 = arith.cmpi slt, %2, %c0_i32_2 : i32
    %10 = vector.broadcast %9 : i1 to vector<1x512xi1>
    %11 = vector.broadcast %10 : vector<1x512xi1> to vector<1x512xi1>
    %12 = arith.xori %8, %11 : vector<1x512xi1>
    %13 = arith.andi %12, %6 : vector<1x512xi1>
    %14 = vector.broadcast %2 : i32 to vector<1x512xi32>
    %15 = arith.addi %4, %14 : vector<1x512xi32>
    %16 = arith.select %13, %15, %4 : vector<1x512xi1>, vector<1x512xi32>
    %c256_i32 = arith.constant 256 : i32
    %c0_i32_3 = arith.constant 0 : i32
    %17 = arith.cmpi eq, %c256_i32, %c0_i32_3 : i32
    %c1_i32_4 = arith.constant 1 : i32
    %18 = arith.select %17, %c1_i32_4, %c256_i32 : i32
    %19 = vector.broadcast %18 : i32 to vector<1x512xi32>
    %20 = arith.remsi %0, %19 : vector<1x512xi32>
    %c0_i32_5 = arith.constant 0 : i32
    %21 = vector.broadcast %c0_i32_5 : i32 to vector<1x512xi32>
    %22 = arith.cmpi ne, %20, %21 : vector<1x512xi32>
    %c0_i32_6 = arith.constant 0 : i32
    %23 = vector.broadcast %c0_i32_6 : i32 to vector<1x512xi32>
    %24 = arith.cmpi slt, %20, %23 : vector<1x512xi32>
    %c0_i32_7 = arith.constant 0 : i32
    %25 = arith.cmpi slt, %18, %c0_i32_7 : i32
    %26 = vector.broadcast %25 : i1 to vector<1x512xi1>
    %27 = vector.broadcast %26 : vector<1x512xi1> to vector<1x512xi1>
    %28 = arith.xori %24, %27 : vector<1x512xi1>
    %29 = arith.andi %28, %22 : vector<1x512xi1>
    %30 = vector.broadcast %18 : i32 to vector<1x512xi32>
    %31 = arith.addi %20, %30 : vector<1x512xi32>
    %32 = arith.select %29, %31, %20 : vector<1x512xi1>, vector<1x512xi32>
    %c0_i32_8 = arith.constant 0 : i32
    %33 = vector.broadcast %c0_i32_8 : i32 to vector<1x512xi32>
    %34 = arith.cmpi eq, %16, %33 : vector<1x512xi32>
    %c15_i32 = arith.constant 15 : i32
    %35 = vector.broadcast %c15_i32 : i32 to vector<1x512xi32>
    %36 = arith.cmpi eq, %16, %35 : vector<1x512xi32>
    %c16_i32_9 = arith.constant 16 : i32
    %37 = vector.broadcast %c16_i32_9 : i32 to vector<1x512xi32>
    %38 = arith.cmpi slt, %32, %37 : vector<1x512xi32>
    %c240_i32 = arith.constant 240 : i32
    %39 = vector.broadcast %c240_i32 : i32 to vector<1x512xi32>
    %40 = arith.cmpi sge, %32, %39 : vector<1x512xi32>
    %41 = arith.ori %34, %38 : vector<1x512xi1>
    %42 = arith.ori %36, %38 : vector<1x512xi1>
    %43 = arith.ori %34, %40 : vector<1x512xi1>
    %44 = arith.ori %36, %40 : vector<1x512xi1>
    %c0 = arith.constant 0 : index
    %45 = memref.load %arg7[%c0] : memref<2xf32, #tpu.memory_space<smem>>
    %c1 = arith.constant 1 : index
    %46 = memref.load %arg7[%c1] : memref<2xf32, #tpu.memory_space<smem>>
    %c0_10 = arith.constant 0 : index
    %c0_11 = arith.constant 0 : index
    %47 = vector.load %arg1[%c0_10, %c0_11] : memref<1x512xf32, #tpu.memory_space<vmem>>, vector<1x512xf32>
    %c0_12 = arith.constant 0 : index
    %c0_13 = arith.constant 0 : index
    %48 = vector.load %arg2[%c0_12, %c0_13] : memref<32x9xf32, #tpu.memory_space<vmem>>, vector<32x9xf32>
    %49 = vector.extract_strided_slice %48 {offsets = [0, 0], sizes = [32, 1], strides = [1, 1]} : vector<32x9xf32> to vector<32x1xf32>
    %c17_i32 = arith.constant 17 : i32
    %50 = tpu.dynamic_rotate %47 by %c17_i32 dim 1 : vector<1x512xf32>, i32 -> vector<1x512xf32>
    %cst = arith.constant 0.000000e+00 : f32
    %51 = vector.broadcast %cst : f32 to vector<1x512xf32>
    %52 = arith.select %41, %51, %50 : vector<1x512xi1>, vector<1x512xf32>
    %53 = vector.broadcast %49 : vector<32x1xf32> to vector<32x512xf32>
    %54 = vector.broadcast %52 : vector<1x512xf32> to vector<32x512xf32>
    %55 = arith.mulf %53, %54 : vector<32x512xf32>
    %56 = vector.extract_strided_slice %48 {offsets = [0, 1], sizes = [32, 1], strides = [1, 1]} : vector<32x9xf32> to vector<32x1xf32>
    %c16_i32_14 = arith.constant 16 : i32
    %57 = tpu.dynamic_rotate %47 by %c16_i32_14 dim 1 : vector<1x512xf32>, i32 -> vector<1x512xf32>
    %cst_15 = arith.constant 0.000000e+00 : f32
    %58 = vector.broadcast %cst_15 : f32 to vector<1x512xf32>
    %59 = arith.select %38, %58, %57 : vector<1x512xi1>, vector<1x512xf32>
    %60 = vector.broadcast %56 : vector<32x1xf32> to vector<32x512xf32>
    %61 = vector.broadcast %59 : vector<1x512xf32> to vector<32x512xf32>
    %62 = arith.mulf %60, %61 : vector<32x512xf32>
    %63 = arith.addf %55, %62 : vector<32x512xf32>
    %64 = vector.extract_strided_slice %48 {offsets = [0, 2], sizes = [32, 1], strides = [1, 1]} : vector<32x9xf32> to vector<32x1xf32>
    %c15_i32_16 = arith.constant 15 : i32
    %65 = tpu.dynamic_rotate %47 by %c15_i32_16 dim 1 : vector<1x512xf32>, i32 -> vector<1x512xf32>
    %cst_17 = arith.constant 0.000000e+00 : f32
    %66 = vector.broadcast %cst_17 : f32 to vector<1x512xf32>
    %67 = arith.select %42, %66, %65 : vector<1x512xi1>, vector<1x512xf32>
    %68 = vector.broadcast %64 : vector<32x1xf32> to vector<32x512xf32>
    %69 = vector.broadcast %67 : vector<1x512xf32> to vector<32x512xf32>
    %70 = arith.mulf %68, %69 : vector<32x512xf32>
    %71 = arith.addf %63, %70 : vector<32x512xf32>
    %72 = vector.extract_strided_slice %48 {offsets = [0, 3], sizes = [32, 1], strides = [1, 1]} : vector<32x9xf32> to vector<32x1xf32>
    %c1_i32_18 = arith.constant 1 : i32
    %73 = tpu.dynamic_rotate %47 by %c1_i32_18 dim 1 : vector<1x512xf32>, i32 -> vector<1x512xf32>
    %cst_19 = arith.constant 0.000000e+00 : f32
    %74 = vector.broadcast %cst_19 : f32 to vector<1x512xf32>
    %75 = arith.select %34, %74, %73 : vector<1x512xi1>, vector<1x512xf32>
    %76 = vector.broadcast %72 : vector<32x1xf32> to vector<32x512xf32>
    %77 = vector.broadcast %75 : vector<1x512xf32> to vector<32x512xf32>
    %78 = arith.mulf %76, %77 : vector<32x512xf32>
    %79 = arith.addf %71, %78 : vector<32x512xf32>
    %80 = vector.extract_strided_slice %48 {offsets = [0, 4], sizes = [32, 1], strides = [1, 1]} : vector<32x9xf32> to vector<32x1xf32>
    %81 = vector.broadcast %80 : vector<32x1xf32> to vector<32x512xf32>
    %82 = vector.broadcast %47 : vector<1x512xf32> to vector<32x512xf32>
    %83 = arith.mulf %81, %82 : vector<32x512xf32>
    %84 = arith.addf %79, %83 : vector<32x512xf32>
    %85 = vector.extract_strided_slice %48 {offsets = [0, 5], sizes = [32, 1], strides = [1, 1]} : vector<32x9xf32> to vector<32x1xf32>
    %c511_i32 = arith.constant 511 : i32
    %86 = tpu.dynamic_rotate %47 by %c511_i32 dim 1 : vector<1x512xf32>, i32 -> vector<1x512xf32>
    %cst_20 = arith.constant 0.000000e+00 : f32
    %87 = vector.broadcast %cst_20 : f32 to vector<1x512xf32>
    %88 = arith.select %36, %87, %86 : vector<1x512xi1>, vector<1x512xf32>
    %89 = vector.broadcast %85 : vector<32x1xf32> to vector<32x512xf32>
    %90 = vector.broadcast %88 : vector<1x512xf32> to vector<32x512xf32>
    %91 = arith.mulf %89, %90 : vector<32x512xf32>
    %92 = arith.addf %84, %91 : vector<32x512xf32>
    %93 = vector.extract_strided_slice %48 {offsets = [0, 6], sizes = [32, 1], strides = [1, 1]} : vector<32x9xf32> to vector<32x1xf32>
    %c497_i32 = arith.constant 497 : i32
    %94 = tpu.dynamic_rotate %47 by %c497_i32 dim 1 : vector<1x512xf32>, i32 -> vector<1x512xf32>
    %cst_21 = arith.constant 0.000000e+00 : f32
    %95 = vector.broadcast %cst_21 : f32 to vector<1x512xf32>
    %96 = arith.select %43, %95, %94 : vector<1x512xi1>, vector<1x512xf32>
    %97 = vector.broadcast %93 : vector<32x1xf32> to vector<32x512xf32>
    %98 = vector.broadcast %96 : vector<1x512xf32> to vector<32x512xf32>
    %99 = arith.mulf %97, %98 : vector<32x512xf32>
    %100 = arith.addf %92, %99 : vector<32x512xf32>
    %101 = vector.extract_strided_slice %48 {offsets = [0, 7], sizes = [32, 1], strides = [1, 1]} : vector<32x9xf32> to vector<32x1xf32>
    %c496_i32 = arith.constant 496 : i32
    %102 = tpu.dynamic_rotate %47 by %c496_i32 dim 1 : vector<1x512xf32>, i32 -> vector<1x512xf32>
    %cst_22 = arith.constant 0.000000e+00 : f32
    %103 = vector.broadcast %cst_22 : f32 to vector<1x512xf32>
    %104 = arith.select %40, %103, %102 : vector<1x512xi1>, vector<1x512xf32>
    %105 = vector.broadcast %101 : vector<32x1xf32> to vector<32x512xf32>
    %106 = vector.broadcast %104 : vector<1x512xf32> to vector<32x512xf32>
    %107 = arith.mulf %105, %106 : vector<32x512xf32>
    %108 = arith.addf %100, %107 : vector<32x512xf32>
    %109 = vector.extract_strided_slice %48 {offsets = [0, 8], sizes = [32, 1], strides = [1, 1]} : vector<32x9xf32> to vector<32x1xf32>
    %c495_i32 = arith.constant 495 : i32
    %110 = tpu.dynamic_rotate %47 by %c495_i32 dim 1 : vector<1x512xf32>, i32 -> vector<1x512xf32>
    %cst_23 = arith.constant 0.000000e+00 : f32
    %111 = vector.broadcast %cst_23 : f32 to vector<1x512xf32>
    %112 = arith.select %44, %111, %110 : vector<1x512xi1>, vector<1x512xf32>
    %113 = vector.broadcast %109 : vector<32x1xf32> to vector<32x512xf32>
    %114 = vector.broadcast %112 : vector<1x512xf32> to vector<32x512xf32>
    %115 = arith.mulf %113, %114 : vector<32x512xf32>
    %116 = arith.addf %108, %115 : vector<32x512xf32>
    %c0_24 = arith.constant 0 : index
    %c0_25 = arith.constant 0 : index
    %117 = vector.load %arg3[%c0_24, %c0_25] : memref<32x1xf32, #tpu.memory_space<vmem>>, vector<32x1xf32>
    %118 = vector.broadcast %117 : vector<32x1xf32> to vector<32x512xf32>
    %119 = arith.addf %116, %118 : vector<32x512xf32>
    %cst_26 = arith.constant 0.000000e+00 : f32
    %120 = vector.broadcast %cst_26 : f32 to vector<32x512xf32>
    %121 = arith.cmpf oge, %119, %120 : vector<32x512xf32>
    %122 = vector.broadcast %45 : f32 to vector<32x512xf32>
    %123 = arith.mulf %122, %119 : vector<32x512xf32>
    %124 = arith.select %121, %119, %123 : vector<32x512xi1>, vector<32x512xf32>
    %c0_27 = arith.constant 0 : index
    %c0_28 = arith.constant 0 : index
    %c0_29 = arith.constant 0 : index
    %125 = vector.load %arg4[%c0_27, %c0_28, %c0_29] : memref<4x32x288xf32, #tpu.memory_space<vmem>>, vector<1x32x288xf32>
    %126 = vector.shape_cast %125 : vector<1x32x288xf32> to vector<32x288xf32>
    %c17_i32_30 = arith.constant 17 : i32
    %127 = tpu.dynamic_rotate %124 by %c17_i32_30 dim 1 : vector<32x512xf32>, i32 -> vector<32x512xf32>
    %cst_31 = arith.constant 0.000000e+00 : f32
    %128 = vector.shape_cast %41 : vector<1x512xi1> to vector<1x512xi1>
    %129 = vector.broadcast %128 : vector<1x512xi1> to vector<32x512xi1>
    %130 = vector.broadcast %cst_31 : f32 to vector<32x512xf32>
    %131 = arith.select %129, %130, %127 : vector<32x512xi1>, vector<32x512xf32>
    %c0_32 = arith.constant 0 : index
    %c0_33 = arith.constant 0 : index
    %132 = vector.load %arg9[%c0_32, %c0_33] : memref<288x512xf32, #tpu.memory_space<vmem>>, vector<32x512xf32>
    tpu.vector_store %arg9[%c0_32, %c0_33], %131 {strides = array<i32>} : memref<288x512xf32, #tpu.memory_space<vmem>>, vector<32x512xf32>,
    %c16_i32_34 = arith.constant 16 : i32
    %133 = tpu.dynamic_rotate %124 by %c16_i32_34 dim 1 : vector<32x512xf32>, i32 -> vector<32x512xf32>
    %cst_35 = arith.constant 0.000000e+00 : f32
    %134 = vector.shape_cast %38 : vector<1x512xi1> to vector<1x512xi1>
    %135 = vector.broadcast %134 : vector<1x512xi1> to vector<32x512xi1>
    %136 = vector.broadcast %cst_35 : f32 to vector<32x512xf32>
    %137 = arith.select %135, %136, %133 : vector<32x512xi1>, vector<32x512xf32>
    %c32 = arith.constant 32 : index
    %c0_36 = arith.constant 0 : index
    %138 = vector.load %arg9[%c32, %c0_36] : memref<288x512xf32, #tpu.memory_space<vmem>>, vector<32x512xf32>
    tpu.vector_store %arg9[%c32, %c0_36], %137 {strides = array<i32>} : memref<288x512xf32, #tpu.memory_space<vmem>>, vector<32x512xf32>,
    %c15_i32_37 = arith.constant 15 : i32
    %139 = tpu.dynamic_rotate %124 by %c15_i32_37 dim 1 : vector<32x512xf32>, i32 -> vector<32x512xf32>
    %cst_38 = arith.constant 0.000000e+00 : f32
    %140 = vector.shape_cast %42 : vector<1x512xi1> to vector<1x512xi1>
    %141 = vector.broadcast %140 : vector<1x512xi1> to vector<32x512xi1>
    %142 = vector.broadcast %cst_38 : f32 to vector<32x512xf32>
    %143 = arith.select %141, %142, %139 : vector<32x512xi1>, vector<32x512xf32>
    %c64 = arith.constant 64 : index
    %c0_39 = arith.constant 0 : index
    %144 = vector.load %arg9[%c64, %c0_39] : memref<288x512xf32, #tpu.memory_space<vmem>>, vector<32x512xf32>
    tpu.vector_store %arg9[%c64, %c0_39], %143 {strides = array<i32>} : memref<288x512xf32, #tpu.memory_space<vmem>>, vector<32x512xf32>,
    %c1_i32_40 = arith.constant 1 : i32
    %145 = tpu.dynamic_rotate %124 by %c1_i32_40 dim 1 : vector<32x512xf32>, i32 -> vector<32x512xf32>
    %cst_41 = arith.constant 0.000000e+00 : f32
    %146 = vector.shape_cast %34 : vector<1x512xi1> to vector<1x512xi1>
    %147 = vector.broadcast %146 : vector<1x512xi1> to vector<32x512xi1>
    %148 = vector.broadcast %cst_41 : f32 to vector<32x512xf32>
    %149 = arith.select %147, %148, %145 : vector<32x512xi1>, vector<32x512xf32>
    %c96 = arith.constant 96 : index
    %c0_42 = arith.constant 0 : index
    %150 = vector.load %arg9[%c96, %c0_42] : memref<288x512xf32, #tpu.memory_space<vmem>>, vector<32x512xf32>
    tpu.vector_store %arg9[%c96, %c0_42], %149 {strides = array<i32>} : memref<288x512xf32, #tpu.memory_space<vmem>>, vector<32x512xf32>,
    %c128 = arith.constant 128 : index
    %c0_43 = arith.constant 0 : index
    %151 = vector.load %arg9[%c128, %c0_43] : memref<288x512xf32, #tpu.memory_space<vmem>>, vector<32x512xf32>
    tpu.vector_store %arg9[%c128, %c0_43], %124 {strides = array<i32>} : memref<288x512xf32, #tpu.memory_space<vmem>>, vector<32x512xf32>,
    %c511_i32_44 = arith.constant 511 : i32
    %152 = tpu.dynamic_rotate %124 by %c511_i32_44 dim 1 : vector<32x512xf32>, i32 -> vector<32x512xf32>
    %cst_45 = arith.constant 0.000000e+00 : f32
    %153 = vector.shape_cast %36 : vector<1x512xi1> to vector<1x512xi1>
    %154 = vector.broadcast %153 : vector<1x512xi1> to vector<32x512xi1>
    %155 = vector.broadcast %cst_45 : f32 to vector<32x512xf32>
    %156 = arith.select %154, %155, %152 : vector<32x512xi1>, vector<32x512xf32>
    %c160 = arith.constant 160 : index
    %c0_46 = arith.constant 0 : index
    %157 = vector.load %arg9[%c160, %c0_46] : memref<288x512xf32, #tpu.memory_space<vmem>>, vector<32x512xf32>
    tpu.vector_store %arg9[%c160, %c0_46], %156 {strides = array<i32>} : memref<288x512xf32, #tpu.memory_space<vmem>>, vector<32x512xf32>,
    %c497_i32_47 = arith.constant 497 : i32
    %158 = tpu.dynamic_rotate %124 by %c497_i32_47 dim 1 : vector<32x512xf32>, i32 -> vector<32x512xf32>
    %cst_48 = arith.constant 0.000000e+00 : f32
    %159 = vector.shape_cast %43 : vector<1x512xi1> to vector<1x512xi1>
    %160 = vector.broadcast %159 : vector<1x512xi1> to vector<32x512xi1>
    %161 = vector.broadcast %cst_48 : f32 to vector<32x512xf32>
    %162 = arith.select %160, %161, %158 : vector<32x512xi1>, vector<32x512xf32>
    %c192 = arith.constant 192 : index
    %c0_49 = arith.constant 0 : index
    %163 = vector.load %arg9[%c192, %c0_49] : memref<288x512xf32, #tpu.memory_space<vmem>>, vector<32x512xf32>
    tpu.vector_store %arg9[%c192, %c0_49], %162 {strides = array<i32>} : memref<288x512xf32, #tpu.memory_space<vmem>>, vector<32x512xf32>,
    %c496_i32_50 = arith.constant 496 : i32
    %164 = tpu.dynamic_rotate %124 by %c496_i32_50 dim 1 : vector<32x512xf32>, i32 -> vector<32x512xf32>
    %cst_51 = arith.constant 0.000000e+00 : f32
    %165 = vector.shape_cast %40 : vector<1x512xi1> to vector<1x512xi1>
    %166 = vector.broadcast %165 : vector<1x512xi1> to vector<32x512xi1>
    %167 = vector.broadcast %cst_51 : f32 to vector<32x512xf32>
    %168 = arith.select %166, %167, %164 : vector<32x512xi1>, vector<32x512xf32>
    %c224 = arith.constant 224 : index
    %c0_52 = arith.constant 0 : index
    %169 = vector.load %arg9[%c224, %c0_52] : memref<288x512xf32, #tpu.memory_space<vmem>>, vector<32x512xf32>
    tpu.vector_store %arg9[%c224, %c0_52], %168 {strides = array<i32>} : memref<288x512xf32, #tpu.memory_space<vmem>>, vector<32x512xf32>,
    %c495_i32_53 = arith.constant 495 : i32
    %170 = tpu.dynamic_rotate %124 by %c495_i32_53 dim 1 : vector<32x512xf32>, i32 -> vector<32x512xf32>
    %cst_54 = arith.constant 0.000000e+00 : f32
    %171 = vector.shape_cast %44 : vector<1x512xi1> to vector<1x512xi1>
    %172 = vector.broadcast %171 : vector<1x512xi1> to vector<32x512xi1>
    %173 = vector.broadcast %cst_54 : f32 to vector<32x512xf32>
    %174 = arith.select %172, %173, %170 : vector<32x512xi1>, vector<32x512xf32>
    %c256 = arith.constant 256 : index
    %c0_55 = arith.constant 0 : index
    %175 = vector.load %arg9[%c256, %c0_55] : memref<288x512xf32, #tpu.memory_space<vmem>>, vector<32x512xf32>
    tpu.vector_store %arg9[%c256, %c0_55], %174 {strides = array<i32>} : memref<288x512xf32, #tpu.memory_space<vmem>>, vector<32x512xf32>,
    %c0_56 = arith.constant 0 : index
    %c0_57 = arith.constant 0 : index
    %176 = vector.load %arg9[%c0_56, %c0_57] : memref<288x512xf32, #tpu.memory_space<vmem>>, vector<288x512xf32>
    %cst_58 = arith.constant dense<0.000000e+00> : vector<32x512xf32>
    %177 = tpu.matmul %126, %176, %cst_58 {dimension_numbers = #tpu.dot_dimension_numbers<[1], [0], [0], [1], [0, 0, 1, 1], [], []>} : vector<32x288xf32>, vector<288x512xf32>, vector<32x512xf32> -> vector<32x512xf32>
    %cst_59 = arith.constant 0.000000e+00 : f32
    %178 = vector.broadcast %cst_59 : f32 to vector<32x512xf32>
    %179 = arith.cmpf oge, %177, %178 : vector<32x512xf32>
    %cst_60 = arith.constant 2.000000e-01 : f32
    %180 = vector.broadcast %cst_60 : f32 to vector<32x512xf32>
    %181 = arith.mulf %180, %177 : vector<32x512xf32>
    %182 = arith.select %179, %177, %181 : vector<32x512xi1>, vector<32x512xf32>
    %c1_61 = arith.constant 1 : index
    %c0_62 = arith.constant 0 : index
    %c0_63 = arith.constant 0 : index
    %183 = vector.load %arg4[%c1_61, %c0_62, %c0_63] : memref<4x32x288xf32, #tpu.memory_space<vmem>>, vector<1x32x288xf32>
    %184 = vector.shape_cast %183 : vector<1x32x288xf32> to vector<32x288xf32>
    %c17_i32_64 = arith.constant 17 : i32
    %185 = tpu.dynamic_rotate %182 by %c17_i32_64 dim 1 : vector<32x512xf32>, i32 -> vector<32x512xf32>
    %cst_65 = arith.constant 0.000000e+00 : f32
    %186 = vector.shape_cast %41 : vector<1x512xi1> to vector<1x512xi1>
    %187 = vector.broadcast %186 : vector<1x512xi1> to vector<32x512xi1>
    %188 = vector.broadcast %cst_65 : f32 to vector<32x512xf32>
    %189 = arith.select %187, %188, %185 : vector<32x512xi1>, vector<32x512xf32>
    %c0_66 = arith.constant 0 : index
    %c0_67 = arith.constant 0 : index
    %190 = vector.load %arg9[%c0_66, %c0_67] : memref<288x512xf32, #tpu.memory_space<vmem>>, vector<32x512xf32>
    tpu.vector_store %arg9[%c0_66, %c0_67], %189 {strides = array<i32>} : memref<288x512xf32, #tpu.memory_space<vmem>>, vector<32x512xf32>,
    %c16_i32_68 = arith.constant 16 : i32
    %191 = tpu.dynamic_rotate %182 by %c16_i32_68 dim 1 : vector<32x512xf32>, i32 -> vector<32x512xf32>
    %cst_69 = arith.constant 0.000000e+00 : f32
    %192 = vector.shape_cast %38 : vector<1x512xi1> to vector<1x512xi1>
    %193 = vector.broadcast %192 : vector<1x512xi1> to vector<32x512xi1>
    %194 = vector.broadcast %cst_69 : f32 to vector<32x512xf32>
    %195 = arith.select %193, %194, %191 : vector<32x512xi1>, vector<32x512xf32>
    %c32_70 = arith.constant 32 : index
    %c0_71 = arith.constant 0 : index
    %196 = vector.load %arg9[%c32_70, %c0_71] : memref<288x512xf32, #tpu.memory_space<vmem>>, vector<32x512xf32>
    tpu.vector_store %arg9[%c32_70, %c0_71], %195 {strides = array<i32>} : memref<288x512xf32, #tpu.memory_space<vmem>>, vector<32x512xf32>,
    %c15_i32_72 = arith.constant 15 : i32
    %197 = tpu.dynamic_rotate %182 by %c15_i32_72 dim 1 : vector<32x512xf32>, i32 -> vector<32x512xf32>
    %cst_73 = arith.constant 0.000000e+00 : f32
    %198 = vector.shape_cast %42 : vector<1x512xi1> to vector<1x512xi1>
    %199 = vector.broadcast %198 : vector<1x512xi1> to vector<32x512xi1>
    %200 = vector.broadcast %cst_73 : f32 to vector<32x512xf32>
    %201 = arith.select %199, %200, %197 : vector<32x512xi1>, vector<32x512xf32>
    %c64_74 = arith.constant 64 : index
    %c0_75 = arith.constant 0 : index
    %202 = vector.load %arg9[%c64_74, %c0_75] : memref<288x512xf32, #tpu.memory_space<vmem>>, vector<32x512xf32>
    tpu.vector_store %arg9[%c64_74, %c0_75], %201 {strides = array<i32>} : memref<288x512xf32, #tpu.memory_space<vmem>>, vector<32x512xf32>,
    %c1_i32_76 = arith.constant 1 : i32
    %203 = tpu.dynamic_rotate %182 by %c1_i32_76 dim 1 : vector<32x512xf32>, i32 -> vector<32x512xf32>
    %cst_77 = arith.constant 0.000000e+00 : f32
    %204 = vector.shape_cast %34 : vector<1x512xi1> to vector<1x512xi1>
    %205 = vector.broadcast %204 : vector<1x512xi1> to vector<32x512xi1>
    %206 = vector.broadcast %cst_77 : f32 to vector<32x512xf32>
    %207 = arith.select %205, %206, %203 : vector<32x512xi1>, vector<32x512xf32>
    %c96_78 = arith.constant 96 : index
    %c0_79 = arith.constant 0 : index
    %208 = vector.load %arg9[%c96_78, %c0_79] : memref<288x512xf32, #tpu.memory_space<vmem>>, vector<32x512xf32>
    tpu.vector_store %arg9[%c96_78, %c0_79], %207 {strides = array<i32>} : memref<288x512xf32, #tpu.memory_space<vmem>>, vector<32x512xf32>,
    %c128_80 = arith.constant 128 : index
    %c0_81 = arith.constant 0 : index
    %209 = vector.load %arg9[%c128_80, %c0_81] : memref<288x512xf32, #tpu.memory_space<vmem>>, vector<32x512xf32>
    tpu.vector_store %arg9[%c128_80, %c0_81], %182 {strides = array<i32>} : memref<288x512xf32, #tpu.memory_space<vmem>>, vector<32x512xf32>,
    %c511_i32_82 = arith.constant 511 : i32
    %210 = tpu.dynamic_rotate %182 by %c511_i32_82 dim 1 : vector<32x512xf32>, i32 -> vector<32x512xf32>
    %cst_83 = arith.constant 0.000000e+00 : f32
    %211 = vector.shape_cast %36 : vector<1x512xi1> to vector<1x512xi1>
    %212 = vector.broadcast %211 : vector<1x512xi1> to vector<32x512xi1>
    %213 = vector.broadcast %cst_83 : f32 to vector<32x512xf32>
    %214 = arith.select %212, %213, %210 : vector<32x512xi1>, vector<32x512xf32>
    %c160_84 = arith.constant 160 : index
    %c0_85 = arith.constant 0 : index
    %215 = vector.load %arg9[%c160_84, %c0_85] : memref<288x512xf32, #tpu.memory_space<vmem>>, vector<32x512xf32>
    tpu.vector_store %arg9[%c160_84, %c0_85], %214 {strides = array<i32>} : memref<288x512xf32, #tpu.memory_space<vmem>>, vector<32x512xf32>,
    %c497_i32_86 = arith.constant 497 : i32
    %216 = tpu.dynamic_rotate %182 by %c497_i32_86 dim 1 : vector<32x512xf32>, i32 -> vector<32x512xf32>
    %cst_87 = arith.constant 0.000000e+00 : f32
    %217 = vector.shape_cast %43 : vector<1x512xi1> to vector<1x512xi1>
    %218 = vector.broadcast %217 : vector<1x512xi1> to vector<32x512xi1>
    %219 = vector.broadcast %cst_87 : f32 to vector<32x512xf32>
    %220 = arith.select %218, %219, %216 : vector<32x512xi1>, vector<32x512xf32>
    %c192_88 = arith.constant 192 : index
    %c0_89 = arith.constant 0 : index
    %221 = vector.load %arg9[%c192_88, %c0_89] : memref<288x512xf32, #tpu.memory_space<vmem>>, vector<32x512xf32>
    tpu.vector_store %arg9[%c192_88, %c0_89], %220 {strides = array<i32>} : memref<288x512xf32, #tpu.memory_space<vmem>>, vector<32x512xf32>,
    %c496_i32_90 = arith.constant 496 : i32
    %222 = tpu.dynamic_rotate %182 by %c496_i32_90 dim 1 : vector<32x512xf32>, i32 -> vector<32x512xf32>
    %cst_91 = arith.constant 0.000000e+00 : f32
    %223 = vector.shape_cast %40 : vector<1x512xi1> to vector<1x512xi1>
    %224 = vector.broadcast %223 : vector<1x512xi1> to vector<32x512xi1>
    %225 = vector.broadcast %cst_91 : f32 to vector<32x512xf32>
    %226 = arith.select %224, %225, %222 : vector<32x512xi1>, vector<32x512xf32>
    %c224_92 = arith.constant 224 : index
    %c0_93 = arith.constant 0 : index
    %227 = vector.load %arg9[%c224_92, %c0_93] : memref<288x512xf32, #tpu.memory_space<vmem>>, vector<32x512xf32>
    tpu.vector_store %arg9[%c224_92, %c0_93], %226 {strides = array<i32>} : memref<288x512xf32, #tpu.memory_space<vmem>>, vector<32x512xf32>,
    %c495_i32_94 = arith.constant 495 : i32
    %228 = tpu.dynamic_rotate %182 by %c495_i32_94 dim 1 : vector<32x512xf32>, i32 -> vector<32x512xf32>
    %cst_95 = arith.constant 0.000000e+00 : f32
    %229 = vector.shape_cast %44 : vector<1x512xi1> to vector<1x512xi1>
    %230 = vector.broadcast %229 : vector<1x512xi1> to vector<32x512xi1>
    %231 = vector.broadcast %cst_95 : f32 to vector<32x512xf32>
    %232 = arith.select %230, %231, %228 : vector<32x512xi1>, vector<32x512xf32>
    %c256_96 = arith.constant 256 : index
    %c0_97 = arith.constant 0 : index
    %233 = vector.load %arg9[%c256_96, %c0_97] : memref<288x512xf32, #tpu.memory_space<vmem>>, vector<32x512xf32>
    tpu.vector_store %arg9[%c256_96, %c0_97], %232 {strides = array<i32>} : memref<288x512xf32, #tpu.memory_space<vmem>>, vector<32x512xf32>,
    %c0_98 = arith.constant 0 : index
    %c0_99 = arith.constant 0 : index
    %234 = vector.load %arg9[%c0_98, %c0_99] : memref<288x512xf32, #tpu.memory_space<vmem>>, vector<288x512xf32>
    %cst_100 = arith.constant dense<0.000000e+00> : vector<32x512xf32>
    %235 = tpu.matmul %184, %234, %cst_100 {dimension_numbers = #tpu.dot_dimension_numbers<[1], [0], [0], [1], [0, 0, 1, 1], [], []>} : vector<32x288xf32>, vector<288x512xf32>, vector<32x512xf32> -> vector<32x512xf32>
    %236 = arith.addf %124, %235 : vector<32x512xf32>
    %c2 = arith.constant 2 : index
    %c0_101 = arith.constant 0 : index
    %c0_102 = arith.constant 0 : index
    %237 = vector.load %arg4[%c2, %c0_101, %c0_102] : memref<4x32x288xf32, #tpu.memory_space<vmem>>, vector<1x32x288xf32>
    %238 = vector.shape_cast %237 : vector<1x32x288xf32> to vector<32x288xf32>
    %c17_i32_103 = arith.constant 17 : i32
    %239 = tpu.dynamic_rotate %236 by %c17_i32_103 dim 1 : vector<32x512xf32>, i32 -> vector<32x512xf32>
    %cst_104 = arith.constant 0.000000e+00 : f32
    %240 = vector.shape_cast %41 : vector<1x512xi1> to vector<1x512xi1>
    %241 = vector.broadcast %240 : vector<1x512xi1> to vector<32x512xi1>
    %242 = vector.broadcast %cst_104 : f32 to vector<32x512xf32>
    %243 = arith.select %241, %242, %239 : vector<32x512xi1>, vector<32x512xf32>
    %c0_105 = arith.constant 0 : index
    %c0_106 = arith.constant 0 : index
    %244 = vector.load %arg9[%c0_105, %c0_106] : memref<288x512xf32, #tpu.memory_space<vmem>>, vector<32x512xf32>
    tpu.vector_store %arg9[%c0_105, %c0_106], %243 {strides = array<i32>} : memref<288x512xf32, #tpu.memory_space<vmem>>, vector<32x512xf32>,
    %c16_i32_107 = arith.constant 16 : i32
    %245 = tpu.dynamic_rotate %236 by %c16_i32_107 dim 1 : vector<32x512xf32>, i32 -> vector<32x512xf32>
    %cst_108 = arith.constant 0.000000e+00 : f32
    %246 = vector.shape_cast %38 : vector<1x512xi1> to vector<1x512xi1>
    %247 = vector.broadcast %246 : vector<1x512xi1> to vector<32x512xi1>
    %248 = vector.broadcast %cst_108 : f32 to vector<32x512xf32>
    %249 = arith.select %247, %248, %245 : vector<32x512xi1>, vector<32x512xf32>
    %c32_109 = arith.constant 32 : index
    %c0_110 = arith.constant 0 : index
    %250 = vector.load %arg9[%c32_109, %c0_110] : memref<288x512xf32, #tpu.memory_space<vmem>>, vector<32x512xf32>
    tpu.vector_store %arg9[%c32_109, %c0_110], %249 {strides = array<i32>} : memref<288x512xf32, #tpu.memory_space<vmem>>, vector<32x512xf32>,
    %c15_i32_111 = arith.constant 15 : i32
    %251 = tpu.dynamic_rotate %236 by %c15_i32_111 dim 1 : vector<32x512xf32>, i32 -> vector<32x512xf32>
    %cst_112 = arith.constant 0.000000e+00 : f32
    %252 = vector.shape_cast %42 : vector<1x512xi1> to vector<1x512xi1>
    %253 = vector.broadcast %252 : vector<1x512xi1> to vector<32x512xi1>
    %254 = vector.broadcast %cst_112 : f32 to vector<32x512xf32>
    %255 = arith.select %253, %254, %251 : vector<32x512xi1>, vector<32x512xf32>
    %c64_113 = arith.constant 64 : index
    %c0_114 = arith.constant 0 : index
    %256 = vector.load %arg9[%c64_113, %c0_114] : memref<288x512xf32, #tpu.memory_space<vmem>>, vector<32x512xf32>
    tpu.vector_store %arg9[%c64_113, %c0_114], %255 {strides = array<i32>} : memref<288x512xf32, #tpu.memory_space<vmem>>, vector<32x512xf32>,
    %c1_i32_115 = arith.constant 1 : i32
    %257 = tpu.dynamic_rotate %236 by %c1_i32_115 dim 1 : vector<32x512xf32>, i32 -> vector<32x512xf32>
    %cst_116 = arith.constant 0.000000e+00 : f32
    %258 = vector.shape_cast %34 : vector<1x512xi1> to vector<1x512xi1>
    %259 = vector.broadcast %258 : vector<1x512xi1> to vector<32x512xi1>
    %260 = vector.broadcast %cst_116 : f32 to vector<32x512xf32>
    %261 = arith.select %259, %260, %257 : vector<32x512xi1>, vector<32x512xf32>
    %c96_117 = arith.constant 96 : index
    %c0_118 = arith.constant 0 : index
    %262 = vector.load %arg9[%c96_117, %c0_118] : memref<288x512xf32, #tpu.memory_space<vmem>>, vector<32x512xf32>
    tpu.vector_store %arg9[%c96_117, %c0_118], %261 {strides = array<i32>} : memref<288x512xf32, #tpu.memory_space<vmem>>, vector<32x512xf32>,
    %c128_119 = arith.constant 128 : index
    %c0_120 = arith.constant 0 : index
    %263 = vector.load %arg9[%c128_119, %c0_120] : memref<288x512xf32, #tpu.memory_space<vmem>>, vector<32x512xf32>
    tpu.vector_store %arg9[%c128_119, %c0_120], %236 {strides = array<i32>} : memref<288x512xf32, #tpu.memory_space<vmem>>, vector<32x512xf32>,
    %c511_i32_121 = arith.constant 511 : i32
    %264 = tpu.dynamic_rotate %236 by %c511_i32_121 dim 1 : vector<32x512xf32>, i32 -> vector<32x512xf32>
    %cst_122 = arith.constant 0.000000e+00 : f32
    %265 = vector.shape_cast %36 : vector<1x512xi1> to vector<1x512xi1>
    %266 = vector.broadcast %265 : vector<1x512xi1> to vector<32x512xi1>
    %267 = vector.broadcast %cst_122 : f32 to vector<32x512xf32>
    %268 = arith.select %266, %267, %264 : vector<32x512xi1>, vector<32x512xf32>
    %c160_123 = arith.constant 160 : index
    %c0_124 = arith.constant 0 : index
    %269 = vector.load %arg9[%c160_123, %c0_124] : memref<288x512xf32, #tpu.memory_space<vmem>>, vector<32x512xf32>
    tpu.vector_store %arg9[%c160_123, %c0_124], %268 {strides = array<i32>} : memref<288x512xf32, #tpu.memory_space<vmem>>, vector<32x512xf32>,
    %c497_i32_125 = arith.constant 497 : i32
    %270 = tpu.dynamic_rotate %236 by %c497_i32_125 dim 1 : vector<32x512xf32>, i32 -> vector<32x512xf32>
    %cst_126 = arith.constant 0.000000e+00 : f32
    %271 = vector.shape_cast %43 : vector<1x512xi1> to vector<1x512xi1>
    %272 = vector.broadcast %271 : vector<1x512xi1> to vector<32x512xi1>
    %273 = vector.broadcast %cst_126 : f32 to vector<32x512xf32>
    %274 = arith.select %272, %273, %270 : vector<32x512xi1>, vector<32x512xf32>
    %c192_127 = arith.constant 192 : index
    %c0_128 = arith.constant 0 : index
    %275 = vector.load %arg9[%c192_127, %c0_128] : memref<288x512xf32, #tpu.memory_space<vmem>>, vector<32x512xf32>
    tpu.vector_store %arg9[%c192_127, %c0_128], %274 {strides = array<i32>} : memref<288x512xf32, #tpu.memory_space<vmem>>, vector<32x512xf32>,
    %c496_i32_129 = arith.constant 496 : i32
    %276 = tpu.dynamic_rotate %236 by %c496_i32_129 dim 1 : vector<32x512xf32>, i32 -> vector<32x512xf32>
    %cst_130 = arith.constant 0.000000e+00 : f32
    %277 = vector.shape_cast %40 : vector<1x512xi1> to vector<1x512xi1>
    %278 = vector.broadcast %277 : vector<1x512xi1> to vector<32x512xi1>
    %279 = vector.broadcast %cst_130 : f32 to vector<32x512xf32>
    %280 = arith.select %278, %279, %276 : vector<32x512xi1>, vector<32x512xf32>
    %c224_131 = arith.constant 224 : index
    %c0_132 = arith.constant 0 : index
    %281 = vector.load %arg9[%c224_131, %c0_132] : memref<288x512xf32, #tpu.memory_space<vmem>>, vector<32x512xf32>
    tpu.vector_store %arg9[%c224_131, %c0_132], %280 {strides = array<i32>} : memref<288x512xf32, #tpu.memory_space<vmem>>, vector<32x512xf32>,
    %c495_i32_133 = arith.constant 495 : i32
    %282 = tpu.dynamic_rotate %236 by %c495_i32_133 dim 1 : vector<32x512xf32>, i32 -> vector<32x512xf32>
    %cst_134 = arith.constant 0.000000e+00 : f32
    %283 = vector.shape_cast %44 : vector<1x512xi1> to vector<1x512xi1>
    %284 = vector.broadcast %283 : vector<1x512xi1> to vector<32x512xi1>
    %285 = vector.broadcast %cst_134 : f32 to vector<32x512xf32>
    %286 = arith.select %284, %285, %282 : vector<32x512xi1>, vector<32x512xf32>
    %c256_135 = arith.constant 256 : index
    %c0_136 = arith.constant 0 : index
    %287 = vector.load %arg9[%c256_135, %c0_136] : memref<288x512xf32, #tpu.memory_space<vmem>>, vector<32x512xf32>
    tpu.vector_store %arg9[%c256_135, %c0_136], %286 {strides = array<i32>} : memref<288x512xf32, #tpu.memory_space<vmem>>, vector<32x512xf32>,
    %c0_137 = arith.constant 0 : index
    %c0_138 = arith.constant 0 : index
    %288 = vector.load %arg9[%c0_137, %c0_138] : memref<288x512xf32, #tpu.memory_space<vmem>>, vector<288x512xf32>
    %cst_139 = arith.constant dense<0.000000e+00> : vector<32x512xf32>
    %289 = tpu.matmul %238, %288, %cst_139 {dimension_numbers = #tpu.dot_dimension_numbers<[1], [0], [0], [1], [0, 0, 1, 1], [], []>} : vector<32x288xf32>, vector<288x512xf32>, vector<32x512xf32> -> vector<32x512xf32>
    %cst_140 = arith.constant 0.000000e+00 : f32
    %290 = vector.broadcast %cst_140 : f32 to vector<32x512xf32>
    %291 = arith.cmpf oge, %289, %290 : vector<32x512xf32>
    %cst_141 = arith.constant 2.000000e-01 : f32
    %292 = vector.broadcast %cst_141 : f32 to vector<32x512xf32>
    %293 = arith.mulf %292, %289 : vector<32x512xf32>
    %294 = arith.select %291, %289, %293 : vector<32x512xi1>, vector<32x512xf32>
    %c3 = arith.constant 3 : index
    %c0_142 = arith.constant 0 : index
    %c0_143 = arith.constant 0 : index
    %295 = vector.load %arg4[%c3, %c0_142, %c0_143] : memref<4x32x288xf32, #tpu.memory_space<vmem>>, vector<1x32x288xf32>
    %296 = vector.shape_cast %295 : vector<1x32x288xf32> to vector<32x288xf32>
    %c17_i32_144 = arith.constant 17 : i32
    %297 = tpu.dynamic_rotate %294 by %c17_i32_144 dim 1 : vector<32x512xf32>, i32 -> vector<32x512xf32>
    %cst_145 = arith.constant 0.000000e+00 : f32
    %298 = vector.shape_cast %41 : vector<1x512xi1> to vector<1x512xi1>
    %299 = vector.broadcast %298 : vector<1x512xi1> to vector<32x512xi1>
    %300 = vector.broadcast %cst_145 : f32 to vector<32x512xf32>
    %301 = arith.select %299, %300, %297 : vector<32x512xi1>, vector<32x512xf32>
    %c0_146 = arith.constant 0 : index
    %c0_147 = arith.constant 0 : index
    %302 = vector.load %arg9[%c0_146, %c0_147] : memref<288x512xf32, #tpu.memory_space<vmem>>, vector<32x512xf32>
    tpu.vector_store %arg9[%c0_146, %c0_147], %301 {strides = array<i32>} : memref<288x512xf32, #tpu.memory_space<vmem>>, vector<32x512xf32>,
    %c16_i32_148 = arith.constant 16 : i32
    %303 = tpu.dynamic_rotate %294 by %c16_i32_148 dim 1 : vector<32x512xf32>, i32 -> vector<32x512xf32>
    %cst_149 = arith.constant 0.000000e+00 : f32
    %304 = vector.shape_cast %38 : vector<1x512xi1> to vector<1x512xi1>
    %305 = vector.broadcast %304 : vector<1x512xi1> to vector<32x512xi1>
    %306 = vector.broadcast %cst_149 : f32 to vector<32x512xf32>
    %307 = arith.select %305, %306, %303 : vector<32x512xi1>, vector<32x512xf32>
    %c32_150 = arith.constant 32 : index
    %c0_151 = arith.constant 0 : index
    %308 = vector.load %arg9[%c32_150, %c0_151] : memref<288x512xf32, #tpu.memory_space<vmem>>, vector<32x512xf32>
    tpu.vector_store %arg9[%c32_150, %c0_151], %307 {strides = array<i32>} : memref<288x512xf32, #tpu.memory_space<vmem>>, vector<32x512xf32>,
    %c15_i32_152 = arith.constant 15 : i32
    %309 = tpu.dynamic_rotate %294 by %c15_i32_152 dim 1 : vector<32x512xf32>, i32 -> vector<32x512xf32>
    %cst_153 = arith.constant 0.000000e+00 : f32
    %310 = vector.shape_cast %42 : vector<1x512xi1> to vector<1x512xi1>
    %311 = vector.broadcast %310 : vector<1x512xi1> to vector<32x512xi1>
    %312 = vector.broadcast %cst_153 : f32 to vector<32x512xf32>
    %313 = arith.select %311, %312, %309 : vector<32x512xi1>, vector<32x512xf32>
    %c64_154 = arith.constant 64 : index
    %c0_155 = arith.constant 0 : index
    %314 = vector.load %arg9[%c64_154, %c0_155] : memref<288x512xf32, #tpu.memory_space<vmem>>, vector<32x512xf32>
    tpu.vector_store %arg9[%c64_154, %c0_155], %313 {strides = array<i32>} : memref<288x512xf32, #tpu.memory_space<vmem>>, vector<32x512xf32>,
    %c1_i32_156 = arith.constant 1 : i32
    %315 = tpu.dynamic_rotate %294 by %c1_i32_156 dim 1 : vector<32x512xf32>, i32 -> vector<32x512xf32>
    %cst_157 = arith.constant 0.000000e+00 : f32
    %316 = vector.shape_cast %34 : vector<1x512xi1> to vector<1x512xi1>
    %317 = vector.broadcast %316 : vector<1x512xi1> to vector<32x512xi1>
    %318 = vector.broadcast %cst_157 : f32 to vector<32x512xf32>
    %319 = arith.select %317, %318, %315 : vector<32x512xi1>, vector<32x512xf32>
    %c96_158 = arith.constant 96 : index
    %c0_159 = arith.constant 0 : index
    %320 = vector.load %arg9[%c96_158, %c0_159] : memref<288x512xf32, #tpu.memory_space<vmem>>, vector<32x512xf32>
    tpu.vector_store %arg9[%c96_158, %c0_159], %319 {strides = array<i32>} : memref<288x512xf32, #tpu.memory_space<vmem>>, vector<32x512xf32>,
    %c128_160 = arith.constant 128 : index
    %c0_161 = arith.constant 0 : index
    %321 = vector.load %arg9[%c128_160, %c0_161] : memref<288x512xf32, #tpu.memory_space<vmem>>, vector<32x512xf32>
    tpu.vector_store %arg9[%c128_160, %c0_161], %294 {strides = array<i32>} : memref<288x512xf32, #tpu.memory_space<vmem>>, vector<32x512xf32>,
    %c511_i32_162 = arith.constant 511 : i32
    %322 = tpu.dynamic_rotate %294 by %c511_i32_162 dim 1 : vector<32x512xf32>, i32 -> vector<32x512xf32>
    %cst_163 = arith.constant 0.000000e+00 : f32
    %323 = vector.shape_cast %36 : vector<1x512xi1> to vector<1x512xi1>
    %324 = vector.broadcast %323 : vector<1x512xi1> to vector<32x512xi1>
    %325 = vector.broadcast %cst_163 : f32 to vector<32x512xf32>
    %326 = arith.select %324, %325, %322 : vector<32x512xi1>, vector<32x512xf32>
    %c160_164 = arith.constant 160 : index
    %c0_165 = arith.constant 0 : index
    %327 = vector.load %arg9[%c160_164, %c0_165] : memref<288x512xf32, #tpu.memory_space<vmem>>, vector<32x512xf32>
    tpu.vector_store %arg9[%c160_164, %c0_165], %326 {strides = array<i32>} : memref<288x512xf32, #tpu.memory_space<vmem>>, vector<32x512xf32>,
    %c497_i32_166 = arith.constant 497 : i32
    %328 = tpu.dynamic_rotate %294 by %c497_i32_166 dim 1 : vector<32x512xf32>, i32 -> vector<32x512xf32>
    %cst_167 = arith.constant 0.000000e+00 : f32
    %329 = vector.shape_cast %43 : vector<1x512xi1> to vector<1x512xi1>
    %330 = vector.broadcast %329 : vector<1x512xi1> to vector<32x512xi1>
    %331 = vector.broadcast %cst_167 : f32 to vector<32x512xf32>
    %332 = arith.select %330, %331, %328 : vector<32x512xi1>, vector<32x512xf32>
    %c192_168 = arith.constant 192 : index
    %c0_169 = arith.constant 0 : index
    %333 = vector.load %arg9[%c192_168, %c0_169] : memref<288x512xf32, #tpu.memory_space<vmem>>, vector<32x512xf32>
    tpu.vector_store %arg9[%c192_168, %c0_169], %332 {strides = array<i32>} : memref<288x512xf32, #tpu.memory_space<vmem>>, vector<32x512xf32>,
    %c496_i32_170 = arith.constant 496 : i32
    %334 = tpu.dynamic_rotate %294 by %c496_i32_170 dim 1 : vector<32x512xf32>, i32 -> vector<32x512xf32>
    %cst_171 = arith.constant 0.000000e+00 : f32
    %335 = vector.shape_cast %40 : vector<1x512xi1> to vector<1x512xi1>
    %336 = vector.broadcast %335 : vector<1x512xi1> to vector<32x512xi1>
    %337 = vector.broadcast %cst_171 : f32 to vector<32x512xf32>
    %338 = arith.select %336, %337, %334 : vector<32x512xi1>, vector<32x512xf32>
    %c224_172 = arith.constant 224 : index
    %c0_173 = arith.constant 0 : index
    %339 = vector.load %arg9[%c224_172, %c0_173] : memref<288x512xf32, #tpu.memory_space<vmem>>, vector<32x512xf32>
    tpu.vector_store %arg9[%c224_172, %c0_173], %338 {strides = array<i32>} : memref<288x512xf32, #tpu.memory_space<vmem>>, vector<32x512xf32>,
    %c495_i32_174 = arith.constant 495 : i32
    %340 = tpu.dynamic_rotate %294 by %c495_i32_174 dim 1 : vector<32x512xf32>, i32 -> vector<32x512xf32>
    %cst_175 = arith.constant 0.000000e+00 : f32
    %341 = vector.shape_cast %44 : vector<1x512xi1> to vector<1x512xi1>
    %342 = vector.broadcast %341 : vector<1x512xi1> to vector<32x512xi1>
    %343 = vector.broadcast %cst_175 : f32 to vector<32x512xf32>
    %344 = arith.select %342, %343, %340 : vector<32x512xi1>, vector<32x512xf32>
    %c256_176 = arith.constant 256 : index
    %c0_177 = arith.constant 0 : index
    %345 = vector.load %arg9[%c256_176, %c0_177] : memref<288x512xf32, #tpu.memory_space<vmem>>, vector<32x512xf32>
    tpu.vector_store %arg9[%c256_176, %c0_177], %344 {strides = array<i32>} : memref<288x512xf32, #tpu.memory_space<vmem>>, vector<32x512xf32>,
    %c0_178 = arith.constant 0 : index
    %c0_179 = arith.constant 0 : index
    %346 = vector.load %arg9[%c0_178, %c0_179] : memref<288x512xf32, #tpu.memory_space<vmem>>, vector<288x512xf32>
    %cst_180 = arith.constant dense<0.000000e+00> : vector<32x512xf32>
    %347 = tpu.matmul %296, %346, %cst_180 {dimension_numbers = #tpu.dot_dimension_numbers<[1], [0], [0], [1], [0, 0, 1, 1], [], []>} : vector<32x288xf32>, vector<288x512xf32>, vector<32x512xf32> -> vector<32x512xf32>
    %348 = arith.addf %236, %347 : vector<32x512xf32>
    %c0_181 = arith.constant 0 : index
    %c0_182 = arith.constant 0 : index
    %349 = vector.load %arg5[%c0_181, %c0_182] : memref<1x288xf32, #tpu.memory_space<vmem>>, vector<1x288xf32>
    %c17_i32_183 = arith.constant 17 : i32
    %350 = tpu.dynamic_rotate %348 by %c17_i32_183 dim 1 : vector<32x512xf32>, i32 -> vector<32x512xf32>
    %cst_184 = arith.constant 0.000000e+00 : f32
    %351 = vector.shape_cast %41 : vector<1x512xi1> to vector<1x512xi1>
    %352 = vector.broadcast %351 : vector<1x512xi1> to vector<32x512xi1>
    %353 = vector.broadcast %cst_184 : f32 to vector<32x512xf32>
    %354 = arith.select %352, %353, %350 : vector<32x512xi1>, vector<32x512xf32>
    %c0_185 = arith.constant 0 : index
    %c0_186 = arith.constant 0 : index
    %355 = vector.load %arg9[%c0_185, %c0_186] : memref<288x512xf32, #tpu.memory_space<vmem>>, vector<32x512xf32>
    tpu.vector_store %arg9[%c0_185, %c0_186], %354 {strides = array<i32>} : memref<288x512xf32, #tpu.memory_space<vmem>>, vector<32x512xf32>,
    %c16_i32_187 = arith.constant 16 : i32
    %356 = tpu.dynamic_rotate %348 by %c16_i32_187 dim 1 : vector<32x512xf32>, i32 -> vector<32x512xf32>
    %cst_188 = arith.constant 0.000000e+00 : f32
    %357 = vector.shape_cast %38 : vector<1x512xi1> to vector<1x512xi1>
    %358 = vector.broadcast %357 : vector<1x512xi1> to vector<32x512xi1>
    %359 = vector.broadcast %cst_188 : f32 to vector<32x512xf32>
    %360 = arith.select %358, %359, %356 : vector<32x512xi1>, vector<32x512xf32>
    %c32_189 = arith.constant 32 : index
    %c0_190 = arith.constant 0 : index
    %361 = vector.load %arg9[%c32_189, %c0_190] : memref<288x512xf32, #tpu.memory_space<vmem>>, vector<32x512xf32>
    tpu.vector_store %arg9[%c32_189, %c0_190], %360 {strides = array<i32>} : memref<288x512xf32, #tpu.memory_space<vmem>>, vector<32x512xf32>,
    %c15_i32_191 = arith.constant 15 : i32
    %362 = tpu.dynamic_rotate %348 by %c15_i32_191 dim 1 : vector<32x512xf32>, i32 -> vector<32x512xf32>
    %cst_192 = arith.constant 0.000000e+00 : f32
    %363 = vector.shape_cast %42 : vector<1x512xi1> to vector<1x512xi1>
    %364 = vector.broadcast %363 : vector<1x512xi1> to vector<32x512xi1>
    %365 = vector.broadcast %cst_192 : f32 to vector<32x512xf32>
    %366 = arith.select %364, %365, %362 : vector<32x512xi1>, vector<32x512xf32>
    %c64_193 = arith.constant 64 : index
    %c0_194 = arith.constant 0 : index
    %367 = vector.load %arg9[%c64_193, %c0_194] : memref<288x512xf32, #tpu.memory_space<vmem>>, vector<32x512xf32>
    tpu.vector_store %arg9[%c64_193, %c0_194], %366 {strides = array<i32>} : memref<288x512xf32, #tpu.memory_space<vmem>>, vector<32x512xf32>,
    %c1_i32_195 = arith.constant 1 : i32
    %368 = tpu.dynamic_rotate %348 by %c1_i32_195 dim 1 : vector<32x512xf32>, i32 -> vector<32x512xf32>
    %cst_196 = arith.constant 0.000000e+00 : f32
    %369 = vector.shape_cast %34 : vector<1x512xi1> to vector<1x512xi1>
    %370 = vector.broadcast %369 : vector<1x512xi1> to vector<32x512xi1>
    %371 = vector.broadcast %cst_196 : f32 to vector<32x512xf32>
    %372 = arith.select %370, %371, %368 : vector<32x512xi1>, vector<32x512xf32>
    %c96_197 = arith.constant 96 : index
    %c0_198 = arith.constant 0 : index
    %373 = vector.load %arg9[%c96_197, %c0_198] : memref<288x512xf32, #tpu.memory_space<vmem>>, vector<32x512xf32>
    tpu.vector_store %arg9[%c96_197, %c0_198], %372 {strides = array<i32>} : memref<288x512xf32, #tpu.memory_space<vmem>>, vector<32x512xf32>,
    %c128_199 = arith.constant 128 : index
    %c0_200 = arith.constant 0 : index
    %374 = vector.load %arg9[%c128_199, %c0_200] : memref<288x512xf32, #tpu.memory_space<vmem>>, vector<32x512xf32>
    tpu.vector_store %arg9[%c128_199, %c0_200], %348 {strides = array<i32>} : memref<288x512xf32, #tpu.memory_space<vmem>>, vector<32x512xf32>,
    %c511_i32_201 = arith.constant 511 : i32
    %375 = tpu.dynamic_rotate %348 by %c511_i32_201 dim 1 : vector<32x512xf32>, i32 -> vector<32x512xf32>
    %cst_202 = arith.constant 0.000000e+00 : f32
    %376 = vector.shape_cast %36 : vector<1x512xi1> to vector<1x512xi1>
    %377 = vector.broadcast %376 : vector<1x512xi1> to vector<32x512xi1>
    %378 = vector.broadcast %cst_202 : f32 to vector<32x512xf32>
    %379 = arith.select %377, %378, %375 : vector<32x512xi1>, vector<32x512xf32>
    %c160_203 = arith.constant 160 : index
    %c0_204 = arith.constant 0 : index
    %380 = vector.load %arg9[%c160_203, %c0_204] : memref<288x512xf32, #tpu.memory_space<vmem>>, vector<32x512xf32>
    tpu.vector_store %arg9[%c160_203, %c0_204], %379 {strides = array<i32>} : memref<288x512xf32, #tpu.memory_space<vmem>>, vector<32x512xf32>,
    %c497_i32_205 = arith.constant 497 : i32
    %381 = tpu.dynamic_rotate %348 by %c497_i32_205 dim 1 : vector<32x512xf32>, i32 -> vector<32x512xf32>
    %cst_206 = arith.constant 0.000000e+00 : f32
    %382 = vector.shape_cast %43 : vector<1x512xi1> to vector<1x512xi1>
    %383 = vector.broadcast %382 : vector<1x512xi1> to vector<32x512xi1>
    %384 = vector.broadcast %cst_206 : f32 to vector<32x512xf32>
    %385 = arith.select %383, %384, %381 : vector<32x512xi1>, vector<32x512xf32>
    %c192_207 = arith.constant 192 : index
    %c0_208 = arith.constant 0 : index
    %386 = vector.load %arg9[%c192_207, %c0_208] : memref<288x512xf32, #tpu.memory_space<vmem>>, vector<32x512xf32>
    tpu.vector_store %arg9[%c192_207, %c0_208], %385 {strides = array<i32>} : memref<288x512xf32, #tpu.memory_space<vmem>>, vector<32x512xf32>,
    %c496_i32_209 = arith.constant 496 : i32
    %387 = tpu.dynamic_rotate %348 by %c496_i32_209 dim 1 : vector<32x512xf32>, i32 -> vector<32x512xf32>
    %cst_210 = arith.constant 0.000000e+00 : f32
    %388 = vector.shape_cast %40 : vector<1x512xi1> to vector<1x512xi1>
    %389 = vector.broadcast %388 : vector<1x512xi1> to vector<32x512xi1>
    %390 = vector.broadcast %cst_210 : f32 to vector<32x512xf32>
    %391 = arith.select %389, %390, %387 : vector<32x512xi1>, vector<32x512xf32>
    %c224_211 = arith.constant 224 : index
    %c0_212 = arith.constant 0 : index
    %392 = vector.load %arg9[%c224_211, %c0_212] : memref<288x512xf32, #tpu.memory_space<vmem>>, vector<32x512xf32>
    tpu.vector_store %arg9[%c224_211, %c0_212], %391 {strides = array<i32>} : memref<288x512xf32, #tpu.memory_space<vmem>>, vector<32x512xf32>,
    %c495_i32_213 = arith.constant 495 : i32
    %393 = tpu.dynamic_rotate %348 by %c495_i32_213 dim 1 : vector<32x512xf32>, i32 -> vector<32x512xf32>
    %cst_214 = arith.constant 0.000000e+00 : f32
    %394 = vector.shape_cast %44 : vector<1x512xi1> to vector<1x512xi1>
    %395 = vector.broadcast %394 : vector<1x512xi1> to vector<32x512xi1>
    %396 = vector.broadcast %cst_214 : f32 to vector<32x512xf32>
    %397 = arith.select %395, %396, %393 : vector<32x512xi1>, vector<32x512xf32>
    %c256_215 = arith.constant 256 : index
    %c0_216 = arith.constant 0 : index
    %398 = vector.load %arg9[%c256_215, %c0_216] : memref<288x512xf32, #tpu.memory_space<vmem>>, vector<32x512xf32>
    tpu.vector_store %arg9[%c256_215, %c0_216], %397 {strides = array<i32>} : memref<288x512xf32, #tpu.memory_space<vmem>>, vector<32x512xf32>,
    %c0_217 = arith.constant 0 : index
    %c0_218 = arith.constant 0 : index
    %399 = vector.load %arg9[%c0_217, %c0_218] : memref<288x512xf32, #tpu.memory_space<vmem>>, vector<288x512xf32>
    %cst_219 = arith.constant dense<0.000000e+00> : vector<1x512xf32>
    %400 = tpu.matmul %349, %399, %cst_219 {dimension_numbers = #tpu.dot_dimension_numbers<[1], [0], [0], [1], [0, 0, 1, 1], [], []>} : vector<1x288xf32>, vector<288x512xf32>, vector<1x512xf32> -> vector<1x512xf32>
    %c0_220 = arith.constant 0 : index
    %c0_221 = arith.constant 0 : index
    %401 = vector.load %arg6[%c0_220, %c0_221] : memref<1x1xf32, #tpu.memory_space<vmem>>, vector<1x1xf32>
    %402 = vector.broadcast %401 : vector<1x1xf32> to vector<1x512xf32>
    %403 = arith.addf %400, %402 : vector<1x512xf32>
    %cst_222 = arith.constant 0.000000e+00 : f32
    %404 = vector.broadcast %cst_222 : f32 to vector<1x512xf32>
    %405 = arith.cmpf oge, %403, %404 : vector<1x512xf32>
    %406 = vector.broadcast %46 : f32 to vector<1x512xf32>
    %407 = arith.mulf %406, %403 : vector<1x512xf32>
    %408 = arith.select %405, %403, %407 : vector<1x512xi1>, vector<1x512xf32>
    %c0_223 = arith.constant 0 : index
    %c0_224 = arith.constant 0 : index
    %409 = vector.load %arg8[%c0_223, %c0_224] : memref<1x512xf32, #tpu.memory_space<vmem>>, vector<1x512xf32>
    tpu.vector_store %arg8[%c0_223, %c0_224], %408 {strides = array<i32>} : memref<1x512xf32, #tpu.memory_space<vmem>>, vector<1x512xf32>,
    return
  }
  func.func @transform_0(%arg0: i32) -> (i32, i32) {
    %c0_i32 = arith.constant 0 : i32
    %c0_i32_0 = arith.constant 0 : i32
    return %c0_i32, %arg0 : i32, i32
  }
  func.func @transform_1(%arg0: i32) -> (i32, i32) {
    %c0_i32 = arith.constant 0 : i32
    %c0_i32_0 = arith.constant 0 : i32
    %c0_i32_1 = arith.constant 0 : i32
    return %c0_i32, %c0_i32_0 : i32, i32
  }
  func.func @transform_2(%arg0: i32) -> (i32, i32) {
    %c0_i32 = arith.constant 0 : i32
    %c0_i32_0 = arith.constant 0 : i32
    %c0_i32_1 = arith.constant 0 : i32
    return %c0_i32, %c0_i32_0 : i32, i32
  }
  func.func @transform_3(%arg0: i32) -> (i32, i32, i32) {
    %c0_i32 = arith.constant 0 : i32
    %c0_i32_0 = arith.constant 0 : i32
    %c0_i32_1 = arith.constant 0 : i32
    %c0_i32_2 = arith.constant 0 : i32
    return %c0_i32, %c0_i32_0, %c0_i32_1 : i32, i32, i32
  }
  func.func @transform_4(%arg0: i32) -> (i32, i32) {
    %c0_i32 = arith.constant 0 : i32
    %c0_i32_0 = arith.constant 0 : i32
    %c0_i32_1 = arith.constant 0 : i32
    return %c0_i32, %c0_i32_0 : i32, i32
  }
  func.func @transform_5(%arg0: i32) -> (i32, i32) {
    %c0_i32 = arith.constant 0 : i32
    %c0_i32_0 = arith.constant 0 : i32
    %c0_i32_1 = arith.constant 0 : i32
    return %c0_i32, %c0_i32_0 : i32, i32
  }
  func.func @transform_6(%arg0: i32) -> i32 {
    %c0_i32 = arith.constant 0 : i32
    %c0_i32_0 = arith.constant 0 : i32
    return %c0_i32 : i32
  }
  func.func @transform_7(%arg0: i32) -> (i32, i32) {
    %c0_i32 = arith.constant 0 : i32
    %c0_i32_0 = arith.constant 0 : i32
    return %c0_i32, %arg0 : i32, i32
  }
}

</mosaic_0001>

<bundles_post_ra>
// kernel: lat_forward.1
= control target key start
LH: loop header
LB: loop body
LE: loop exit
PB: predicated region body
PF: predicated region fallthrough
CT: control target
= control target key end

     0   :  { %s16447_s0 = inlined_call_operand.vmem [shape: f32[1,1024], index: 0, kind: input, shape index: {}]   ;;  %s16448_s1 = inlined_call_operand.vmem [shape: f32[32,9], index: 1, kind: input, shape index: {}]   ;;  %s16449_s2 = inlined_call_operand.vmem [shape: f32[32,1], index: 2, kind: input, shape index: {}]   ;;  %s16450_s3 = inlined_call_operand.vmem [shape: f32[4,32,288], index: 3, kind: input, shape index: {}]   ;;  %s16451_s4 = inlined_call_operand.vmem [shape: f32[1,288], index: 4, kind: input, shape index: {}]   ;;  %s16452_s5 = inlined_call_operand.<no memory space> [shape: f32[1,1], index: 5, kind: input, shape index: {}]   ;;  %s16453_s6 = inlined_call_operand.vmem [shape: f32[2], index: 6, kind: input, shape index: {}]   ;;  %s16454_s7 = inlined_call_operand.vmem [shape: f32[1,1024], index: 7, kind: output, shape index: {}]  }
   0x1   :  { %v12_v0 = vstv %s16452_s5 }
   0x2   :  { %13 = vst [vmem:[#allocation3] sm:$0x1] %v12_v0 }
   0x3   :  { %14 = vsyncpa [#allocation5], 0  ;;  %s11389_s26 = smov 0  }
   0x4 LB: > { %s7361_s27 = sadd.s32 4294967295, %s11324_s26   ;;  %p7363_p0 = scmp.ge.s32.totalorder %s11324_s26, 1  ;;  %s11324_s26 = sphi %s11389_s26, %s20_s26  }
   0x5   : > { %p203_p1 = scmp.lt.s32.totalorder %s11324_s26, 3  ;;  %s231_s30 = sshll.u32 %s16453_s6, 4  ;;  %s232_s30 = int_to_ptr.vmem [resolvable:$true] %s231_s30 }
   0x6   : > { %p11404_p3 = scmp.eq.s32.totalorder %s7361_s27, 0  ;;  %s11299_s9 = scalar_lea.vmem %s232_s30, 16 }
   0x7   : > { %p11400_p2 = pnand %p7363_p0, %p203_p1  ;;  %p11300_p6 = scmp.ne.s32.totalorder %s232_s30, %s11299_s9 }
   0x8   : > { %p11307_p10 = scmp.lt.s32.totalorder %s232_s30, %s232_s30  ;;  %p11308_p11 = scmp.lt.s32.totalorder %s11299_s9, %s11299_s9 }
   0x9   : > { %p9639_p4 = pneg %p11400_p2 }
   0xa   : > { %p11309_p12 = por %p11308_p11, %p11307_p10 }
   0xb   : > { %p9640_p5 = pnand %p11404_p3, %p9639_p4 }
   0xd   : > { %p11301_p7 = pneg %p9640_p5 }
   0xf   : > { %p11302_p8 = pnand %p11301_p7, %p11300_p6 }
  0x11   : > { %p11303_p9 = pneg %p11302_p8 }
  0x13   : > { %p11310_p13 = pnand %p11309_p12, %p11303_p9 }
  0x15   : > { %11313 = shalt.err (!%p11310_p13)
}
  0x16   : > { %s11326_s10 = smov [#allocation4]   ;;  %252 = sbr.rel (%p11400_p2) target bundleno = 2771 (0xad3), region = 48 }
  0x17   : > { %9642 = dma.vmem_to_smem (!%p9640_p5), %s232_s30, 16, %s11326_s10, [#allocation5]  }
  0x1d   : > { %11319 = dma.done.wait (%p11404_p3), [#allocation5], 16  }
  0x1e   : > { %11321 = vsyncadd (%p11404_p3), [#allocation5], 4294967280 }
  0x1f   : > { %258 = sfence }
  0x20   : > { %v11421_v1 = vld [vmem:[%s16448_s1] sm:$0xff]  ;;  %s7368_s13 = sshll.u32 %s7361_s27, 2  ;;  %v16455_v2 = vlaneseq  ;;  %v11327_v3 = vmov 1   ;;  %v11328_v4 = vmov 0   ;;  %v11432_v6 = vld [vmem:[%s16448_s1 + $0x8] sm:$0xff]  ;;  %v11329_v12 = vmov 2  }
  0x21   : > { %9674 = vset.pattern.permute.xlu1 %v11327_v3  ;;  %9673 = vset.pattern.permute.xlu0 %v11328_v4  ;;  %p284_p0 = scmp.lt.s32.totalorder %s7368_s13, 7  ;;  %s11330_s19 = smov 17   ;;  %v11480_v17 = vld [vmem:[%s16448_s1 + $0x18] sm:$0xff]  ;;  %v11488_v18 = vld [vmem:[%s16448_s1 + $0x10] sm:$0xff]  ;;  %v11333_v19 = vmov 3   ;;  %v11335_v20 = vmov 4  }
  0x22   : > { %541 = vperm.xlu1 %9674, %v11421_v1   ;;  %473 = vperm.xlu0 %9673, %v11421_v1   ;;  %v11427_v5 = vshrl.u32 %v16455_v2, 7  ;;  %s11331_s20 = smov 16   ;;  %s11332_s25 = smov 15   ;;  %v11336_v21 = vmov 5   ;;  %v11338_v22 = vmov 6   ;;  %v11341_v23 = vmov 7  }
  0x23   : > { %s17813_s13 = smov (!%p284_p0, %s7368_s13), 7  ;;  %s11334_s27 = smov 1   ;;  %v11342_v24 = vmov 8   ;;  %v1140_v25 = vld [vmem:[%s16449_s2 + $0x10] sm:$0xff]  ;;  %v1138_v42 = vld [vmem:[%s16449_s2] sm:$0xff]  ;;  %v1139_v45 = vld [vmem:[%s16449_s2 + $0x8] sm:$0xff] }
  0x24   : > { %16735 = vst [vmem:[#allocation7_spill] sm:$0xff] %v11427_v5  ;;  %v16457_v7 = vsub.s32 1, %v11427_v5  ;;  %s286_s18 = scalar_lea.vmem %s16447_s0, %s17813_s13  ;;  %v448_v9 = vsub.s32 3, %v11427_v5  ;;  %v11445_v10 = vsub.s32 0, %v11427_v5  ;;  %v16456_v15 = vsub.s32 2, %v11427_v5  ;;  %s11337_s28 = smov 127  }
  0x25   : > { %v428_v8 = vld [vmem:[%s286_s18] sm:$0xf]  ;;  %s11339_s29 = smov 113   ;;  %s11340_s30 = smov 112   ;;  %v1141_v47 = vld [vmem:[%s16449_s2 + $0x18] sm:$0xff]  ;;  %v11635_v56 = vand.u32 127, %v16455_v2 }
  0x26   : > { %545 = vperm.xlu1 %9674, %v11432_v6   ;;  %478 = vperm.xlu0 %9673, %v11432_v6   ;;  %16736 = vst [vmem:[#allocation8_spill] sm:$0xff] %v11445_v10  ;;  %v11449_v11 = vrot.slane %v428_v8, %v16457_v7  ;;  %v11453_v13 = vrot.slane %v428_v8, %v448_v9  ;;  %s11343_s5 = smov 111   ;;  %s11833_s17 = sld [smem:[#allocation4]] }
  0x27   : > { %v11457_v14 = vrot.slane %v428_v8, %v11445_v10  ;;  %v11466_v16 = vrot.slane %v428_v8, %v16456_v15  ;;  %v296_v58 = vadd.s32 256, %v11635_v56  ;;  %v11643_v60 = vadd.s32 128, %v11635_v56 }
  0x28   : > { %16737 = vst [vmem:[#allocation9_spill] sm:$0xff] %v11449_v11  ;;  %16738 = vst [vmem:[#allocation10_spill] sm:$0xff] %v11453_v13  ;;  %v302_v61 = vand.u32 15, %v11635_v56  ;;  %v350_v62 = vand.u32 255, %v11635_v56  ;;  %v11650_v0 = vadd.s32 384, %v11635_v56  ;;  %v16750_v8 = vmov 0 }
  0x29   : > { %16739 = vst [vmem:[#allocation11_spill] sm:$0xff] %v11457_v14  ;;  %16740 = vst [vmem:[#allocation12_spill] sm:$0xff] %v11466_v16  ;;  %vm16506_vm2 = vcmp.lt.s32.totalorder %v11635_v56, 17  ;;  %vm16471_vm3 = vcmp.lt.s32.totalorder %v11635_v56, 16  ;;  %vm16503_vm12 = vcmp.lt.s32.totalorder %v11635_v56, 15 }
  0x2a   : > { %9675 = vset.pattern.permute.xlu1 %v11329_v12  ;;  %456 = vrot.lane.b32.xlu0 %v11449_v11, %s11330_s19  ;;  %16745 = vst [vmem:[#allocation17_spill] sm:$0xff] %v11643_v60  ;;  %16746 = vst [vmem:[#allocation18_spill] sm:$0xff] %v11650_v0  ;;  %vm11653_vm0 = vcmp.eq.s32.totalorder %v302_v61, 0  ;;  %vm11657_vm1 = vcmp.lt.s32.totalorder %v350_v62, 16  ;;  %vm11742_vm10 = vcmp.eq.s32.totalorder %v302_v61, 15 }
  0x2b   : > { %626 = vperm.xlu1 %9675, %v11432_v6   ;;  %v16751_v8 = vsel %vm11657_vm1, 4294967295, %v16750_v8  ;;  %vm16507_vm4 = vmor %vm11653_vm0, %vm11657_vm1 }
  0x2c   : > { %16752 = vst [vmem:[#allocation20_spill] sm:$0xff] %v16751_v8  ;;  %vm16483_vm15 = vmor %vm11742_vm10, %vm11657_vm1 }
  0x2e   : > { %460 = vrot.lane.b32.xlu0 %v11453_v13, %s11330_s19 }
  0x2f   : > { %454 = vrot.lane.b32.xlu1 %v11457_v14, %s11330_s19 }
  0x30   : > { %9676 = vset.pattern.permute.xlu1 %v11328_v4 }
  0x32   : > { %525 = vrot.lane.b32.xlu0 %v11449_v11, %s11331_s20 }
  0x33   : > { %458 = vrot.lane.b32.xlu1 %v11466_v16, %s11330_s19 }
  0x36   : > { %529 = vrot.lane.b32.xlu0 %v11453_v13, %s11331_s20 }
  0x37   : > { %523 = vrot.lane.b32.xlu1 %v11457_v14, %s11331_s20 }
  0x3a   : > { %488 = vperm.xlu0 %9673, %v11480_v17  }
  0x3b   : > { %527 = vrot.lane.b32.xlu1 %v11466_v16, %s11331_s20 }
  0x3e   : > { %9677 = vset.pattern.permute.xlu0 %v11329_v12 }
  0x3f   : > { %483 = vperm.xlu1 %9676, %v11488_v18   ;;  %622 = vperm.xlu0 %9677, %v11421_v1  }
  0x43   : > { %9678 = vset.pattern.permute.xlu1 %v11327_v3  ;;  %606 = vrot.lane.b32.xlu0 %v11449_v11, %s11332_s25  ;;  %v364_v3 = vand.u32 255, %v296_v58 }
  0x44   : > { %549 = vperm.xlu1 %9678, %v11488_v18  }
  0x45   : > { %vm11679_vm6 = vcmp.lt.s32.totalorder %v364_v3, 16 }
  0x47   : > { %610 = vrot.lane.b32.xlu0 %v11453_v13, %s11332_s25 }
  0x48   : > { %553 = vperm.xlu1 %9678, %v11480_v17  }
  0x4b   : > { %634 = vperm.xlu0 %9677, %v11480_v17  }
  0x4c   : > { %9679 = vset.pattern.permute.xlu1 %v11333_v19 }
  0x4d   : > { %707 = vperm.xlu1 %9679, %v11432_v6  }
  0x4f   : > { %9681 = vset.pattern.permute.xlu0 %v11333_v19 }
  0x50   : > { %703 = vperm.xlu0 %9681, %v11421_v1  }
  0x51   : > { %604 = vrot.lane.b32.xlu1 %v11457_v14, %s11332_s25 }
  0x52   : > { %9680 = vset.pattern.permute.xlu1 %v11329_v12 }
  0x54   : > { %685 = vrot.lane.b32.xlu0 %v11457_v14, %s11334_s27 }
  0x55   : > { %608 = vrot.lane.b32.xlu1 %v11466_v16, %s11332_s25 }
  0x58   : > { %689 = vrot.lane.b32.xlu0 %v11466_v16, %s11334_s27 }
  0x59   : > { %630 = vperm.xlu1 %9680, %v11488_v18  }
  0x5c   : > { %711 = vperm.xlu0 %9681, %v11488_v18  }
  0x5d   : > { %9682 = vset.pattern.permute.xlu1 %v11335_v20 }
  0x5e   : > { %767 = vperm.xlu1 %9682, %v11421_v1  }
  0x60   : > { %9685 = vset.pattern.permute.xlu0 %v11336_v21 }
  0x61   : > { %836 = vperm.xlu0 %9685, %v11432_v6  }
  0x62   : > { %771 = vperm.xlu1 %9682, %v11432_v6  }
  0x65   : > { %816 = vrot.lane.b32.xlu0 %v11449_v11, %s11337_s28 }
  0x66   : > { %687 = vrot.lane.b32.xlu1 %v11449_v11, %s11334_s27 }
  0x67   : > { %9683 = vset.pattern.permute.xlu1 %v11333_v19  ;;  %v16753_v19 = vmov 0 }
  0x69   : > { %820 = vrot.lane.b32.xlu0 %v11453_v13, %s11337_s28 }
  0x6a   : > { %691 = vrot.lane.b32.xlu1 %v11453_v13, %s11334_s27 }
  0x6d   : > { %844 = vperm.xlu0 %9685, %v11480_v17  }
  0x6e   : > { %715 = vperm.xlu1 %9683, %v11480_v17  }
  0x71   : > { %9689 = vset.pattern.permute.xlu0 %v11338_v22 }
  0x72   : > { %9684 = vset.pattern.permute.xlu1 %v11336_v21  ;;  %913 = vperm.xlu0 %9689, %v11421_v1  }
  0x73   : > { %832 = vperm.xlu1 %9684, %v11421_v1  }
  0x76   : > { %895 = vrot.lane.b32.xlu0 %v11457_v14, %s11339_s29 }
  0x77   : > { %9686 = vset.pattern.permute.xlu1 %v11335_v20  ;;  %v16756_v20 = vmov 0 }
  0x78   : > { %775 = vperm.xlu1 %9686, %v11488_v18   ;;  %v16757_v20 = vsel %vm11679_vm6, 4294967295, %v16756_v20 }
  0x79   : > { %16758 = vst [vmem:[#allocation22_spill] sm:$0xff] %v16757_v20 }
  0x7a   : > { %899 = vrot.lane.b32.xlu0 %v11466_v16, %s11339_s29 }
  0x7c   : > { %779 = vperm.xlu1 %9686, %v11480_v17  }
  0x7e   : > { %921 = vperm.xlu0 %9689, %v11488_v18  }
  0x80   : > { %9687 = vset.pattern.permute.xlu1 %v11338_v22 }
  0x81   : > { %917 = vperm.xlu1 %9687, %v11432_v6  }
  0x82   : > { %980 = vrot.lane.b32.xlu0 %v11466_v16, %s11340_s30 }
  0x83   : > { %9693 = vset.pattern.permute.xlu0 %v11341_v23 }
  0x85   : > { %814 = vrot.lane.b32.xlu1 %v11457_v14, %s11337_s28 }
  0x86   : > { %9688 = vset.pattern.permute.xlu1 %v11336_v21  ;;  %1002 = vperm.xlu0 %9693, %v11488_v18   ;;  %v16759_v21 = vmov 0 }
  0x89   : > { %818 = vrot.lane.b32.xlu1 %v11466_v16, %s11337_s28 }
  0x8a   : > { %9694 = vset.pattern.permute.xlu0 %v11342_v24 }
  0x8b   : > { %1079 = vperm.xlu0 %9694, %v11432_v6  }
  0x8d   : > { %840 = vperm.xlu1 %9688, %v11488_v18  }
  0x8f   : > { %1059 = vrot.lane.b32.xlu0 %v11449_v11, %s11343_s5 }
  0x91   : > { %9690 = vset.pattern.permute.xlu1 %v11341_v23 }
  0x92   : > { %994 = vperm.xlu1 %9690, %v11421_v1  }
  0x93   : > { %1063 = vrot.lane.b32.xlu0 %v11453_v13, %s11343_s5 }
  0x96   : > { %998 = vperm.xlu1 %9690, %v11432_v6   ;;  %v16747_v6 = vmov 0 }
  0x97   : > { %1087 = vperm.xlu0 %9694, %v11480_v17   ;;  %v16748_v6 = vsel %vm11653_vm0, 4294967295, %v16747_v6 }
  0x98   : > { %16749 = vst [vmem:[#allocation19_spill] sm:$0xff] %v16748_v6 }
  0x9a   : > { %897 = vrot.lane.b32.xlu1 %v11449_v11, %s11339_s29 }
  0x9b   : > { %9691 = vset.pattern.permute.xlu1 %v11338_v22  ;;  %9698 = vset.pattern.permute.xlu0 %v11328_v4 }
  0x9c   : > { %1154 = vperm.xlu0 %9698, %v1140_v25  }
  0x9e   : > { %901 = vrot.lane.b32.xlu1 %v11453_v13, %s11339_s29 }
  0xa1   : > { %v11558_v26 = vpop.permute.xlu1 %541  ;;  %v11560_v27 = vpop.permute.xlu0 %473 }
  0xa2   : > { %925 = vperm.xlu1 %9691, %v11480_v17  }
  0xa5   : > { %v11563_v28 = vpop.permute.xlu1 %545  ;;  %v11565_v29 = vpop.permute.xlu0 %478 }
  0xa6   : > { %9692 = vset.pattern.permute.xlu1 %v11342_v24 }
  0xa7   : > { %1075 = vperm.xlu1 %9692, %v11421_v1   ;;  %v316_v1 = vand.u32 15, %v296_v58 }
  0xa9   : > { %v11572_v31 = vpop.permute.xlu0 %456  ;;  %vm11675_vm5 = vcmp.eq.s32.totalorder %v316_v1, 0  ;;  %vm11765_vm13 = vcmp.eq.s32.totalorder %v316_v1, 15 }
  0xaa   : > { %v11568_v30 = vpop.permute.xlu1 %626  ;;  %v16754_v19 = vsel %vm11675_vm5, 4294967295, %v16753_v19  ;;  %vm16504_vm9 = vmor %vm11675_vm5, %vm11679_vm6 }
  0xab   : > { %976 = vrot.lane.b32.xlu1 %v11457_v14, %s11340_s30  ;;  %16755 = vst [vmem:[#allocation21_spill] sm:$0xff] %v16754_v19 }
  0xac   : > { %9695 = vset.pattern.permute.xlu1 %v11341_v23 }
  0xad   : > { %v11576_v33 = vpop.permute.xlu0 %460 }
  0xae   : > { %v455_v32 = vpop.permute.xlu1 %454 }
  0xaf   : > { %978 = vrot.lane.b32.xlu1 %v11449_v11, %s11340_s30  ;;  %v465_v22 = vsel %vm16506_vm2, %v455_v32, %v11572_v31 }
  0xb1   : > { %v11585_v36 = vpop.permute.xlu0 %525 }
  0xb2   : > { %v11578_v34 = vpop.permute.xlu1 %458 }
  0xb3   : > { %982 = vrot.lane.b32.xlu1 %v11453_v13, %s11340_s30 }
  0xb5   : > { %v11591_v38 = vpop.permute.xlu0 %529 }
  0xb6   : > { %v11582_v35 = vpop.permute.xlu1 %523 }
  0xb7   : > { %1006 = vperm.xlu1 %9695, %v11480_v17   ;;  %v323_v17 = vand.u32 15, %v11650_v0  ;;  %v534_v62 = vsel %vm16471_vm3, %v11582_v35, %v11585_v36 }
  0xb9   : > { %v11600_v41 = vpop.permute.xlu0 %488  ;;  %vm11701_vm8 = vcmp.eq.s32.totalorder %v323_v17, 0  ;;  %vm11788_vm14 = vcmp.eq.s32.totalorder %v323_v17, 15 }
  0xba   : > { %v11587_v37 = vpop.permute.xlu1 %527 }
  0xbb   : > { %1057 = vrot.lane.b32.xlu1 %v11457_v14, %s11343_s5 }
  0xbc   : > { %9696 = vset.pattern.permute.xlu1 %v11342_v24  ;;  %v535_v24 = vsel %vm16471_vm3, %v11591_v38, %v11582_v35  ;;  %v533_v35 = vsel %vm16471_vm3, %v11585_v36, %v11587_v37 }
  0xbd   : > { %v536_v3 = vsel %vm11657_vm1, 0.0, %v535_v24 }
  0xbe   : > { %v11593_v39 = vpop.permute.xlu1 %483  ;;  %v11608_v44 = vpop.permute.xlu0 %622 }
  0xbf   : > { %1061 = vrot.lane.b32.xlu1 %v11466_v16, %s11343_s5 }
  0xc2   : > { %v11618_v48 = vpop.permute.xlu0 %606 }
  0xc3   : > { %1083 = vperm.xlu1 %9696, %v11488_v18   ;;  %v11598_v40 = vpop.permute.xlu1 %549  ;;  %v466_v18 = vsel %vm16506_vm2, %v11576_v33, %v455_v32  ;;  %v463_v32 = vsel %vm16506_vm2, %v11578_v34, %v11576_v33 }
  0xc4   : > { %v467_v25 = vsel %vm16507_vm4, 0.0, %v466_v18 }
  0xc5   : > { %v494_v33 = vrot.slane %v467_v25, %v11445_v10  ;;  %v11747_v25 = vrot.slane %v536_v3, %v11445_v10 }
  0xc6   : > { %v11622_v50 = vpop.permute.xlu0 %610 }
  0xc7   : > { %9697 = vset.pattern.permute.xlu1 %v11328_v4  ;;  %v11606_v43 = vpop.permute.xlu1 %553  ;;  %v309_v4 = vand.u32 15, %v11643_v60  ;;  %v507_v3 = vmul.f32 %v494_v33, %v11560_v27  ;;  %v572_v5 = vmul.f32 %v11747_v25, %v11558_v26 }
  0xc8   : > { %1144 = vperm.xlu1 %9697, %v1138_v42   ;;  %v16763_v42 = vmov 0 }
  0xc9   : > { %vm11683_vm7 = vcmp.eq.s32.totalorder %v309_v4, 0  ;;  %v16764_v42 = vsel %vm11701_vm8, 4294967295, %v16763_v42  ;;  %vm11756_vm11 = vcmp.eq.s32.totalorder %v309_v4, 15 }
  0xca   : > { %v11628_v53 = vpop.permute.xlu0 %634  ;;  %v16760_v21 = vsel %vm11683_vm7, 4294967295, %v16759_v21  ;;  %16765 = vst [vmem:[#allocation25_spill] sm:$0xff] %v16764_v42 }
  0xcb   : > { %16761 = vst [vmem:[#allocation23_spill] sm:$0xff] %v16760_v21 }
  0xcc   : > { %1149 = vperm.xlu1 %9697, %v1139_v45   ;;  %v11613_v46 = vpop.permute.xlu1 %707  ;;  %v464_v45 = vsel %vm16506_vm2, %v11572_v31, %v11578_v34  ;;  %v470_v34 = vsel %vm11701_vm8, 0.0, %v463_v32  ;;  %v532_v32 = vsel %vm16471_vm3, %v11587_v37, %v11591_v38  ;;  %v538_v37 = vsel %vm11679_vm6, 0.0, %v533_v35 }
  0xcd   : > { %16741 = vst [vmem:[#allocation13_spill] sm:$0xff] %v11613_v46  ;;  %v469_v31 = vsel %vm16504_vm9, 0.0, %v464_v45  ;;  %v11750_v45 = vrot.slane %v534_v62, %v11445_v10  ;;  %v506_v2 = vrot.slane %v470_v34, %v11445_v10  ;;  %v571_v1 = vrot.slane %v532_v32, %v11445_v10 }
  0xce   : > { %v502_v61 = vrot.slane %v469_v31, %v11445_v10  ;;  %v511_v31 = vmul.f32 %v494_v33, %v11565_v29  ;;  %v576_v38 = vmul.f32 %v11747_v25, %v11563_v28  ;;  %vm16502_vm3 = vcmp.lt.s32.totalorder %v11635_v56, 1 }
  0xcf   : > { %v11632_v55 = vpop.permute.xlu0 %703  ;;  %v573_v35 = vmul.f32 %v11750_v45, %v11558_v26  ;;  %v577_v4 = vmul.f32 %v11750_v45, %v11563_v28  ;;  %v514_v60 = vmul.f32 %v506_v2, %v11565_v29  ;;  %v522_v13 = vmul.f32 %v506_v2, %v11600_v41 }
  0xd0   : > { %1159 = vperm.xlu1 %9697, %v1141_v47   ;;  %v11620_v49 = vpop.permute.xlu1 %604  ;;  %16743 = vst [vmem:[#allocation15_spill] sm:$0xff] %v11632_v55  ;;  %v468_v47 = vsel %vm11683_vm7, 0.0, %v465_v22  ;;  %v509_v32 = vmul.f32 %v502_v61, %v11560_v27  ;;  %v513_v0 = vmul.f32 %v502_v61, %v11565_v29  ;;  %v575_v16 = vmul.f32 %v571_v1, %v11558_v26 }
  0xd1   : > { %v498_v22 = vrot.slane %v468_v47, %v11445_v10  ;;  %v16770_v47 = vmov 0  ;;  %v615_v17 = vsel %vm16503_vm12, %v11620_v49, %v11618_v48  ;;  %v588_v46 = vadd.f32 %v572_v5, %v507_v3 }
  0xd2   : > { %v16771_v47 = vsel %vm11756_vm11, 4294967295, %v16770_v47  ;;  %v592_v55 = vadd.f32 %v576_v38, %v511_v31  ;;  %v618_v14 = vsel %vm11756_vm11, 0.0, %v615_v17  ;;  %v515_v5 = vmul.f32 %v494_v33, %v11593_v39 }
  0xd3   : > { %v11640_v59 = vpop.permute.xlu0 %685  ;;  %v508_v15 = vmul.f32 %v498_v22, %v11560_v27  ;;  %v512_v34 = vmul.f32 %v498_v22, %v11565_v29  ;;  %v520_v29 = vmul.f32 %v498_v22, %v11600_v41  ;;  %v517_v38 = vmul.f32 %v502_v61, %v11593_v39 }
  0xd4   : > { %v11624_v51 = vpop.permute.xlu1 %608  ;;  %v518_v17 = vmul.f32 %v506_v2, %v11593_v39  ;;  %vm16509_vm2 = vcmp.lt.s32.totalorder %v11635_v56, 112 }
  0xd5   : > { %v589_v11 = vadd.f32 %v573_v35, %v508_v15  ;;  %v516_v15 = vmul.f32 %v498_v22, %v11593_v39  ;;  %v613_v22 = vsel %vm16503_vm12, %v11624_v51, %v11622_v50 }
  0xd6   : > { %v620_v39 = vsel %vm11788_vm14, 0.0, %v613_v22 }
  0xd7   : > { %v11664_v12 = vpop.permute.xlu0 %689 }
  0xd8   : > { %v11626_v52 = vpop.permute.xlu1 %630 }
  0xdb   : > { %v11719_v58 = vpop.permute.xlu0 %711 }
  0xdc   : > { %16766 = vst [vmem:[#allocation26_spill] sm:$0xff] %v11719_v58 }
  0xdd   : > { %v11630_v54 = vpop.permute.xlu1 %767 }
  0xde   : > { %16742 = vst [vmem:[#allocation14_spill] sm:$0xff] %v11630_v54  ;;  %v593_v54 = vadd.f32 %v577_v4, %v512_v34  ;;  %v581_v4 = vmul.f32 %v11750_v45, %v11598_v40 }
  0xe0   : > { %v11760_v36 = vpop.permute.xlu0 %836 }
  0xe1   : > { %v11637_v57 = vpop.permute.xlu1 %771  ;;  %16772 = vst [vmem:[#allocation28_spill] sm:$0xff] %v11760_v36  ;;  %v16776_v36 = vmov 0 }
  0xe2   : > { %16744 = vst [vmem:[#allocation16_spill] sm:$0xff] %v11637_v57  ;;  %v16777_v36 = vsel %vm11788_vm14, 4294967295, %v16776_v36  ;;  %v521_v57 = vmul.f32 %v502_v61, %v11600_v41 }
  0xe5   : > { %v11647_v63 = vpop.permute.xlu1 %687 }
  0xe9   : > { %v11662_v9 = vpop.permute.xlu1 %691 }
  0xed   : > { %v11690_v23 = vpop.permute.xlu1 %715 }
  0xee   : > { %16762 = vst [vmem:[#allocation24_spill] sm:$0xff] %v11690_v23  ;;  %v519_v23 = vmul.f32 %v494_v33, %v11600_v41 }
  0xf2   : > { %v11735_v18 = vpop.permute.xlu1 %832 }
  0xf3   : > { %16767 = vst [vmem:[#allocation27_spill] sm:$0xff] %v11735_v18  ;;  %v510_v18 = vmul.f32 %v506_v2, %v11560_v27  ;;  %v616_v27 = vsel %vm16503_vm12, %v11622_v50, %v11620_v49 }
  0xf4   : > { %v617_v41 = vsel %vm16483_vm15, 0.0, %v616_v27  ;;  %vm16486_vm15 = vmor %vm11765_vm13, %vm11679_vm6 }
  0xf5   : > { %v11835_v3 = vadd.f32 %v575_v16, %v510_v18  ;;  %v640_v16 = vrot.slane %v617_v41, %v11445_v10  ;;  %v644_v18 = vrot.slane %v618_v14, %v11445_v10  ;;  %v584_v14 = vmul.f32 %v11747_v25, %v11606_v43 }
  0xf7   : > { %v11778_v7 = vpop.permute.xlu1 %775 }
  0xf8   : > { %16775 = vst [vmem:[#allocation29_spill] sm:$0xff] %v11778_v7  ;;  %v567_v7 = vrot.slane %v538_v37, %v11445_v10  ;;  %v11810_v37 = vpop.permute.xlu0 %816 }
  0xf9   : > { %16778 = vst [vmem:[#allocation30_spill] sm:$0xff] %v11810_v37  ;;  %v579_v37 = vmul.f32 %v571_v1, %v11563_v28 }
  0xfa   : > { %v574_v49 = vmul.f32 %v567_v7, %v11558_v26  ;;  %v578_v42 = vmul.f32 %v567_v7, %v11563_v28  ;;  %v580_v26 = vmul.f32 %v11747_v25, %v11598_v40  ;;  %v614_v28 = vsel %vm16503_vm12, %v11618_v48, %v11624_v51 }
  0xfb   : > { %v11817_v58 = vpop.permute.xlu1 %779  ;;  %v582_v33 = vmul.f32 %v567_v7, %v11598_v40  ;;  %v595_v35 = vadd.f32 %v579_v37, %v514_v60  ;;  %v583_v48 = vmul.f32 %v571_v1, %v11598_v40  ;;  %v619_v50 = vsel %vm16486_vm15, 0.0, %v614_v28 }
  0xfc   : > { %v11857_v31 = vpop.permute.xlu0 %820  ;;  %v590_v34 = vadd.f32 %v574_v49, %v509_v32  ;;  %v594_v27 = vadd.f32 %v578_v42, %v513_v0  ;;  %v596_v8 = vadd.f32 %v580_v26, %v515_v5  ;;  %v597_v51 = vadd.f32 %v581_v4, %v516_v15 }
  0xfd   : > { %v585_v32 = vmul.f32 %v11750_v45, %v11606_v43  ;;  %v586_v2 = vmul.f32 %v567_v7, %v11606_v43  ;;  %v598_v40 = vadd.f32 %v582_v33, %v517_v38  ;;  %v587_v60 = vmul.f32 %v571_v1, %v11606_v43 }
  0xfe   : > { %v653_v0 = vmul.f32 %v640_v16, %v11608_v44  ;;  %v654_v42 = vmul.f32 %v644_v18, %v11608_v44  ;;  %v599_v37 = vadd.f32 %v583_v48, %v518_v17  ;;  %v657_v49 = vmul.f32 %v640_v16, %v11568_v30 }
  0xff   : > { %v658_v45 = vmul.f32 %v644_v18, %v11568_v30  ;;  %v648_v41 = vrot.slane %v619_v50, %v11445_v10  ;;  %v600_v7 = vadd.f32 %v584_v14, %v519_v23  ;;  %v652_v5 = vrot.slane %v620_v39, %v11445_v10 }
 0x100   : > { %v11855_v61 = vpop.permute.xlu1 %917  ;;  %v696_v43 = vsel %vm16502_vm3, %v11640_v59, %v11647_v63  ;;  %v11886_v1 = vpop.permute.xlu0 %844  ;;  %v11889_v15 = vstv %s11833_s17  ;;  %v601_v26 = vadd.f32 %v585_v32, %v520_v29  ;;  %v602_v38 = vadd.f32 %v586_v2, %v521_v57 }
 0x101   : > { %16779 = vst [vmem:[#allocation31_spill] sm:$0xff] %v11855_v61  ;;  %16780 = vst [vmem:[#allocation32_spill] sm:$0xff] %v11886_v1  ;;  %v665_v4 = vmul.f32 %v640_v16, %v11628_v53  ;;  %v695_v23 = vsel %vm16502_vm3, %v11647_v63, %v11664_v12  ;;  %v603_v28 = vadd.f32 %v587_v60, %v522_v13  ;;  %v699_v29 = vsel %vm11683_vm7, 0.0, %v696_v43  ;;  %v16795_v61 = vld [vmem:[#allocation16_spill] sm:$0xff] }
 0x102   : > { %16781 = vst [vmem:[#allocation33_spill] sm:$0xff] %v11889_v15  ;;  %v11896_v33 = vadd.f32 %v653_v0, %v588_v46  ;;  %v670_v22 = vadd.f32 %v654_v42, %v589_v11  ;;  %v666_v17 = vmul.f32 %v644_v18, %v11628_v53  ;;  %v11901_v14 = vadd.f32 %v657_v49, %v592_v55 }
 0x103   : > { %v674_v50 = vadd.f32 %v658_v45, %v593_v54  ;;  %v655_v57 = vmul.f32 %v648_v41, %v11608_v44  ;;  %v656_v32 = vmul.f32 %v652_v5, %v11608_v44  ;;  %v659_v63 = vmul.f32 %v648_v41, %v11568_v30 }
 0x104   : > { %v11876_v25 = vpop.permute.xlu1 %814  ;;  %v660_v13 = vmul.f32 %v652_v5, %v11568_v30  ;;  %v700_v11 = vsel %vm11675_vm5, 0.0, %v695_v23  ;;  %v11911_v46 = vpop.permute.xlu0 %913  ;;  %v11913_v2 = vadd.f32 %v665_v4, %v600_v7  ;;  %v661_v54 = vmul.f32 %v640_v16, %v11626_v52 }
 0x105   : > { %16782 = vst [vmem:[#allocation34_spill] sm:$0xff] %v11911_v46  ;;  %v662_v55 = vmul.f32 %v644_v18, %v11626_v52  ;;  %v663_v39 = vmul.f32 %v648_v41, %v11626_v52  ;;  %v664_v60 = vmul.f32 %v652_v5, %v11626_v52  ;;  %v725_v44 = vrot.slane %v699_v29, %v11445_v10 }
 0x106   : > { %v694_v30 = vsel %vm16502_vm3, %v11664_v12, %v11662_v9  ;;  %v697_v0 = vsel %vm16502_vm3, %v11662_v9, %v11640_v59  ;;  %v11930_v16 = vadd.f32 %v666_v17, %v601_v26  ;;  %v667_v18 = vmul.f32 %v648_v41, %v11628_v53  ;;  %v16786_v17 = vld [vmem:[#allocation14_spill] sm:$0xff] }
 0x107   : > { %v668_v52 = vmul.f32 %v652_v5, %v11628_v53  ;;  %v729_v49 = vrot.slane %v700_v11, %v11445_v10  ;;  %vm16505_vm15 = vcmp.lt.s32.totalorder %v11635_v56, 127  ;;  %v671_v45 = vadd.f32 %v655_v57, %v590_v34  ;;  %v16785_v5 = vld [vmem:[#allocation11_spill] sm:$0xff] }
 0x108   : > { %v11899_v48 = vpop.permute.xlu1 %818  ;;  %v672_v12 = vadd.f32 %v656_v32, %v11835_v3  ;;  %v675_v7 = vadd.f32 %v659_v63, %v594_v27  ;;  %v676_v43 = vadd.f32 %v660_v13, %v595_v35  ;;  %v11937_v4 = vadd.f32 %v661_v54, %v596_v8  ;;  %v16787_v34 = vld [vmem:[#allocation15_spill] sm:$0xff]  ;;  %v11948_v3 = vpop.permute.xlu0 %895  ;;  %v16789_v35 = vld [vmem:[#allocation9_spill] sm:$0xff] }
 0x109   : > { %v678_v59 = vadd.f32 %v662_v55, %v597_v51  ;;  %v698_v9 = vsel %vm11653_vm0, 0.0, %v697_v0  ;;  %v701_v41 = vsel %vm11701_vm8, 0.0, %v694_v30  ;;  %v679_v23 = vadd.f32 %v663_v39, %v598_v40  ;;  %16788 = vst [vmem:[#allocation11_spill] sm:$0xff] %v11948_v3  ;;  %v16790_v51 = vld [vmem:[#allocation13_spill] sm:$0xff]  ;;  %v16792_v40 = vld [vmem:[#allocation26_spill] sm:$0xff]  ;;  %v16793_v39 = vld [vmem:[#allocation12_spill] sm:$0xff] }
 0x10a   : > { %v680_v53 = vadd.f32 %v664_v60, %v599_v37  ;;  %v11945_v29 = vmul.f32 %v16786_v17, %v16785_v5  ;;  %v735_v57 = vmul.f32 %v725_v44, %v16787_v34  ;;  %v783_v8 = vmul.f32 %v16786_v17, %v16789_v35  ;;  %v16794_v30 = vld [vmem:[#allocation10_spill] sm:$0xff] }
 0x10b   : > { %v736_v27 = vmul.f32 %v729_v49, %v16787_v34  ;;  %v739_v32 = vmul.f32 %v725_v44, %v16790_v51  ;;  %v740_v63 = vmul.f32 %v729_v49, %v16790_v51  ;;  %v743_v37 = vmul.f32 %v725_v44, %v16792_v40 }
 0x10c   : > { %v11928_v42 = vpop.permute.xlu1 %840  ;;  %v744_v11 = vmul.f32 %v729_v49, %v16792_v40  ;;  %v721_v54 = vrot.slane %v698_v9, %v11445_v10  ;;  %v733_v55 = vrot.slane %v701_v41, %v11445_v10  ;;  %v784_v60 = vmul.f32 %v16786_v17, %v16793_v39 }
 0x10d   : > { %16783 = vst [vmem:[#allocation35_spill] sm:$0xff] %v11928_v42  ;;  %v785_v0 = vmul.f32 %v16786_v17, %v16794_v30  ;;  %v683_v20 = vadd.f32 %v667_v18, %v602_v38  ;;  %v684_v15 = vadd.f32 %v668_v52, %v603_v28  ;;  %v786_v46 = vmul.f32 %v16795_v61, %v16785_v5  ;;  %v11977_v17 = vpop.permute.xlu0 %899 }
 0x10e   : > { %v788_v19 = vmul.f32 %v16795_v61, %v16793_v39  ;;  %v751_v9 = vadd.f32 %v735_v57, %v670_v22  ;;  %v789_v41 = vmul.f32 %v16795_v61, %v16794_v30  ;;  %v752_v26 = vadd.f32 %v736_v27, %v671_v45  ;;  %v16796_v57 = vld [vmem:[#allocation24_spill] sm:$0xff] }
 0x10f   : > { %v755_v42 = vadd.f32 %v739_v32, %v674_v50  ;;  %v756_v6 = vadd.f32 %v740_v63, %v675_v7  ;;  %v759_v38 = vadd.f32 %v743_v37, %v678_v59  ;;  %v760_v28 = vadd.f32 %v744_v11, %v679_v23  ;;  %v16797_v7 = vld [vmem:[#allocation30_spill] sm:$0xff] }
 0x110   : > { %v734_v18 = vmul.f32 %v721_v54, %v16787_v34  ;;  %v737_v52 = vmul.f32 %v733_v55, %v16787_v34  ;;  %v738_v21 = vmul.f32 %v721_v54, %v16790_v51  ;;  %v741_v22 = vmul.f32 %v733_v55, %v16790_v51  ;;  %v16798_v51 = vld [vmem:[#allocation17_spill] sm:$0xff] }
 0x111   : > { %v11955_v13 = vpop.permute.xlu1 %994  ;;  %v746_v3 = vmul.f32 %v721_v54, %v16796_v57  ;;  %v748_v50 = vmul.f32 %v729_v49, %v16796_v57  ;;  %v749_v45 = vmul.f32 %v733_v55, %v16796_v57  ;;  %v825_v59 = vsel %vm16505_vm15, %v11876_v25, %v16797_v7 }
 0x112   : > { %16791 = vst [vmem:[#allocation14_spill] sm:$0xff] %v11955_v13  ;;  %v787_v13 = vmul.f32 %v16795_v61, %v16789_v35  ;;  %v747_v61 = vmul.f32 %v725_v44, %v16796_v57  ;;  %v11989_v23 = vadd.f32 %v783_v8, %v751_v9  ;;  %vm16508_vm3 = vcmp.lt.s32.totalorder %v11635_v56, 113 }
 0x113   : > { %v742_v34 = vmul.f32 %v721_v54, %v16792_v40  ;;  %v745_v27 = vmul.f32 %v733_v55, %v16792_v40  ;;  %v826_v44 = vsel %vm16505_vm15, %v11857_v31, %v11876_v25  ;;  %v11998_v49 = vadd.f32 %v784_v60, %v752_v26 }
 0x114   : > { %v16799_v32 = vand.u32 255, %v16798_v51  ;;  %v16800_v63 = vmov 0  ;;  %v750_v37 = vadd.f32 %v734_v18, %v11896_v33  ;;  %v753_v11 = vadd.f32 %v737_v52, %v672_v12  ;;  %v12018_v12 = vpop.permute.xlu0 %921 }
 0x115   : > { %v11973_v1 = vpop.permute.xlu1 %998  ;;  %v12007_v54 = vadd.f32 %v787_v13, %v755_v42  ;;  %v12009_v40 = vadd.f32 %v788_v19, %v756_v6  ;;  %v754_v55 = vadd.f32 %v738_v21, %v11901_v14  ;;  %v757_v9 = vadd.f32 %v741_v22, %v676_v43  ;;  %v16802_v21 = vld [vmem:[#allocation29_spill] sm:$0xff] }
 0x116   : > { %vm12002_vm12 = vcmp.ge.s32.totalorder %v16799_v32, 240  ;;  %v762_v25 = vadd.f32 %v746_v3, %v11913_v2  ;;  %v827_v26 = vsel %vm11742_vm10, 0.0, %v825_v59  ;;  %v763_v60 = vadd.f32 %v747_v61, %v11930_v16  ;;  %v16808_v32 = vld [vmem:[#allocation28_spill] sm:$0xff] }
 0x117   : > { %v16801_v63 = vsel %vm12002_vm12, 4294967295, %v16800_v63  ;;  %v764_v57 = vadd.f32 %v748_v50, %v683_v20  ;;  %v765_v51 = vadd.f32 %v749_v45, %v684_v15  ;;  %v830_v33 = vsel %vm11788_vm14, 0.0, %v826_v44 }
 0x118   : > { %v758_v6 = vadd.f32 %v742_v34, %v11937_v4  ;;  %v761_v19 = vadd.f32 %v745_v27, %v680_v53  ;;  %v790_v14 = vmul.f32 %v16802_v21, %v16785_v5  ;;  %v791_v2 = vmul.f32 %v16802_v21, %v16789_v35  ;;  %v16803_v4 = vld [vmem:[#allocation18_spill] sm:$0xff]  ;;  %v12050_v45 = vpop.permute.xlu0 %980 }
 0x119   : > { %v898_v8 = vpop.permute.xlu1 %897  ;;  %v792_v16 = vmul.f32 %v16802_v21, %v16793_v39  ;;  %v850_v20 = vrot.slane %v827_v26, %v11445_v10  ;;  %v823_v15 = vsel %vm16505_vm15, %v11899_v48, %v11857_v31  ;;  %v824_v43 = vsel %vm16505_vm15, %v16797_v7, %v11899_v48  ;;  %vm16510_vm15 = vmor %vm11683_vm7, %vm12002_vm12 }
 0x11a   : > { %v16804_v53 = vand.u32 255, %v16803_v4  ;;  %v16805_v3 = vmov 0  ;;  %v798_v13 = vadd.f32 %v11945_v29, %v750_v37  ;;  %v801_v18 = vadd.f32 %v785_v0, %v753_v11 }
 0x11b   : > { %v802_v52 = vadd.f32 %v786_v46, %v754_v55  ;;  %v862_v22 = vrot.slane %v830_v33, %v11445_v10  ;;  %v793_v31 = vmul.f32 %v16802_v21, %v16794_v30  ;;  %v794_v61 = vmul.f32 %v11817_v58, %v16785_v5 }
 0x11c   : > { %vm12038_vm9 = vcmp.ge.s32.totalorder %v16804_v53, 240  ;;  %v795_v48 = vmul.f32 %v11817_v58, %v16789_v35  ;;  %v805_v50 = vadd.f32 %v789_v41, %v757_v9  ;;  %v796_v7 = vmul.f32 %v11817_v58, %v16793_v39  ;;  %v16807_v41 = vld [vmem:[#allocation27_spill] sm:$0xff]  ;;  %v12085_v53 = vpop.permute.xlu0 %1002 }
 0x11d   : > { %v902_v42 = vpop.permute.xlu1 %901  ;;  %v16806_v3 = vsel %vm12038_vm9, 4294967295, %v16805_v3  ;;  %v797_v46 = vmul.f32 %v11817_v58, %v16794_v30  ;;  %v828_v29 = vsel %vm11756_vm11, 0.0, %v824_v43  ;;  %v829_v0 = vsel %vm11765_vm13, 0.0, %v823_v15  ;;  %v16809_v58 = vld [vmem:[#allocation11_spill] sm:$0xff]  ;;  %vm16514_vm4 = vmor %vm11701_vm8, %vm12038_vm9 }
 0x11e   : > { %v806_v5 = vadd.f32 %v790_v14, %v758_v6  ;;  %v807_v34 = vadd.f32 %v791_v2, %v759_v38  ;;  %v808_v35 = vadd.f32 %v792_v16, %v760_v28  ;;  %v863_v27 = vmul.f32 %v850_v20, %v16807_v41  ;;  %v16810_v38 = vld [vmem:[#allocation23_spill] sm:$0xff]  ;;  %v16811_v14 = vld [vmem:[#allocation32_spill] sm:$0xff] }
 0x11f   : > { %v866_v44 = vmul.f32 %v862_v22, %v16807_v41  ;;  %v867_v39 = vmul.f32 %v850_v20, %v16808_v32  ;;  %v870_v37 = vmul.f32 %v862_v22, %v16808_v32  ;;  %v906_v30 = vsel %vm16508_vm3, %v16809_v58, %v898_v8  ;;  %v16812_v15 = vld [vmem:[#allocation19_spill] sm:$0xff] }
 0x120   : > { %v809_v11 = vadd.f32 %v793_v31, %v761_v19  ;;  %v854_v55 = vrot.slane %v828_v29, %v11445_v10  ;;  %v858_v9 = vrot.slane %v829_v0, %v11445_v10  ;;  %v905_v28 = vsel %vm16508_vm3, %v898_v8, %v11977_v17 }
 0x121   : > { %v12060_v59 = vpop.permute.xlu1 %925  ;;  %v810_v26 = vadd.f32 %v794_v61, %v762_v25  ;;  %v811_v33 = vadd.f32 %v795_v48, %v763_v60  ;;  %v812_v6 = vadd.f32 %v796_v7, %v764_v57  ;;  %v813_v21 = vadd.f32 %v797_v46, %v765_v51  ;;  %v16814_v48 = vld [vmem:[#allocation25_spill] sm:$0xff] }
 0x122   : > { %v879_v19 = vadd.f32 %v863_v27, %v798_v13  ;;  %v875_v2 = vmul.f32 %v850_v20, %v16811_v14  ;;  %v878_v16 = vmul.f32 %v862_v22, %v16811_v14  ;;  %v908_v43 = vsel %vm11653_vm0, 0.0, %v906_v30  ;;  %v16813_v13 = vld [vmem:[#allocation35_spill] sm:$0xff] }
 0x123   : > { %v12087_v31 = vadd.f32 %v866_v44, %v801_v18  ;;  %v883_v8 = vadd.f32 %v867_v39, %v802_v52  ;;  %v12089_v29 = vadd.f32 %v870_v37, %v805_v50  ;;  %v909_v25 = vsel %vm16510_vm15, 0.0, %v905_v28  ;;  %vm16512_vm15 = vmor %vm11756_vm11, %vm12002_vm12 }
 0x124   : > { %v864_v60 = vmul.f32 %v854_v55, %v16807_v41  ;;  %v865_v57 = vmul.f32 %v858_v9, %v16807_v41  ;;  %v868_v51 = vmul.f32 %v854_v55, %v16808_v32  ;;  %v871_v61 = vmul.f32 %v850_v20, %v16813_v13 }
 0x125   : > { %v869_v18 = vmul.f32 %v858_v9, %v16808_v32  ;;  %v931_v52 = vrot.slane %v908_v43, %v11445_v10  ;;  %v904_v50 = vsel %vm16508_vm3, %v11977_v17, %v902_v42  ;;  %v907_v7 = vsel %vm16508_vm3, %v902_v42, %v16809_v58  ;;  %v16815_v42 = vld [vmem:[#allocation21_spill] sm:$0xff] }
 0x126   : > { %v12083_v4 = vpop.permute.xlu1 %1075  ;;  %v891_v46 = vadd.f32 %v875_v2, %v810_v26  ;;  %v872_v20 = vmul.f32 %v854_v55, %v16813_v13  ;;  %v873_v0 = vmul.f32 %v858_v9, %v16813_v13  ;;  %v935_v41 = vrot.slane %v909_v25, %v11445_v10  ;;  %v12127_v26 = vpop.permute.xlu0 %1079 }
 0x127   : > { %v894_v44 = vadd.f32 %v878_v16, %v813_v21  ;;  %v876_v32 = vmul.f32 %v854_v55, %v16811_v14  ;;  %v877_v39 = vmul.f32 %v858_v9, %v16811_v14  ;;  %v874_v37 = vmul.f32 %v862_v22, %v16813_v13  ;;  %v16816_v21 = vld [vmem:[#allocation34_spill] sm:$0xff] }
 0x128   : > { %v880_v17 = vadd.f32 %v864_v60, %v11989_v23  ;;  %v881_v30 = vadd.f32 %v865_v57, %v11998_v49  ;;  %v910_v58 = vsel %vm11675_vm5, 0.0, %v904_v50  ;;  %v911_v28 = vsel %vm16514_vm4, 0.0, %v907_v7 }
 0x129   : > { %v884_v55 = vadd.f32 %v868_v51, %v12007_v54  ;;  %v885_v9 = vadd.f32 %v869_v18, %v12009_v40  ;;  %v887_v22 = vadd.f32 %v871_v61, %v806_v5  ;;  %v944_v23 = vmul.f32 %v931_v52, %v16816_v21  ;;  %v16817_v5 = vld [vmem:[#allocation31_spill] sm:$0xff] }
 0x12a   : > { %v977_v27 = vpop.permute.xlu1 %976  ;;  %v888_v14 = vadd.f32 %v872_v20, %v807_v34  ;;  %v889_v49 = vadd.f32 %v873_v0, %v808_v35  ;;  %v945_v2 = vmul.f32 %v935_v41, %v16816_v21  ;;  %v952_v16 = vmul.f32 %v931_v52, %v12018_v12 }
 0x12b   : > { %v953_v25 = vmul.f32 %v935_v41, %v12018_v12  ;;  %v939_v60 = vrot.slane %v910_v58, %v11445_v10  ;;  %v943_v57 = vrot.slane %v911_v28, %v11445_v10  ;;  %v890_v40 = vadd.f32 %v874_v37, %v809_v11  ;;  %v1060_v37 = vpop.permute.xlu0 %1059 }
 0x12c   : > { %v948_v51 = vmul.f32 %v931_v52, %v16817_v5  ;;  %v892_v34 = vadd.f32 %v876_v32, %v811_v33  ;;  %vm16511_vm3 = vcmp.lt.s32.totalorder %v11635_v56, 111  ;;  %v949_v13 = vmul.f32 %v935_v41, %v16817_v5 }
 0x12d   : > { %v893_v61 = vadd.f32 %v877_v39, %v812_v6  ;;  %v960_v50 = vadd.f32 %v944_v23, %v879_v19  ;;  %v968_v7 = vadd.f32 %v952_v16, %v887_v22  ;;  %v956_v20 = vmul.f32 %v931_v52, %v12060_v59 }
 0x12e   : > { %v979_v43 = vpop.permute.xlu1 %978  ;;  %v957_v11 = vmul.f32 %v935_v41, %v12060_v59  ;;  %v961_v33 = vadd.f32 %v945_v2, %v880_v17  ;;  %v969_v32 = vadd.f32 %v953_v25, %v888_v14  ;;  %v946_v58 = vmul.f32 %v939_v60, %v16816_v21 }
 0x12f   : > { %v986_v54 = vsel %vm16509_vm2, %v979_v43, %v12050_v45  ;;  %v987_v35 = vsel %vm16509_vm2, %v977_v27, %v979_v43  ;;  %v947_v28 = vmul.f32 %v943_v57, %v16816_v21  ;;  %v958_v6 = vmul.f32 %v939_v60, %v12060_v59 }
 0x130   : > { %v990_v18 = vsel %vm12002_vm12, 0.0, %v986_v54  ;;  %v1012_v43 = vrot.slane %v987_v35, %v11445_v10  ;;  %v959_v39 = vmul.f32 %v943_v57, %v12060_v59  ;;  %v964_v22 = vadd.f32 %v948_v51, %v883_v8  ;;  %v16818_v51 = vld [vmem:[#allocation14_spill] sm:$0xff] }
 0x131   : > { %v1016_v19 = vrot.slane %v990_v18, %v11445_v10  ;;  %v950_v52 = vmul.f32 %v939_v60, %v16817_v5  ;;  %v951_v41 = vmul.f32 %v943_v57, %v16817_v5  ;;  %v954_v17 = vmul.f32 %v939_v60, %v12018_v12 }
 0x132   : > { %v983_v0 = vpop.permute.xlu1 %982  ;;  %v965_v23 = vadd.f32 %v949_v13, %v884_v55  ;;  %v955_v14 = vmul.f32 %v943_v57, %v12018_v12  ;;  %v972_v2 = vadd.f32 %v956_v20, %v891_v46  ;;  %v973_v21 = vadd.f32 %v957_v11, %v892_v34  ;;  %v1064_v57 = vpop.permute.xlu0 %1063 }
 0x133   : > { %v985_v16 = vsel %vm16509_vm2, %v12050_v45, %v983_v0  ;;  %v1033_v59 = vmul.f32 %v1012_v43, %v12085_v53  ;;  %v988_v8 = vsel %vm16509_vm2, %v983_v0, %v977_v27  ;;  %v962_v54 = vadd.f32 %v946_v58, %v881_v30  ;;  %vm16513_vm2 = vmor %vm11788_vm14, %vm12038_vm9 }
 0x134   : > { %v12166_v5 = vadd.f32 %v947_v28, %v12087_v31  ;;  %v974_v60 = vadd.f32 %v958_v6, %v893_v61  ;;  %v975_v55 = vadd.f32 %v959_v39, %v894_v44  ;;  %v1025_v12 = vmul.f32 %v1012_v43, %v16818_v51 }
 0x135   : > { %v1034_v46 = vmul.f32 %v1016_v19, %v12085_v53  ;;  %v1026_v34 = vmul.f32 %v1016_v19, %v16818_v51  ;;  %v1029_v45 = vmul.f32 %v1012_v43, %v11973_v1  ;;  %v1020_v35 = vrot.slane %v985_v16, %v11445_v10 }
 0x136   : > { %v1007_v25 = vpop.permute.xlu1 %1006  ;;  %v970_v31 = vadd.f32 %v954_v17, %v889_v49  ;;  %v992_v27 = vsel %vm12038_vm9, 0.0, %v988_v8  ;;  %v971_v30 = vadd.f32 %v955_v14, %v890_v40  ;;  %v12179_v13 = vadd.f32 %v950_v52, %v885_v9 }
 0x137   : > { %v12182_v61 = vadd.f32 %v951_v41, %v12089_v29  ;;  %v1030_v18 = vmul.f32 %v1016_v19, %v11973_v1  ;;  %v1049_v0 = vadd.f32 %v1033_v59, %v968_v7  ;;  %v1050_v29 = vadd.f32 %v1034_v46, %v969_v32 }
 0x138   : > { %v1041_v40 = vadd.f32 %v1025_v12, %v960_v50  ;;  %v1024_v58 = vrot.slane %v992_v27, %v11445_v10  ;;  %v1027_v28 = vmul.f32 %v1020_v35, %v16818_v51  ;;  %v1042_v7 = vadd.f32 %v1026_v34, %v961_v33 }
 0x139   : > { %v12202_v6 = vadd.f32 %v1029_v45, %v964_v22  ;;  %v1031_v39 = vmul.f32 %v1020_v35, %v11973_v1  ;;  %v1037_v52 = vmul.f32 %v1012_v43, %v1007_v25  ;;  %v1038_v41 = vmul.f32 %v1016_v19, %v1007_v25 }
 0x13a   : > { %v1058_v44 = vpop.permute.xlu1 %1057  ;;  %v1039_v17 = vmul.f32 %v1020_v35, %v1007_v25  ;;  %v1035_v33 = vmul.f32 %v1020_v35, %v12085_v53  ;;  %v1046_v22 = vadd.f32 %v1030_v18, %v965_v23  ;;  %v1036_v8 = vmul.f32 %v1024_v58, %v12085_v53  ;;  %v1088_v23 = vpop.permute.xlu0 %1087 }
 0x13b   : > { %v1068_v20 = vsel %vm16511_vm3, %v1058_v44, %v1060_v37  ;;  %v1069_v11 = vsel %vm16511_vm3, %v1064_v57, %v1058_v44  ;;  %v1040_v12 = vmul.f32 %v1024_v58, %v1007_v25  ;;  %v1032_v34 = vmul.f32 %v1024_v58, %v11973_v1 }
 0x13c   : > { %v1070_v49 = vsel %vm11742_vm10, 0.0, %v1068_v20  ;;  %v1073_v9 = vsel %vm16513_vm2, 0.0, %v1069_v11  ;;  %v1053_v45 = vadd.f32 %v1037_v52, %v972_v2  ;;  %v12228_v35 = vadd.f32 %v1038_v41, %v973_v21 }
 0x13d   : > { %v1093_v50 = vrot.slane %v1070_v49, %v11445_v10  ;;  %v1105_v32 = vrot.slane %v1073_v9, %v11445_v10  ;;  %v12230_v44 = vadd.f32 %v1039_v17, %v974_v60  ;;  %v1043_v18 = vadd.f32 %v1027_v28, %v962_v54 }
 0x13e   : > { %v1062_v14 = vpop.permute.xlu1 %1061  ;;  %v1056_v2 = vadd.f32 %v1040_v12, %v975_v55  ;;  %v1051_v60 = vadd.f32 %v1035_v33, %v970_v31  ;;  %v1052_v49 = vadd.f32 %v1036_v8, %v971_v30  ;;  %v1155_v55 = vpop.permute.xlu0 %1154 }
 0x13f   : > { %v1066_v16 = vsel %vm16511_vm3, %v1062_v14, %v1064_v57  ;;  %v1067_v59 = vsel %vm16511_vm3, %v1060_v37, %v1062_v14  ;;  %v1028_v57 = vmul.f32 %v1024_v58, %v16818_v51  ;;  %v1106_v53 = vmul.f32 %v1093_v50, %v12083_v4 }
 0x140   : > { %v1071_v43 = vsel %vm16512_vm15, 0.0, %v1067_v59  ;;  %v1072_v19 = vsel %vm11765_vm13, 0.0, %v1066_v16  ;;  %v1109_v25 = vmul.f32 %v1105_v32, %v12083_v4  ;;  %v1118_v9 = vmul.f32 %v1093_v50, %v1088_v23 }
 0x141   : > { %v12221_v46 = vrot.slane %v1071_v43, %v11445_v10  ;;  %v12224_v37 = vrot.slane %v1072_v19, %v11445_v10  ;;  %v1044_v54 = vadd.f32 %v1028_v57, %v12166_v5  ;;  %v1121_v52 = vmul.f32 %v1105_v32, %v1088_v23 }
 0x142   : > { %v1084_v27 = vpop.permute.xlu1 %1083  ;;  %v1122_v17 = vadd.f32 %v1106_v53, %v1041_v40  ;;  %v1110_v16 = vmul.f32 %v1093_v50, %v12127_v26  ;;  %v1047_v5 = vadd.f32 %v1031_v39, %v12179_v13  ;;  %v1134_v57 = vadd.f32 %v1118_v9, %v1053_v45 }
 0x143   : > { %v1114_v20 = vmul.f32 %v1093_v50, %v1084_v27  ;;  %v1115_v11 = vmul.f32 %v12221_v46, %v1084_v27  ;;  %v1107_v51 = vmul.f32 %v12221_v46, %v12083_v4  ;;  %v1108_v1 = vmul.f32 %v12224_v37, %v12083_v4 }
 0x144   : > { %v1116_v21 = vmul.f32 %v12224_v37, %v1084_v27  ;;  %v1117_v41 = vmul.f32 %v1105_v32, %v1084_v27  ;;  %v1125_v19 = vadd.f32 %v1109_v25, %v1044_v54  ;;  %v1111_v4 = vmul.f32 %v12221_v46, %v12127_v26 }
 0x145   : > { %v1123_v58 = vadd.f32 %v1107_v51, %v1042_v7  ;;  %v1124_v28 = vadd.f32 %v1108_v1, %v1043_v18  ;;  %v1130_v59 = vadd.f32 %v1114_v20, %v1049_v0  ;;  %v1131_v43 = vadd.f32 %v1115_v11, %v1050_v29 }
 0x146   : > { %v1132_v31 = vadd.f32 %v1116_v21, %v1051_v60  ;;  %v1048_v7 = vadd.f32 %v1032_v34, %v12182_v61  ;;  %v1112_v40 = vmul.f32 %v12224_v37, %v12127_v26  ;;  %v1113_v0 = vmul.f32 %v1105_v32, %v12127_v26  ;;  %v16819_v34 = vld [vmem:[#allocation33_spill] sm:$0xff] }
 0x147   : > { %v1145_v14 = vpop.permute.xlu1 %1144  ;;  %v1133_v29 = vadd.f32 %v1117_v41, %v1052_v49  ;;  %v1137_v27 = vadd.f32 %v1121_v52, %v1056_v2  ;;  %v12251_v18 = vadd.f32 %v1155_v55, %v1130_v59  ;;  %v12253_v53 = vadd.f32 %v1155_v55, %v1131_v43 }
 0x148   : > { %v1162_v30 = vadd.f32 %v1145_v14, %v1122_v17  ;;  %v1163_v33 = vadd.f32 %v1145_v14, %v1123_v58  ;;  %v12244_v8 = vadd.f32 %v1145_v14, %v1124_v28  ;;  %v1165_v50 = vadd.f32 %v1145_v14, %v1125_v19 }
 0x149   : > { %v1126_v25 = vadd.f32 %v1110_v16, %v12202_v6  ;;  %v1127_v20 = vadd.f32 %v1111_v4, %v1046_v22  ;;  %v12256_v13 = vadd.f32 %v1155_v55, %v1132_v31  ;;  %v1128_v61 = vadd.f32 %v1112_v40, %v1047_v5 }
 0x14a   : > { %vm1178_vm3 = vcmp.ge.f32.partialorder %v1162_v30, 0.0  ;;  %vm1179_vm15 = vcmp.ge.f32.partialorder %v1163_v33, 0.0  ;;  %v1129_v26 = vadd.f32 %v1113_v0, %v1048_v7  ;;  %v1195_v45 = vmul.f32 %v16819_v34, %v1162_v30 }
 0x14b   : > { %v1150_v12 = vpop.permute.xlu1 %1149  ;;  %v1196_v11 = vmul.f32 %v16819_v34, %v1163_v33  ;;  %v1197_v51 = vmul.f32 %v16819_v34, %v12244_v8  ;;  %v1119_v21 = vmul.f32 %v12221_v46, %v1088_v23  ;;  %v1120_v60 = vmul.f32 %v12224_v37, %v1088_v23 }
 0x14c   : > { %v1166_v39 = vadd.f32 %v1150_v12, %v1126_v25  ;;  %v1167_v32 = vadd.f32 %v1150_v12, %v1127_v20  ;;  %v1168_v6 = vadd.f32 %v1150_v12, %v1128_v61  ;;  %v1169_v22 = vadd.f32 %v1150_v12, %v1129_v26 }
 0x14d   : > { %v1198_v9 = vmul.f32 %v16819_v34, %v1165_v50  ;;  %v1135_v41 = vadd.f32 %v1119_v21, %v12228_v35  ;;  %v12276_v17 = vsel %vm1178_vm3, %v1162_v30, %v1195_v45  ;;  %v12279_v46 = vsel %vm1179_vm15, %v1163_v33, %v1196_v11 }
 0x14e   : > { %vm1182_vm12 = vcmp.ge.f32.partialorder %v1166_v39, 0.0  ;;  %vm1183_vm9 = vcmp.ge.f32.partialorder %v1167_v32, 0.0  ;;  %v1199_v1 = vmul.f32 %v16819_v34, %v1166_v39  ;;  %v1200_v2 = vmul.f32 %v16819_v34, %v1167_v32  ;;  %16822 = vst [vmem:[#allocation13_spill] sm:$0xff] %v12276_v17  ;;  %16823 = vst [vmem:[#allocation26_spill] sm:$0xff] %v12279_v46 }
 0x14f   : > { %v1160_v49 = vpop.permute.xlu1 %1159  ;;  %vm1184_vm4 = vcmp.ge.f32.partialorder %v1168_v6, 0.0  ;;  %v1201_v54 = vmul.f32 %v16819_v34, %v1168_v6  ;;  %v1202_v58 = vmul.f32 %v16819_v34, %v1169_v22  ;;  %vm1185_vm2 = vcmp.ge.f32.partialorder %v1169_v22, 0.0 }
 0x150   : > { %v12270_v28 = vsel %vm1182_vm12, %v1166_v39, %v1199_v1  ;;  %v12272_v52 = vsel %vm1183_vm9, %v1167_v32, %v1200_v2  ;;  %v1136_v37 = vadd.f32 %v1120_v60, %v12230_v44  ;;  %v1174_v23 = vadd.f32 %v1160_v49, %v1134_v57 }
 0x151   : > { %16820 = vst [vmem:[#allocation15_spill] sm:$0xff] %v12270_v28  ;;  %16821 = vst [vmem:[#allocation9_spill] sm:$0xff] %v12272_v52  ;;  %v12282_v14 = vsel %vm1184_vm4, %v1168_v6, %v1201_v54  ;;  %v1175_v16 = vadd.f32 %v1160_v49, %v1135_v41  ;;  %v12286_v59 = vpack.i.bf16 %v12272_v52, %v12279_v46  ;;  %vm16828_vm4 = vcmp.ge.f32.partialorder %v1165_v50, 0.0 }
 0x152   : > { %16824 = vst [vmem:[#allocation12_spill] sm:$0xff] %v12282_v14  ;;  %v12290_v43 = vpack.i.bf16 %v12270_v28, %v12276_v17  ;;  %v12292_v35 = vsel %vm1185_vm2, %v1169_v22, %v1202_v58  ;;  %v1176_v19 = vadd.f32 %v1160_v49, %v1136_v37  ;;  %v1177_v4 = vadd.f32 %v1160_v49, %v1137_v27 }
 0x153   : > { %16825 = vst [vmem:[#allocation10_spill] sm:$0xff] %v12292_v35  ;;  %v1207_v31 = vmul.f32 %v16819_v34, %v1174_v23  ;;  %v1173_v30 = vadd.f32 %v1155_v55, %v1133_v29  ;;  %vm1190_vm3 = vcmp.ge.f32.partialorder %v1174_v23, 0.0  ;;  %vm1191_vm9 = vcmp.ge.f32.partialorder %v1175_v16, 0.0  ;;  %9705 = vrot.lane.b32.xlu0 %v12286_v59, %s11330_s19 }
 0x154   : > { %v1208_v44 = vmul.f32 %v16819_v34, %v1175_v16  ;;  %9700 = vrot.lane.b32.xlu1 %v12290_v43, %s11330_s19  ;;  %v1203_v33 = vmul.f32 %v16819_v34, %v12251_v18  ;;  %v1204_v5 = vmul.f32 %v16819_v34, %v12253_v53  ;;  %vm16826_vm2 = vcmp.ge.f32.partialorder %v12244_v8, 0.0 }
 0x155   : > { %v12307_v55 = vsel %vm16826_vm2, %v12244_v8, %v1197_v51  ;;  %v12310_v7 = vsel %vm16828_vm4, %v1165_v50, %v1198_v9  ;;  %vm1186_vm12 = vcmp.ge.f32.partialorder %v12251_v18, 0.0  ;;  %vm1187_vm15 = vcmp.ge.f32.partialorder %v12253_v53, 0.0 }
 0x156   : > { %16827 = vst [vmem:[#allocation16_spill] sm:$0xff] %v12307_v55  ;;  %16829 = vst [vmem:[#allocation24_spill] sm:$0xff] %v12310_v7  ;;  %v12316_v40 = vpack.i.bf16 %v12292_v35, %v12310_v7  ;;  %v12320_v0 = vpack.i.bf16 %v12282_v14, %v12307_v55  ;;  %v1209_v29 = vmul.f32 %v16819_v34, %v1176_v19  ;;  %vm1192_vm2 = vcmp.ge.f32.partialorder %v1176_v19, 0.0 }
 0x157   : > { %v1210_v8 = vmul.f32 %v16819_v34, %v1177_v4  ;;  %v12324_v12 = vsel %vm1190_vm3, %v1174_v23, %v1207_v31  ;;  %v12326_v50 = vsel %vm1191_vm9, %v1175_v16, %v1208_v44  ;;  %vm1193_vm4 = vcmp.ge.f32.partialorder %v1177_v4, 0.0 }
 0x158   : > { %16830 = vst [vmem:[#allocation30_spill] sm:$0xff] %v12324_v12  ;;  %16831 = vst [vmem:[#allocation17_spill] sm:$0xff] %v12326_v50  ;;  %9715 = vrot.lane.b32.xlu0 %v12316_v40, %s11330_s19  ;;  %9710 = vrot.lane.b32.xlu1 %v12320_v0, %s11330_s19  ;;  %v1205_v57 = vmul.f32 %v16819_v34, %v12256_v13  ;;  %v1206_v27 = vmul.f32 %v16819_v34, %v1173_v30  ;;  %vm1188_vm3 = vcmp.ge.f32.partialorder %v12256_v13, 0.0  ;;  %v16842_v9 = vmov 0 }
 0x159   : > { %v12336_v25 = vsel %vm1186_vm12, %v12251_v18, %v1203_v33  ;;  %v12339_v20 = vsel %vm1187_vm15, %v12253_v53, %v1204_v5  ;;  %vm1189_vm9 = vcmp.ge.f32.partialorder %v1173_v30, 0.0  ;;  %v12350_v39 = vsel %vm1192_vm2, %v1176_v19, %v1209_v29  ;;  %vm7443_vm12 = vmneg %vm11683_vm7 }
 0x15a   : > { %16832 = vst [vmem:[#allocation29_spill] sm:$0xff] %v12336_v25  ;;  %16833 = vst [vmem:[#allocation18_spill] sm:$0xff] %v12339_v20  ;;  %v12344_v61 = vpack.i.bf16 %v12326_v50, %v12339_v20  ;;  %v12348_v26 = vpack.i.bf16 %v12324_v12, %v12336_v25  ;;  %v12352_v32 = vsel %vm1193_vm4, %v1177_v4, %v1210_v8  ;;  %vm16840_vm4 = vcmp.lt.s32.totalorder %v11635_v56, 17 }
 0x15b   : > { %16834 = vst [vmem:[#allocation27_spill] sm:$0xff] %v12350_v39  ;;  %16835 = vst [vmem:[#allocation28_spill] sm:$0xff] %v12352_v32  ;;  %v12359_v18 = vsel %vm1188_vm3, %v12256_v13, %v1205_v57  ;;  %v12361_v53 = vsel %vm1189_vm9, %v1173_v30, %v1206_v27  ;;  %v1228_v13 = vld [vmem:[%s16450_s3 + $0x8] sm:$0xff]  ;;  %v16848_v4 = vmov 0  ;;  %v16853_v5 = vmov 0 }
 0x15c   : > { %9725 = vrot.lane.b32.xlu0 %v12344_v61, %s11330_s19  ;;  %9720 = vrot.lane.b32.xlu1 %v12348_v26, %s11330_s19  ;;  %16836 = vst [vmem:[#allocation11_spill] sm:$0xff] %v12359_v18  ;;  %16837 = vst [vmem:[#allocation23_spill] sm:$0xff] %v12361_v53  ;;  %v12365_v34 = vpack.i.bf16 %v12352_v32, %v12361_v53  ;;  %v12369_v45 = vpack.i.bf16 %v12350_v39, %v12359_v18 }
 0x15d   : > { %2180 = vmatprep.mubr.f32.mxu0 %v1228_v13  ;;  %2358 = vmatprep.mubr.f32.mxu1 %v1228_v13  ;;  %vm16839_vm15 = vmor %vm11653_vm0, %vm11657_vm1 }
 0x15e   : > { %vm7445_vm2 = vmneg %vm16839_vm15 }
 0x15f   : > { %vm16841_vm3 = vmmov %vm16840_vm4 }
 0x160   : > { %9735 = vrot.lane.b32.xlu0 %v12365_v34, %s11330_s19  ;;  %9730 = vrot.lane.b32.xlu1 %v12369_v45, %s11330_s19  ;;  %vm12493_vm9 = vmpackc.low %vm7443_vm12, %vm7443_vm12 }
 0x161   : > { %v16843_v9 = vsel %vm12493_vm9, 4294967295, %v16842_v9  ;;  %vm7555_vm7 = vmneg %vm11701_vm8 }
 0x162   : > { %vm16845_vm15 = vmor %vm11675_vm5, %vm11679_vm6 }
 0x163   : > { %vm12512_vm12 = vmpackc.low %vm7445_vm2, %vm7445_vm2 }
 0x164   : > { %9745 = vrot.lane.b32.xlu0 %v12286_v59, %s11331_s20  ;;  %9740 = vrot.lane.b32.xlu1 %v12290_v43, %s11331_s20  ;;  %v16849_v4 = vsel %vm12512_vm12, 4294967295, %v16848_v4  ;;  %vm16851_vm8 = vmmov %vm16841_vm3 }
 0x165   : > { %vm16852_vm5 = vmmov %vm16841_vm3 }
 0x166   : > { %vm12526_vm0 = vmpackc.low %vm7555_vm7, %vm7555_vm7 }
 0x167   : > { %v16854_v5 = vsel %vm12526_vm0, 4294967295, %v16853_v5  ;;  %vm16855_vm2 = vmmov %vm16841_vm3 }
 0x168   : > { %9755 = vrot.lane.b32.xlu0 %v12316_v40, %s11331_s20  ;;  %9750 = vrot.lane.b32.xlu1 %v12320_v0, %s11331_s20  ;;  %vm16860_vm7 = vmmov %vm16855_vm2 }
 0x16c   : > { %9765 = vrot.lane.b32.xlu0 %v12344_v61, %s11331_s20  ;;  %9760 = vrot.lane.b32.xlu1 %v12348_v26, %s11331_s20 }
 0x170   : > { %9775 = vrot.lane.b32.xlu0 %v12365_v34, %s11331_s20  ;;  %9770 = vrot.lane.b32.xlu1 %v12369_v45, %s11331_s20 }
 0x174   : > { %9785 = vrot.lane.b32.xlu0 %v12286_v59, %s11332_s25  ;;  %9780 = vrot.lane.b32.xlu1 %v12290_v43, %s11332_s25 }
 0x178   : > { %9795 = vrot.lane.b32.xlu0 %v12316_v40, %s11332_s25  ;;  %9790 = vrot.lane.b32.xlu1 %v12320_v0, %s11332_s25 }
 0x17c   : > { %9805 = vrot.lane.b32.xlu0 %v12344_v61, %s11332_s25  ;;  %9800 = vrot.lane.b32.xlu1 %v12348_v26, %s11332_s25 }
 0x180   : > { %9815 = vrot.lane.b32.xlu0 %v12365_v34, %s11332_s25  ;;  %9810 = vrot.lane.b32.xlu1 %v12369_v45, %s11332_s25 }
 0x184   : > { %9825 = vrot.lane.b32.xlu0 %v12286_v59, %s11334_s27  ;;  %9820 = vrot.lane.b32.xlu1 %v12290_v43, %s11334_s27 }
 0x188   : > { %9835 = vrot.lane.b32.xlu0 %v12316_v40, %s11334_s27  ;;  %9830 = vrot.lane.b32.xlu1 %v12320_v0, %s11334_s27 }
 0x18c   : > { %9845 = vrot.lane.b32.xlu0 %v12344_v61, %s11334_s27  ;;  %9840 = vrot.lane.b32.xlu1 %v12348_v26, %s11334_s27 }
 0x190   : > { %9855 = vrot.lane.b32.xlu0 %v12365_v34, %s11334_s27  ;;  %9850 = vrot.lane.b32.xlu1 %v12369_v45, %s11334_s27 }
 0x194   : > { %9865 = vrot.lane.b32.xlu0 %v12286_v59, %s11337_s28  ;;  %9860 = vrot.lane.b32.xlu1 %v12290_v43, %s11337_s28 }
 0x198   : > { %9875 = vrot.lane.b32.xlu0 %v12316_v40, %s11337_s28  ;;  %9870 = vrot.lane.b32.xlu1 %v12320_v0, %s11337_s28 }
 0x19c   : > { %9885 = vrot.lane.b32.xlu0 %v12344_v61, %s11337_s28  ;;  %9880 = vrot.lane.b32.xlu1 %v12348_v26, %s11337_s28 }
 0x1a0   : > { %9895 = vrot.lane.b32.xlu0 %v12365_v34, %s11337_s28  ;;  %9890 = vrot.lane.b32.xlu1 %v12369_v45, %s11337_s28 }
 0x1a4   : > { %9905 = vrot.lane.b32.xlu0 %v12286_v59, %s11339_s29  ;;  %9900 = vrot.lane.b32.xlu1 %v12290_v43, %s11339_s29 }
 0x1a8   : > { %9915 = vrot.lane.b32.xlu0 %v12316_v40, %s11339_s29  ;;  %9910 = vrot.lane.b32.xlu1 %v12320_v0, %s11339_s29 }
 0x1ac   : > { %9925 = vrot.lane.b32.xlu0 %v12344_v61, %s11339_s29  ;;  %9920 = vrot.lane.b32.xlu1 %v12348_v26, %s11339_s29 }
 0x1b0   : > { %9935 = vrot.lane.b32.xlu0 %v12365_v34, %s11339_s29  ;;  %9930 = vrot.lane.b32.xlu1 %v12369_v45, %s11339_s29 }
 0x1b4   : > { %9945 = vrot.lane.b32.xlu0 %v12286_v59, %s11340_s30  ;;  %9940 = vrot.lane.b32.xlu1 %v12290_v43, %s11340_s30 }
 0x1b8   : > { %9955 = vrot.lane.b32.xlu0 %v12316_v40, %s11340_s30  ;;  %9950 = vrot.lane.b32.xlu1 %v12320_v0, %s11340_s30 }
 0x1bc   : > { %9965 = vrot.lane.b32.xlu0 %v12344_v61, %s11340_s30  ;;  %9960 = vrot.lane.b32.xlu1 %v12348_v26, %s11340_s30 }
 0x1c0   : > { %9975 = vrot.lane.b32.xlu0 %v12365_v34, %s11340_s30  ;;  %9970 = vrot.lane.b32.xlu1 %v12369_v45, %s11340_s30 }
 0x1c4   : > { %9985 = vrot.lane.b32.xlu0 %v12286_v59, %s11343_s5  ;;  %9980 = vrot.lane.b32.xlu1 %v12290_v43, %s11343_s5 }
 0x1c5   : > { %v9706_v11 = vpop.permute.xlu0 %9705 }
 0x1c6   : > { %v9701_v51 = vpop.permute.xlu1 %9700  ;;  %v9708_v6 = vunpack.i.h.bf16 %v9706_v11  ;;  %v9707_v22 = vunpack.i.l.bf16 %v9706_v11 }
 0x1c7   : > { %v9703_v1 = vunpack.i.h.bf16 %v9701_v51  ;;  %v9702_v2 = vunpack.i.l.bf16 %v9701_v51 }
 0x1c8   : > { %9995 = vrot.lane.b32.xlu0 %v12316_v40, %s11343_s5  ;;  %9990 = vrot.lane.b32.xlu1 %v12320_v0, %s11343_s5 }
 0x1c9   : > { %v1279_v60 = vsel %vm16840_vm4, %v9702_v2, %v9707_v22  ;;  %v1280_v49 = vsel %vm16841_vm3, %v9703_v1, %v9708_v6  ;;  %vm12504_vm4 = vmneg %vm16845_vm15 }
 0x1ca   : > { %v9716_v54 = vpop.permute.xlu0 %9715  ;;  %v9711_v58 = vpop.permute.xlu1 %9710  ;;  %v8563_v41 = vpack.c.bf16 %v1280_v49, %v1279_v60  ;;  %vm16850_vm15 = vmmov %vm16841_vm3 }
 0x1cb   : > { %v9718_v37 = vunpack.i.h.bf16 %v9716_v54  ;;  %v9717_v23 = vunpack.i.l.bf16 %v9716_v54  ;;  %v9713_v16 = vunpack.i.h.bf16 %v9711_v58  ;;  %v9712_v59 = vunpack.i.l.bf16 %v9711_v58 }
 0x1cc   : > { %10005 = vrot.lane.b32.xlu0 %v12344_v61, %s11343_s5  ;;  %10000 = vrot.lane.b32.xlu1 %v12348_v26, %s11343_s5  ;;  %v16857_v61 = vmov 0 }
 0x1cd   : > { %8565 = vmatprep.subr.msk.bf16.mxu0 %vm12493_vm9, %v8563_v41  ;;  %v1283_v31 = vsel %vm16841_vm3, %v9717_v23, %v9702_v2  ;;  %v1284_v30 = vsel %vm16850_vm15, %v9718_v37, %v9703_v1  ;;  %v1271_v44 = vsel %vm16851_vm8, %v9712_v59, %v9717_v23  ;;  %v1272_v33 = vsel %vm16852_vm5, %v9713_v16, %v9718_v37  ;;  %vm16856_vm3 = vmmov %vm16855_vm2 }
 0x1ce   : > { %v9726_v40 = vpop.permute.xlu0 %9725  ;;  %v9721_v0 = vpop.permute.xlu1 %9720  ;;  %v8566_v29 = vpack.c.bf16 %v1284_v30, %v1283_v31  ;;  %v8663_v8 = vpack.c.bf16 %v1272_v33, %v1271_v44  ;;  %v1275_v57 = vsel %vm16855_vm2, %v9707_v22, %v9712_v59  ;;  %v1276_v27 = vsel %vm16856_vm3, %v9708_v6, %v9713_v16  ;;  %vm12537_vm8 = vmpackc.low %vm12504_vm4, %vm12504_vm4 }
 0x1cf   : > { %v16858_v61 = vsel %vm12537_vm8, 4294967295, %v16857_v61  ;;  %v9728_v26 = vunpack.i.h.bf16 %v9726_v40  ;;  %v9727_v13 = vunpack.i.l.bf16 %v9726_v40  ;;  %v9723_v11 = vunpack.i.h.bf16 %v9721_v0  ;;  %vm16859_vm5 = vmmov %vm16855_vm2 }
 0x1d0   : > { %v9722_v51 = vunpack.i.l.bf16 %v9721_v0  ;;  %10015 = vrot.lane.b32.xlu0 %v12365_v34, %s11343_s5  ;;  %10010 = vrot.lane.b32.xlu1 %v12369_v45, %s11343_s5  ;;  %v8666_v22 = vpack.c.bf16 %v1276_v27, %v1275_v57  ;;  %vm16861_vm4 = vmmov %vm16855_vm2 }
 0x1d1   : > { %v1282_v6 = vsel %vm16859_vm5, %v9723_v11, %v9728_v26  ;;  %8568 = vmatpush1.bf16.msk.msra.mxu0 %vm12512_vm12, %v8566_v29  ;;  %8665 = vmatprep.subr.msk.bf16.mxu1 %vm12526_vm0, %v8663_v8  ;;  %vm16862_vm15 = vmmov %vm16855_vm2 }
 0x1d2   : > { %v1281_v1 = vsel %vm16860_vm7, %v9722_v51, %v9727_v13  ;;  %8668 = vmatpush1.bf16.msk.msra.mxu1 %vm12537_vm8, %v8666_v22  ;;  %v9736_v34 = vpop.permute.xlu0 %9735  ;;  %v9731_v2 = vpop.permute.xlu1 %9730  ;;  %vm16863_vm3 = vmmov %vm16855_vm2 }
 0x1d3   : > { %v8569_v60 = vpack.c.bf16 %v1282_v6, %v1281_v1  ;;  %v9738_v45 = vunpack.i.h.bf16 %v9736_v34  ;;  %v9737_v49 = vunpack.i.l.bf16 %v9736_v34  ;;  %v9733_v54 = vunpack.i.h.bf16 %v9731_v2  ;;  %vm16864_vm5 = vmmov %vm16855_vm2 }
 0x1d4   : > { %v9732_v58 = vunpack.i.l.bf16 %v9731_v2  ;;  %vm16865_vm7 = vmmov %vm16855_vm2  ;;  %v16868_v2 = vmov 0 }
 0x1d5   : > { %8571 = vmatprep.subr.msk.bf16.mxu0 %vm12493_vm9, %v8569_v60  ;;  %v1285_v41 = vsel %vm16861_vm4, %v9737_v49, %v9722_v51  ;;  %v1286_v37 = vsel %vm16862_vm15, %v9738_v45, %v9723_v11  ;;  %v1274_v23 = vsel %vm16855_vm2, %v9733_v54, %v9738_v45  ;;  %v1278_v16 = vsel %vm16863_vm3, %v9728_v26, %v9733_v54  ;;  %vm7459_vm4 = vmneg %vm11657_vm1 }
 0x1d6   : > { %v1273_v59 = vsel %vm16864_vm5, %v9732_v58, %v9737_v49  ;;  %v1277_v19 = vsel %vm16865_vm7, %v9727_v13, %v9732_v58  ;;  %v9746_v31 = vpop.permute.xlu0 %9745  ;;  %v9741_v30 = vpop.permute.xlu1 %9740  ;;  %v8572_v44 = vpack.c.bf16 %v1286_v37, %v1285_v41  ;;  %vm16866_vm15 = vcmp.lt.s32.totalorder %v11635_v56, 16  ;;  %vm12581_vm3 = vmpackc.low %vm7459_vm4, %vm7459_vm4 }
 0x1d7   : > { %v9748_v33 = vunpack.i.h.bf16 %v9746_v31  ;;  %v9747_v40 = vunpack.i.l.bf16 %v9746_v31  ;;  %v9743_v0 = vunpack.i.h.bf16 %v9741_v30  ;;  %v9742_v29 = vunpack.i.l.bf16 %v9741_v30  ;;  %vm16867_vm2 = vmmov %vm16866_vm15 }
 0x1d8   : > { %8574 = vmatpush1.bf16.msk.msra.mxu0 %vm12512_vm12, %v8572_v44  ;;  %v8669_v8 = vpack.c.bf16 %v1274_v23, %v1273_v59  ;;  %v8672_v57 = vpack.c.bf16 %v1278_v16, %v1277_v19  ;;  %v16869_v2 = vsel %vm12581_vm3, 4294967295, %v16868_v2  ;;  %vm7571_vm5 = vmneg %vm11679_vm6 }
 0x1d9   : > { %v1367_v27 = vsel %vm16866_vm15, %v9742_v29, %v9747_v40  ;;  %v1368_v26 = vsel %vm16867_vm2, %v9743_v0, %v9748_v33  ;;  %vm16870_vm7 = vmmov %vm16867_vm2 }
 0x1da   : > { %8671 = vmatprep.subr.msk.bf16.mxu1 %vm12526_vm0, %v8669_v8  ;;  %v9756_v13 = vpop.permute.xlu0 %9755  ;;  %v9751_v11 = vpop.permute.xlu1 %9750  ;;  %v8575_v51 = vpack.c.bf16 %v1368_v26, %v1367_v27  ;;  %vm16871_vm15 = vmmov %vm16867_vm2 }
 0x1db   : > { %8674 = vmatpush1.bf16.msk.msra.mxu1 %vm12537_vm8, %v8672_v57  ;;  %v9758_v22 = vunpack.i.h.bf16 %v9756_v13  ;;  %v9757_v6 = vunpack.i.l.bf16 %v9756_v13  ;;  %v9753_v1 = vunpack.i.h.bf16 %v9751_v11  ;;  %v9752_v34 = vunpack.i.l.bf16 %v9751_v11  ;;  %vm16872_vm8 = vmmov %vm16867_vm2 }
 0x1dc   : > { %8576 = vmatprep.subr.bf16.mxu0 %v8575_v51  ;;  %vm16873_vm4 = vmmov %vm16867_vm2 }
 0x1dd   : > { %v1371_v60 = vsel %vm16870_vm7, %v9757_v6, %v9742_v29  ;;  %v1372_v45 = vsel %vm16871_vm15, %v9758_v22, %v9743_v0  ;;  %v1364_v49 = vsel %vm16867_vm2, %v9748_v33, %v9753_v1  ;;  %v1363_v54 = vsel %vm16872_vm8, %v9747_v40, %v9752_v34  ;;  %vm16874_vm12 = vmmov %vm16867_vm2 }
 0x1de   : > { %v9766_v58 = vpop.permute.xlu0 %9765  ;;  %v9761_v41 = vpop.permute.xlu1 %9760  ;;  %v8577_v37 = vpack.c.bf16 %v1372_v45, %v1371_v60  ;;  %v1359_v23 = vsel %vm16873_vm4, %v9752_v34, %v9757_v6  ;;  %v1360_v16 = vsel %vm16874_vm12, %v9753_v1, %v9758_v22  ;;  %v8677_v59 = vpack.c.bf16 %v1364_v49, %v1363_v54  ;;  %vm12599_vm7 = vmpackc.low %vm7571_vm5, %vm7571_vm5 }
 0x1df   : > { %v9768_v19 = vunpack.i.h.bf16 %v9766_v58  ;;  %v9767_v31 = vunpack.i.l.bf16 %v9766_v58  ;;  %v9763_v30 = vunpack.i.h.bf16 %v9761_v41  ;;  %v9762_v44 = vunpack.i.l.bf16 %v9761_v41  ;;  %vm16877_vm8 = vmmov %vm16867_vm2 }
 0x1e0   : > { %v16875_v0 = vmov 0  ;;  %8579 = vmatpush1.bf16.msk.msra.mxu0 %vm12581_vm3, %v8577_v37  ;;  %v8675_v33 = vpack.c.bf16 %v1360_v16, %v1359_v23  ;;  %vm16878_vm15 = vmmov %vm16867_vm2 }
 0x1e1   : > { %v16876_v0 = vsel %vm12599_vm7, 4294967295, %v16875_v0  ;;  %v1369_v40 = vsel %vm16877_vm8, %v9762_v44, %v9767_v31  ;;  %v1370_v29 = vsel %vm16878_vm15, %v9763_v30, %v9768_v19  ;;  %vm16879_vm12 = vmmov %vm16867_vm2 }
 0x1e2   : > { %8676 = vmatprep.subr.bf16.mxu1 %v8675_v33  ;;  %v9776_v8 = vpop.permute.xlu0 %9775  ;;  %v9771_v57 = vpop.permute.xlu1 %9770  ;;  %v8580_v27 = vpack.c.bf16 %v1370_v29, %v1369_v40  ;;  %vm16880_vm5 = vmmov %vm16867_vm2  ;;  %v16889_v29 = vmov 0 }
 0x1e3   : > { %8679 = vmatpush1.bf16.msk.msra.mxu1 %vm12599_vm7, %v8677_v59  ;;  %v9778_v26 = vunpack.i.h.bf16 %v9776_v8  ;;  %v9777_v13 = vunpack.i.l.bf16 %v9776_v8  ;;  %v9773_v11 = vunpack.i.h.bf16 %v9771_v57  ;;  %v9772_v51 = vunpack.i.l.bf16 %v9771_v57  ;;  %vm16881_vm4 = vmmov %vm16867_vm2 }
 0x1e4   : > { %8581 = vmatprep.subr.bf16.mxu0 %v8580_v27  ;;  %vm7467_vm8 = vmneg %vm11756_vm11 }
 0x1e5   : > { %v1373_v22 = vsel %vm16879_vm12, %v9777_v13, %v9762_v44  ;;  %v1374_v6 = vsel %vm16880_vm5, %v9778_v26, %v9763_v30  ;;  %v1366_v1 = vsel %vm16867_vm2, %v9768_v19, %v9773_v11  ;;  %v1365_v34 = vsel %vm16881_vm4, %v9767_v31, %v9772_v51  ;;  %vm16882_vm15 = vmmov %vm16867_vm2 }
 0x1e6   : > { %v9786_v60 = vpop.permute.xlu0 %9785  ;;  %v9781_v45 = vpop.permute.xlu1 %9780  ;;  %v8582_v49 = vpack.c.bf16 %v1374_v6, %v1373_v22  ;;  %v1361_v54 = vsel %vm16882_vm15, %v9772_v51, %v9777_v13  ;;  %vm16883_vm12 = vmmov %vm16867_vm2  ;;  %v8682_v41 = vpack.c.bf16 %v1366_v1, %v1365_v34  ;;  %v16885_v31 = vmov 0 }
 0x1e7   : > { %v1362_v58 = vsel %vm16883_vm12, %v9773_v11, %v9778_v26  ;;  %v9788_v37 = vunpack.i.h.bf16 %v9786_v60  ;;  %v9787_v23 = vunpack.i.l.bf16 %v9786_v60  ;;  %v9783_v16 = vunpack.i.h.bf16 %v9781_v45  ;;  %vm16884_vm5 = vmor %vm11742_vm10, %vm11657_vm1 }
 0x1e8   : > { %v9782_v59 = vunpack.i.l.bf16 %v9781_v45  ;;  %vm7469_vm2 = vmneg %vm16884_vm5  ;;  %8584 = vmatpush1.bf16.msk.msra.mxu0 %vm12581_vm3, %v8582_v49  ;;  %v8680_v19 = vpack.c.bf16 %v1362_v58, %v1361_v54  ;;  %vm16887_vm15 = vcmp.lt.s32.totalorder %v11635_v56, 15  ;;  %v16897_v45 = vmov 0 }
 0x1e9   : > { %vm12632_vm4 = vmpackc.low %vm7467_vm8, %vm7467_vm8  ;;  %v1456_v30 = vsel %vm16887_vm15, %v9783_v16, %v9788_v37 }
 0x1ea   : > { %v16886_v31 = vsel %vm12632_vm4, 4294967295, %v16885_v31  ;;  %vm16888_vm12 = vmmov %vm16887_vm15  ;;  %8681 = vmatprep.subr.bf16.mxu1 %v8680_v19  ;;  %v9796_v33 = vpop.permute.xlu0 %9795  ;;  %v9791_v40 = vpop.permute.xlu1 %9790 }
 0x1eb   : > { %v1455_v44 = vsel %vm16888_vm12, %v9782_v59, %v9787_v23  ;;  %vm12640_vm1 = vmpackc.low %vm7469_vm2, %vm7469_vm2  ;;  %8684 = vmatpush1.bf16.msk.msra.mxu1 %vm12599_vm7, %v8682_v41  ;;  %v9798_v8 = vunpack.i.h.bf16 %v9796_v33  ;;  %v9797_v57 = vunpack.i.l.bf16 %v9796_v33  ;;  %v9793_v27 = vunpack.i.h.bf16 %v9791_v40 }
 0x1ec   : > { %v8585_v21 = vpack.c.bf16 %v1456_v30, %v1455_v44  ;;  %v16890_v29 = vsel %vm12640_vm1, 4294967295, %v16889_v29  ;;  %v9792_v26 = vunpack.i.l.bf16 %v9791_v40  ;;  %vm7579_vm8 = vmneg %vm11788_vm14 }
 0x1ed   : > { %vm16891_vm5 = vmor %vm11765_vm13, %vm11679_vm6  ;;  %v1460_v11 = vsel %vm16888_vm12, %v9798_v8, %v9783_v16  ;;  %v16899_v16 = vmov 0 }
 0x1ee   : > { %8587 = vmatprep.subr.msk.bf16.mxu0 %vm12632_vm4, %v8585_v21  ;;  %vm7581_vm2 = vmneg %vm16891_vm5  ;;  %v9806_v1 = vpop.permute.xlu0 %9805  ;;  %v9801_v34 = vpop.permute.xlu1 %9800 }
 0x1ef   : > { %vm16892_vm15 = vmmov %vm16888_vm12  ;;  %v9808_v49 = vunpack.i.h.bf16 %v9806_v1  ;;  %v9807_v54 = vunpack.i.l.bf16 %v9806_v1  ;;  %v9803_v58 = vunpack.i.h.bf16 %v9801_v34  ;;  %v9802_v41 = vunpack.i.l.bf16 %v9801_v34 }
 0x1f0   : > { %v1459_v13 = vsel %vm16892_vm15, %v9797_v57, %v9782_v59  ;;  %vm16893_vm7 = vmmov %vm16888_vm12 }
 0x1f1   : > { %v1448_v51 = vsel %vm16893_vm7, %v9793_v27, %v9798_v8  ;;  %vm16894_vm3 = vmmov %vm16893_vm7  ;;  %v8588_v60 = vpack.c.bf16 %v1460_v11, %v1459_v13 }
 0x1f2   : > { %v1452_v22 = vsel %vm16894_vm3, %v9788_v37, %v9793_v27  ;;  %vm16895_vm11 = vmmov %vm16894_vm3  ;;  %v9816_v30 = vpop.permute.xlu0 %9815  ;;  %v9811_v44 = vpop.permute.xlu1 %9810 }
 0x1f3   : > { %v1447_v6 = vsel %vm16895_vm11, %v9792_v26, %v9797_v57  ;;  %vm16896_vm14 = vmmov %vm16894_vm3  ;;  %8590 = vmatpush1.bf16.msk.msra.mxu0 %vm12640_vm1, %v8588_v60  ;;  %v9818_v40 = vunpack.i.h.bf16 %v9816_v30  ;;  %v9817_v21 = vunpack.i.l.bf16 %v9816_v30  ;;  %v9813_v8 = vunpack.i.h.bf16 %v9811_v44 }
 0x1f4   : > { %v1451_v43 = vsel %vm16896_vm14, %v9787_v23, %v9792_v26  ;;  %vm12667_vm6 = vmpackc.low %vm7579_vm8, %vm7579_vm8  ;;  %v8685_v37 = vpack.c.bf16 %v1448_v51, %v1447_v6  ;;  %v9812_v57 = vunpack.i.l.bf16 %v9811_v44 }
 0x1f5   : > { %v16898_v45 = vsel %vm12667_vm6, 4294967295, %v16897_v45  ;;  %vm12671_vm7 = vmpackc.low %vm7581_vm2, %vm7581_vm2  ;;  %v8688_v23 = vpack.c.bf16 %v1452_v22, %v1451_v43  ;;  %v1461_v27 = vsel %vm16894_vm3, %v9817_v21, %v9802_v41 }
 0x1f6   : > { %v16900_v16 = vsel %vm12671_vm7, 4294967295, %v16899_v16  ;;  %vm16901_vm11 = vmmov %vm16894_vm3  ;;  %8687 = vmatprep.subr.msk.bf16.mxu1 %vm12667_vm6, %v8685_v37  ;;  %v9826_v6 = vpop.permute.xlu0 %9825  ;;  %v9821_v43 = vpop.permute.xlu1 %9820 }
 0x1f7   : > { %v1458_v59 = vsel %vm16901_vm11, %v9803_v58, %v9808_v49  ;;  %vm16902_vm14 = vmmov %vm16894_vm3  ;;  %8690 = vmatpush1.bf16.msk.msra.mxu1 %vm12671_vm7, %v8688_v23  ;;  %v9828_v34 = vunpack.i.h.bf16 %v9826_v6  ;;  %v9827_v60 = vunpack.i.l.bf16 %v9826_v6  ;;  %v9822_v37 = vunpack.i.l.bf16 %v9821_v43 }
 0x1f8   : > { %v1457_v19 = vsel %vm16902_vm14, %v9802_v41, %v9807_v54  ;;  %vm16903_vm8 = vmmov %vm16894_vm3  ;;  %v9823_v41 = vunpack.i.h.bf16 %v9821_v43  ;;  %vm16908_vm11 = vnez %v16812_v15 }
 0x1f9   : > { %v8591_v33 = vpack.c.bf16 %v1458_v59, %v1457_v19  ;;  %v1462_v26 = vsel %vm16903_vm8, %v9818_v40, %v9803_v58  ;;  %vm16904_vm5 = vmmov %vm16894_vm3 }
 0x1fa   : > { %v1450_v13 = vsel %vm16904_vm5, %v9813_v8, %v9818_v40  ;;  %vm16905_vm2 = vmmov %vm16894_vm3  ;;  %v8594_v1 = vpack.c.bf16 %v1462_v26, %v1461_v27  ;;  %vm16909_vm3 = vcmp.lt.s32.totalorder %v11635_v56, 1  ;;  %v9836_v59 = vpop.permute.xlu0 %9835  ;;  %v9831_v19 = vpop.permute.xlu1 %9830 }
 0x1fb   : > { %8593 = vmatprep.subr.msk.bf16.mxu0 %vm12632_vm4, %v8591_v33  ;;  %v1454_v11 = vsel %vm16905_vm2, %v9808_v49, %v9813_v8  ;;  %vm16906_vm15 = vmmov %vm16905_vm2  ;;  %v1544_v49 = vsel %vm16909_vm3, %v9823_v41, %v9828_v34  ;;  %v9838_v44 = vunpack.i.h.bf16 %v9836_v59  ;;  %v9837_v33 = vunpack.i.l.bf16 %v9836_v59 }
 0x1fc   : > { %v1449_v51 = vsel %vm16906_vm15, %v9812_v57, %v9817_v21  ;;  %vm16907_vm12 = vmmov %vm16905_vm2  ;;  %8596 = vmatpush1.bf16.msk.msra.mxu0 %vm12640_vm1, %v8594_v1  ;;  %v9833_v40 = vunpack.i.h.bf16 %v9831_v19  ;;  %v9832_v15 = vunpack.i.l.bf16 %v9831_v19  ;;  %vm16913_vm2 = vnez %v16815_v42 }
 0x1fd   : > { %v1453_v22 = vsel %vm16907_vm12, %v9807_v54, %v9812_v57  ;;  %v8691_v58 = vpack.c.bf16 %v1450_v13, %v1449_v51  ;;  %vm7485_vm14 = vmneg %vm16908_vm11 }
 0x1fe   : > { %v8694_v23 = vpack.c.bf16 %v1454_v11, %v1453_v22  ;;  %vm16910_vm8 = vmmov %vm16909_vm3  ;;  %v1536_v27 = vsel %vm16909_vm3, %v9833_v40, %v9838_v44  ;;  %v9846_v42 = vpop.permute.xlu0 %9845  ;;  %v9841_v51 = vpop.permute.xlu1 %9840 }
 0x1ff   : > { %v1543_v54 = vsel %vm16910_vm8, %v9822_v37, %v9827_v60  ;;  %8693 = vmatprep.subr.msk.bf16.mxu1 %vm12667_vm6, %v8691_v58  ;;  %vm12711_vm5 = vmpackc.low %vm7485_vm14, %vm7485_vm14  ;;  %v9848_v6 = vunpack.i.h.bf16 %v9846_v42  ;;  %v9847_v43 = vunpack.i.l.bf16 %v9846_v42  ;;  %v9843_v1 = vunpack.i.h.bf16 %v9841_v51 }
 0x200   : > { %v8597_v30 = vpack.c.bf16 %v1544_v49, %v1543_v54  ;;  %8696 = vmatpush1.bf16.msk.msra.mxu1 %vm12671_vm7, %v8694_v23  ;;  %vm7597_vm15 = vmneg %vm16913_vm2 }
 0x201   : > { %vm16914_vm12 = vmmov %vm16909_vm3 }
 0x202   : > { %8599 = vmatprep.subr.msk.bf16.mxu0 %vm12493_vm9, %v8597_v30  ;;  %v1547_v8 = vsel %vm16914_vm12, %v9837_v33, %v9822_v37  ;;  %vm16915_vm11 = vmmov %vm16909_vm3  ;;  %v9842_v37 = vunpack.i.l.bf16 %v9841_v51  ;;  %v9856_v49 = vpop.permute.xlu0 %9855  ;;  %v9851_v54 = vpop.permute.xlu1 %9850  ;;  %v8609_v51 = vpack.c.bf16 %v12272_v52, %v12279_v46 }
 0x203   : > { %v1548_v57 = vsel %vm16915_vm11, %v9838_v44, %v9823_v41  ;;  %vm16916_vm14 = vmmov %vm16909_vm3  ;;  %v16919_v41 = vmov 0  ;;  %v9858_v19 = vunpack.i.h.bf16 %v9856_v49  ;;  %v9857_v30 = vunpack.i.l.bf16 %v9856_v49 }
 0x204   : > { %v1540_v26 = vsel %vm16916_vm14, %v9828_v34, %v9833_v40  ;;  %vm16917_vm8 = vmmov %vm16909_vm3  ;;  %v8600_v22 = vpack.c.bf16 %v1548_v57, %v1547_v8  ;;  %v9853_v44 = vunpack.i.h.bf16 %v9851_v54 }
 0x205   : > { %v1535_v13 = vsel %vm16917_vm8, %v9832_v15, %v9837_v33  ;;  %vm16918_vm7 = vmmov %vm16909_vm3  ;;  %v9852_v33 = vunpack.i.l.bf16 %v9851_v54 }
 0x206   : > { %v1539_v11 = vsel %vm16918_vm7, %v9827_v60, %v9832_v15  ;;  %vm12731_vm2 = vmpackc.low %vm7597_vm15, %vm7597_vm15  ;;  %8602 = vmatpush1.bf16.msk.msra.mxu0 %vm12711_vm5, %v8600_v22  ;;  %v8697_v34 = vpack.c.bf16 %v1536_v27, %v1535_v13  ;;  %v1538_v8 = vsel %vm16909_vm3, %v9853_v44, %v9858_v19  ;;  %v9866_v13 = vpop.permute.xlu0 %9865 }
 0x207   : > { %v16920_v41 = vsel %vm12731_vm2, 4294967295, %v16919_v41  ;;  %v8700_v58 = vpack.c.bf16 %v1540_v26, %v1539_v11  ;;  %vm16921_vm12 = vmmov %vm16909_vm3  ;;  %v9861_v11 = vpop.permute.xlu1 %9860 }
 0x208   : > { %v1546_v23 = vsel %vm16921_vm12, %v9843_v1, %v9848_v6  ;;  %vm16922_vm7 = vmmov %vm16909_vm3  ;;  %8699 = vmatprep.subr.msk.bf16.mxu1 %vm12526_vm0, %v8697_v34  ;;  %v9868_v34 = vunpack.i.h.bf16 %v9866_v13 }
 0x209   : > { %v1545_v60 = vsel %vm16922_vm7, %v9842_v37, %v9847_v43  ;;  %8702 = vmatpush1.bf16.msk.msra.mxu1 %vm12731_vm2, %v8700_v58  ;;  %vm16923_vm15 = vmmov %vm16909_vm3  ;;  %v9867_v58 = vunpack.i.l.bf16 %v9866_v13 }
 0x20a   : > { %v8603_v59 = vpack.c.bf16 %v1546_v23, %v1545_v60  ;;  %v1549_v40 = vsel %vm16923_vm15, %v9857_v30, %v9842_v37  ;;  %vm16924_vm11 = vmmov %vm16909_vm3  ;;  %v8611_v37 = vpack.c.bf16 %v12270_v28, %v12276_v17  ;;  %v9863_v23 = vunpack.i.h.bf16 %v9861_v11  ;;  %v9876_v49 = vpop.permute.xlu0 %9875 }
 0x20b   : > { %v1550_v15 = vsel %vm16924_vm11, %v9858_v19, %v9843_v1  ;;  %vm16925_vm14 = vmmov %vm16909_vm3  ;;  %v9862_v60 = vunpack.i.l.bf16 %v9861_v11  ;;  %v9871_v54 = vpop.permute.xlu1 %9870  ;;  %v9877_v19 = vunpack.i.l.bf16 %v9876_v49  ;;  %vm16928_vm15 = vcmp.lt.s32.totalorder %v11635_v56, 127 }
 0x20c   : > { %8605 = vmatprep.subr.msk.bf16.mxu0 %vm12493_vm9, %v8603_v59  ;;  %v1542_v57 = vsel %vm16925_vm14, %v9848_v6, %v9853_v44  ;;  %vm16926_vm8 = vmmov %vm16909_vm3  ;;  %v8606_v42 = vpack.c.bf16 %v1550_v15, %v1549_v40  ;;  %v8709_v6 = vpack.c.bf16 %v12292_v35, %v12310_v7  ;;  %v9878_v59 = vunpack.i.h.bf16 %v9876_v49 }
 0x20d   : > { %v1537_v27 = vsel %vm16926_vm8, %v9852_v33, %v9857_v30  ;;  %vm16927_vm12 = vmmov %vm16909_vm3  ;;  %v9873_v30 = vunpack.i.h.bf16 %v9871_v54  ;;  %v9872_v44 = vunpack.i.l.bf16 %v9871_v54  ;;  %v8711_v40 = vpack.c.bf16 %v12282_v14, %v12307_v55 }
 0x20e   : > { %v1541_v26 = vsel %vm16927_vm12, %v9847_v43, %v9852_v33  ;;  %8608 = vmatpush1.bf16.msk.msra.mxu0 %vm12711_vm5, %v8606_v42  ;;  %v8703_v22 = vpack.c.bf16 %v1538_v8, %v1537_v27  ;;  %v8613_v43 = vpack.c.bf16 %v12326_v50, %v12339_v20  ;;  %vm7501_vm7 = vmneg %vm11742_vm10  ;;  %v9886_v8 = vpop.permute.xlu0 %9885  ;;  %v8713_v27 = vpack.c.bf16 %v12352_v32, %v12361_v53 }
 0x20f   : > { %v8706_v1 = vpack.c.bf16 %v1542_v57, %v1541_v26  ;;  %8610 = vmatprep.subr.bf16.mxu0 %v8609_v51  ;;  %v1644_v33 = vsel %vm16928_vm15, %v9868_v34, %v9873_v30  ;;  %vm16929_vm11 = vmmov %vm16928_vm15  ;;  %v9881_v57 = vpop.permute.xlu1 %9880  ;;  %v8615_v26 = vpack.c.bf16 %v12324_v12, %v12336_v25  ;;  %v16934_v51 = vmov 0 }
 0x210   : > { %8705 = vmatprep.subr.msk.bf16.mxu1 %vm12526_vm0, %v8703_v22  ;;  %v1643_v15 = vsel %vm16929_vm11, %v9867_v58, %v9872_v44  ;;  %vm16930_vm10 = vmmov %vm16929_vm11  ;;  %v9888_v22 = vunpack.i.h.bf16 %v9886_v8 }
 0x211   : > { %8708 = vmatpush1.bf16.msk.msra.mxu1 %vm12731_vm2, %v8706_v1  ;;  %v1648_v24 = vsel %vm16930_vm10, %v9863_v23, %v9868_v34  ;;  %vm16931_vm3 = vmmov %vm16930_vm10  ;;  %v9883_v1 = vunpack.i.h.bf16 %v9881_v57  ;;  %v8715_v34 = vpack.c.bf16 %v12350_v39, %v12359_v18 }
 0x212   : > { %8710 = vmatprep.subr.bf16.mxu1 %v8709_v6  ;;  %8612 = vmatpush1.bf16.msra.mxu0 %v8611_v37  ;;  %v1647_v13 = vsel %vm16931_vm3, %v9862_v60, %v9867_v58  ;;  %vm16932_vm14 = vmmov %vm16931_vm3  ;;  %v8617_v6 = vpack.c.bf16 %v1644_v33, %v1643_v15  ;;  %v9887_v58 = vunpack.i.l.bf16 %v9886_v8 }
 0x213   : > { %8614 = vmatprep.subr.bf16.mxu0 %v8613_v43  ;;  %v1651_v11 = vsel %vm16932_vm14, %v9877_v19, %v9862_v60  ;;  %vm16933_vm8 = vmmov %vm16931_vm3  ;;  %v9896_v60 = vpop.permute.xlu0 %9895  ;;  %v9891_v49 = vpop.permute.xlu1 %9890  ;;  %v8620_v33 = vpack.c.bf16 %v1648_v24, %v1647_v13 }
 0x214   : > { %v1652_v42 = vsel %vm16933_vm8, %v9878_v59, %v9863_v23  ;;  %vm12793_vm12 = vmpackc.low %vm7501_vm7, %vm7501_vm7  ;;  %v9882_v23 = vunpack.i.l.bf16 %v9881_v57  ;;  %v9897_v15 = vunpack.i.l.bf16 %v9896_v60 }
 0x215   : > { %8712 = vmatpush1.bf16.msra.mxu1 %v8711_v40  ;;  %v16935_v51 = vsel %vm12793_vm12, 4294967295, %v16934_v51  ;;  %vm7613_vm15 = vmneg %vm11765_vm13  ;;  %v8717_v54 = vpack.c.bf16 %v1652_v42, %v1651_v11  ;;  %v9898_v40 = vunpack.i.h.bf16 %v9896_v60 }
 0x216   : > { %16936 = vst [vmem:[#allocation32_spill] sm:$0xff] %v16935_v51  ;;  %8714 = vmatprep.subr.bf16.mxu1 %v8713_v27  ;;  %8616 = vmatpush1.bf16.msra.mxu0 %v8615_v26  ;;  %vm16937_vm11 = vmmov %vm16931_vm3  ;;  %v9893_v27 = vunpack.i.h.bf16 %v9891_v49 }
 0x217   : > { %v1640_v37 = vsel %vm16937_vm11, %v9873_v30, %v9878_v59  ;;  %vm16938_vm10 = vmmov %vm16931_vm3  ;;  %8619 = vmatprep.subr.msk.bf16.mxu0 %vm12632_vm4, %v8617_v6  ;;  %v9892_v59 = vunpack.i.l.bf16 %v9891_v49  ;;  %v1650_v30 = vsel %vm16931_vm3, %v9883_v1, %v9888_v22  ;;  %v9906_v42 = vpop.permute.xlu0 %9905  ;;  %v9901_v6 = vpop.permute.xlu1 %9900 }
 0x218   : > { %v1639_v43 = vsel %vm16938_vm10, %v9872_v44, %v9877_v19  ;;  %vm12811_vm7 = vmpackc.low %vm7613_vm15, %vm7613_vm15  ;;  %v16939_v19 = vmov 0  ;;  %v9902_v60 = vunpack.i.l.bf16 %v9901_v6 }
 0x219   : > { %8716 = vmatpush1.bf16.msra.mxu1 %v8715_v34  ;;  %v16940_v19 = vsel %vm12811_vm7, 4294967295, %v16939_v19  ;;  %v8720_v44 = vpack.c.bf16 %v1640_v37, %v1639_v43  ;;  %vm16942_vm14 = vmmov %vm16931_vm3  ;;  %v1645_v11 = vsel %vm16931_vm3, %v9887_v58, %v9892_v59  ;;  %v9903_v43 = vunpack.i.h.bf16 %v9901_v6 }
 0x21a   : > { %16941 = vst [vmem:[#allocation19_spill] sm:$0xff] %v16940_v19  ;;  %8719 = vmatprep.subr.msk.bf16.mxu1 %vm12667_vm6, %v8717_v54  ;;  %8622 = vmatpush1.bf16.msk.msra.mxu0 %vm12793_vm12, %v8620_v33  ;;  %v1653_v8 = vsel %vm16942_vm14, %v9897_v15, %v9882_v23  ;;  %vm16943_vm13 = vmmov %vm16931_vm3  ;;  %vm16948_vm14 = vnez %v16814_v48 }
 0x21b   : > { %v1654_v62 = vsel %vm16943_vm13, %v9898_v40, %v9883_v1  ;;  %vm16944_vm8 = vmmov %vm16931_vm3  ;;  %v9908_v1 = vunpack.i.h.bf16 %v9906_v42  ;;  %vm16949_vm13 = vnez %v16806_v3  ;;  %v9916_v49 = vpop.permute.xlu0 %9915  ;;  %v9911_v54 = vpop.permute.xlu1 %9910 }
 0x21c   : > { %v1642_v57 = vsel %vm16944_vm8, %v9893_v27, %v9898_v40  ;;  %vm16945_vm15 = vmmov %vm16931_vm3  ;;  %v8723_v37 = vpack.c.bf16 %v1654_v62, %v1653_v8  ;;  %v9918_v33 = vunpack.i.h.bf16 %v9916_v49  ;;  %v9917_v40 = vunpack.i.l.bf16 %v9916_v49 }
 0x21d   : > { %v1646_v26 = vsel %vm16945_vm15, %v9888_v22, %v9893_v27  ;;  %vm16946_vm11 = vmmov %vm16931_vm3  ;;  %8722 = vmatpush1.bf16.msk.msra.mxu1 %vm12811_vm7, %v8720_v44  ;;  %v9913_v48 = vunpack.i.h.bf16 %v9911_v54 }
 0x21e   : > { %v1649_v24 = vsel %vm16946_vm11, %v9882_v23, %v9887_v58  ;;  %vm16947_vm10 = vmmov %vm16931_vm3  ;;  %v8623_v34 = vpack.c.bf16 %v1646_v26, %v1645_v11  ;;  %8725 = vmatprep.subr.msk.bf16.mxu1 %vm12667_vm6, %v8723_v37  ;;  %v9907_v58 = vunpack.i.l.bf16 %v9906_v42  ;;  %vm16951_vm11 = vnez %v16810_v38 }
 0x21f   : > { %v1641_v13 = vsel %vm16947_vm10, %v9892_v59, %v9897_v15  ;;  %v8626_v23 = vpack.c.bf16 %v1650_v30, %v1649_v24  ;;  %vm16950_vm8 = vmor %vm16948_vm14, %vm16949_vm13  ;;  %v9912_v15 = vunpack.i.l.bf16 %v9911_v54  ;;  %vm16952_vm10 = vnez %v16801_v63  ;;  %v9926_v24 = vpop.permute.xlu0 %9925 }
 0x220   : > { %v8726_v22 = vpack.c.bf16 %v1642_v57, %v1641_v13  ;;  %vm7627_vm15 = vmneg %vm16950_vm8  ;;  %8625 = vmatprep.subr.msk.bf16.mxu0 %vm12632_vm4, %v8623_v34  ;;  %vm16954_vm8 = vcmp.lt.s32.totalorder %v11635_v56, 113  ;;  %v16955_v59 = vmov 0  ;;  %v9921_v13 = vpop.permute.xlu1 %9920  ;;  %v16965_v42 = vmov 0 }
 0x221   : > { %8628 = vmatpush1.bf16.msk.msra.mxu0 %vm12793_vm12, %v8626_v23  ;;  %vm16953_vm3 = vmor %vm16951_vm11, %vm16952_vm10  ;;  %v1736_v27 = vsel %vm16954_vm8, %v9903_v43, %v9908_v1  ;;  %v9928_v6 = vunpack.i.h.bf16 %v9926_v24  ;;  %v9923_v37 = vunpack.i.h.bf16 %v9921_v13  ;;  %v9922_v23 = vunpack.i.l.bf16 %v9921_v13 }
 0x222   : > { %8728 = vmatpush1.bf16.msk.msra.mxu1 %vm12811_vm7, %v8726_v22  ;;  %vm7515_vm14 = vmneg %vm16953_vm3  ;;  %v9927_v22 = vunpack.i.l.bf16 %v9926_v24 }
 0x223   : > { %vm12857_vm1 = vmpackc.low %vm7627_vm15, %vm7627_vm15 }
 0x224   : > { %v16956_v59 = vsel %vm12857_vm1, 4294967295, %v16955_v59  ;;  %vm16958_vm6 = vmmov %vm16954_vm8 }
 0x225   : > { %16957 = vst [vmem:[#allocation35_spill] sm:$0xff] %v16956_v59  ;;  %v1739_v30 = vsel %vm16958_vm6, %v9917_v40, %v9902_v60  ;;  %vm16959_vm4 = vmmov %vm16958_vm6 }
 0x226   : > { %v1740_v44 = vsel %vm16959_vm4, %v9918_v33, %v9903_v43  ;;  %vm16960_vm0 = vmmov %vm16959_vm4 }
 0x227   : > { %v1728_v38 = vsel %vm16960_vm0, %v9913_v48, %v9918_v33  ;;  %vm16961_vm9 = vmmov %vm16960_vm0  ;;  %v8729_v11 = vpack.c.bf16 %v1740_v44, %v1739_v30 }
 0x228   : > { %v1732_v8 = vsel %vm16961_vm9, %v9908_v1, %v9913_v48  ;;  %vm16962_vm11 = vmmov %vm16960_vm0  ;;  %v1738_v48 = vsel %vm16960_vm0, %v9923_v37, %v9928_v6 }
 0x229   : > { %v1735_v62 = vsel %vm16962_vm11, %v9902_v60, %v9907_v58  ;;  %vm16963_vm15 = vmmov %vm16960_vm0  ;;  %8731 = vmatprep.subr.msk.bf16.mxu1 %vm12857_vm1, %v8729_v11  ;;  %v9931_v60 = vpop.permute.xlu1 %9930 }
 0x22a   : > { %v1727_v57 = vsel %vm16963_vm15, %v9912_v15, %v9917_v40  ;;  %vm16964_vm3 = vmmov %vm16960_vm0  ;;  %v8632_v34 = vpack.c.bf16 %v1736_v27, %v1735_v62  ;;  %v9933_v33 = vunpack.i.h.bf16 %v9931_v60  ;;  %v9932_v40 = vunpack.i.l.bf16 %v9931_v60 }
 0x22b   : > { %v1731_v26 = vsel %vm16964_vm3, %v9907_v58, %v9912_v15  ;;  %vm12875_vm6 = vmpackc.low %vm7515_vm14, %vm7515_vm14  ;;  %v8732_v1 = vpack.c.bf16 %v1728_v38, %v1727_v57  ;;  %v9936_v58 = vpop.permute.xlu0 %9935 }
 0x22c   : > { %v16966_v42 = vsel %vm12875_vm6, 4294967295, %v16965_v42  ;;  %v8629_v43 = vpack.c.bf16 %v1732_v8, %v1731_v26  ;;  %v9938_v49 = vunpack.i.h.bf16 %v9936_v58  ;;  %v9937_v54 = vunpack.i.l.bf16 %v9936_v58  ;;  %vm16968_vm9 = vmmov %vm16960_vm0 }
 0x22d   : > { %16967 = vst [vmem:[#allocation25_spill] sm:$0xff] %v16966_v42  ;;  %8734 = vmatpush1.bf16.msk.msra.mxu1 %vm12731_vm2, %v8732_v1  ;;  %vm16969_vm4 = vmmov %vm16960_vm0  ;;  %v9941_v26 = vpop.permute.xlu1 %9940 }
 0x22e   : > { %8631 = vmatprep.subr.msk.bf16.mxu0 %vm12875_vm6, %v8629_v43  ;;  %v1741_v15 = vsel %vm16968_vm9, %v9937_v54, %v9922_v23  ;;  %v1742_v27 = vsel %vm16969_vm4, %v9938_v49, %v9923_v37  ;;  %vm16970_vm14 = vmmov %vm16960_vm0  ;;  %v9943_v37 = vunpack.i.h.bf16 %v9941_v26  ;;  %v9942_v43 = vunpack.i.l.bf16 %v9941_v26 }
 0x22f   : > { %8634 = vmatpush1.bf16.msk.msra.mxu0 %vm12711_vm5, %v8632_v34  ;;  %v1730_v30 = vsel %vm16970_vm14, %v9933_v33, %v9938_v49  ;;  %vm16971_vm8 = vmmov %vm16960_vm0  ;;  %v9946_v57 = vpop.permute.xlu0 %9945  ;;  %v8735_v24 = vpack.c.bf16 %v1742_v27, %v1741_v15  ;;  %vm16978_vm14 = vcmp.lt.s32.totalorder %v11635_v56, 112  ;;  %v16980_v15 = vmov 0 }
 0x230   : > { %v1734_v44 = vsel %vm16971_vm8, %v9928_v6, %v9933_v33  ;;  %vm16972_vm11 = vmmov %vm16960_vm0  ;;  %v9948_v13 = vunpack.i.h.bf16 %v9946_v57  ;;  %v9947_v11 = vunpack.i.l.bf16 %v9946_v57  ;;  %v16975_v33 = vmov 0 }
 0x231   : > { %v1737_v38 = vsel %vm16972_vm11, %v9922_v23, %v9927_v22  ;;  %vm16973_vm15 = vmmov %vm16960_vm0  ;;  %8737 = vmatprep.subr.msk.bf16.mxu1 %vm12857_vm1, %v8735_v24  ;;  %v9951_v23 = vpop.permute.xlu1 %9950 }
 0x232   : > { %v1729_v8 = vsel %vm16973_vm15, %v9932_v40, %v9937_v54  ;;  %vm16974_vm3 = vmmov %vm16960_vm0  ;;  %v8638_v34 = vpack.c.bf16 %v1738_v48, %v1737_v38  ;;  %v9953_v49 = vunpack.i.h.bf16 %v9951_v23  ;;  %v9952_v54 = vunpack.i.l.bf16 %v9951_v23 }
 0x233   : > { %v1733_v62 = vsel %vm16974_vm3, %v9927_v22, %v9932_v40  ;;  %v8738_v6 = vpack.c.bf16 %v1730_v30, %v1729_v8  ;;  %vm7531_vm0 = vmneg %vm16952_vm10  ;;  %v9956_v22 = vpop.permute.xlu0 %9955  ;;  %v1823_v40 = vsel %vm16978_vm14, %v9942_v43, %v9947_v11 }
 0x234   : > { %v8635_v1 = vpack.c.bf16 %v1734_v44, %v1733_v62  ;;  %vm7643_vm9 = vmneg %vm16949_vm13  ;;  %v9958_v58 = vunpack.i.h.bf16 %v9956_v22  ;;  %v9957_v60 = vunpack.i.l.bf16 %v9956_v22 }
 0x235   : > { %8740 = vmatpush1.bf16.msk.msra.mxu1 %vm12731_vm2, %v8738_v6  ;;  %vm12915_vm4 = vmpackc.low %vm7531_vm0, %vm7531_vm0  ;;  %v9961_v62 = vpop.permute.xlu1 %9960 }
 0x236   : > { %8637 = vmatprep.subr.msk.bf16.mxu0 %vm12875_vm6, %v8635_v1  ;;  %v16976_v33 = vsel %vm12915_vm4, 4294967295, %v16975_v33  ;;  %vm16979_vm8 = vmmov %vm16978_vm14  ;;  %v9962_v22 = vunpack.i.l.bf16 %v9961_v62 }
 0x237   : > { %8640 = vmatpush1.bf16.msk.msra.mxu0 %vm12711_vm5, %v8638_v34  ;;  %16977 = vst [vmem:[#allocation21_spill] sm:$0xff] %v16976_v33  ;;  %v1824_v48 = vsel %vm16979_vm8, %v9943_v37, %v9948_v13  ;;  %vm12923_vm11 = vmpackc.low %vm7643_vm9, %vm7643_vm9  ;;  %v9966_v8 = vpop.permute.xlu0 %9965 }
 0x238   : > { %v16981_v15 = vsel %vm12923_vm11, 4294967295, %v16980_v15  ;;  %vm16983_vm15 = vmmov %vm16979_vm8  ;;  %v8644_v6 = vpack.c.bf16 %v1824_v48, %v1823_v40  ;;  %v9967_v34 = vunpack.i.l.bf16 %v9966_v8 }
 0x239   : > { %16982 = vst [vmem:[#allocation34_spill] sm:$0xff] %v16981_v15  ;;  %v1827_v27 = vsel %vm16983_vm15, %v9957_v60, %v9942_v43  ;;  %vm16984_vm3 = vmmov %vm16979_vm8  ;;  %v9968_v43 = vunpack.i.h.bf16 %v9966_v8  ;;  %v9971_v23 = vpop.permute.xlu1 %9970 }
 0x23a   : > { %v1828_v30 = vsel %vm16984_vm3, %v9958_v58, %v9943_v37  ;;  %vm16985_vm0 = vmmov %vm16984_vm3  ;;  %v9963_v37 = vunpack.i.h.bf16 %v9961_v62 }
 0x23b   : > { %v1820_v44 = vsel %vm16985_vm0, %v9948_v13, %v9953_v49  ;;  %vm16986_vm1 = vmmov %vm16985_vm0  ;;  %v8741_v26 = vpack.c.bf16 %v1828_v30, %v1827_v27  ;;  %v9973_v27 = vunpack.i.h.bf16 %v9971_v23 }
 0x23c   : > { %v1819_v38 = vsel %vm16986_vm1, %v9947_v11, %v9952_v54  ;;  %vm16987_vm9 = vmmov %vm16985_vm0  ;;  %v9976_v11 = vpop.permute.xlu0 %9975 }
 0x23d   : > { %v8641_v57 = vpack.c.bf16 %v1820_v44, %v1819_v38  ;;  %v1815_v24 = vsel %vm16987_vm9, %v9952_v54, %v9957_v60  ;;  %vm16988_vm14 = vmmov %vm16985_vm0  ;;  %8743 = vmatprep.subr.msk.bf16.mxu1 %vm12923_vm11, %v8741_v26  ;;  %v9978_v60 = vunpack.i.h.bf16 %v9976_v11  ;;  %v9977_v54 = vunpack.i.l.bf16 %v9976_v11  ;;  %v9981_v62 = vpop.permute.xlu1 %9980 }
 0x23e   : > { %v1816_v1 = vsel %vm16988_vm14, %v9953_v49, %v9958_v58  ;;  %v9972_v58 = vunpack.i.l.bf16 %v9971_v23  ;;  %vm16989_vm1 = vmmov %vm16985_vm0  ;;  %v1822_v44 = vsel %vm16985_vm0, %v9968_v43, %v9973_v27  ;;  %v9982_v11 = vunpack.i.l.bf16 %v9981_v62 }
 0x23f   : > { %8643 = vmatprep.subr.msk.bf16.mxu0 %vm12915_vm4, %v8641_v57  ;;  %v8744_v13 = vpack.c.bf16 %v1816_v1, %v1815_v24  ;;  %v1825_v49 = vsel %vm16989_vm1, %v9962_v22, %v9967_v34  ;;  %vm16990_vm8 = vmmov %vm16985_vm0 }
 0x240   : > { %8645 = vmatpush1.bf16.msra.mxu0 %v8644_v6  ;;  %v1826_v40 = vsel %vm16990_vm8, %v9963_v37, %v9968_v43  ;;  %vm16991_vm15 = vmmov %vm16985_vm0  ;;  %v9986_v8 = vpop.permute.xlu0 %9985  ;;  %vm16996_vm8 = vnez %v16777_v36 }
 0x241   : > { %8745 = vmatpush1.bf16.msra.mxu1 %v8744_v13  ;;  %v1829_v48 = vsel %vm16991_vm15, %v9977_v54, %v9962_v22  ;;  %vm16992_vm3 = vmmov %vm16985_vm0  ;;  %v9988_v6 = vunpack.i.h.bf16 %v9986_v8  ;;  %v8649_v22 = vpack.c.bf16 %v1826_v40, %v1825_v49  ;;  %v9987_v13 = vunpack.i.l.bf16 %v9986_v8  ;;  %v1231_v40 = vld [vmem:[%s16450_s3 + $0x20] sm:$0xff]  ;;  %v1230_v8 = vld [vmem:[%s16450_s3 + $0x18] sm:$0xff] }
 0x242   : > { %v1830_v30 = vsel %vm16992_vm3, %v9978_v60, %v9963_v37  ;;  %vm16993_vm9 = vmmov %vm16985_vm0  ;;  %v9983_v37 = vunpack.i.h.bf16 %v9981_v62 }
 0x243   : > { %v1821_v38 = vsel %vm16993_vm9, %v9967_v34, %v9972_v58  ;;  %v8746_v26 = vpack.c.bf16 %v1830_v30, %v1829_v48  ;;  %vm16994_vm14 = vmmov %vm16985_vm0  ;;  %v1227_v34 = vld [vmem:[%s16450_s3] sm:$0xff]  ;;  %v17004_v30 = vmov 0 }
 0x244   : > { %v8646_v57 = vpack.c.bf16 %v1822_v44, %v1821_v38  ;;  %v1817_v24 = vsel %vm16994_vm14, %v9972_v58, %v9977_v54  ;;  %vm16995_vm1 = vmmov %vm16985_vm0  ;;  %v9996_v23 = vpop.permute.xlu0 %9995  ;;  %vm16998_vm0 = vnez %v16771_v47 }
 0x245   : > { %v1818_v1 = vsel %vm16995_vm1, %v9973_v27, %v9978_v60  ;;  %8748 = vmatprep.subr.msk.bf16.mxu1 %vm12923_vm11, %v8746_v26  ;;  %vm16997_vm15 = vmor %vm16996_vm8, %vm16949_vm13  ;;  %v9991_v60 = vpop.permute.xlu1 %9990  ;;  %v9998_v54 = vunpack.i.h.bf16 %v9996_v23  ;;  %v9997_v27 = vunpack.i.l.bf16 %v9996_v23  ;;  %vm17002_vm13 = vcmp.lt.s32.totalorder %v11635_v56, 111 }
 0x246   : > { %8648 = vmatprep.subr.msk.bf16.mxu0 %vm12915_vm4, %v8646_v57  ;;  %v8749_v43 = vpack.c.bf16 %v1818_v1, %v1817_v24  ;;  %vm7651_vm3 = vmneg %vm16997_vm15  ;;  %v9993_v58 = vunpack.i.h.bf16 %v9991_v60  ;;  %v9992_v49 = vunpack.i.l.bf16 %v9991_v60  ;;  %v1912_v3 = vsel %vm17002_vm13, %v9983_v37, %v9988_v6 }
 0x247   : > { %8650 = vmatpush1.bf16.msra.mxu0 %v8649_v22  ;;  %vm16999_vm9 = vmor %vm16998_vm0, %vm16952_vm10  ;;  %v17013_v22 = vmov 0 }
 0x248   : > { %8750 = vmatpush1.bf16.msra.mxu1 %v8749_v43  ;;  %vm12979_vm14 = vmneg %vm16999_vm9  ;;  %v10006_v26 = vpop.permute.xlu0 %10005 }
 0x249   : > { %vm17003_vm1 = vmmov %vm17002_vm13  ;;  %v10001_v24 = vpop.permute.xlu1 %10000  ;;  %v10007_v43 = vunpack.i.l.bf16 %v10006_v26 }
 0x24a   : > { %v1911_v48 = vsel %vm17003_vm1, %v9982_v11, %v9987_v13  ;;  %2181 = vmatmul.mubr.f32.vlgmr.msra.gmra.mrb[0].mxu0 %v1227_v34  ;;  %vm12987_vm8 = vmpackc.low %vm7651_vm3, %vm7651_vm3 }
 0x24b   : > { %v17005_v30 = vsel %vm12987_vm8, 4294967295, %v17004_v30  ;;  %vm17007_vm15 = vmmov %vm17003_vm1  ;;  %2359 = vmatmul.mubr.f32.vlgmr.msra.gmra.mrb[0].mxu1 %v1227_v34  ;;  %2186 = vmatprep.mubr.f32.mxu0 %v1231_v40  ;;  %v10002_v34 = vunpack.i.l.bf16 %v10001_v24  ;;  %v8654_v60 = vpack.c.bf16 %v1912_v3, %v1911_v48  ;;  %v1237_v3 = vld [vmem:[%s16450_s3 + $0x50] sm:$0xff] }
 0x24c   : > { %17006 = vst [vmem:[#allocation31_spill] sm:$0xff] %v17005_v30  ;;  %v1915_v47 = vsel %vm17007_vm15, %v9997_v27, %v9982_v11  ;;  %vm17008_vm10 = vmmov %vm17003_vm1  ;;  %2364 = vmatprep.mubr.f32.mxu1 %v1231_v40  ;;  %v10008_v11 = vunpack.i.h.bf16 %v10006_v26 }
 0x24d   : > { %v1916_v63 = vsel %vm17008_vm10, %v9998_v54, %v9983_v37  ;;  %vm17009_vm0 = vmmov %vm17003_vm1 }
 0x24e   : > { %v1904_v44 = vsel %vm17009_vm0, %v9993_v58, %v9998_v54  ;;  %vm17010_vm9 = vmmov %vm17009_vm0  ;;  %v8751_v1 = vpack.c.bf16 %v1916_v63, %v1915_v47  ;;  %2187 = vmatmul.mubr.f32.gmra.mrb[2].mxu0 %v1230_v8  ;;  %v1233_v54 = vld [vmem:[%s16450_s3 + $0x30] sm:$0xff] }
 0x24f   : > { %v1908_v38 = vsel %vm17010_vm9, %v9988_v6, %v9993_v58  ;;  %vm17011_vm3 = vmmov %vm17009_vm0  ;;  %v1234_v6 = vld [vmem:[%s16450_s3 + $0x38] sm:$0xff]  ;;  %2365 = vmatmul.mubr.f32.gmra.mrb[2].mxu1 %v1230_v8  ;;  %v10011_v58 = vpop.permute.xlu1 %10010 }
 0x250   : > { %v1903_v62 = vsel %vm17011_vm3, %v9992_v49, %v9997_v27  ;;  %vm17012_vm13 = vmmov %vm17009_vm0  ;;  %8753 = vmatprep.subr.msk.bf16.mxu1 %vm12987_vm8, %v8751_v1  ;;  %2192 = vmatprep.mubr.f32.mxu0 %v1234_v6  ;;  %v10016_v27 = vpop.permute.xlu0 %10015  ;;  %v10013_v36 = vunpack.i.h.bf16 %v10011_v58  ;;  %v10012_v63 = vunpack.i.l.bf16 %v10011_v58 }
 0x251   : > { %v1907_v57 = vsel %vm17012_vm13, %v9987_v13, %v9992_v49  ;;  %vm13012_vm1 = vmpackc.low %vm12979_vm14, %vm12979_vm14  ;;  %v8754_v37 = vpack.c.bf16 %v1904_v44, %v1903_v62  ;;  %v10003_v13 = vunpack.i.h.bf16 %v10001_v24  ;;  %v10018_v49 = vunpack.i.h.bf16 %v10016_v27  ;;  %2370 = vmatprep.mubr.f32.mxu1 %v1234_v6 }
 0x252   : > { %v17014_v22 = vsel %vm13012_vm1, 4294967295, %v17013_v22  ;;  %v8651_v23 = vpack.c.bf16 %v1908_v38, %v1907_v57  ;;  %v10017_v40 = vunpack.i.l.bf16 %v10016_v27  ;;  %vm17016_vm14 = vmmov %vm17009_vm0  ;;  %2193 = vmatmul.mubr.f32.gmra.mrb[4].mxu0 %v1233_v54  ;;  %v1236_v57 = vld [vmem:[%s16450_s3 + $0x48] sm:$0xff] }
 0x253   : > { %17015 = vst [vmem:[#allocation14_spill] sm:$0xff] %v17014_v22  ;;  %8756 = vmatpush1.bf16.msk.msra.mxu1 %vm12811_vm7, %v8754_v37  ;;  %v1914_v48 = vsel %vm17016_vm14, %v10003_v13, %v10008_v11  ;;  %vm17017_vm15 = vmmov %vm17009_vm0  ;;  %v1918_v38 = vsel %vm17009_vm0, %v10018_v49, %v10003_v13  ;;  %2198 = vmatprep.mubr.f32.mxu0 %v1237_v3 }
 0x254   : > { %8653 = vmatprep.subr.msk.bf16.mxu0 %vm13012_vm1, %v8651_v23  ;;  %v1913_v47 = vsel %vm17017_vm15, %v10002_v34, %v10007_v43  ;;  %vm17018_vm10 = vmmov %vm17009_vm0  ;;  %2371 = vmatmul.mubr.f32.gmra.mrb[4].mxu1 %v1233_v54  ;;  %vm16547_vm15 = vcmask 261120   ;;  %v1235_v23 = vld [vmem:[%s16450_s3 + $0x40] sm:$0xff] }
 0x255   : > { %8656 = vmatpush1.bf16.msk.msra.mxu0 %vm12793_vm12, %v8654_v60  ;;  %v1917_v44 = vsel %vm17018_vm10, %v10017_v40, %v10002_v34  ;;  %vm17019_vm9 = vmmov %vm17009_vm0  ;;  %2376 = vmatprep.mubr.f32.mxu1 %v1237_v3  ;;  %v8660_v13 = vpack.c.bf16 %v1914_v48, %v1913_v47  ;;  %v1232_v34 = vld [vmem:[%s16450_s3 + $0x28] sm:$0xff]  ;;  %v1238_v60 = vld [vmem:[%s16450_s3 + $0x58] sm:$0xff] }
 0x256   : > { %v1906_v8 = vsel %vm17019_vm9, %v10013_v36, %v10018_v49  ;;  %vm17020_vm3 = vmmov %vm17009_vm0  ;;  %v8757_v1 = vpack.c.bf16 %v1918_v38, %v1917_v44  ;;  %2199 = vmatmul.mubr.f32.gmra.mrb[6].mxu0 %v1236_v57 }
 0x257   : > { %v1910_v62 = vsel %vm17020_vm3, %v10008_v11, %v10013_v36  ;;  %vm17021_vm13 = vmmov %vm17009_vm0  ;;  %v1229_v11 = vld [vmem:[%s16450_s3 + $0x10] sm:$0xff] }
 0x258   : > { %v1905_v26 = vsel %vm17021_vm13, %v10012_v63, %v10017_v40  ;;  %vm17022_vm14 = vmmov %vm17009_vm0  ;;  %8759 = vmatprep.subr.msk.bf16.mxu1 %vm12987_vm8, %v8757_v1  ;;  %2377 = vmatmul.mubr.f32.gmra.mrb[6].mxu1 %v1236_v57 }
 0x259   : > { %v1909_v24 = vsel %vm17022_vm14, %v10007_v43, %v10012_v63  ;;  %v8760_v6 = vpack.c.bf16 %v1906_v8, %v1905_v26  ;;  %v16548_v43 = vmov 0.0  }
 0x25a   : > { %v8657_v37 = vpack.c.bf16 %v1910_v62, %v1909_v24  ;;  %2269 = vmatprep.mubr.f32.mxu0 %v16548_v43  ;;  %2447 = vmatprep.mubr.f32.mxu1 %v16548_v43 }
 0x25b   : > { %8762 = vmatpush1.bf16.msk.msra.mxu1 %vm12811_vm7, %v8760_v6 }
 0x25c   : > { %8659 = vmatprep.subr.msk.bf16.mxu0 %vm13012_vm1, %v8657_v37 }
 0x25d   : > { %8662 = vmatpush1.bf16.msk.msra.mxu0 %vm12793_vm12, %v8660_v13 }
 0x25e   : > { %7375 = vmatmul.mubr.msk.f32.vlgmr.msra.gmra.mrb[0].mxu1 %vm16547_vm15, %v1229_v11 }
 0x25f   : > { %2453 = vmatprep.mubr.f32.mxu1 %v16548_v43 }
 0x260   : > { %7371 = vmatmul.mubr.msk.f32.vlgmr.msra.gmra.mrb[0].mxu0 %vm16547_vm15, %v1229_v11 }
 0x261   : > { %2275 = vmatprep.mubr.f32.mxu0 %v16548_v43 }
 0x262   : > { %7376 = vmatmul.mubr.msk.f32.gmra.mrb[2].mxu1 %vm16547_vm15, %v1232_v34 }
 0x263   : > { %2459 = vmatprep.mubr.f32.mxu1 %v16548_v43 }
 0x264   : > { %7372 = vmatmul.mubr.msk.f32.gmra.mrb[2].mxu0 %vm16547_vm15, %v1232_v34 }
 0x265   : > { %2281 = vmatprep.mubr.f32.mxu0 %v16548_v43 }
 0x266   : > { %7377 = vmatmul.mubr.msk.f32.gmra.mrb[4].mxu1 %vm16547_vm15, %v1235_v23 }
 0x267   : > { %2465 = vmatprep.mubr.f32.mxu1 %v16548_v43 }
 0x268   : > { %7373 = vmatmul.mubr.msk.f32.gmra.mrb[4].mxu0 %vm16547_vm15, %v1235_v23 }
 0x269   : > { %2287 = vmatprep.mubr.f32.mxu0 %v16548_v43 }
 0x26a   : > { %7378 = vmatmul.mubr.msk.f32.gmra.mrb[6].mxu1 %vm16547_vm15, %v1238_v60 }
 0x26c   : > { %7374 = vmatmul.mubr.msk.f32.gmra.mrb[6].mxu0 %vm16547_vm15, %v1238_v60 }
 0x331   : > { %v2449_v27 = vpop.f32.mrb[0].mxu1 }
 0x332   : > { %v2490_v49 = vmul.f32 0.2, %v2449_v27  ;;  %vm2474_vm0 = vcmp.ge.f32.partialorder %v2449_v27, 0.0  ;;  %v2451_v36 = vpop.f32.mrb[1].mxu1 }
 0x333   : > { %v2271_v54 = vpop.f32.mrb[0].mxu0  ;;  %vm2475_vm3 = vcmp.ge.f32.partialorder %v2451_v36, 0.0  ;;  %v2491_v47 = vmul.f32 0.2, %v2451_v36 }
 0x334   : > { %vm2472_vm10 = vcmp.ge.f32.partialorder %v2271_v54, 0.0  ;;  %v2488_v58 = vmul.f32 0.2, %v2271_v54  ;;  %v2273_v40 = vpop.f32.mrb[1].mxu0  ;;  %v13087_v38 = vsel %vm2474_vm0, %v2449_v27, %v2490_v49 }
 0x335   : > { %vm2473_vm9 = vcmp.ge.f32.partialorder %v2273_v40, 0.0  ;;  %v2489_v3 = vmul.f32 0.2, %v2273_v40  ;;  %v2455_v44 = vpop.f32.mrb[2].mxu1  ;;  %17024 = vst [vmem:[#allocation20_spill] sm:$0xff] %v13087_v38  ;;  %v13091_v6 = vsel %vm2475_vm3, %v2451_v36, %v2491_v47 }
 0x336   : > { %v13085_v48 = vsel %vm2472_vm10, %v2271_v54, %v2488_v58  ;;  %vm2478_vm14 = vcmp.ge.f32.partialorder %v2455_v44, 0.0  ;;  %v2457_v57 = vpop.f32.mrb[3].mxu1  ;;  %v2494_v24 = vmul.f32 0.2, %v2455_v44  ;;  %17025 = vst [vmem:[#allocation22_spill] sm:$0xff] %v13091_v6 }
 0x337   : > { %17023 = vst [vmem:[#allocation33_spill] sm:$0xff] %v13085_v48  ;;  %v2277_v63 = vpop.f32.mrb[2].mxu0  ;;  %v13089_v26 = vsel %vm2473_vm9, %v2273_v40, %v2489_v3  ;;  %vm2479_vm10 = vcmp.ge.f32.partialorder %v2457_v57, 0.0  ;;  %v2495_v13 = vmul.f32 0.2, %v2457_v57 }
 0x338   : > { %vm2476_vm13 = vcmp.ge.f32.partialorder %v2277_v63, 0.0  ;;  %v2492_v8 = vmul.f32 0.2, %v2277_v63  ;;  %v2279_v62 = vpop.f32.mrb[3].mxu0  ;;  %v13095_v11 = vsel %vm2478_vm14, %v2455_v44, %v2494_v24 }
 0x339   : > { %vm2477_vm15 = vcmp.ge.f32.partialorder %v2279_v62, 0.0  ;;  %v2493_v1 = vmul.f32 0.2, %v2279_v62  ;;  %17027 = vst [vmem:[#allocation37_spill] sm:$0xff] %v13095_v11  ;;  %v2461_v60 = vpop.f32.mrb[4].mxu1  ;;  %v13103_v27 = vsel %vm2479_vm10, %v2457_v57, %v2495_v13 }
 0x33a   : > { %v13093_v37 = vsel %vm2476_vm13, %v2277_v63, %v2492_v8  ;;  %vm2482_vm9 = vcmp.ge.f32.partialorder %v2461_v60, 0.0  ;;  %v2463_v40 = vpop.f32.mrb[5].mxu1  ;;  %v2498_v36 = vmul.f32 0.2, %v2461_v60  ;;  %v13115_v8 = vpack.i.bf16 %v13095_v11, %v13087_v38 }
 0x33b   : > { %17026 = vst [vmem:[#allocation36_spill] sm:$0xff] %v13093_v37  ;;  %v13097_v34 = vsel %vm2477_vm15, %v2279_v62, %v2493_v1  ;;  %v2283_v23 = vpop.f32.mrb[4].mxu0  ;;  %v13101_v54 = vpack.i.bf16 %v13093_v37, %v13085_v48  ;;  %vm2483_vm13 = vcmp.ge.f32.partialorder %v2463_v40, 0.0  ;;  %v2499_v63 = vmul.f32 0.2, %v2463_v40 }
 0x33c   : > { %vm2480_vm0 = vcmp.ge.f32.partialorder %v2283_v23, 0.0  ;;  %v2496_v58 = vmul.f32 0.2, %v2283_v23  ;;  %v2285_v49 = vpop.f32.mrb[5].mxu0  ;;  %v13111_v44 = vpack.i.bf16 %v13097_v34, %v13089_v26  ;;  %v13117_v62 = vsel %vm2482_vm9, %v2461_v60, %v2498_v36 }
 0x33d   : > { %vm2481_vm3 = vcmp.ge.f32.partialorder %v2285_v49, 0.0  ;;  %v2497_v3 = vmul.f32 0.2, %v2285_v49  ;;  %10020 = vrot.lane.b32.xlu1 %v13101_v54, %s11330_s19  ;;  %17029 = vst [vmem:[#allocation39_spill] sm:$0xff] %v13117_v62  ;;  %v2467_v1 = vpop.f32.mrb[6].mxu1  ;;  %v13123_v13 = vpack.i.bf16 %v13103_v27, %v13091_v6  ;;  %vm17036_vm9 = vcmp.lt.s32.totalorder %v11635_v56, 17 }
 0x33e   : > { %v13107_v47 = vsel %vm2480_vm0, %v2283_v23, %v2496_v58  ;;  %v13125_v23 = vsel %vm2483_vm13, %v2463_v40, %v2499_v63  ;;  %10080 = vrot.lane.b32.xlu0 %v13111_v44, %s11330_s19  ;;  %vm2486_vm14 = vcmp.ge.f32.partialorder %v2467_v1, 0.0  ;;  %v2469_v10 = vpop.f32.mrb[7].mxu1  ;;  %v2502_v60 = vmul.f32 0.2, %v2467_v1 }
 0x33f   : > { %17028 = vst [vmem:[#allocation38_spill] sm:$0xff] %v13107_v47  ;;  %v13119_v57 = vsel %vm2481_vm3, %v2285_v49, %v2497_v3  ;;  %v2289_v24 = vpop.f32.mrb[6].mxu0  ;;  %17031 = vst [vmem:[#allocation41_spill] sm:$0xff] %v13125_v23  ;;  %vm2487_vm0 = vcmp.ge.f32.partialorder %v2469_v10, 0.0  ;;  %v2503_v3 = vmul.f32 0.2, %v2469_v10 }
 0x340   : > { %17030 = vst [vmem:[#allocation40_spill] sm:$0xff] %v13119_v57  ;;  %vm2484_vm15 = vcmp.ge.f32.partialorder %v2289_v24, 0.0  ;;  %v2500_v58 = vmul.f32 0.2, %v2289_v24  ;;  %v2291_v43 = vpop.f32.mrb[7].mxu0  ;;  %v13133_v40 = vsel %vm2486_vm14, %v2467_v1, %v2502_v60  ;;  %v7380_v1 = vld [vmem:[%s16450_s3 + $0x68] sm:$0xff]  ;;  %vm17037_vm3 = vmmov %vm17036_vm9  ;;  %vm17040_vm14 = vnez %v16843_v9 }
 0x341   : > { %vm2485_vm10 = vcmp.ge.f32.partialorder %v2291_v43, 0.0  ;;  %v2501_v49 = vmul.f32 0.2, %v2291_v43  ;;  %10025 = vrot.lane.b32.xlu1 %v13115_v8, %s11330_s19  ;;  %17033 = vst [vmem:[#allocation43_spill] sm:$0xff] %v13133_v40  ;;  %v13137_v53 = vsel %vm2487_vm0, %v2469_v10, %v2503_v3  ;;  %v13155_v10 = vpack.i.bf16 %v13133_v40, %v13117_v62  ;;  %3409 = vmatprep.mubr.f32.mxu0 %v7380_v1  ;;  %vm17038_vm13 = vmmov %vm17037_vm3 }
 0x342   : > { %v13131_v36 = vsel %vm2484_vm15, %v2289_v24, %v2500_v58  ;;  %17035 = vst [vmem:[#allocation45_spill] sm:$0xff] %v13137_v53  ;;  %10085 = vrot.lane.b32.xlu0 %v13123_v13, %s11330_s19  ;;  %3587 = vmatprep.mubr.f32.mxu1 %v7380_v1  ;;  %vm17039_vm15 = vmmov %vm17037_vm3 }
 0x343   : > { %17032 = vst [vmem:[#allocation42_spill] sm:$0xff] %v13131_v36  ;;  %v13135_v63 = vsel %vm2485_vm10, %v2291_v43, %v2501_v49  ;;  %v13145_v18 = vpack.i.bf16 %v13131_v36, %v13107_v47  ;;  %v13159_v43 = vpack.i.bf16 %v13137_v53, %v13125_v23  ;;  %vm17041_vm10 = vmmov %vm17037_vm3 }
 0x344   : > { %17034 = vst [vmem:[#allocation44_spill] sm:$0xff] %v13135_v63  ;;  %v13151_v24 = vpack.i.bf16 %v13135_v63, %v13119_v57  ;;  %vm17042_vm0 = vmmov %vm17037_vm3 }
 0x345   : > { %10030 = vrot.lane.b32.xlu1 %v13101_v54, %s11331_s20 }
 0x346   : > { %10090 = vrot.lane.b32.xlu0 %v13111_v44, %s11331_s20 }
 0x349   : > { %10035 = vrot.lane.b32.xlu1 %v13115_v8, %s11331_s20 }
 0x34a   : > { %10095 = vrot.lane.b32.xlu0 %v13123_v13, %s11331_s20 }
 0x34d   : > { %10040 = vrot.lane.b32.xlu1 %v13101_v54, %s11332_s25 }
 0x34e   : > { %10100 = vrot.lane.b32.xlu0 %v13111_v44, %s11332_s25 }
 0x351   : > { %10045 = vrot.lane.b32.xlu1 %v13115_v8, %s11332_s25 }
 0x352   : > { %10105 = vrot.lane.b32.xlu0 %v13123_v13, %s11332_s25 }
 0x355   : > { %10050 = vrot.lane.b32.xlu1 %v13101_v54, %s11334_s27 }
 0x356   : > { %10110 = vrot.lane.b32.xlu0 %v13111_v44, %s11334_s27 }
 0x359   : > { %10055 = vrot.lane.b32.xlu1 %v13115_v8, %s11334_s27 }
 0x35a   : > { %10115 = vrot.lane.b32.xlu0 %v13123_v13, %s11334_s27 }
 0x35d   : > { %10060 = vrot.lane.b32.xlu1 %v13101_v54, %s11337_s28 }
 0x35e   : > { %10120 = vrot.lane.b32.xlu0 %v13111_v44, %s11337_s28 }
 0x361   : > { %10065 = vrot.lane.b32.xlu1 %v13115_v8, %s11337_s28 }
 0x362   : > { %10125 = vrot.lane.b32.xlu0 %v13123_v13, %s11337_s28 }
 0x365   : > { %10070 = vrot.lane.b32.xlu1 %v13101_v54, %s11339_s29 }
 0x366   : > { %10130 = vrot.lane.b32.xlu0 %v13111_v44, %s11339_s29 }
 0x369   : > { %10075 = vrot.lane.b32.xlu1 %v13115_v8, %s11339_s29 }
 0x36a   : > { %10135 = vrot.lane.b32.xlu0 %v13123_v13, %s11339_s29 }
 0x36d   : > { %10140 = vrot.lane.b32.xlu1 %v13145_v18, %s11330_s19 }
 0x36e   : > { %10205 = vrot.lane.b32.xlu0 %v13151_v24, %s11330_s19 }
 0x371   : > { %10145 = vrot.lane.b32.xlu1 %v13155_v10, %s11330_s19 }
 0x372   : > { %10210 = vrot.lane.b32.xlu0 %v13159_v43, %s11330_s19 }
 0x375   : > { %10150 = vrot.lane.b32.xlu1 %v13145_v18, %s11331_s20 }
 0x376   : > { %10215 = vrot.lane.b32.xlu0 %v13151_v24, %s11331_s20 }
 0x379   : > { %10155 = vrot.lane.b32.xlu1 %v13155_v10, %s11331_s20 }
 0x37a   : > { %10220 = vrot.lane.b32.xlu0 %v13159_v43, %s11331_s20 }
 0x37d   : > { %10160 = vrot.lane.b32.xlu1 %v13145_v18, %s11332_s25 }
 0x37e   : > { %10225 = vrot.lane.b32.xlu0 %v13151_v24, %s11332_s25 }
 0x381   : > { %10165 = vrot.lane.b32.xlu1 %v13155_v10, %s11332_s25 }
 0x382   : > { %10230 = vrot.lane.b32.xlu0 %v13159_v43, %s11332_s25 }
 0x385   : > { %10170 = vrot.lane.b32.xlu1 %v13145_v18, %s11334_s27 }
 0x386   : > { %10235 = vrot.lane.b32.xlu0 %v13151_v24, %s11334_s27 }
 0x389   : > { %10175 = vrot.lane.b32.xlu1 %v13155_v10, %s11334_s27 }
 0x38a   : > { %10240 = vrot.lane.b32.xlu0 %v13159_v43, %s11334_s27 }
 0x38d   : > { %10180 = vrot.lane.b32.xlu1 %v13101_v54, %s11340_s30 }
 0x38e   : > { %10245 = vrot.lane.b32.xlu0 %v13111_v44, %s11340_s30 }
 0x391   : > { %10185 = vrot.lane.b32.xlu1 %v13145_v18, %s11337_s28 }
 0x392   : > { %10255 = vrot.lane.b32.xlu0 %v13123_v13, %s11340_s30 }
 0x395   : > { %10190 = vrot.lane.b32.xlu1 %v13155_v10, %s11337_s28 }
 0x396   : > { %10275 = vrot.lane.b32.xlu0 %v13151_v24, %s11337_s28 }
 0x399   : > { %10195 = vrot.lane.b32.xlu1 %v13145_v18, %s11339_s29 }
 0x39a   : > { %10280 = vrot.lane.b32.xlu0 %v13159_v43, %s11337_s28 }
 0x39d   : > { %10200 = vrot.lane.b32.xlu1 %v13155_v10, %s11339_s29 }
 0x39e   : > { %10285 = vrot.lane.b32.xlu0 %v13151_v24, %s11339_s29 }
 0x3a1   : > { %10250 = vrot.lane.b32.xlu1 %v13115_v8, %s11340_s30 }
 0x3a2   : > { %10290 = vrot.lane.b32.xlu0 %v13159_v43, %s11339_s29 }
 0x3a5   : > { %10260 = vrot.lane.b32.xlu1 %v13145_v18, %s11340_s30 }
 0x3a6   : > { %10295 = vrot.lane.b32.xlu0 %v13151_v24, %s11340_s30 }
 0x3a9   : > { %10265 = vrot.lane.b32.xlu1 %v13155_v10, %s11340_s30 }
 0x3aa   : > { %10300 = vrot.lane.b32.xlu0 %v13159_v43, %s11340_s30 }
 0x3ad   : > { %10270 = vrot.lane.b32.xlu1 %v13101_v54, %s11343_s5 }
 0x3ae   : > { %10305 = vrot.lane.b32.xlu0 %v13111_v44, %s11343_s5 }
 0x3af   : > { %v10021_v39 = vpop.permute.xlu1 %10020 }
 0x3b0   : > { %v10023_v32 = vunpack.i.h.bf16 %v10021_v39  ;;  %v10022_v3 = vunpack.i.l.bf16 %v10021_v39  ;;  %v10081_v1 = vpop.permute.xlu0 %10080 }
 0x3b1   : > { %10310 = vrot.lane.b32.xlu1 %v13115_v8, %s11343_s5  ;;  %v10083_v49 = vunpack.i.h.bf16 %v10081_v1  ;;  %v10082_v60 = vunpack.i.l.bf16 %v10081_v1 }
 0x3b2   : > { %10315 = vrot.lane.b32.xlu0 %v13123_v13, %s11343_s5 }
 0x3b3   : > { %v10026_v58 = vpop.permute.xlu1 %10025  ;;  %v2574_v54 = vsel %vm17036_vm9, %v10023_v32, %v10083_v49  ;;  %v2573_v44 = vsel %vm17037_vm3, %v10022_v3, %v10082_v60  ;;  %vm17043_vm9 = vmmov %vm17042_vm0 }
 0x3b4   : > { %v10028_v20 = vunpack.i.h.bf16 %v10026_v58  ;;  %v10027_v25 = vunpack.i.l.bf16 %v10026_v58  ;;  %v10086_v39 = vpop.permute.xlu0 %10085  ;;  %v8763_v8 = vpack.c.bf16 %v2574_v54, %v2573_v44  ;;  %vm17044_vm3 = vmmov %vm17042_vm0 }
 0x3b5   : > { %10320 = vrot.lane.b32.xlu1 %v13145_v18, %s11343_s5  ;;  %v10088_v50 = vunpack.i.h.bf16 %v10086_v39  ;;  %v10087_v12 = vunpack.i.l.bf16 %v10086_v39 }
 0x3b6   : > { %v2569_v7 = vsel %vm17038_vm13, %v10082_v60, %v10027_v25  ;;  %v2570_v13 = vsel %vm17039_vm15, %v10083_v49, %v10028_v20  ;;  %8765 = vmatprep.subr.msk.bf16.mxu0 %vm17040_vm14, %v8763_v8  ;;  %10330 = vrot.lane.b32.xlu0 %v13151_v24, %s11343_s5  ;;  %vm17045_vm13 = vnez %v16849_v4  ;;  %vm17046_vm15 = vnez %v16854_v5 }
 0x3b7   : > { %v10031_v1 = vpop.permute.xlu1 %10030  ;;  %v2566_v18 = vsel %vm17041_vm10, %v10028_v20, %v10088_v50  ;;  %v2578_v58 = vsel %vm17042_vm0, %v10088_v50, %v10023_v32  ;;  %v2565_v54 = vsel %vm17043_vm9, %v10027_v25, %v10087_v12  ;;  %v2577_v60 = vsel %vm17044_vm3, %v10087_v12, %v10022_v3 }
 0x3b8   : > { %v8766_v49 = vpack.c.bf16 %v2578_v58, %v2577_v60  ;;  %v10091_v44 = vpop.permute.xlu0 %10090  ;;  %v8863_v39 = vpack.c.bf16 %v2566_v18, %v2565_v54  ;;  %v8866_v8 = vpack.c.bf16 %v2570_v13, %v2569_v7  ;;  %vm17047_vm10 = vnez %v16858_v61 }
 0x3b9   : > { %10325 = vrot.lane.b32.xlu1 %v13155_v10, %s11343_s5  ;;  %v10093_v35 = vunpack.i.h.bf16 %v10091_v44  ;;  %v10092_v14 = vunpack.i.l.bf16 %v10091_v44  ;;  %vm17049_vm0 = vcmp.lt.s32.totalorder %v11635_v56, 16 }
 0x3ba   : > { %8768 = vmatpush1.bf16.msk.msra.mxu0 %vm17045_vm13, %v8766_v49  ;;  %8865 = vmatprep.subr.msk.bf16.mxu1 %vm17046_vm15, %v8863_v39  ;;  %v10033_v39 = vunpack.i.h.bf16 %v10031_v1  ;;  %vm17050_vm9 = vmmov %vm17049_vm0 }
 0x3bb   : > { %v10036_v24 = vpop.permute.xlu1 %10035  ;;  %10335 = vrot.lane.b32.xlu0 %v13159_v43, %s11343_s5  ;;  %8868 = vmatpush1.bf16.msk.msra.mxu1 %vm17047_vm10, %v8866_v8  ;;  %v10032_v8 = vunpack.i.l.bf16 %v10031_v1  ;;  %vm17051_vm3 = vmmov %vm17049_vm0 }
 0x3bc   : > { %v10096_v12 = vpop.permute.xlu0 %10095  ;;  %v10038_v52 = vunpack.i.h.bf16 %v10036_v24  ;;  %v10037_v46 = vunpack.i.l.bf16 %v10036_v24  ;;  %vm17052_vm8 = vmmov %vm17049_vm0 }
 0x3bd   : > { %v10098_v28 = vunpack.i.h.bf16 %v10096_v12  ;;  %v10097_v17 = vunpack.i.l.bf16 %v10096_v12  ;;  %v2653_v1 = vsel %vm17051_vm3, %v10032_v8, %v10092_v14  ;;  %v2654_v44 = vsel %vm17052_vm8, %v10033_v39, %v10093_v35  ;;  %vm17053_vm1 = vmmov %vm17049_vm0 }
 0x3be   : > { %v13352_v15 = vsel %vm17049_vm0, %v10092_v14, %v10037_v46  ;;  %v13356_v33 = vsel %vm17050_vm9, %v10093_v35, %v10038_v52  ;;  %v8775_v53 = vpack.c.bf16 %v2654_v44, %v2653_v1  ;;  %vm17054_vm8 = vcmp.lt.s32.totalorder %v11635_v56, 17  ;;  %vm17056_vm9 = vmmov %vm17049_vm0 }
 0x3bf   : > { %v13320_v50 = vpop.permute.xlu1 %10040  ;;  %v13366_v19 = vsel %vm17053_vm1, %v10098_v28, %v10033_v39  ;;  %v13370_v51 = vsel %vm17049_vm0, %v10097_v17, %v10032_v8  ;;  %vm17055_vm1 = vmmov %vm17054_vm8  ;;  %v2645_v38 = vsel %vm17056_vm9, %v10037_v46, %v10097_v17 }
 0x3c0   : > { %v10101_v25 = vpop.permute.xlu0 %10100  ;;  %vm17057_vm3 = vmmov %vm17049_vm0  ;;  %vm17059_vm0 = vcmp.lt.s32.totalorder %v11635_v56, 15  ;;  %v17060_v44 = vunpack.i.l.bf16 %v13320_v50 }
 0x3c1   : > { %v10103_v62 = vunpack.i.h.bf16 %v10101_v25  ;;  %v10102_v40 = vunpack.i.l.bf16 %v10101_v25  ;;  %vm17063_vm9 = vmmov %vm17059_vm0 }
 0x3c3   : > { %v13322_v20 = vpop.permute.xlu1 %10045 }
 0x3c4   : > { %v13324_v7 = vpop.permute.xlu0 %10105  ;;  %v10048_v47 = vunpack.i.h.bf16 %v13322_v20  ;;  %v10047_v35 = vunpack.i.l.bf16 %v13322_v20  ;;  %v2646_v20 = vsel %vm17057_vm3, %v10038_v52, %v10098_v28  ;;  %vm17064_vm3 = vcmp.lt.s32.totalorder %v11635_v56, 17 }
 0x3c5   : > { %v10108_v57 = vunpack.i.h.bf16 %v13324_v7  ;;  %v8875_v6 = vpack.c.bf16 %v2646_v20, %v2645_v38  ;;  %v17073_v20 = vunpack.i.h.bf16 %v13320_v50 }
 0x3c6   : > { %v13404_v52 = vsel %vm17063_vm9, %v10103_v62, %v10048_v47 }
 0x3c7   : > { %v13326_v32 = vpop.permute.xlu1 %10050 }
 0x3c8   : > { %v13328_v10 = vpop.permute.xlu0 %10110 }
 0x3cb   : > { %v13330_v3 = vpop.permute.xlu1 %10055 }
 0x3cc   : > { %v13332_v13 = vpop.permute.xlu0 %10115 }
 0x3cf   : > { %v13334_v43 = vpop.permute.xlu1 %10060 }
 0x3d0   : > { %v13336_v18 = vpop.permute.xlu0 %10120 }
 0x3d3   : > { %v13338_v58 = vpop.permute.xlu1 %10065 }
 0x3d4   : > { %v13340_v54 = vpop.permute.xlu0 %10125 }
 0x3d7   : > { %v13342_v60 = vpop.permute.xlu1 %10070 }
 0x3d8   : > { %v13344_v49 = vpop.permute.xlu0 %10130 }
 0x3db   : > { %v13346_v55 = vpop.permute.xlu1 %10075 }
 0x3dc   : > { %v13348_v30 = vpop.permute.xlu0 %10135 }
 0x3dd   : > { %17048 = vst [vmem:[#allocation46_spill] sm:$0xff] %v13348_v30 }
 0x3df   : > { %v10141_v22 = vpop.permute.xlu1 %10140 }
 0x3e0   : > { %v10143_v59 = vunpack.i.h.bf16 %v10141_v22  ;;  %v10142_v42 = vunpack.i.l.bf16 %v10141_v22  ;;  %v10206_v14 = vpop.permute.xlu0 %10205  ;;  %v17058_v22 = vunpack.i.h.bf16 %v13320_v50 }
 0x3e1   : > { %v10208_v24 = vunpack.i.h.bf16 %v10206_v14  ;;  %v10207_v36 = vunpack.i.l.bf16 %v10206_v14  ;;  %v8777_v14 = vpack.c.bf16 %v13366_v19, %v13370_v51 }
 0x3e2   : > { %v13390_v1 = vsel %vm17059_vm0, %v17058_v22, %v10103_v62 }
 0x3e3   : > { %v10146_v12 = vpop.permute.xlu1 %10145  ;;  %v2576_v8 = vsel %vm17054_vm8, %v10143_v59, %v10208_v24  ;;  %v2575_v25 = vsel %vm17055_vm1, %v10142_v42, %v10207_v36  ;;  %vm17061_vm8 = vmmov %vm17059_vm0 }
 0x3e4   : > { %v10148_v23 = vunpack.i.h.bf16 %v10146_v12  ;;  %v10147_v39 = vunpack.i.l.bf16 %v10146_v12  ;;  %v13396_v12 = vsel %vm17061_vm8, %v17060_v44, %v10102_v40  ;;  %v10211_v11 = vpop.permute.xlu0 %10210  ;;  %v8769_v17 = vpack.c.bf16 %v2576_v8, %v2575_v25  ;;  %vm17062_vm1 = vmmov %vm17059_vm0 }
 0x3e5   : > { %v13400_v28 = vsel %vm17062_vm1, %v10102_v40, %v10047_v35  ;;  %v10213_v46 = vunpack.i.h.bf16 %v10211_v11  ;;  %v10212_v51 = vunpack.i.l.bf16 %v10211_v11  ;;  %vm17065_vm0 = vmmov %vm17064_vm3 }
 0x3e6   : > { %v2571_v22 = vsel %vm17064_vm3, %v10207_v36, %v10147_v39  ;;  %v2572_v44 = vsel %vm17065_vm0, %v10208_v24, %v10148_v23  ;;  %8771 = vmatprep.subr.msk.bf16.mxu0 %vm17040_vm14, %v8769_v17  ;;  %vm17066_vm8 = vmmov %vm17065_vm0  ;;  %v10107_v24 = vunpack.i.l.bf16 %v13324_v7  ;;  %v8785_v7 = vpack.c.bf16 %v13390_v1, %v13396_v12 }
 0x3e7   : > { %v10151_v19 = vpop.permute.xlu1 %10150  ;;  %v2568_v40 = vsel %vm17066_vm8, %v10148_v23, %v10213_v46  ;;  %vm17067_vm1 = vmmov %vm17065_vm0 }
 0x3e8   : > { %v10153_v8 = vunpack.i.h.bf16 %v10151_v19  ;;  %v10152_v25 = vunpack.i.l.bf16 %v10151_v19  ;;  %v2580_v62 = vsel %vm17067_vm1, %v10213_v46, %v10143_v59  ;;  %vm17068_vm9 = vmmov %vm17065_vm0  ;;  %v10216_v17 = vpop.permute.xlu0 %10215  ;;  %v8872_v19 = vpack.c.bf16 %v2572_v44, %v2571_v22 }
 0x3e9   : > { %v2567_v11 = vsel %vm17068_vm9, %v10147_v39, %v10212_v51  ;;  %vm17069_vm11 = vmmov %vm17065_vm0  ;;  %v10218_v37 = vunpack.i.h.bf16 %v10216_v17  ;;  %v10217_v30 = vunpack.i.l.bf16 %v10216_v17  ;;  %v8888_v59 = vpack.c.bf16 %v13404_v52, %v13400_v28 }
 0x3ea   : > { %v2579_v36 = vsel %vm17069_vm11, %v10212_v51, %v10142_v42  ;;  %v8869_v48 = vpack.c.bf16 %v2568_v40, %v2567_v11  ;;  %v10053_v46 = vunpack.i.h.bf16 %v13326_v32  ;;  %v10052_v51 = vunpack.i.l.bf16 %v13326_v32 }
 0x3eb   : > { %v8772_v63 = vpack.c.bf16 %v2580_v62, %v2579_v36  ;;  %v10156_v23 = vpop.permute.xlu1 %10155  ;;  %vm17070_vm11 = vcmp.lt.s32.totalorder %v11635_v56, 16  ;;  %vm17072_vm0 = vcmp.lt.s32.totalorder %v11635_v56, 15  ;;  %v17076_v44 = vunpack.i.l.bf16 %v13320_v50 }
 0x3ec   : > { %8871 = vmatprep.subr.msk.bf16.mxu1 %vm17046_vm15, %v8869_v48  ;;  %v10158_v42 = vunpack.i.h.bf16 %v10156_v23  ;;  %v10157_v39 = vunpack.i.l.bf16 %v10156_v23  ;;  %v2655_v38 = vsel %vm17070_vm11, %v10152_v25, %v10217_v30  ;;  %vm17071_vm3 = vmmov %vm17070_vm11  ;;  %v2726_v48 = vsel %vm17072_vm0, %v10048_v47, %v10108_v57  ;;  %v10221_v12 = vpop.permute.xlu0 %10220 }
 0x3ed   : > { %8774 = vmatpush1.bf16.msk.msra.mxu0 %vm17045_vm13, %v8772_v63  ;;  %8874 = vmatpush1.bf16.msk.msra.mxu1 %vm17047_vm10, %v8872_v19  ;;  %v2656_v63 = vsel %vm17071_vm3, %v10153_v8, %v10218_v37  ;;  %vm17074_vm8 = vmmov %vm17072_vm0  ;;  %v10113_v62 = vunpack.i.h.bf16 %v13328_v10  ;;  %v10223_v11 = vunpack.i.h.bf16 %v10221_v12  ;;  %v10222_v47 = vunpack.i.l.bf16 %v10221_v12 }
 0x3ee   : > { %8776 = vmatprep.subr.bf16.mxu0 %v8775_v53  ;;  %v2738_v1 = vsel %vm17074_vm8, %v10108_v57, %v17073_v20  ;;  %vm17075_vm1 = vmmov %vm17072_vm0  ;;  %8876 = vmatprep.subr.bf16.mxu1 %v8875_v6  ;;  %v8780_v22 = vpack.c.bf16 %v2656_v63, %v2655_v38  ;;  %v10112_v17 = vunpack.i.l.bf16 %v13328_v10  ;;  %v17082_v23 = vpack.c.bf16 %v13356_v33, %v13352_v15 }
 0x3ef   : > { %v2725_v53 = vsel %vm17075_vm1, %v10047_v35, %v10107_v24  ;;  %vm17077_vm9 = vmmov %vm17072_vm0  ;;  %v10161_v36 = vpop.permute.xlu1 %10160  ;;  %v2652_v35 = vsel %vm17071_vm3, %v10218_v37, %v10158_v42  ;;  %vm17079_vm0 = vnez %v16869_v2 }
 0x3f0   : > { %v2737_v40 = vsel %vm17077_vm9, %v10107_v24, %v17076_v44  ;;  %vm17078_vm11 = vmmov %vm17071_vm3  ;;  %v10163_v6 = vunpack.i.h.bf16 %v10161_v36  ;;  %v10162_v19 = vunpack.i.l.bf16 %v10161_v36  ;;  %vm17083_vm9 = vnez %v16876_v0  ;;  %v10226_v63 = vpop.permute.xlu0 %10225 }
 0x3f1   : > { %v2651_v57 = vsel %vm17078_vm11, %v10217_v30, %v10157_v39  ;;  %8779 = vmatpush1.bf16.msk.msra.mxu0 %vm17079_vm0, %v8777_v14  ;;  %vm17080_vm8 = vmmov %vm17071_vm3  ;;  %8879 = vmatpush1.bf16.msk.msra.mxu1 %vm17083_vm9, %v17082_v23  ;;  %v8788_v37 = vpack.c.bf16 %v2738_v1, %v2737_v40  ;;  %v10057_v14 = vunpack.i.l.bf16 %v13330_v3  ;;  %v10228_v15 = vunpack.i.h.bf16 %v10226_v63 }
 0x3f2   : > { %v2660_v50 = vsel %vm17080_vm8, %v10223_v11, %v10153_v8  ;;  %vm17081_vm1 = vmmov %vm17071_vm3  ;;  %8781 = vmatprep.subr.bf16.mxu0 %v8780_v22  ;;  %vm17086_vm8 = vcmp.lt.s32.totalorder %v11635_v56, 1  ;;  %v8882_v1 = vpack.c.bf16 %v2652_v35, %v2651_v57  ;;  %v10118_v36 = vunpack.i.h.bf16 %v13332_v13 }
 0x3f3   : > { %v2659_v24 = vsel %vm17081_vm1, %v10222_v47, %v10152_v25  ;;  %vm17084_vm11 = vmmov %vm17081_vm1  ;;  %v2814_v33 = vsel %vm17086_vm8, %v10053_v46, %v10113_v62  ;;  %v10227_v25 = vunpack.i.l.bf16 %v10226_v63  ;;  %v10166_v12 = vpop.permute.xlu1 %10165  ;;  %v10117_v57 = vunpack.i.l.bf16 %v13332_v13 }
 0x3f4   : > { %v2647_v30 = vsel %vm17084_vm11, %v10157_v39, %v10222_v47  ;;  %v8782_v38 = vpack.c.bf16 %v2660_v50, %v2659_v24  ;;  %vm17085_vm3 = vmmov %vm17081_vm1  ;;  %v10167_v22 = vunpack.i.l.bf16 %v10166_v12  ;;  %vm17088_vm11 = vcmp.lt.s32.totalorder %v11635_v56, 15  ;;  %v10231_v35 = vpop.permute.xlu0 %10230 }
 0x3f5   : > { %v2648_v8 = vsel %vm17085_vm3, %v10158_v42, %v10223_v11  ;;  %vm17087_vm1 = vmmov %vm17086_vm8  ;;  %v10168_v42 = vunpack.i.h.bf16 %v10166_v12  ;;  %v2736_v44 = vsel %vm17088_vm11, %v10163_v6, %v10228_v15  ;;  %vm17090_vm8 = vnez %v16886_v31 }
 0x3f6   : > { %v8880_v20 = vpack.c.bf16 %v2648_v8, %v2647_v30  ;;  %v2813_v39 = vsel %vm17087_vm1, %v10052_v51, %v10112_v17  ;;  %8784 = vmatpush1.bf16.msk.msra.mxu0 %vm17079_vm0, %v8782_v38  ;;  %vm17089_vm3 = vmmov %vm17088_vm11  ;;  %v8885_v11 = vpack.c.bf16 %v2726_v48, %v2725_v53  ;;  %v10058_v47 = vunpack.i.h.bf16 %v13330_v3 }
 0x3f7   : > { %v2735_v40 = vsel %vm17089_vm3, %v10162_v19, %v10227_v25  ;;  %8787 = vmatprep.subr.msk.bf16.mxu0 %vm17090_vm8, %v8785_v7  ;;  %v2809_v24 = vsel %vm17087_vm1, %v10112_v17, %v10057_v14  ;;  %v10233_v23 = vunpack.i.h.bf16 %v10231_v35  ;;  %v10232_v30 = vunpack.i.l.bf16 %v10231_v35  ;;  %v10171_v7 = vpop.permute.xlu1 %10170  ;;  %vm17092_vm0 = vmmov %vm17089_vm3 }
 0x3f8   : > { %8881 = vmatprep.subr.bf16.mxu1 %v8880_v20  ;;  %v8791_v50 = vpack.c.bf16 %v2736_v44, %v2735_v40  ;;  %vm17091_vm11 = vnez %v16898_v45  ;;  %v8797_v48 = vpack.c.bf16 %v2814_v33, %v2813_v39  ;;  %v2731_v3 = vsel %vm17089_vm3, %v10227_v25, %v10167_v22  ;;  %vm17094_vm1 = vmmov %vm17092_vm0 }
 0x3f9   : > { %8884 = vmatpush1.bf16.msk.msra.mxu1 %vm17083_vm9, %v8882_v1  ;;  %v2732_v13 = vsel %vm17092_vm0, %v10228_v15, %v10168_v42  ;;  %vm17093_vm9 = vnez %v16890_v29  ;;  %v10173_v53 = vunpack.i.h.bf16 %v10171_v7  ;;  %v10172_v38 = vunpack.i.l.bf16 %v10171_v7  ;;  %vm17095_vm10 = vmmov %vm17092_vm0 }
 0x3fa   : > { %8887 = vmatprep.subr.msk.bf16.mxu1 %vm17091_vm11, %v8885_v11  ;;  %8790 = vmatpush1.bf16.msk.msra.mxu0 %vm17093_vm9, %v8788_v37  ;;  %v2728_v17 = vsel %vm17094_vm1, %v10168_v42, %v10233_v23  ;;  %v2740_v63 = vsel %vm17095_vm10, %v10233_v23, %v10163_v6  ;;  %vm17096_vm13 = vmmov %vm17092_vm0  ;;  %vm17100_vm10 = vnez %v16900_v16  ;;  %v10236_v6 = vpop.permute.xlu0 %10235  ;;  %v8894_v52 = vpack.c.bf16 %v2732_v13, %v2731_v3 }
 0x3fb   : > { %v2727_v8 = vsel %vm17096_vm13, %v10167_v22, %v10232_v30  ;;  %vm17097_vm4 = vmmov %vm17092_vm0  ;;  %8793 = vmatprep.subr.msk.bf16.mxu0 %vm17090_vm8, %v8791_v50  ;;  %vm17098_vm0 = vcmp.lt.s32.totalorder %v11635_v56, 1  ;;  %v10237_v39 = vunpack.i.l.bf16 %v10236_v6  ;;  %v10176_v1 = vpop.permute.xlu1 %10175  ;;  %v10063_v40 = vunpack.i.h.bf16 %v13334_v43 }
 0x3fc   : > { %v2739_v33 = vsel %vm17097_vm4, %v10232_v30, %v10162_v19  ;;  %v2806_v37 = vsel %vm17098_vm0, %v10058_v47, %v10118_v36  ;;  %vm17099_vm3 = vmmov %vm17098_vm0  ;;  %v8891_v20 = vpack.c.bf16 %v2728_v17, %v2727_v8  ;;  %v10177_v32 = vunpack.i.l.bf16 %v10176_v1 }
 0x3fd   : > { %v2805_v15 = vsel %vm17099_vm3, %v10057_v14, %v10117_v57  ;;  %v8794_v25 = vpack.c.bf16 %v2740_v63, %v2739_v33  ;;  %8890 = vmatpush1.bf16.msk.msra.mxu1 %vm17100_vm10, %v8888_v59  ;;  %vm17101_vm4 = vmmov %vm17098_vm0  ;;  %v10238_v14 = vunpack.i.h.bf16 %v10236_v6  ;;  %v10178_v59 = vunpack.i.h.bf16 %v10176_v1  ;;  %v17118_v1 = vld [vmem:[#allocation22_spill] sm:$0xff] }
 0x3fe   : > { %v2818_v19 = vsel %vm17101_vm4, %v10118_v36, %v10053_v46  ;;  %vm17102_vm13 = vmmov %vm17098_vm0  ;;  %8893 = vmatprep.subr.msk.bf16.mxu1 %vm17091_vm11, %v8891_v20  ;;  %v8897_v10 = vpack.c.bf16 %v2806_v37, %v2805_v15  ;;  %v10241_v42 = vpop.permute.xlu0 %10240  ;;  %v10123_v35 = vunpack.i.h.bf16 %v13336_v18  ;;  %v10067_v3 = vunpack.i.l.bf16 %v13338_v58 }
 0x3ff   : > { %v2817_v12 = vsel %vm17102_vm13, %v10117_v57, %v10052_v51  ;;  %vm17103_vm1 = vmmov %vm17098_vm0  ;;  %8796 = vmatpush1.bf16.msk.msra.mxu0 %vm17093_vm9, %v8794_v25  ;;  %v2816_v46 = vsel %vm17098_vm0, %v10173_v53, %v10238_v14  ;;  %v10243_v11 = vunpack.i.h.bf16 %v10241_v42  ;;  %v13551_v36 = vpop.permute.xlu1 %10180  ;;  %v10062_v57 = vunpack.i.l.bf16 %v13334_v43 }
 0x400   : > { %v2810_v28 = vsel %vm17103_vm1, %v10113_v62, %v10058_v47  ;;  %vm17104_vm3 = vmmov %vm17098_vm0  ;;  %8799 = vmatprep.subr.msk.bf16.mxu0 %vm17040_vm14, %v8797_v48  ;;  %v8800_v62 = vpack.c.bf16 %v2818_v19, %v2817_v12  ;;  %v10242_v47 = vunpack.i.l.bf16 %v10241_v42  ;;  %v10122_v48 = vunpack.i.l.bf16 %v13336_v18  ;;  %v17125_v42 = vld [vmem:[#allocation33_spill] sm:$0xff] }
 0x401   : > { %v2815_v51 = vsel %vm17104_vm3, %v10172_v38, %v10237_v39  ;;  %8896 = vmatpush1.bf16.msk.msra.mxu1 %vm17100_vm10, %v8894_v52  ;;  %v8900_v44 = vpack.c.bf16 %v2810_v28, %v2809_v24  ;;  %vm17105_vm4 = vmmov %vm17098_vm0  ;;  %v2820_v30 = vsel %vm17098_vm0, %v10243_v11, %v10173_v53  ;;  %v10068_v63 = vunpack.i.h.bf16 %v13338_v58 }
 0x402   : > { %v8803_v22 = vpack.c.bf16 %v2816_v46, %v2815_v51  ;;  %8899 = vmatprep.subr.msk.bf16.mxu1 %vm17046_vm15, %v8897_v10  ;;  %v2811_v50 = vsel %vm17105_vm4, %v10237_v39, %v10177_v32  ;;  %vm17106_vm13 = vmmov %vm17098_vm0  ;;  %v13575_v17 = vpop.permute.xlu0 %10245  ;;  %v10128_v8 = vunpack.i.h.bf16 %v13340_v54  ;;  %v10073_v33 = vunpack.i.h.bf16 %v13342_v60  ;;  %v17123_v51 = vld [vmem:[#allocation46_spill] sm:$0xff] }
 0x403   : > { %v2812_v23 = vsel %vm17106_vm13, %v10238_v14, %v10178_v59  ;;  %8802 = vmatpush1.bf16.msk.msra.mxu0 %vm12711_vm5, %v8800_v62  ;;  %vm17107_vm1 = vmmov %vm17098_vm0  ;;  %v13581_v37 = vpop.permute.xlu1 %10185  ;;  %v10072_v18 = vunpack.i.l.bf16 %v13342_v60  ;;  %v10133_v15 = vunpack.i.h.bf16 %v13344_v49  ;;  %v10132_v25 = vunpack.i.l.bf16 %v13344_v49  ;;  %v17124_v62 = vld [vmem:[#allocation36_spill] sm:$0xff] }
 0x404   : > { %v2808_v24 = vsel %vm17107_vm1, %v10178_v59, %v10243_v11  ;;  %vm17108_vm3 = vmmov %vm17098_vm0  ;;  %8805 = vmatprep.subr.msk.bf16.mxu0 %vm17040_vm14, %v8803_v22  ;;  %v8906_v6 = vpack.c.bf16 %v2812_v23, %v2811_v50  ;;  %v10078_v58 = vunpack.i.h.bf16 %v13346_v55  ;;  %v17110_v20 = vpack.c.bf16 %v13097_v34, %v13089_v26 }
 0x405   : > { %v2807_v43 = vsel %vm17108_vm3, %v10177_v32, %v10242_v47  ;;  %vm17109_vm10 = vmmov %vm17098_vm0  ;;  %8902 = vmatpush1.bf16.msk.msra.mxu1 %vm12731_vm2, %v8900_v44  ;;  %v17119_v28 = vpack.c.bf16 %v13103_v27, %v17118_v1  ;;  %v10138_v10 = vunpack.i.h.bf16 %v17123_v51  ;;  %v17126_v22 = vpack.c.bf16 %v17124_v62, %v17125_v42 }
 0x406   : > { %v2819_v7 = vsel %vm17109_vm10, %v10242_v47, %v10172_v38  ;;  %v8903_v53 = vpack.c.bf16 %v2808_v24, %v2807_v43  ;;  %v10127_v38 = vunpack.i.l.bf16 %v13340_v54  ;;  %v10077_v54 = vunpack.i.l.bf16 %v13346_v55  ;;  %v13603_v12 = vpop.permute.xlu0 %10255  ;;  %v17129_v47 = vld [vmem:[#allocation44_spill] sm:$0xff]  ;;  %v17132_v24 = vld [vmem:[#allocation37_spill] sm:$0xff] }
 0x407   : > { %v8806_v13 = vpack.c.bf16 %v2820_v30, %v2819_v7  ;;  %vm17111_vm10 = vcmp.lt.s32.totalorder %v11635_v56, 127  ;;  %v10191_v52 = vpop.permute.xlu1 %10190  ;;  %v10137_v23 = vunpack.i.l.bf16 %v17123_v51  ;;  %v17133_v30 = vld [vmem:[#allocation20_spill] sm:$0xff]  ;;  %v10188_v1 = vunpack.i.h.bf16 %v13581_v37  ;;  %v17145_v51 = vld [vmem:[#allocation39_spill] sm:$0xff] }
 0x408   : > { %8905 = vmatprep.subr.msk.bf16.mxu1 %vm17046_vm15, %v8903_v53  ;;  %v2910_v60 = vsel %vm17111_vm10, %v10063_v40, %v10123_v35  ;;  %vm17112_vm4 = vmmov %vm17111_vm10  ;;  %v10192_v11 = vunpack.i.l.bf16 %v10191_v52  ;;  %v17134_v43 = vpack.c.bf16 %v17132_v24, %v17133_v30  ;;  %v17135_v53 = vld [vmem:[#allocation45_spill] sm:$0xff] }
 0x409   : > { %8808 = vmatpush1.bf16.msk.msra.mxu0 %vm12711_vm5, %v8806_v13  ;;  %v2909_v49 = vsel %vm17112_vm4, %v10062_v57, %v10122_v48  ;;  %vm17113_vm13 = vmmov %vm17112_vm4  ;;  %8908 = vmatpush1.bf16.msk.msra.mxu1 %vm12731_vm2, %v8906_v6 }
 0x40a   : > { %8810 = vmatprep.subr.bf16.mxu0 %v17110_v20  ;;  %v2905_v19 = vsel %vm17113_vm13, %v10122_v48, %v10067_v3  ;;  %vm17114_vm1 = vmmov %vm17112_vm4  ;;  %8910 = vmatprep.subr.bf16.mxu1 %v17119_v28  ;;  %vm17121_vm13 = vcmp.lt.s32.totalorder %v11635_v56, 113  ;;  %v8820_v50 = vpack.c.bf16 %v2910_v60, %v2909_v49  ;;  %v10276_v7 = vpop.permute.xlu0 %10275  ;;  %v17139_v20 = vld [vmem:[#allocation42_spill] sm:$0xff]  ;;  %v10187_v28 = vunpack.i.l.bf16 %v13581_v37 }
 0x40b   : > { %v2906_v14 = vsel %vm17114_vm1, %v10123_v35, %v10068_v63  ;;  %vm17115_vm0 = vmmov %vm17114_vm1  ;;  %v13620_v32 = vsel %vm17121_vm13, %v10073_v33, %v10133_v15  ;;  %v10277_v13 = vunpack.i.l.bf16 %v10276_v7  ;;  %v17140_v60 = vld [vmem:[#allocation38_spill] sm:$0xff] }
 0x40c   : > { %v2902_v26 = vsel %vm17115_vm0, %v10068_v63, %v10128_v8  ;;  %vm17116_vm3 = vmmov %vm17115_vm0  ;;  %v17136_v63 = vld [vmem:[#allocation41_spill] sm:$0xff]  ;;  %v17141_v49 = vpack.c.bf16 %v17139_v20, %v17140_v60 }
 0x40d   : > { %v2914_v34 = vsel %vm17116_vm3, %v10128_v8, %v10063_v40  ;;  %vm17117_vm10 = vmmov %vm17115_vm0  ;;  %8812 = vmatpush1.bf16.msra.mxu0 %v17126_v22  ;;  %v10193_v40 = vunpack.i.h.bf16 %v10191_v52  ;;  %8912 = vmatpush1.bf16.msra.mxu1 %v17134_v43  ;;  %v17137_v8 = vpack.c.bf16 %v17135_v53, %v17136_v63  ;;  %v10183_v52 = vunpack.i.h.bf16 %v13551_v36 }
 0x40e   : > { %v2901_v39 = vsel %vm17117_vm10, %v10067_v3, %v10127_v38  ;;  %vm17120_vm4 = vmmov %vm17115_vm0  ;;  %v10278_v3 = vunpack.i.h.bf16 %v10276_v7  ;;  %v10281_v62 = vpop.permute.xlu0 %10280 }
 0x40f   : > { %v2913_v59 = vsel %vm17120_vm4, %v10127_v38, %v10062_v57  ;;  %vm17122_vm1 = vmmov %vm17121_vm13  ;;  %v17130_v57 = vld [vmem:[#allocation40_spill] sm:$0xff]  ;;  %v8920_v48 = vpack.c.bf16 %v2902_v26, %v2901_v39  ;;  %8914 = vmatprep.subr.bf16.mxu1 %v17137_v8  ;;  %v13650_v38 = vpop.permute.xlu1 %10195  ;;  %v10258_v8 = vunpack.i.h.bf16 %v13603_v12 }
 0x410   : > { %v13624_v46 = vsel %vm17122_vm1, %v10072_v18, %v10132_v25  ;;  %vm17127_vm0 = vmmov %vm17122_vm1  ;;  %v17131_v35 = vpack.c.bf16 %v17129_v47, %v17130_v57  ;;  %v8917_v26 = vpack.c.bf16 %v2914_v34, %v2913_v59  ;;  %v17144_v59 = vld [vmem:[#allocation43_spill] sm:$0xff]  ;;  %v10282_v47 = vunpack.i.l.bf16 %v10281_v62 }
 0x411   : > { %v13634_v27 = vsel %vm17127_vm0, %v10132_v25, %v10077_v54  ;;  %vm17128_vm3 = vmmov %vm17127_vm0  ;;  %v8832_v25 = vpack.c.bf16 %v13620_v32, %v13624_v46  ;;  %v2993_v34 = vsel %vm17127_vm0, %v10137_v23, %v10072_v18  ;;  %v17146_v37 = vpack.c.bf16 %v17144_v59, %v17145_v51 }
 0x412   : > { %v13638_v44 = vsel %vm17128_vm3, %v10133_v15, %v10078_v58  ;;  %8814 = vmatprep.subr.bf16.mxu0 %v17131_v35  ;;  %v8817_v15 = vpack.c.bf16 %v2906_v14, %v2905_v19  ;;  %vm17138_vm10 = vmmov %vm17127_vm0  ;;  %v2908_v19 = vsel %vm17120_vm4, %v10278_v3, %v10193_v40  ;;  %v10182_v18 = vunpack.i.l.bf16 %v13551_v36 }
 0x413   : > { %v13656_v6 = vsel %vm17138_vm10, %v10078_v58, %v10138_v10  ;;  %8816 = vmatpush1.bf16.msra.mxu0 %v17141_v49  ;;  %v8829_v39 = vpack.c.bf16 %v13638_v44, %v13634_v27  ;;  %vm17142_vm13 = vmmov %vm17120_vm4  ;;  %8916 = vmatpush1.bf16.msra.mxu1 %v17146_v37  ;;  %v10283_v44 = vunpack.i.h.bf16 %v10281_v62  ;;  %v10247_v36 = vunpack.i.l.bf16 %v13575_v17 }
 0x414   : > { %v2907_v14 = vsel %vm17142_vm13, %v10277_v13, %v10192_v11  ;;  %8819 = vmatprep.subr.msk.bf16.mxu0 %vm17090_vm8, %v8817_v15  ;;  %vm17143_vm1 = vmmov %vm17127_vm0  ;;  %8919 = vmatprep.subr.msk.bf16.mxu1 %vm17091_vm11, %v8917_v26  ;;  %v10257_v49 = vunpack.i.l.bf16 %v13603_v12  ;;  %v10197_v26 = vunpack.i.l.bf16 %v13650_v38 }
 0x415   : > { %v2994_v58 = vsel %vm17143_vm1, %v10138_v10, %v10073_v33  ;;  %v8823_v42 = vpack.c.bf16 %v2908_v19, %v2907_v14  ;;  %vm17147_vm3 = vmmov %vm17120_vm4  ;;  %v10201_v33 = vpop.permute.xlu1 %10200  ;;  %v10248_v10 = vunpack.i.h.bf16 %v13575_v17  ;;  %v10198_v17 = vunpack.i.h.bf16 %v13650_v38 }
 0x416   : > { %v2912_v22 = vsel %vm17147_vm3, %v10188_v1, %v10278_v3  ;;  %vm17148_vm10 = vmmov %vm17147_vm3  ;;  %v10203_v35 = vunpack.i.h.bf16 %v10201_v33  ;;  %v10202_v24 = vunpack.i.l.bf16 %v10201_v33  ;;  %v8929_v12 = vpack.c.bf16 %v2994_v58, %v2993_v34  ;;  %v17163_v34 = vld [vmem:[#allocation35_spill] sm:$0xff] }
 0x417   : > { %v2911_v27 = vsel %vm17148_vm10, %v10187_v28, %v10277_v13  ;;  %8822 = vmatpush1.bf16.msk.msra.mxu0 %vm12793_vm12, %v8820_v50  ;;  %vm17150_vm4 = vmmov %vm17147_vm3  ;;  %8922 = vmatpush1.bf16.msk.msra.mxu1 %vm12811_vm7, %v8920_v48 }
 0x418   : > { %v2904_v30 = vsel %vm17150_vm4, %v10193_v40, %v10283_v44  ;;  %vm17151_vm13 = vmmov %vm17147_vm3  ;;  %8825 = vmatprep.subr.msk.bf16.mxu0 %vm17090_vm8, %v8823_v42  ;;  %v8826_v50 = vpack.c.bf16 %v2912_v22, %v2911_v27  ;;  %v10286_v40 = vpop.permute.xlu0 %10285 }
 0x419   : > { %v2916_v43 = vsel %vm17151_vm13, %v10283_v44, %v10188_v1  ;;  %vm17152_vm1 = vmmov %vm17147_vm3  ;;  %vm17155_vm3 = vcmp.lt.s32.totalorder %v11635_v56, 113  ;;  %v10288_v15 = vunpack.i.h.bf16 %v10286_v40  ;;  %v10287_v20 = vunpack.i.l.bf16 %v10286_v40  ;;  %v10251_v60 = vpop.permute.xlu1 %10250  ;;  %v17172_v40 = vld [vmem:[#allocation21_spill] sm:$0xff] }
 0x41a   : > { %v2903_v7 = vsel %vm17152_vm1, %v10192_v11, %v10282_v47  ;;  %vm17153_vm0 = vmmov %vm17152_vm1  ;;  %v2981_v11 = vsel %vm17155_vm3, %v10077_v54, %v10137_v23  ;;  %v10253_v48 = vunpack.i.h.bf16 %v10251_v60  ;;  %v10252_v55 = vunpack.i.l.bf16 %v10251_v60 }
 0x41b   : > { %v2915_v3 = vsel %vm17153_vm0, %v10282_v47, %v10187_v28  ;;  %v8926_v13 = vpack.c.bf16 %v2904_v30, %v2903_v7  ;;  %8828 = vmatpush1.bf16.msk.msra.mxu0 %vm12793_vm12, %v8826_v50  ;;  %vm17156_vm10 = vmmov %vm17155_vm3  ;;  %v8932_v28 = vpack.c.bf16 %v13656_v6, %v2981_v11  ;;  %vm17159_vm13 = vcmp.lt.s32.totalorder %v11635_v56, 112 }
 0x41c   : > { %v8923_v63 = vpack.c.bf16 %v2916_v43, %v2915_v3  ;;  %v2988_v54 = vsel %vm17156_vm10, %v10288_v15, %v10203_v35  ;;  %vm17157_vm4 = vmmov %vm17155_vm3  ;;  %8831 = vmatprep.subr.msk.bf16.mxu0 %vm12875_vm6, %v8829_v39  ;;  %v3070_v19 = vsel %vm17159_vm13, %v10183_v52, %v10248_v10  ;;  %v10291_v59 = vpop.permute.xlu0 %10290  ;;  %vm17164_vm10 = vnez %v17163_v34 }
 0x41d   : > { %v2987_v23 = vsel %vm17157_vm4, %v10287_v20, %v10202_v24  ;;  %vm17160_vm1 = vmmov %vm17159_vm13  ;;  %v10293_v39 = vunpack.i.h.bf16 %v10291_v59  ;;  %v10292_v58 = vunpack.i.l.bf16 %v10291_v59  ;;  %v10261_v6 = vpop.permute.xlu1 %10260 }
 0x41e   : > { %8925 = vmatprep.subr.msk.bf16.mxu1 %vm17091_vm11, %v8923_v63  ;;  %v3069_v14 = vsel %vm17160_vm1, %v10182_v18, %v10247_v36  ;;  %vm17161_vm0 = vmmov %vm17155_vm3  ;;  %v8835_v37 = vpack.c.bf16 %v2988_v54, %v2987_v23  ;;  %v3065_v22 = vsel %vm17160_vm1, %v10247_v36, %v10252_v55  ;;  %v10263_v46 = vunpack.i.h.bf16 %v10261_v6 }
 0x41f   : > { %v2992_v38 = vsel %vm17161_vm0, %v10198_v17, %v10288_v15  ;;  %8928 = vmatpush1.bf16.msk.msra.mxu1 %vm12811_vm7, %v8926_v13  ;;  %vm17162_vm3 = vmmov %vm17161_vm0  ;;  %8834 = vmatpush1.bf16.msk.msra.mxu0 %vm12711_vm5, %v8832_v25 }
 0x420   : > { %v2991_v51 = vsel %vm17162_vm3, %v10197_v26, %v10287_v20  ;;  %8931 = vmatprep.subr.msk.bf16.mxu1 %vm17164_vm10, %v8929_v12  ;;  %vm17165_vm4 = vmmov %vm17160_vm1  ;;  %v2984_v44 = vsel %vm17162_vm3, %v10203_v35, %v10293_v39  ;;  %8837 = vmatprep.subr.msk.bf16.mxu0 %vm12875_vm6, %v8835_v37  ;;  %v10296_v25 = vpop.permute.xlu0 %10295  ;;  %v10262_v35 = vunpack.i.l.bf16 %v10261_v6 }
 0x421   : > { %v3074_v62 = vsel %vm17165_vm4, %v10258_v8, %v10183_v52  ;;  %vm17166_vm13 = vmmov %vm17160_vm1  ;;  %v10298_v30 = vunpack.i.h.bf16 %v10296_v25  ;;  %v10297_v43 = vunpack.i.l.bf16 %v10296_v25  ;;  %v10266_v7 = vpop.permute.xlu1 %10265 }
 0x422   : > { %v3073_v42 = vsel %vm17166_vm13, %v10257_v49, %v10182_v18  ;;  %vm17167_vm0 = vmmov %vm17160_vm1  ;;  %v8838_v18 = vpack.c.bf16 %v2992_v38, %v2991_v51  ;;  %v10267_v36 = vunpack.i.l.bf16 %v10266_v7 }
 0x423   : > { %v3066_v27 = vsel %vm17167_vm0, %v10248_v10, %v10253_v48  ;;  %vm17168_vm4 = vmmov %vm17162_vm3  ;;  %8934 = vmatpush1.bf16.msk.msra.mxu1 %vm12731_vm2, %v8932_v28  ;;  %v3061_v50 = vsel %vm17167_vm0, %v10252_v55, %v10257_v49  ;;  %v8941_v63 = vpack.c.bf16 %v3074_v62, %v3073_v42  ;;  %v8844_v49 = vpack.c.bf16 %v3070_v19, %v3069_v14  ;;  %v17177_v55 = vld [vmem:[#allocation34_spill] sm:$0xff] }
 0x424   : > { %v2996_v52 = vsel %vm17168_vm4, %v10293_v39, %v10198_v17  ;;  %vm17169_vm13 = vmmov %vm17162_vm3  ;;  %v8841_v3 = vpack.c.bf16 %v3066_v27, %v3065_v22  ;;  %8840 = vmatpush1.bf16.msk.msra.mxu0 %vm12711_vm5, %v8838_v18  ;;  %vm17173_vm4 = vnez %v17172_v40  ;;  %v10301_v60 = vpop.permute.xlu0 %10300 }
 0x425   : > { %v2983_v47 = vsel %vm17169_vm13, %v10202_v24, %v10292_v58  ;;  %vm17170_vm1 = vmmov %vm17162_vm3  ;;  %v10268_v24 = vunpack.i.h.bf16 %v10266_v7  ;;  %v10303_v17 = vunpack.i.h.bf16 %v10301_v60  ;;  %v7382_v7 = vld [vmem:[%s16450_s3 + $0x78] sm:$0xff] }
 0x426   : > { %v2995_v33 = vsel %vm17170_vm1, %v10292_v58, %v10197_v26  ;;  %v8938_v32 = vpack.c.bf16 %v2984_v44, %v2983_v47  ;;  %vm17171_vm3 = vmmov %vm17167_vm0  ;;  %8843 = vmatprep.subr.msk.bf16.mxu0 %vm17173_vm4, %v8841_v3  ;;  %v10271_v26 = vpop.permute.xlu1 %10270  ;;  %v7379_v44 = vld [vmem:[%s16450_s3 + $0x60] sm:$0xff] }
 0x427   : > { %v8935_v10 = vpack.c.bf16 %v2996_v52, %v2995_v33  ;;  %v3062_v13 = vsel %vm17171_vm3, %v10253_v48, %v10258_v8  ;;  %vm17174_vm13 = vmmov %vm17167_vm0  ;;  %v3071_v8 = vsel %vm17167_vm0, %v10262_v35, %v10297_v43  ;;  %v10302_v48 = vunpack.i.l.bf16 %v10301_v60  ;;  %v7383_v52 = vld [vmem:[%s16450_s3 + $0x80] sm:$0xff] }
 0x428   : > { %v3072_v11 = vsel %vm17174_vm13, %v10263_v46, %v10298_v30  ;;  %vm17175_vm1 = vmmov %vm17167_vm0  ;;  %vm17178_vm3 = vnez %v17177_v55  ;;  %8845 = vmatpush1.bf16.msra.mxu0 %v8844_v49  ;;  %v8944_v23 = vpack.c.bf16 %v3062_v13, %v3061_v50  ;;  %v10273_v38 = vunpack.i.h.bf16 %v10271_v26  ;;  %v10306_v59 = vpop.permute.xlu0 %10305  ;;  %v7386_v49 = vld [vmem:[%s16450_s3 + $0x98] sm:$0xff] }
 0x429   : > { %8937 = vmatprep.subr.msk.bf16.mxu1 %vm17164_vm10, %v8935_v10  ;;  %v3067_v15 = vsel %vm17175_vm1, %v10297_v43, %v10267_v36  ;;  %vm17176_vm10 = vmmov %vm17167_vm0  ;;  %v3075_v14 = vsel %vm17167_vm0, %v10302_v48, %v10262_v35  ;;  %v8849_v51 = vpack.c.bf16 %v3072_v11, %v3071_v8  ;;  %v10272_v6 = vunpack.i.l.bf16 %v10271_v26  ;;  %v17191_v26 = vld [vmem:[#allocation31_spill] sm:$0xff] }
 0x42a   : > { %v3068_v20 = vsel %vm17176_vm10, %v10298_v30, %v10268_v24  ;;  %8940 = vmatpush1.bf16.msk.msra.mxu1 %vm12731_vm2, %v8938_v32  ;;  %vm17179_vm13 = vmmov %vm17167_vm0  ;;  %v10308_v37 = vunpack.i.h.bf16 %v10306_v59  ;;  %v10307_v62 = vunpack.i.l.bf16 %v10306_v59  ;;  %v10311_v42 = vpop.permute.xlu1 %10310 }
 0x42b   : > { %8943 = vmatprep.subr.msk.bf16.mxu1 %vm17178_vm3, %v8941_v63  ;;  %v8846_v54 = vpack.c.bf16 %v3068_v20, %v3067_v15  ;;  %v3064_v12 = vsel %vm17179_vm13, %v10268_v24, %v10303_v17  ;;  %vm17180_vm10 = vmmov %vm17167_vm0  ;;  %v10313_v22 = vunpack.i.h.bf16 %v10311_v42  ;;  %v10312_v27 = vunpack.i.l.bf16 %v10311_v42  ;;  %v17189_v20 = vld [vmem:[#allocation14_spill] sm:$0xff] }
 0x42c   : > { %v3076_v28 = vsel %vm17180_vm10, %v10303_v17, %v10263_v46  ;;  %vm17181_vm1 = vmmov %vm17167_vm0  ;;  %vm17182_vm13 = vcmp.lt.s32.totalorder %v11635_v56, 111  ;;  %v10316_v32 = vpop.permute.xlu0 %10315 }
 0x42d   : > { %v3063_v19 = vsel %vm17181_vm1, %v10267_v36, %v10302_v48  ;;  %8848 = vmatprep.subr.msk.bf16.mxu0 %vm17173_vm4, %v8846_v54  ;;  %v8946_v39 = vpack.c.bf16 %v3076_v28, %v3075_v14  ;;  %v3150_v47 = vsel %vm17182_vm13, %v10273_v38, %v10308_v37  ;;  %vm17183_vm10 = vmmov %vm17182_vm13  ;;  %v10318_v25 = vunpack.i.h.bf16 %v10316_v32 }
 0x42e   : > { %8945 = vmatpush1.bf16.msra.mxu1 %v8944_v23  ;;  %v8949_v58 = vpack.c.bf16 %v3064_v12, %v3063_v19  ;;  %8850 = vmatpush1.bf16.msra.mxu0 %v8849_v51  ;;  %v3145_v33 = vsel %vm17183_vm10, %v10307_v62, %v10312_v27  ;;  %vm17184_vm1 = vmmov %vm17183_vm10  ;;  %v10317_v10 = vunpack.i.l.bf16 %v10316_v32  ;;  %v10321_v35 = vpop.permute.xlu1 %10320  ;;  %v7385_v12 = vld [vmem:[%s16450_s3 + $0x90] sm:$0xff]  ;;  %v7384_v32 = vld [vmem:[%s16450_s3 + $0x88] sm:$0xff] }
 0x42f   : > { %8948 = vmatprep.subr.msk.bf16.mxu1 %vm17178_vm3, %v8946_v39  ;;  %v3146_v18 = vsel %vm17184_vm1, %v10308_v37, %v10313_v22  ;;  %vm17185_vm0 = vmmov %vm17184_vm1  ;;  %v10323_v43 = vunpack.i.h.bf16 %v10321_v35  ;;  %v10322_v11 = vunpack.i.l.bf16 %v10321_v35  ;;  %vm17190_vm3 = vnez %v17189_v20  ;;  %v7389_v19 = vld [vmem:[%s16450_s3 + $0xb0] sm:$0xff]  ;;  %v7388_v37 = vld [vmem:[%s16450_s3 + $0xa8] sm:$0xff] }
 0x430   : > { %v3149_v46 = vsel %vm17185_vm0, %v10272_v6, %v10307_v62  ;;  %v8851_v30 = vpack.c.bf16 %v3146_v18, %v3145_v33  ;;  %vm17186_vm13 = vmmov %vm17185_vm0  ;;  %v3153_v50 = vsel %vm17185_vm0, %v10317_v10, %v10272_v6  ;;  %v10331_v15 = vpop.permute.xlu0 %10330  ;;  %v17199_v33 = vmov 0.0   ;;  %v7381_v18 = vld [vmem:[%s16450_s3 + $0x70] sm:$0xff] }
 0x431   : > { %3410 = vmatmul.mubr.f32.vlgmr.msra.gmra.mrb[8].mxu0 %v7379_v44  ;;  %v3142_v3 = vsel %vm17186_vm13, %v10313_v22, %v10318_v25  ;;  %vm17187_vm10 = vmmov %vm17185_vm0  ;;  %v8854_v13 = vpack.c.bf16 %v3150_v47, %v3149_v46  ;;  %v10333_v8 = vunpack.i.h.bf16 %v10331_v15  ;;  %v10332_v17 = vunpack.i.l.bf16 %v10331_v15  ;;  %v7387_v46 = vld [vmem:[%s16450_s3 + $0xa0] sm:$0xff]  ;;  %v17214_v15 = vld [vmem:[#allocation9_spill] sm:$0xff] }
 0x432   : > { %8950 = vmatpush1.bf16.msra.mxu1 %v8949_v58  ;;  %3415 = vmatprep.mubr.f32.mxu0 %v7383_v52  ;;  %v3154_v24 = vsel %vm17187_vm10, %v10318_v25, %v10273_v38  ;;  %vm17188_vm1 = vmmov %vm17185_vm0  ;;  %v10326_v48 = vpop.permute.xlu1 %10325  ;;  %vm17192_vm13 = vnez %v17191_v26  ;;  %v7390_v25 = vld [vmem:[%s16450_s3 + $0xb8] sm:$0xff] }
 0x433   : > { %v3141_v36 = vsel %vm17188_vm1, %v10312_v27, %v10317_v10  ;;  %8853 = vmatprep.subr.msk.bf16.mxu0 %vm17190_vm3, %v8851_v30  ;;  %v8951_v60 = vpack.c.bf16 %v3154_v24, %v3153_v50  ;;  %v10328_v54 = vunpack.i.h.bf16 %v10326_v48  ;;  %v10327_v23 = vunpack.i.l.bf16 %v10326_v48  ;;  %vm17193_vm10 = vmmov %vm17185_vm0 }
 0x434   : > { %v8954_v63 = vpack.c.bf16 %v3142_v3, %v3141_v36  ;;  %8856 = vmatpush1.bf16.msk.msra.mxu0 %vm12793_vm12, %v8854_v13  ;;  %v3152_v28 = vsel %vm17193_vm10, %v10323_v43, %v10333_v8  ;;  %vm17194_vm1 = vmmov %vm17185_vm0  ;;  %v10336_v51 = vpop.permute.xlu0 %10335  ;;  %v17208_v3 = vld [vmem:[#allocation13_spill] sm:$0xff]  ;;  %v17210_v36 = vld [vmem:[#allocation15_spill] sm:$0xff] }
 0x435   : > { %3588 = vmatmul.mubr.f32.vlgmr.msra.gmra.mrb[8].mxu1 %v7379_v44  ;;  %3416 = vmatmul.mubr.f32.gmra.mrb[10].mxu0 %v7382_v7  ;;  %v3151_v14 = vsel %vm17194_vm1, %v10322_v11, %v10332_v17  ;;  %v3147_v38 = vsel %vm17185_vm0, %v10332_v17, %v10327_v23  ;;  %vm17195_vm4 = vmmov %vm17185_vm0  ;;  %v10338_v58 = vunpack.i.h.bf16 %v10336_v51  ;;  %v10337_v6 = vunpack.i.l.bf16 %v10336_v51  ;;  %v17222_v51 = vld [vmem:[#allocation24_spill] sm:$0xff] }
 0x436   : > { %3593 = vmatprep.mubr.f32.mxu1 %v7383_v52  ;;  %8953 = vmatprep.subr.msk.bf16.mxu1 %vm17192_vm13, %v8951_v60  ;;  %v3148_v59 = vsel %vm17195_vm4, %v10333_v8, %v10328_v54  ;;  %v8860_v62 = vpack.c.bf16 %v3152_v28, %v3151_v14  ;;  %vm17196_vm4 = vmmov %vm17185_vm0  ;;  %v17216_v8 = vld [vmem:[#allocation12_spill] sm:$0xff] }
 0x437   : > { %3421 = vmatprep.mubr.f32.mxu0 %v7386_v49  ;;  %8956 = vmatpush1.bf16.msk.msra.mxu1 %vm12811_vm7, %v8954_v63  ;;  %v8857_v39 = vpack.c.bf16 %v3148_v59, %v3147_v38  ;;  %v3144_v42 = vsel %vm17196_vm4, %v10328_v54, %v10338_v58  ;;  %vm17197_vm10 = vmmov %vm17185_vm0  ;;  %v3155_v44 = vsel %vm17185_vm0, %v10337_v6, %v10322_v11  ;;  %vm17200_vm4 = vcmask 261120   ;;  %v17212_v63 = vld [vmem:[#allocation26_spill] sm:$0xff]  ;;  %v17220_v14 = vld [vmem:[#allocation16_spill] sm:$0xff] }
 0x438   : > { %v3156_v22 = vsel %vm17197_vm10, %v10338_v58, %v10323_v43  ;;  %vm17198_vm1 = vmmov %vm17185_vm0 }
 0x439   : > { %3594 = vmatmul.mubr.f32.gmra.mrb[10].mxu1 %v7382_v7  ;;  %3422 = vmatmul.mubr.f32.gmra.mrb[12].mxu0 %v7385_v12  ;;  %v3143_v27 = vsel %vm17198_vm1, %v10327_v23, %v10337_v6  ;;  %v8957_v47 = vpack.c.bf16 %v3156_v22, %v3155_v44  ;;  %vm17201_vm10 = vmmov %vm17200_vm4  ;;  %v17218_v23 = vld [vmem:[#allocation10_spill] sm:$0xff] }
 0x43a   : > { %3599 = vmatprep.mubr.f32.mxu1 %v7386_v49  ;;  %3427 = vmatprep.mubr.f32.mxu0 %v7389_v19  ;;  %v8960_v52 = vpack.c.bf16 %v3144_v42, %v3143_v27  ;;  %vm17202_vm1 = vmmov %vm17200_vm4 }
 0x43b   : > { %8859 = vmatprep.subr.msk.bf16.mxu0 %vm17190_vm3, %v8857_v39  ;;  %8959 = vmatprep.subr.msk.bf16.mxu1 %vm17192_vm13, %v8957_v47  ;;  %vm17203_vm0 = vmmov %vm17202_vm1 }
 0x43c   : > { %8862 = vmatpush1.bf16.msk.msra.mxu0 %vm12793_vm12, %v8860_v62  ;;  %8962 = vmatpush1.bf16.msk.msra.mxu1 %vm12811_vm7, %v8960_v52  ;;  %vm17207_vm13 = vmmov %vm17203_vm0  ;;  %v17224_v52 = vld [vmem:[#allocation30_spill] sm:$0xff] }
 0x43d   : > { %3600 = vmatmul.mubr.f32.gmra.mrb[12].mxu1 %v7385_v12  ;;  %3428 = vmatmul.mubr.f32.gmra.mrb[14].mxu0 %v7388_v37 }
 0x43e   : > { %3605 = vmatprep.mubr.f32.mxu1 %v7389_v19  ;;  %3498 = vmatprep.mubr.f32.mxu0 %v17199_v33 }
 0x441   : > { %3606 = vmatmul.mubr.f32.gmra.mrb[14].mxu1 %v7388_v37  ;;  %7391 = vmatmul.mubr.msk.f32.vlgmr.msra.gmra.mrb[8].mxu0 %vm17200_vm4, %v7381_v18  ;;  %vm17204_vm4 = vmmov %vm17203_vm0 }
 0x442   : > { %3676 = vmatprep.mubr.f32.mxu1 %v17199_v33  ;;  %3504 = vmatprep.mubr.f32.mxu0 %v17199_v33 }
 0x445   : > { %7395 = vmatmul.mubr.msk.f32.vlgmr.msra.gmra.mrb[8].mxu1 %vm17201_vm10, %v7381_v18  ;;  %7392 = vmatmul.mubr.msk.f32.gmra.mrb[10].mxu0 %vm17202_vm1, %v7384_v32  ;;  %vm17205_vm10 = vmmov %vm17203_vm0  ;;  %v17226_v18 = vld [vmem:[#allocation17_spill] sm:$0xff] }
 0x446   : > { %3682 = vmatprep.mubr.f32.mxu1 %v17199_v33  ;;  %3510 = vmatprep.mubr.f32.mxu0 %v17199_v33  ;;  %vm17206_vm1 = vmmov %vm17203_vm0 }
 0x449   : > { %7396 = vmatmul.mubr.msk.f32.gmra.mrb[10].mxu1 %vm17203_vm0, %v7384_v32  ;;  %7393 = vmatmul.mubr.msk.f32.gmra.mrb[12].mxu0 %vm17204_vm4, %v7387_v46 }
 0x44a   : > { %3688 = vmatprep.mubr.f32.mxu1 %v17199_v33  ;;  %3516 = vmatprep.mubr.f32.mxu0 %v17199_v33 }
 0x44d   : > { %7397 = vmatmul.mubr.msk.f32.gmra.mrb[12].mxu1 %vm17205_vm10, %v7387_v46  ;;  %7394 = vmatmul.mubr.msk.f32.gmra.mrb[14].mxu0 %vm17206_vm1, %v7390_v25  ;;  %v17228_v46 = vld [vmem:[#allocation29_spill] sm:$0xff] }
 0x44e   : > { %3694 = vmatprep.mubr.f32.mxu1 %v17199_v33 }
 0x451   : > { %7398 = vmatmul.mubr.msk.f32.gmra.mrb[14].mxu1 %vm17207_vm13, %v7390_v25  ;;  %vm17240_vm13 = vcmp.lt.s32.totalorder %v11635_v56, 17 }
 0x452   : > { %vm17241_vm0 = vmmov %vm17240_vm13 }
 0x453   : > { %vm17242_vm4 = vmmov %vm17241_vm0 }
 0x454   : > { %vm17243_vm10 = vmmov %vm17241_vm0 }
 0x455   : > { %vm17244_vm1 = vmmov %vm17241_vm0 }
 0x514   : > { %v3500_v10 = vpop.f32.mrb[8].mxu0 }
 0x515   : > { %v3502_v35 = vpop.f32.mrb[9].mxu0  ;;  %v13890_v24 = vadd.f32 %v3500_v10, %v17208_v3  ;;  %v17230_v10 = vld [vmem:[#allocation18_spill] sm:$0xff]  ;;  %v17234_v3 = vld [vmem:[#allocation28_spill] sm:$0xff] }
 0x516   : > { %v13896_v11 = vadd.f32 %v3502_v35, %v17212_v63  ;;  %v17236_v63 = vld [vmem:[#allocation11_spill] sm:$0xff] }
 0x517   : > { %17209 = vst [vmem:[#allocation22_spill] sm:$0xff] %v13890_v24 }
 0x518   : > { %v3678_v30 = vpop.f32.mrb[8].mxu1  ;;  %v3506_v7 = vpop.f32.mrb[10].mxu0  ;;  %17213 = vst [vmem:[#allocation36_spill] sm:$0xff] %v13896_v11 }
 0x519   : > { %v3680_v43 = vpop.f32.mrb[9].mxu1  ;;  %v13893_v50 = vadd.f32 %v3506_v7, %v17210_v36  ;;  %v3508_v13 = vpop.f32.mrb[11].mxu0  ;;  %v13916_v38 = vadd.f32 %v3678_v30, %v17220_v14  ;;  %v17232_v30 = vld [vmem:[#allocation27_spill] sm:$0xff] }
 0x51a   : > { %v13899_v60 = vadd.f32 %v3508_v13, %v17214_v15  ;;  %v13921_v39 = vadd.f32 %v3680_v43, %v17222_v51 }
 0x51b   : > { %17211 = vst [vmem:[#allocation46_spill] sm:$0xff] %v13893_v50  ;;  %v13906_v54 = vpack.i.bf16 %v13893_v50, %v13890_v24  ;;  %17221 = vst [vmem:[#allocation37_spill] sm:$0xff] %v13916_v38 }
 0x51c   : > { %17215 = vst [vmem:[#allocation33_spill] sm:$0xff] %v13899_v60  ;;  %v3684_v49 = vpop.f32.mrb[10].mxu1  ;;  %v3512_v28 = vpop.f32.mrb[12].mxu0  ;;  %v13913_v19 = vpack.i.bf16 %v13899_v60, %v13896_v11  ;;  %17223 = vst [vmem:[#allocation20_spill] sm:$0xff] %v13921_v39 }
 0x51d   : > { %v13902_v17 = vadd.f32 %v3684_v49, %v17216_v8  ;;  %v3686_v48 = vpop.f32.mrb[11].mxu1  ;;  %10340 = vrot.lane.b32.xlu1 %v13906_v54, %s11330_s19  ;;  %v3514_v59 = vpop.f32.mrb[13].mxu0  ;;  %v13980_v25 = vadd.f32 %v3512_v28, %v17228_v46  ;;  %v17238_v49 = vld [vmem:[#allocation23_spill] sm:$0xff] }
 0x51e   : > { %v13909_v12 = vadd.f32 %v3686_v48, %v17218_v23  ;;  %10400 = vrot.lane.b32.xlu0 %v13913_v19, %s11330_s19  ;;  %v13985_v35 = vadd.f32 %v3514_v59, %v17230_v10  ;;  %v7400_v28 = vld [vmem:[%s16450_s3 + $0xc8] sm:$0xff] }
 0x51f   : > { %17217 = vst [vmem:[#allocation44_spill] sm:$0xff] %v13902_v17  ;;  %v13927_v37 = vpack.i.bf16 %v13902_v17, %v13916_v38  ;;  %17229 = vst [vmem:[#allocation42_spill] sm:$0xff] %v13980_v25  ;;  %4606 = vmatprep.mubr.f32.mxu0 %v7400_v28  ;;  %4784 = vmatprep.mubr.f32.mxu1 %v7400_v28 }
 0x520   : > { %17219 = vst [vmem:[#allocation40_spill] sm:$0xff] %v13909_v12  ;;  %v3690_v58 = vpop.f32.mrb[12].mxu1  ;;  %v3518_v62 = vpop.f32.mrb[14].mxu0  ;;  %v13931_v42 = vpack.i.bf16 %v13909_v12, %v13921_v39  ;;  %17231 = vst [vmem:[#allocation38_spill] sm:$0xff] %v13985_v35 }
 0x521   : > { %v3692_v6 = vpop.f32.mrb[13].mxu1  ;;  %10345 = vrot.lane.b32.xlu1 %v13927_v37, %s11330_s19  ;;  %v3520_v22 = vpop.f32.mrb[15].mxu0  ;;  %v13974_v47 = vadd.f32 %v3518_v62, %v17224_v52  ;;  %v14002_v15 = vadd.f32 %v3690_v58, %v17236_v63 }
 0x522   : > { %10405 = vrot.lane.b32.xlu0 %v13931_v42, %s11330_s19  ;;  %v13977_v32 = vadd.f32 %v3520_v22, %v17226_v18  ;;  %v14006_v8 = vadd.f32 %v3692_v6, %v17238_v49 }
 0x523   : > { %17225 = vst [vmem:[#allocation45_spill] sm:$0xff] %v13974_v47  ;;  %v10459_v7 = vpack.i.bf16 %v13974_v47, %v13980_v25  ;;  %17237 = vst [vmem:[#allocation13_spill] sm:$0xff] %v14002_v15 }
 0x524   : > { %v3696_v27 = vpop.f32.mrb[14].mxu1  ;;  %17227 = vst [vmem:[#allocation41_spill] sm:$0xff] %v13977_v32  ;;  %v13999_v13 = vpack.i.bf16 %v13977_v32, %v13985_v35  ;;  %17239 = vst [vmem:[#allocation15_spill] sm:$0xff] %v14006_v8 }
 0x525   : > { %v3698_v44 = vpop.f32.mrb[15].mxu1  ;;  %10350 = vrot.lane.b32.xlu1 %v13906_v54, %s11331_s20  ;;  %v13990_v43 = vadd.f32 %v3696_v27, %v17232_v30 }
 0x526   : > { %10410 = vrot.lane.b32.xlu0 %v13913_v19, %s11331_s20  ;;  %v13995_v36 = vadd.f32 %v3698_v44, %v17234_v3 }
 0x527   : > { %17233 = vst [vmem:[#allocation43_spill] sm:$0xff] %v13990_v43  ;;  %v14012_v48 = vpack.i.bf16 %v13990_v43, %v14002_v15 }
 0x528   : > { %17235 = vst [vmem:[#allocation39_spill] sm:$0xff] %v13995_v36  ;;  %v14016_v23 = vpack.i.bf16 %v13995_v36, %v14006_v8 }
 0x529   : > { %10355 = vrot.lane.b32.xlu1 %v13927_v37, %s11331_s20 }
 0x52a   : > { %10415 = vrot.lane.b32.xlu0 %v13931_v42, %s11331_s20 }
 0x52d   : > { %10360 = vrot.lane.b32.xlu1 %v13906_v54, %s11332_s25 }
 0x52e   : > { %10420 = vrot.lane.b32.xlu0 %v13913_v19, %s11332_s25 }
 0x531   : > { %10365 = vrot.lane.b32.xlu1 %v13927_v37, %s11332_s25 }
 0x532   : > { %10425 = vrot.lane.b32.xlu0 %v13931_v42, %s11332_s25 }
 0x535   : > { %10370 = vrot.lane.b32.xlu1 %v13906_v54, %s11334_s27 }
 0x536   : > { %10430 = vrot.lane.b32.xlu0 %v13913_v19, %s11334_s27 }
 0x539   : > { %10375 = vrot.lane.b32.xlu1 %v13927_v37, %s11334_s27 }
 0x53a   : > { %10435 = vrot.lane.b32.xlu0 %v13931_v42, %s11334_s27 }
 0x53d   : > { %10380 = vrot.lane.b32.xlu1 %v13906_v54, %s11337_s28 }
 0x53e   : > { %10440 = vrot.lane.b32.xlu0 %v13913_v19, %s11337_s28 }
 0x541   : > { %10385 = vrot.lane.b32.xlu1 %v13927_v37, %s11337_s28 }
 0x542   : > { %10445 = vrot.lane.b32.xlu0 %v13931_v42, %s11337_s28 }
 0x545   : > { %10390 = vrot.lane.b32.xlu1 %v13906_v54, %s11339_s29 }
 0x546   : > { %10450 = vrot.lane.b32.xlu0 %v13913_v19, %s11339_s29 }
 0x549   : > { %10395 = vrot.lane.b32.xlu1 %v13927_v37, %s11339_s29 }
 0x54a   : > { %10455 = vrot.lane.b32.xlu0 %v13931_v42, %s11339_s29 }
 0x54d   : > { %10460 = vrot.lane.b32.xlu1 %v10459_v7, %s11330_s19 }
 0x54e   : > { %10525 = vrot.lane.b32.xlu0 %v13999_v13, %s11330_s19 }
 0x551   : > { %10465 = vrot.lane.b32.xlu1 %v14012_v48, %s11330_s19 }
 0x552   : > { %10530 = vrot.lane.b32.xlu0 %v14016_v23, %s11330_s19 }
 0x555   : > { %10470 = vrot.lane.b32.xlu1 %v10459_v7, %s11331_s20 }
 0x556   : > { %10535 = vrot.lane.b32.xlu0 %v13999_v13, %s11331_s20 }
 0x559   : > { %10475 = vrot.lane.b32.xlu1 %v14012_v48, %s11331_s20 }
 0x55a   : > { %10540 = vrot.lane.b32.xlu0 %v14016_v23, %s11331_s20 }
 0x55d   : > { %10480 = vrot.lane.b32.xlu1 %v10459_v7, %s11332_s25 }
 0x55e   : > { %10545 = vrot.lane.b32.xlu0 %v13999_v13, %s11332_s25 }
 0x561   : > { %10485 = vrot.lane.b32.xlu1 %v14012_v48, %s11332_s25 }
 0x562   : > { %10550 = vrot.lane.b32.xlu0 %v14016_v23, %s11332_s25 }
 0x565   : > { %10490 = vrot.lane.b32.xlu1 %v10459_v7, %s11334_s27 }
 0x566   : > { %10555 = vrot.lane.b32.xlu0 %v13999_v13, %s11334_s27 }
 0x569   : > { %10495 = vrot.lane.b32.xlu1 %v14012_v48, %s11334_s27 }
 0x56a   : > { %10560 = vrot.lane.b32.xlu0 %v14016_v23, %s11334_s27 }
 0x56d   : > { %10500 = vrot.lane.b32.xlu1 %v13906_v54, %s11340_s30 }
 0x56e   : > { %10565 = vrot.lane.b32.xlu0 %v13913_v19, %s11340_s30 }
 0x571   : > { %10505 = vrot.lane.b32.xlu1 %v10459_v7, %s11337_s28 }
 0x572   : > { %10575 = vrot.lane.b32.xlu0 %v13931_v42, %s11340_s30 }
 0x575   : > { %10510 = vrot.lane.b32.xlu1 %v14012_v48, %s11337_s28 }
 0x576   : > { %10595 = vrot.lane.b32.xlu0 %v13999_v13, %s11337_s28 }
 0x579   : > { %10515 = vrot.lane.b32.xlu1 %v10459_v7, %s11339_s29 }
 0x57a   : > { %10600 = vrot.lane.b32.xlu0 %v14016_v23, %s11337_s28 }
 0x57d   : > { %10520 = vrot.lane.b32.xlu1 %v14012_v48, %s11339_s29 }
 0x57e   : > { %10605 = vrot.lane.b32.xlu0 %v13999_v13, %s11339_s29 }
 0x581   : > { %10570 = vrot.lane.b32.xlu1 %v13927_v37, %s11340_s30 }
 0x582   : > { %10610 = vrot.lane.b32.xlu0 %v14016_v23, %s11339_s29 }
 0x585   : > { %10580 = vrot.lane.b32.xlu1 %v10459_v7, %s11340_s30 }
 0x586   : > { %10615 = vrot.lane.b32.xlu0 %v13999_v13, %s11340_s30 }
 0x589   : > { %10585 = vrot.lane.b32.xlu1 %v14012_v48, %s11340_s30 }
 0x58a   : > { %10620 = vrot.lane.b32.xlu0 %v14016_v23, %s11340_s30 }
 0x58d   : > { %10590 = vrot.lane.b32.xlu1 %v13906_v54, %s11343_s5 }
 0x58e   : > { %10625 = vrot.lane.b32.xlu0 %v13913_v19, %s11343_s5 }
 0x58f   : > { %v10341_v14 = vpop.permute.xlu1 %10340 }
 0x590   : > { %v10343_v59 = vunpack.i.h.bf16 %v10341_v14  ;;  %v10342_v51 = vunpack.i.l.bf16 %v10341_v14  ;;  %v10401_v58 = vpop.permute.xlu0 %10400 }
 0x591   : > { %v10403_v6 = vunpack.i.h.bf16 %v10401_v58  ;;  %v10402_v62 = vunpack.i.l.bf16 %v10401_v58  ;;  %10630 = vrot.lane.b32.xlu1 %v13927_v37, %s11343_s5 }
 0x592   : > { %10635 = vrot.lane.b32.xlu0 %v13931_v42, %s11343_s5 }
 0x593   : > { %v3771_v22 = vsel %vm17240_vm13, %v10343_v59, %v10403_v6  ;;  %v3770_v54 = vsel %vm17241_vm0, %v10342_v51, %v10402_v62  ;;  %v10346_v27 = vpop.permute.xlu1 %10345  ;;  %vm17245_vm13 = vmmov %vm17241_vm0 }
 0x594   : > { %v10348_v19 = vunpack.i.h.bf16 %v10346_v27  ;;  %v10347_v44 = vunpack.i.l.bf16 %v10346_v27  ;;  %v10406_v52 = vpop.permute.xlu0 %10405  ;;  %v8963_v18 = vpack.c.bf16 %v3771_v22, %v3770_v54 }
 0x595   : > { %v10408_v46 = vunpack.i.h.bf16 %v10406_v52  ;;  %v10407_v10 = vunpack.i.l.bf16 %v10406_v52  ;;  %10640 = vrot.lane.b32.xlu1 %v10459_v7, %s11343_s5 }
 0x596   : > { %v3766_v37 = vsel %vm17242_vm4, %v10402_v62, %v10347_v44  ;;  %v3767_v42 = vsel %vm17243_vm10, %v10403_v6, %v10348_v19  ;;  %8965 = vmatprep.subr.msk.bf16.mxu0 %vm17040_vm14, %v8963_v18  ;;  %10650 = vrot.lane.b32.xlu0 %v13999_v13, %s11343_s5  ;;  %vm17246_vm4 = vmmov %vm17241_vm0  ;;  %vm17247_vm10 = vnez %v16849_v4 }
 0x597   : > { %v3763_v30 = vsel %vm17244_vm1, %v10348_v19, %v10408_v46  ;;  %v3775_v3 = vsel %vm17245_vm13, %v10408_v46, %v10343_v59  ;;  %v3762_v7 = vsel %vm17241_vm0, %v10347_v44, %v10407_v10  ;;  %v10351_v63 = vpop.permute.xlu1 %10350  ;;  %v3774_v49 = vsel %vm17246_vm4, %v10407_v10, %v10342_v51 }
 0x598   : > { %v10411_v28 = vpop.permute.xlu0 %10410  ;;  %v9063_v14 = vpack.c.bf16 %v3763_v30, %v3762_v7  ;;  %v9066_v58 = vpack.c.bf16 %v3767_v42, %v3766_v37  ;;  %v8966_v6 = vpack.c.bf16 %v3775_v3, %v3774_v49  ;;  %vm17248_vm1 = vnez %v16858_v61 }
 0x599   : > { %10645 = vrot.lane.b32.xlu1 %v14012_v48, %s11343_s5  ;;  %v10353_v37 = vunpack.i.h.bf16 %v10351_v63  ;;  %v10352_v42 = vunpack.i.l.bf16 %v10351_v63  ;;  %v10413_v30 = vunpack.i.h.bf16 %v10411_v28  ;;  %v10412_v3 = vunpack.i.l.bf16 %v10411_v28 }
 0x59a   : > { %9065 = vmatprep.subr.msk.bf16.mxu1 %vm17046_vm15, %v9063_v14  ;;  %10655 = vrot.lane.b32.xlu0 %v14016_v23, %s11343_s5  ;;  %vm17253_vm13 = vcmp.lt.s32.totalorder %v11635_v56, 16 }
 0x59b   : > { %8968 = vmatpush1.bf16.msk.msra.mxu0 %vm17247_vm10, %v8966_v6  ;;  %v10356_v13 = vpop.permute.xlu1 %10355  ;;  %9068 = vmatpush1.bf16.msk.msra.mxu1 %vm17248_vm1, %v9066_v58  ;;  %v14148_v26 = vsel %vm17253_vm13, %v10352_v42, %v10412_v3  ;;  %vm17254_vm0 = vmmov %vm17253_vm13 }
 0x59c   : > { %v10416_v59 = vpop.permute.xlu0 %10415  ;;  %v10357_v49 = vunpack.i.l.bf16 %v10356_v13  ;;  %v10358_v58 = vunpack.i.h.bf16 %v10356_v13  ;;  %v14152_v20 = vsel %vm17254_vm0, %v10353_v37, %v10413_v30  ;;  %vm17255_vm4 = vmmov %vm17254_vm0 }
 0x59d   : > { %v10418_v6 = vunpack.i.h.bf16 %v10416_v59  ;;  %v10417_v63 = vunpack.i.l.bf16 %v10416_v59  ;;  %v8975_v53 = vpack.c.bf16 %v14152_v20, %v14148_v26  ;;  %vm17256_vm13 = vmmov %vm17254_vm0 }
 0x59e   : > { %v14160_v34 = vsel %vm17255_vm4, %v10412_v3, %v10357_v49  ;;  %v14166_v57 = vsel %vm17256_vm13, %v10413_v30, %v10358_v58  ;;  %vm17257_vm3 = vmmov %vm17254_vm0  ;;  %vm17260_vm13 = vcmp.lt.s32.totalorder %v11635_v56, 15 }
 0x59f   : > { %v14114_v51 = vpop.permute.xlu1 %10360  ;;  %v14170_v59 = vsel %vm17254_vm0, %v10418_v6, %v10353_v37  ;;  %vm17258_vm4 = vmmov %vm17254_vm0 }
 0x5a0   : > { %v14116_v62 = vpop.permute.xlu0 %10420  ;;  %v3842_v20 = vsel %vm17258_vm4, %v10357_v49, %v10417_v63  ;;  %v17259_v26 = vunpack.i.h.bf16 %v14114_v51  ;;  %v17261_v37 = vunpack.i.l.bf16 %v14114_v51  ;;  %vm17262_vm0 = vmmov %vm17260_vm13  ;;  %vm17263_vm4 = vcmp.lt.s32.totalorder %v11635_v56, 17 }
 0x5a1   : > { %v10423_v40 = vunpack.i.h.bf16 %v14116_v62  ;;  %v10422_v13 = vunpack.i.l.bf16 %v14116_v62  ;;  %v14174_v62 = vsel %vm17257_vm3, %v10417_v63, %v10352_v42 }
 0x5a3   : > { %v14118_v22 = vpop.permute.xlu1 %10365  ;;  %v14182_v30 = vsel %vm17260_vm13, %v17259_v26, %v10423_v40  ;;  %vm17264_vm13 = vmmov %vm17263_vm4 }
 0x5a4   : > { %v14120_v48 = vpop.permute.xlu0 %10425  ;;  %v10367_v42 = vunpack.i.l.bf16 %v14118_v22  ;;  %v10368_v63 = vunpack.i.h.bf16 %v14118_v22 }
 0x5a5   : > { %v10428_v8 = vunpack.i.h.bf16 %v14120_v48 }
 0x5a6   : > { %v14206_v49 = vsel %vm17262_vm0, %v10422_v13, %v10367_v42 }
 0x5a7   : > { %v14122_v54 = vpop.permute.xlu1 %10370 }
 0x5a8   : > { %v14124_v27 = vpop.permute.xlu0 %10430 }
 0x5ab   : > { %v14126_v23 = vpop.permute.xlu1 %10375 }
 0x5ac   : > { %v14128_v19 = vpop.permute.xlu0 %10435 }
 0x5af   : > { %v14130_v44 = vpop.permute.xlu1 %10380 }
 0x5b0   : > { %v14132_v52 = vpop.permute.xlu0 %10440 }
 0x5b3   : > { %v14134_v18 = vpop.permute.xlu1 %10385 }
 0x5b4   : > { %v14136_v46 = vpop.permute.xlu0 %10445 }
 0x5b7   : > { %v14138_v10 = vpop.permute.xlu1 %10390 }
 0x5b8   : > { %17249 = vst [vmem:[#allocation26_spill] sm:$0xff] %v14138_v10  ;;  %v14140_v7 = vpop.permute.xlu0 %10450 }
 0x5b9   : > { %17250 = vst [vmem:[#allocation9_spill] sm:$0xff] %v14140_v7 }
 0x5bb   : > { %v14142_v14 = vpop.permute.xlu1 %10395 }
 0x5bc   : > { %17251 = vst [vmem:[#allocation12_spill] sm:$0xff] %v14142_v14  ;;  %v14144_v33 = vpop.permute.xlu0 %10455 }
 0x5bd   : > { %17252 = vst [vmem:[#allocation10_spill] sm:$0xff] %v14144_v33 }
 0x5bf   : > { %v10461_v1 = vpop.permute.xlu1 %10460 }
 0x5c0   : > { %v10463_v55 = vunpack.i.h.bf16 %v10461_v1  ;;  %v10462_v28 = vunpack.i.l.bf16 %v10461_v1  ;;  %v10526_v43 = vpop.permute.xlu0 %10525  ;;  %v14188_v1 = vsel %vm17262_vm0, %v17261_v37, %v10422_v13  ;;  %v8977_v37 = vpack.c.bf16 %v14170_v59, %v14174_v62 }
 0x5c1   : > { %v10528_v3 = vunpack.i.h.bf16 %v10526_v43  ;;  %v10527_v15 = vunpack.i.l.bf16 %v10526_v43  ;;  %v3843_v43 = vsel %vm17257_vm3, %v10358_v58, %v10418_v6  ;;  %vm17265_vm3 = vmmov %vm17263_vm4 }
 0x5c2   : > { %v9075_v36 = vpack.c.bf16 %v3843_v43, %v3842_v20  ;;  %vm17268_vm6 = vmmov %vm17265_vm3 }
 0x5c3   : > { %v3773_v26 = vsel %vm17263_vm4, %v10463_v55, %v10528_v3  ;;  %v3772_v33 = vsel %vm17264_vm13, %v10462_v28, %v10527_v15  ;;  %v10466_v14 = vpop.permute.xlu1 %10465  ;;  %vm17266_vm4 = vmmov %vm17265_vm3 }
 0x5c4   : > { %v10468_v7 = vunpack.i.h.bf16 %v10466_v14  ;;  %v10467_v10 = vunpack.i.l.bf16 %v10466_v14  ;;  %v10531_v47 = vpop.permute.xlu0 %10530  ;;  %v8969_v25 = vpack.c.bf16 %v3773_v26, %v3772_v33  ;;  %vm17267_vm13 = vmmov %vm17262_vm0 }
 0x5c5   : > { %v10533_v58 = vunpack.i.h.bf16 %v10531_v47  ;;  %v10532_v6 = vunpack.i.l.bf16 %v10531_v47  ;;  %v14217_v33 = vsel %vm17267_vm13, %v10423_v40, %v10368_v63  ;;  %vm17269_vm0 = vmmov %vm17265_vm3 }
 0x5c6   : > { %v3768_v17 = vsel %vm17265_vm3, %v10527_v15, %v10467_v10  ;;  %v3769_v14 = vsel %vm17266_vm4, %v10528_v3, %v10468_v7  ;;  %8971 = vmatprep.subr.msk.bf16.mxu0 %vm17040_vm14, %v8969_v25  ;;  %vm17270_vm7 = vmmov %vm17269_vm0 }
 0x5c7   : > { %v3765_v47 = vsel %vm17268_vm6, %v10468_v7, %v10533_v58  ;;  %v3777_v13 = vsel %vm17269_vm0, %v10533_v58, %v10463_v55  ;;  %v3764_v59 = vsel %vm17270_vm7, %v10467_v10, %v10532_v6  ;;  %v10471_v15 = vpop.permute.xlu1 %10470  ;;  %vm17271_vm3 = vmmov %vm17269_vm0  ;;  %v9072_v26 = vpack.c.bf16 %v3769_v14, %v3768_v17 }
 0x5c8   : > { %v3776_v62 = vsel %vm17271_vm3, %v10532_v6, %v10462_v28  ;;  %v10473_v3 = vunpack.i.h.bf16 %v10471_v15  ;;  %v10472_v20 = vunpack.i.l.bf16 %v10471_v15  ;;  %v10536_v25 = vpop.permute.xlu0 %10535  ;;  %v9069_v43 = vpack.c.bf16 %v3765_v47, %v3764_v59  ;;  %vm17272_vm7 = vmmov %vm17267_vm13 }
 0x5c9   : > { %v8972_v40 = vpack.c.bf16 %v3777_v13, %v3776_v62  ;;  %v10538_v22 = vunpack.i.h.bf16 %v10536_v25  ;;  %v10537_v38 = vunpack.i.l.bf16 %v10536_v25  ;;  %v10427_v55 = vunpack.i.l.bf16 %v14120_v48  ;;  %vm17276_vm13 = vmmov %vm17272_vm7 }
 0x5ca   : > { %v10373_v58 = vunpack.i.h.bf16 %v14122_v54  ;;  %v10433_v10 = vunpack.i.h.bf16 %v14124_v27  ;;  %9071 = vmatprep.subr.msk.bf16.mxu1 %vm17046_vm15, %v9069_v43  ;;  %v14236_v28 = vsel %vm17272_vm7, %v10368_v63, %v10428_v8  ;;  %vm17273_vm6 = vcmp.lt.s32.totalorder %v11635_v56, 16  ;;  %vm17277_vm0 = vmmov %vm17272_vm7 }
 0x5cb   : > { %8974 = vmatpush1.bf16.msk.msra.mxu0 %vm17247_vm10, %v8972_v40  ;;  %v10476_v17 = vpop.permute.xlu1 %10475  ;;  %9074 = vmatpush1.bf16.msk.msra.mxu1 %vm17248_vm1, %v9072_v26  ;;  %v3852_v48 = vsel %vm17273_vm6, %v10472_v20, %v10537_v38  ;;  %vm17274_vm4 = vmmov %vm17273_vm6  ;;  %v17275_v14 = vunpack.i.h.bf16 %v14114_v51  ;;  %v10372_v62 = vunpack.i.l.bf16 %v14122_v54  ;;  %v10432_v25 = vunpack.i.l.bf16 %v14124_v27 }
 0x5cc   : > { %v3853_v6 = vsel %vm17274_vm4, %v10473_v3, %v10538_v22  ;;  %v10478_v63 = vunpack.i.h.bf16 %v10476_v17  ;;  %v10477_v13 = vunpack.i.l.bf16 %v10476_v17  ;;  %8976 = vmatprep.subr.bf16.mxu0 %v8975_v53  ;;  %v10541_v59 = vpop.permute.xlu0 %10540  ;;  %9076 = vmatprep.subr.bf16.mxu1 %v9075_v36  ;;  %v3922_v40 = vsel %vm17277_vm0, %v10367_v42, %v10427_v55  ;;  %vm17279_vm3 = vmmov %vm17277_vm0 }
 0x5cd   : > { %v14250_v47 = vsel %vm17276_vm13, %v10428_v8, %v17275_v14  ;;  %v8980_v15 = vpack.c.bf16 %v3853_v6, %v3852_v48  ;;  %v10543_v43 = vunpack.i.h.bf16 %v10541_v59  ;;  %v10542_v26 = vunpack.i.l.bf16 %v10541_v59  ;;  %vm17281_vm6 = vmmov %vm17274_vm4 }
 0x5ce   : > { %v17278_v7 = vunpack.i.l.bf16 %v14114_v51  ;;  %vm17280_vm7 = vcmp.lt.s32.totalorder %v11635_v56, 1  ;;  %v3848_v36 = vsel %vm17281_vm6, %v10537_v38, %v10477_v13  ;;  %v3849_v17 = vsel %vm17274_vm4, %v10538_v22, %v10478_v63  ;;  %vm17282_vm13 = vmmov %vm17274_vm4 }
 0x5cf   : > { %v14266_v53 = vsel %vm17280_vm7, %v10373_v58, %v10433_v10  ;;  %v3857_v51 = vsel %vm17282_vm13, %v10543_v43, %v10473_v3  ;;  %vm17283_vm0 = vmmov %vm17274_vm4  ;;  %vm17286_vm7 = vnez %v16876_v0  ;;  %vm17288_vm4 = vcmp.lt.s32.totalorder %v11635_v56, 1 }
 0x5d0   : > { %v3934_v8 = vsel %vm17279_vm3, %v10427_v55, %v17278_v7  ;;  %v3856_v42 = vsel %vm17283_vm0, %v10542_v26, %v10472_v20  ;;  %vm17284_vm3 = vnez %v16869_v2  ;;  %v10481_v7 = vpop.permute.xlu1 %10480  ;;  %v17285_v55 = vpack.c.bf16 %v14166_v57, %v14160_v34  ;;  %v10546_v22 = vpop.permute.xlu0 %10545  ;;  %vm17287_vm6 = vmmov %vm17283_vm0 }
 0x5d1   : > { %8979 = vmatpush1.bf16.msk.msra.mxu0 %vm17284_vm3, %v8977_v37  ;;  %v8982_v38 = vpack.c.bf16 %v3857_v51, %v3856_v42  ;;  %v10483_v48 = vunpack.i.h.bf16 %v10481_v7  ;;  %v10482_v6 = vunpack.i.l.bf16 %v10481_v7  ;;  %v3844_v3 = vsel %vm17287_vm6, %v10477_v13, %v10542_v26  ;;  %vm17289_vm13 = vmmov %vm17283_vm0 }
 0x5d2   : > { %9079 = vmatpush1.bf16.msk.msra.mxu1 %vm17286_vm7, %v17285_v55  ;;  %8981 = vmatprep.subr.bf16.mxu0 %v8980_v15  ;;  %v4010_v37 = vsel %vm17288_vm4, %v10372_v62, %v10432_v25  ;;  %v10548_v20 = vunpack.i.h.bf16 %v10546_v22  ;;  %v10547_v14 = vunpack.i.l.bf16 %v10546_v22  ;;  %v3845_v57 = vsel %vm17289_vm13, %v10478_v63, %v10543_v43  ;;  %vm17293_vm13 = vmmov %vm17288_vm4 }
 0x5d3   : > { %v10378_v34 = vunpack.i.h.bf16 %v14126_v23  ;;  %v10377_v59 = vunpack.i.l.bf16 %v14126_v23  ;;  %v10438_v15 = vunpack.i.h.bf16 %v14128_v19  ;;  %v9080_v51 = vpack.c.bf16 %v3845_v57, %v3844_v3 }
 0x5d4   : > { %v9082_v42 = vpack.c.bf16 %v3849_v17, %v3848_v36  ;;  %vm17290_vm0 = vcmp.lt.s32.totalorder %v11635_v56, 15  ;;  %v10486_v7 = vpop.permute.xlu1 %10485  ;;  %v9085_v63 = vpack.c.bf16 %v14236_v28, %v3922_v40  ;;  %v8988_v43 = vpack.c.bf16 %v14250_v47, %v3934_v8  ;;  %v10551_v17 = vpop.permute.xlu0 %10550 }
 0x5d5   : > { %v3933_v13 = vsel %vm17290_vm0, %v10483_v48, %v10548_v20  ;;  %vm17291_vm6 = vmmov %vm17290_vm0  ;;  %8984 = vmatpush1.bf16.msk.msra.mxu0 %vm17284_vm3, %v8982_v38  ;;  %9081 = vmatprep.subr.bf16.mxu1 %v9080_v51  ;;  %v10488_v23 = vunpack.i.h.bf16 %v10486_v7  ;;  %v10487_v55 = vunpack.i.l.bf16 %v10486_v7  ;;  %v17292_v36 = vpack.c.bf16 %v14182_v30, %v14188_v1 }
 0x5d6   : > { %v3932_v26 = vsel %vm17291_vm6, %v10482_v6, %v10547_v14  ;;  %v10437_v3 = vunpack.i.l.bf16 %v14128_v19  ;;  %9084 = vmatpush1.bf16.msk.msra.mxu1 %vm17286_vm7, %v9082_v42  ;;  %v10553_v38 = vunpack.i.h.bf16 %v10551_v17  ;;  %v10552_v28 = vunpack.i.l.bf16 %v10551_v17  ;;  %vm17294_vm0 = vmmov %vm17288_vm4 }
 0x5d7   : > { %8987 = vmatprep.subr.msk.bf16.mxu0 %vm17090_vm8, %v17292_v36  ;;  %v8991_v22 = vpack.c.bf16 %v3933_v13, %v3932_v26  ;;  %v8997_v47 = vpack.c.bf16 %v14266_v53, %v4010_v37  ;;  %v14313_v40 = vsel %vm17288_vm4, %v10432_v25, %v10377_v59  ;;  %v4007_v30 = vsel %vm17293_vm13, %v10433_v10, %v10378_v34  ;;  %vm17295_vm7 = vmmov %vm17291_vm6 }
 0x5d8   : > { %v4003_v1 = vsel %vm17294_vm0, %v10378_v34, %v10438_v15  ;;  %v3928_v19 = vsel %vm17291_vm6, %v10547_v14, %v10487_v55  ;;  %9087 = vmatprep.subr.msk.bf16.mxu1 %vm17091_vm11, %v9085_v63  ;;  %v3929_v8 = vsel %vm17295_vm7, %v10548_v20, %v10488_v23  ;;  %vm17296_vm4 = vmmov %vm17291_vm6  ;;  %v10491_v53 = vpop.permute.xlu1 %10490  ;;  %v10556_v20 = vpop.permute.xlu0 %10555  ;;  %vm17300_vm7 = vcmp.lt.s32.totalorder %v11635_v56, 1 }
 0x5d9   : > { %v3925_v25 = vsel %vm17296_vm4, %v10488_v23, %v10553_v38  ;;  %vm17297_vm3 = vmmov %vm17296_vm4  ;;  %8990 = vmatpush1.bf16.msk.msra.mxu0 %vm17093_vm9, %v8988_v43  ;;  %v10493_v14 = vunpack.i.h.bf16 %v10491_v53  ;;  %v10492_v57 = vunpack.i.l.bf16 %v10491_v53  ;;  %v17301_v42 = vpack.c.bf16 %v14217_v33, %v14206_v49 }
 0x5da   : > { %v3937_v27 = vsel %vm17297_vm3, %v10553_v38, %v10483_v48  ;;  %vm17298_vm13 = vmmov %vm17297_vm3  ;;  %8993 = vmatprep.subr.msk.bf16.mxu0 %vm17090_vm8, %v8991_v22  ;;  %v4002_v48 = vsel %vm17300_vm7, %v10377_v59, %v10437_v3  ;;  %v10558_v13 = vunpack.i.h.bf16 %v10556_v20  ;;  %v10557_v26 = vunpack.i.l.bf16 %v10556_v20 }
 0x5db   : > { %v3924_v10 = vsel %vm17298_vm13, %v10487_v55, %v10552_v28  ;;  %vm17299_vm0 = vmmov %vm17297_vm3  ;;  %vm17302_vm3 = vnez %v16900_v16  ;;  %v10383_v63 = vunpack.i.h.bf16 %v14130_v44  ;;  %v10382_v49 = vunpack.i.l.bf16 %v14130_v44 }
 0x5dc   : > { %v3936_v37 = vsel %vm17299_vm0, %v10552_v28, %v10482_v6  ;;  %v9091_v34 = vpack.c.bf16 %v3925_v25, %v3924_v10  ;;  %9090 = vmatpush1.bf16.msk.msra.mxu1 %vm17302_vm3, %v17301_v42  ;;  %v9100_v6 = vpack.c.bf16 %v4007_v30, %v14313_v40  ;;  %vm17303_vm6 = vmmov %vm17300_vm7  ;;  %v9094_v33 = vpack.c.bf16 %v3929_v8, %v3928_v19  ;;  %v10496_v54 = vpop.permute.xlu1 %10495 }
 0x5dd   : > { %v8994_v51 = vpack.c.bf16 %v3937_v27, %v3936_v37  ;;  %v4015_v7 = vsel %vm17303_vm6, %v10438_v15, %v10373_v58  ;;  %vm17304_vm4 = vmmov %vm17303_vm6  ;;  %v10498_v58 = vunpack.i.h.bf16 %v10496_v54  ;;  %v10561_v15 = vpop.permute.xlu0 %10560  ;;  %v9097_v55 = vpack.c.bf16 %v4003_v1, %v4002_v48  ;;  %v17312_v48 = vld [vmem:[#allocation37_spill] sm:$0xff] }
 0x5de   : > { %v4014_v59 = vsel %vm17304_vm4, %v10437_v3, %v10372_v62  ;;  %9093 = vmatprep.subr.msk.bf16.mxu1 %vm17091_vm11, %v9091_v34  ;;  %vm17305_vm13 = vmmov %vm17304_vm4  ;;  %v10497_v62 = vunpack.i.l.bf16 %v10496_v54  ;;  %v10443_v22 = vunpack.i.h.bf16 %v14132_v52  ;;  %v10563_v3 = vunpack.i.h.bf16 %v10561_v15  ;;  %v17319_v54 = vld [vmem:[#allocation45_spill] sm:$0xff] }
 0x5df   : > { %v4013_v43 = vsel %vm17305_vm13, %v10493_v14, %v10558_v13  ;;  %vm17306_vm0 = vmmov %vm17304_vm4  ;;  %8996 = vmatpush1.bf16.msk.msra.mxu0 %vm17093_vm9, %v8994_v51  ;;  %v9000_v17 = vpack.c.bf16 %v4015_v7, %v4014_v59  ;;  %v10562_v38 = vunpack.i.l.bf16 %v10561_v15  ;;  %v10442_v28 = vunpack.i.l.bf16 %v14132_v52  ;;  %v17313_v51 = vld [vmem:[#allocation44_spill] sm:$0xff] }
 0x5e0   : > { %v4012_v23 = vsel %vm17306_vm0, %v10492_v57, %v10557_v26  ;;  %8999 = vmatprep.subr.msk.bf16.mxu0 %vm17040_vm14, %v8997_v47  ;;  %9096 = vmatpush1.bf16.msk.msra.mxu1 %vm17302_vm3, %v9094_v33  ;;  %v10388_v40 = vunpack.i.h.bf16 %v14134_v18  ;;  %v10387_v30 = vunpack.i.l.bf16 %v14134_v18  ;;  %v10448_v19 = vunpack.i.h.bf16 %v14136_v46  ;;  %vm17307_vm7 = vmmov %vm17306_vm0  ;;  %v14385_v18 = vpop.permute.xlu1 %10500 }
 0x5e1   : > { %v9003_v36 = vpack.c.bf16 %v4013_v43, %v4012_v23  ;;  %9099 = vmatprep.subr.msk.bf16.mxu1 %vm17046_vm15, %v9097_v55  ;;  %v10447_v47 = vunpack.i.l.bf16 %v14136_v46  ;;  %v4005_v1 = vsel %vm17307_vm7, %v10498_v58, %v10563_v3  ;;  %vm17308_vm6 = vmmov %vm17306_vm0  ;;  %v4009_v46 = vsel %vm17306_vm0, %v10558_v13, %v10498_v58  ;;  %v14395_v10 = vpop.permute.xlu0 %10565  ;;  %v17314_v13 = vld [vmem:[#allocation15_spill] sm:$0xff]  ;;  %v17318_v23 = vld [vmem:[#allocation42_spill] sm:$0xff] }
 0x5e2   : > { %v4017_v8 = vsel %vm17308_vm6, %v10563_v3, %v10493_v14  ;;  %vm17309_vm4 = vmmov %vm17306_vm0  ;;  %v9009_v14 = vpack.c.bf16 %v13899_v60, %v13896_v11  ;;  %v9109_v20 = vpack.c.bf16 %v13909_v12, %v13921_v39  ;;  %v9013_v34 = vpack.c.bf16 %v13977_v32, %v13985_v35  ;;  %v17324_v3 = vld [vmem:[#allocation26_spill] sm:$0xff] }
 0x5e3   : > { %v4004_v52 = vsel %vm17309_vm4, %v10497_v62, %v10562_v38  ;;  %9002 = vmatpush1.bf16.msk.msra.mxu0 %vm12711_vm5, %v9000_v17  ;;  %vm17310_vm13 = vmmov %vm17306_vm0  ;;  %v9111_v42 = vpack.c.bf16 %v17313_v51, %v17312_v48  ;;  %v9015_v58 = vpack.c.bf16 %v17319_v54, %v17318_v23 }
 0x5e4   : > { %v4008_v25 = vsel %vm17310_vm13, %v10557_v26, %v10497_v62  ;;  %vm17311_vm3 = vmmov %vm17306_vm0  ;;  %9005 = vmatprep.subr.msk.bf16.mxu0 %vm17040_vm14, %v9003_v36  ;;  %v9103_v53 = vpack.c.bf16 %v4005_v1, %v4004_v52  ;;  %9102 = vmatpush1.bf16.msk.msra.mxu1 %vm12731_vm2, %v9100_v6  ;;  %v17315_v26 = vld [vmem:[#allocation39_spill] sm:$0xff]  ;;  %v14427_v43 = vpop.permute.xlu1 %10505  ;;  %v10392_v1 = vunpack.i.l.bf16 %v17324_v3 }
 0x5e5   : > { %v4016_v27 = vsel %vm17311_vm3, %v10562_v38, %v10492_v57  ;;  %v9011_v57 = vpack.c.bf16 %v13893_v50, %v13890_v24  ;;  %v9113_v6 = vpack.c.bf16 %v17315_v26, %v17314_v13  ;;  %vm17316_vm3 = vcmp.lt.s32.totalorder %v11635_v56, 127  ;;  %v14443_v17 = vpop.permute.xlu0 %10575 }
 0x5e6   : > { %v9006_v37 = vpack.c.bf16 %v4017_v8, %v4016_v27  ;;  %9105 = vmatprep.subr.msk.bf16.mxu1 %vm17046_vm15, %v9103_v53  ;;  %v14417_v7 = vsel %vm17316_vm3, %v10383_v63, %v10443_v22  ;;  %vm17317_vm7 = vmmov %vm17316_vm3  ;;  %v9106_v33 = vpack.c.bf16 %v4009_v46, %v4008_v25  ;;  %v10393_v38 = vunpack.i.h.bf16 %v17324_v3  ;;  %v17325_v8 = vld [vmem:[#allocation9_spill] sm:$0xff] }
 0x5e7   : > { %v14423_v59 = vsel %vm17317_vm7, %v10382_v49, %v10442_v28  ;;  %vm17320_vm6 = vmmov %vm17316_vm3  ;;  %v10452_v52 = vunpack.i.l.bf16 %v17325_v8  ;;  %v17330_v3 = vld [vmem:[#allocation13_spill] sm:$0xff] }
 0x5e8   : > { %9008 = vmatpush1.bf16.msk.msra.mxu0 %vm12711_vm5, %v9006_v37  ;;  %v4102_v62 = vsel %vm17320_vm6, %v10442_v28, %v10387_v30  ;;  %vm17321_vm4 = vmmov %vm17316_vm3  ;;  %v10453_v28 = vunpack.i.h.bf16 %v17325_v8  ;;  %9108 = vmatpush1.bf16.msk.msra.mxu1 %vm12731_vm2, %v9106_v33  ;;  %v9020_v53 = vpack.c.bf16 %v14417_v7, %v14423_v59  ;;  %v10511_v33 = vpop.permute.xlu1 %10510  ;;  %v17331_v8 = vld [vmem:[#allocation43_spill] sm:$0xff]  ;;  %vm17332_vm6 = vcmp.lt.s32.totalorder %v11635_v56, 113 }
 0x5e9   : > { %v4103_v15 = vsel %vm17321_vm4, %v10443_v22, %v10388_v40  ;;  %vm17322_vm13 = vmmov %vm17316_vm3  ;;  %9010 = vmatprep.subr.bf16.mxu0 %v9009_v14  ;;  %v17326_v22 = vld [vmem:[#allocation12_spill] sm:$0xff]  ;;  %9110 = vmatprep.subr.bf16.mxu1 %v9109_v20  ;;  %v10512_v7 = vunpack.i.l.bf16 %v10511_v33  ;;  %v10596_v59 = vpop.permute.xlu0 %10595 }
 0x5ea   : > { %v14437_v55 = vsel %vm17322_vm13, %v10388_v40, %v10448_v19  ;;  %vm17323_vm0 = vmmov %vm17316_vm3  ;;  %v10398_v40 = vunpack.i.h.bf16 %v17326_v22  ;;  %v10397_v25 = vunpack.i.l.bf16 %v17326_v22  ;;  %v9115_v22 = vpack.c.bf16 %v17331_v8, %v17330_v3 }
 0x5eb   : > { %v14441_v36 = vsel %vm17323_vm0, %v10387_v30, %v10447_v47  ;;  %v17327_v30 = vld [vmem:[#allocation10_spill] sm:$0xff]  ;;  %vm17328_vm3 = vmmov %vm17323_vm0  ;;  %v9017_v26 = vpack.c.bf16 %v4103_v15, %v4102_v62 }
 0x5ec   : > { %v10458_v46 = vunpack.i.h.bf16 %v17327_v30  ;;  %v10457_v27 = vunpack.i.l.bf16 %v17327_v30  ;;  %v4111_v37 = vsel %vm17328_vm3, %v10448_v19, %v10383_v63  ;;  %vm17329_vm7 = vmmov %vm17323_vm0  ;;  %9012 = vmatpush1.bf16.msra.mxu0 %v9011_v57  ;;  %v9120_v20 = vpack.c.bf16 %v14437_v55, %v14441_v36  ;;  %9112 = vmatpush1.bf16.msra.mxu1 %v9111_v42 }
 0x5ed   : > { %v4110_v14 = vsel %vm17329_vm7, %v10447_v47, %v10382_v49  ;;  %v10513_v30 = vunpack.i.h.bf16 %v10511_v33  ;;  %9014 = vmatprep.subr.bf16.mxu0 %v9013_v34  ;;  %v14471_v63 = vsel %vm17332_vm6, %v10393_v38, %v10453_v28  ;;  %vm17333_vm4 = vmmov %vm17332_vm6  ;;  %v10598_v49 = vunpack.i.h.bf16 %v10596_v59  ;;  %9114 = vmatprep.subr.bf16.mxu1 %v9113_v6 }
 0x5ee   : > { %v14475_v44 = vsel %vm17333_vm4, %v10392_v1, %v10452_v52  ;;  %v10597_v19 = vunpack.i.l.bf16 %v10596_v59  ;;  %vm17334_vm13 = vmmov %vm17333_vm4  ;;  %v10507_v6 = vunpack.i.l.bf16 %v14427_v43 }
 0x5ef   : > { %v4182_v47 = vsel %vm17334_vm13, %v10452_v52, %v10397_v25  ;;  %vm17335_vm0 = vmmov %vm17333_vm4  ;;  %vm17340_vm13 = vcmp.lt.s32.totalorder %v11635_v56, 127  ;;  %v10508_v52 = vunpack.i.h.bf16 %v14427_v43 }
 0x5f0   : > { %v4183_v57 = vsel %vm17335_vm0, %v10453_v28, %v10398_v40  ;;  %vm17336_vm3 = vmmov %vm17335_vm0  ;;  %v4105_v55 = vsel %vm17340_vm13, %v10598_v49, %v10513_v30  ;;  %9016 = vmatpush1.bf16.msra.mxu0 %v9015_v58  ;;  %v14501_v28 = vpop.permute.xlu1 %10515  ;;  %9116 = vmatpush1.bf16.msra.mxu1 %v9115_v22 }
 0x5f1   : > { %v14483_v34 = vsel %vm17336_vm3, %v10398_v40, %v10458_v46  ;;  %vm17337_vm7 = vmmov %vm17335_vm0  ;;  %9019 = vmatprep.subr.msk.bf16.mxu0 %vm17090_vm8, %v9017_v26  ;;  %v9117_v40 = vpack.c.bf16 %v4111_v37, %v4110_v14  ;;  %v9029_v26 = vpack.c.bf16 %v4183_v57, %v4182_v47 }
 0x5f2   : > { %v14487_v62 = vsel %vm17337_vm7, %v10397_v25, %v10457_v27  ;;  %vm17338_vm6 = vmmov %vm17335_vm0  ;;  %v9032_v25 = vpack.c.bf16 %v14471_v63, %v14475_v44 }
 0x5f3   : > { %v14491_v42 = vsel %vm17338_vm6, %v10458_v46, %v10393_v38  ;;  %vm17339_vm4 = vmmov %vm17335_vm0  ;;  %v10601_v38 = vpop.permute.xlu0 %10600  ;;  %v9132_v46 = vpack.c.bf16 %v14483_v34, %v14487_v62  ;;  %9119 = vmatprep.subr.msk.bf16.mxu1 %vm17091_vm11, %v9117_v40  ;;  %v10578_v40 = vunpack.i.h.bf16 %v14443_v17 }
 0x5f4   : > { %v14495_v15 = vsel %vm17339_vm4, %v10457_v27, %v10392_v1  ;;  %vm17341_vm0 = vmmov %vm17340_vm13  ;;  %v10603_v58 = vunpack.i.h.bf16 %v10601_v38  ;;  %v10602_v27 = vunpack.i.l.bf16 %v10601_v38  ;;  %9022 = vmatpush1.bf16.msk.msra.mxu0 %vm12793_vm12, %v9020_v53  ;;  %v10568_v53 = vunpack.i.h.bf16 %v14395_v10 }
 0x5f5   : > { %v4104_v36 = vsel %vm17341_vm0, %v10597_v19, %v10512_v7  ;;  %vm17342_vm3 = vmmov %vm17341_vm0  ;;  %v9129_v37 = vpack.c.bf16 %v14491_v42, %v14495_v15  ;;  %v10567_v38 = vunpack.i.l.bf16 %v14395_v10  ;;  %v10577_v10 = vunpack.i.l.bf16 %v14443_v17 }
 0x5f6   : > { %v9023_v1 = vpack.c.bf16 %v4105_v55, %v4104_v36  ;;  %v4109_v33 = vsel %vm17342_vm3, %v10508_v52, %v10598_v49  ;;  %vm17343_vm7 = vmmov %vm17341_vm0  ;;  %v4112_v63 = vsel %vm17341_vm0, %v10602_v27, %v10507_v6  ;;  %v10521_v49 = vpop.permute.xlu1 %10520  ;;  %v17348_v36 = vld [vmem:[#allocation19_spill] sm:$0xff] }
 0x5f7   : > { %v4108_v43 = vsel %vm17343_vm7, %v10507_v6, %v10597_v19  ;;  %vm17344_vm6 = vmmov %vm17341_vm0  ;;  %v10503_v19 = vunpack.i.h.bf16 %v14385_v18  ;;  %v10523_v47 = vunpack.i.h.bf16 %v10521_v49  ;;  %v10522_v57 = vunpack.i.l.bf16 %v10521_v49 }
 0x5f8   : > { %v4101_v14 = vsel %vm17344_vm6, %v10513_v30, %v10603_v58  ;;  %vm17345_vm4 = vmmov %vm17341_vm0  ;;  %9025 = vmatprep.subr.msk.bf16.mxu0 %vm17090_vm8, %v9023_v1  ;;  %v10606_v30 = vpop.permute.xlu0 %10605  ;;  %v9026_v15 = vpack.c.bf16 %v4109_v33, %v4108_v43  ;;  %vm17349_vm3 = vnez %v17348_v36  ;;  %v10502_v6 = vunpack.i.l.bf16 %v14385_v18 }
 0x5f9   : > { %v4113_v22 = vsel %vm17345_vm4, %v10603_v58, %v10508_v52  ;;  %vm17346_vm13 = vmmov %vm17341_vm0  ;;  %9122 = vmatpush1.bf16.msk.msra.mxu1 %vm17349_vm3, %v9120_v20  ;;  %v10607_v52 = vunpack.i.l.bf16 %v10606_v30  ;;  %v10518_v1 = vunpack.i.h.bf16 %v14501_v28  ;;  %v10517_v58 = vunpack.i.l.bf16 %v14501_v28 }
 0x5fa   : > { %v4100_v59 = vsel %vm17346_vm13, %v10512_v7, %v10602_v27  ;;  %v9123_v42 = vpack.c.bf16 %v4113_v22, %v4112_v63  ;;  %v10608_v7 = vunpack.i.h.bf16 %v10606_v30  ;;  %vm17350_vm7 = vcmp.lt.s32.totalorder %v11635_v56, 113  ;;  %9028 = vmatpush1.bf16.msk.msra.mxu0 %vm12793_vm12, %v9026_v15  ;;  %v10571_v18 = vpop.permute.xlu1 %10570 }
 0x5fb   : > { %v9126_v55 = vpack.c.bf16 %v4101_v14, %v4100_v59  ;;  %vm17351_vm6 = vmmov %vm17350_vm7  ;;  %v10573_v33 = vunpack.i.h.bf16 %v10571_v18  ;;  %v10572_v43 = vunpack.i.l.bf16 %v10571_v18  ;;  %v17352_v14 = vld [vmem:[#allocation25_spill] sm:$0xff] }
 0x5fc   : > { %9125 = vmatprep.subr.msk.bf16.mxu1 %vm17091_vm11, %v9123_v42  ;;  %v4185_v20 = vsel %vm17350_vm7, %v10608_v7, %v10523_v47  ;;  %v4184_v27 = vsel %vm17351_vm6, %v10607_v52, %v10522_v57  ;;  %vm17353_vm4 = vnez %v17352_v14  ;;  %v10611_v22 = vpop.permute.xlu0 %10610  ;;  %vm17354_vm13 = vmmov %vm17351_vm6  ;;  %vm17356_vm7 = vcmp.lt.s32.totalorder %v11635_v56, 112 }
 0x5fd   : > { %9031 = vmatprep.subr.msk.bf16.mxu0 %vm17353_vm4, %v9029_v26  ;;  %v9035_v59 = vpack.c.bf16 %v4185_v20, %v4184_v27  ;;  %v4189_v28 = vsel %vm17354_vm13, %v10518_v1, %v10608_v7  ;;  %vm17355_vm0 = vmmov %vm17351_vm6  ;;  %9128 = vmatpush1.bf16.msk.msra.mxu1 %vm17349_vm3, %v9126_v55  ;;  %v10613_v49 = vunpack.i.h.bf16 %v10611_v22  ;;  %v10612_v30 = vunpack.i.l.bf16 %v10611_v22  ;;  %v17360_v7 = vld [vmem:[#allocation35_spill] sm:$0xff] }
 0x5fe   : > { %v4188_v63 = vsel %vm17355_vm0, %v10517_v58, %v10607_v52  ;;  %v4267_v17 = vsel %vm17356_vm7, %v10503_v19, %v10568_v53  ;;  %vm17357_vm6 = vmmov %vm17356_vm7  ;;  %vm17361_vm13 = vnez %v17360_v7  ;;  %9034 = vmatpush1.bf16.msk.msra.mxu0 %vm12711_vm5, %v9032_v25 }
 0x5ff   : > { %v4266_v42 = vsel %vm17357_vm6, %v10502_v6, %v10567_v38  ;;  %vm17358_vm9 = vmmov %vm17357_vm6  ;;  %9131 = vmatprep.subr.msk.bf16.mxu1 %vm17361_vm13, %v9129_v37  ;;  %v4181_v55 = vsel %vm17355_vm0, %v10523_v47, %v10613_v49  ;;  %v9038_v47 = vpack.c.bf16 %v4189_v28, %v4188_v63  ;;  %9037 = vmatprep.subr.msk.bf16.mxu0 %vm17353_vm4, %v9035_v59 }
 0x600   : > { %v4262_v26 = vsel %vm17358_vm9, %v10567_v38, %v10572_v43  ;;  %vm17359_vm11 = vmmov %vm17357_vm6  ;;  %v10581_v38 = vpop.permute.xlu1 %10580 }
 0x601   : > { %v4263_v15 = vsel %vm17359_vm11, %v10568_v53, %v10573_v33  ;;  %vm17362_vm8 = vmmov %vm17355_vm0  ;;  %v4271_v53 = vsel %vm17358_vm9, %v10578_v40, %v10503_v19  ;;  %v10583_v22 = vunpack.i.h.bf16 %v10581_v38  ;;  %9134 = vmatpush1.bf16.msk.msra.mxu1 %vm12731_vm2, %v9132_v46  ;;  %v10582_v19 = vunpack.i.l.bf16 %v10581_v38 }
 0x602   : > { %v4193_v52 = vsel %vm17362_vm8, %v10613_v49, %v10518_v1  ;;  %vm17363_vm7 = vmmov %vm17355_vm0  ;;  %v10616_v1 = vpop.permute.xlu0 %10615  ;;  %v9041_v59 = vpack.c.bf16 %v4263_v15, %v4262_v26  ;;  %9040 = vmatpush1.bf16.msk.msra.mxu0 %vm12711_vm5, %v9038_v47  ;;  %v9044_v49 = vpack.c.bf16 %v4267_v17, %v4266_v42 }
 0x603   : > { %v4180_v20 = vsel %vm17363_vm7, %v10522_v57, %v10612_v30  ;;  %vm17364_vm6 = vmmov %vm17355_vm0  ;;  %v10617_v28 = vunpack.i.l.bf16 %v10616_v1 }
 0x604   : > { %v4192_v27 = vsel %vm17364_vm6, %v10612_v30, %v10517_v58  ;;  %vm17365_vm11 = vmmov %vm17358_vm9  ;;  %v9138_v25 = vpack.c.bf16 %v4181_v55, %v4180_v20  ;;  %v17374_v20 = vld [vmem:[#allocation34_spill] sm:$0xff] }
 0x605   : > { %v4270_v37 = vsel %vm17365_vm11, %v10577_v10, %v10502_v6  ;;  %v9135_v18 = vpack.c.bf16 %v4193_v52, %v4192_v27  ;;  %vm17366_vm8 = vmmov %vm17358_vm9  ;;  %v10618_v6 = vunpack.i.h.bf16 %v10616_v1 }
 0x606   : > { %v4258_v57 = vsel %vm17366_vm8, %v10572_v43, %v10577_v10  ;;  %vm17367_vm0 = vmmov %vm17366_vm8  ;;  %v10586_v10 = vpop.permute.xlu1 %10585  ;;  %v17368_v43 = vld [vmem:[#allocation21_spill] sm:$0xff]  ;;  %v10621_v34 = vpop.permute.xlu0 %10620  ;;  %v9141_v62 = vpack.c.bf16 %v4271_v53, %v4270_v37 }
 0x607   : > { %v4259_v58 = vsel %vm17367_vm0, %v10573_v33, %v10578_v40  ;;  %9137 = vmatprep.subr.msk.bf16.mxu1 %vm17361_vm13, %v9135_v18  ;;  %v10588_v40 = vunpack.i.h.bf16 %v10586_v10  ;;  %v10587_v33 = vunpack.i.l.bf16 %v10586_v10  ;;  %vm17369_vm7 = vnez %v17368_v43  ;;  %vm17370_vm6 = vmmov %vm17367_vm0 }
 0x608   : > { %9043 = vmatprep.subr.msk.bf16.mxu0 %vm17369_vm7, %v9041_v59  ;;  %9140 = vmatpush1.bf16.msk.msra.mxu1 %vm12731_vm2, %v9138_v25  ;;  %v10623_v46 = vunpack.i.h.bf16 %v10621_v34  ;;  %v10622_v63 = vunpack.i.l.bf16 %v10621_v34  ;;  %v9144_v30 = vpack.c.bf16 %v4259_v58, %v4258_v57  ;;  %v4269_v26 = vsel %vm17370_vm6, %v10583_v22, %v10618_v6  ;;  %vm17371_vm9 = vmmov %vm17367_vm0 }
 0x609   : > { %v4268_v15 = vsel %vm17371_vm9, %v10582_v19, %v10617_v28  ;;  %vm17372_vm11 = vmmov %vm17367_vm0  ;;  %9045 = vmatpush1.bf16.msra.mxu0 %v9044_v49 }
 0x60a   : > { %v4264_v55 = vsel %vm17372_vm11, %v10617_v28, %v10587_v33  ;;  %vm17373_vm8 = vmmov %vm17367_vm0  ;;  %vm17375_vm0 = vnez %v17374_v20  ;;  %v10591_v53 = vpop.permute.xlu1 %10590  ;;  %v10626_v37 = vpop.permute.xlu0 %10625  ;;  %v9049_v18 = vpack.c.bf16 %v4269_v26, %v4268_v15 }
 0x60b   : > { %v4265_v52 = vsel %vm17373_vm8, %v10618_v6, %v10588_v40  ;;  %9143 = vmatprep.subr.msk.bf16.mxu1 %vm17375_vm0, %v9141_v62  ;;  %vm17376_vm13 = vmmov %vm17370_vm6  ;;  %v10593_v58 = vunpack.i.h.bf16 %v10591_v53  ;;  %v10592_v25 = vunpack.i.l.bf16 %v10591_v53  ;;  %v10628_v6 = vunpack.i.h.bf16 %v10626_v37 }
 0x60c   : > { %v4261_v27 = vsel %vm17376_vm13, %v10588_v40, %v10623_v46  ;;  %vm17377_vm4 = vmmov %vm17370_vm6  ;;  %v9046_v47 = vpack.c.bf16 %v4265_v52, %v4264_v55  ;;  %9145 = vmatpush1.bf16.msra.mxu1 %v9144_v30  ;;  %v10627_v28 = vunpack.i.l.bf16 %v10626_v37 }
 0x60d   : > { %v4273_v17 = vsel %vm17377_vm4, %v10623_v46, %v10583_v22  ;;  %vm17378_vm6 = vmmov %vm17377_vm4 }
 0x60e   : > { %v4260_v42 = vsel %vm17378_vm6, %v10587_v33, %v10622_v63  ;;  %vm17379_vm9 = vmmov %vm17377_vm4  ;;  %9048 = vmatprep.subr.msk.bf16.mxu0 %vm17369_vm7, %v9046_v47  ;;  %v10631_v22 = vpop.permute.xlu1 %10630  ;;  %v10636_v40 = vpop.permute.xlu0 %10635  ;;  %v7403_v33 = vld [vmem:[%s16450_s3 + $0xe0] sm:$0xff]  ;;  %vm17380_vm4 = vcmp.lt.s32.totalorder %v11635_v56, 111 }
 0x60f   : > { %v4272_v38 = vsel %vm17379_vm9, %v10622_v63, %v10582_v19  ;;  %v9149_v57 = vpack.c.bf16 %v4261_v27, %v4260_v42  ;;  %9050 = vmatpush1.bf16.msra.mxu0 %v9049_v18  ;;  %v7399_v19 = vld [vmem:[%s16450_s3 + $0xc0] sm:$0xff]  ;;  %v10633_v59 = vunpack.i.h.bf16 %v10631_v22  ;;  %v10632_v10 = vunpack.i.l.bf16 %v10631_v22  ;;  %vm17381_vm13 = vmmov %vm17380_vm4 }
 0x610   : > { %v9146_v1 = vpack.c.bf16 %v4273_v17, %v4272_v38  ;;  %v10638_v34 = vunpack.i.h.bf16 %v10636_v40  ;;  %v10637_v62 = vunpack.i.l.bf16 %v10636_v40  ;;  %v4347_v46 = vsel %vm17380_vm4, %v10593_v58, %v10628_v6  ;;  %vm17382_vm11 = vmmov %vm17380_vm4  ;;  %v7402_v17 = vld [vmem:[%s16450_s3 + $0xd8] sm:$0xff] }
 0x611   : > { %v4346_v63 = vsel %vm17381_vm13, %v10592_v25, %v10627_v28  ;;  %v4342_v49 = vsel %vm17382_vm11, %v10627_v28, %v10632_v10  ;;  %vm17383_vm8 = vmmov %vm17380_vm4  ;;  %v17390_v28 = vld [vmem:[#allocation31_spill] sm:$0xff] }
 0x612   : > { %9148 = vmatprep.subr.msk.bf16.mxu1 %vm17375_vm0, %v9146_v1  ;;  %v4343_v30 = vsel %vm17383_vm8, %v10628_v6, %v10633_v59  ;;  %4607 = vmatmul.mubr.f32.vlgmr.msra.gmra.mrb[16].mxu0 %v7399_v19  ;;  %vm17384_vm6 = vmmov %vm17380_vm4  ;;  %v10641_v27 = vpop.permute.xlu1 %10640  ;;  %v10651_v42 = vpop.permute.xlu0 %10650  ;;  %v9054_v53 = vpack.c.bf16 %v4347_v46, %v4346_v63  ;;  %v7406_v1 = vld [vmem:[%s16450_s3 + $0xf8] sm:$0xff]  ;;  %vm17391_vm13 = vnez %v17390_v28 }
 0x613   : > { %9150 = vmatpush1.bf16.msra.mxu1 %v9149_v57  ;;  %v4339_v26 = vsel %vm17384_vm6, %v10633_v59, %v10638_v34  ;;  %vm17385_vm9 = vmmov %vm17380_vm4  ;;  %4612 = vmatprep.mubr.f32.mxu0 %v7403_v33  ;;  %v9051_v38 = vpack.c.bf16 %v4343_v30, %v4342_v49  ;;  %v10643_v18 = vunpack.i.h.bf16 %v10641_v27  ;;  %v10642_v57 = vunpack.i.l.bf16 %v10641_v27  ;;  %v17388_v6 = vld [vmem:[#allocation14_spill] sm:$0xff]  ;;  %v7408_v27 = vld [vmem:[%s16450_s3 + $0x108] sm:$0xff] }
 0x614   : > { %v4351_v15 = vsel %vm17385_vm9, %v10638_v34, %v10593_v58  ;;  %vm17386_vm0 = vmmov %vm17380_vm4  ;;  %v10653_v58 = vunpack.i.h.bf16 %v10651_v42 }
 0x615   : > { %v4338_v55 = vsel %vm17386_vm0, %v10632_v10, %v10637_v62  ;;  %vm17387_vm4 = vmmov %vm17386_vm0  ;;  %vm17389_vm0 = vnez %v17388_v6 }
 0x616   : > { %v4350_v52 = vsel %vm17387_vm4, %v10637_v62, %v10592_v25  ;;  %4785 = vmatmul.mubr.f32.vlgmr.msra.gmra.mrb[16].mxu1 %v7399_v19  ;;  %v9154_v37 = vpack.c.bf16 %v4339_v26, %v4338_v55  ;;  %v10652_v25 = vunpack.i.l.bf16 %v10651_v42  ;;  %4613 = vmatmul.mubr.f32.gmra.mrb[18].mxu0 %v7402_v17  ;;  %v10646_v22 = vpop.permute.xlu1 %10645  ;;  %v7405_v19 = vld [vmem:[%s16450_s3 + $0xf0] sm:$0xff]  ;;  %v10656_v40 = vpop.permute.xlu0 %10655  ;;  %vm17392_vm11 = vmmov %vm17387_vm4 }
 0x617   : > { %4790 = vmatprep.mubr.f32.mxu1 %v7403_v33  ;;  %v9151_v47 = vpack.c.bf16 %v4351_v15, %v4350_v52  ;;  %9053 = vmatprep.subr.msk.bf16.mxu0 %vm17389_vm0, %v9051_v38  ;;  %v10648_v59 = vunpack.i.h.bf16 %v10646_v22  ;;  %v10647_v10 = vunpack.i.l.bf16 %v10646_v22  ;;  %v7409_v33 = vld [vmem:[%s16450_s3 + $0x110] sm:$0xff]  ;;  %v10658_v34 = vunpack.i.h.bf16 %v10656_v40  ;;  %vm17393_vm8 = vmmov %vm17387_vm4 }
 0x618   : > { %9056 = vmatpush1.bf16.msk.msra.mxu0 %vm12793_vm12, %v9054_v53  ;;  %4618 = vmatprep.mubr.f32.mxu0 %v7406_v1  ;;  %v10657_v62 = vunpack.i.l.bf16 %v10656_v40  ;;  %v4349_v46 = vsel %vm17392_vm11, %v10643_v18, %v10653_v58  ;;  %v4348_v63 = vsel %vm17393_vm8, %v10642_v57, %v10652_v25  ;;  %vm17394_vm6 = vmmov %vm17387_vm4 }
 0x619   : > { %9153 = vmatprep.subr.msk.bf16.mxu1 %vm17391_vm13, %v9151_v47  ;;  %v4344_v49 = vsel %vm17394_vm6, %v10652_v25, %v10647_v10  ;;  %vm17395_vm9 = vmmov %vm17387_vm4  ;;  %v4341_v26 = vsel %vm17387_vm4, %v10648_v59, %v10658_v34  ;;  %v9060_v38 = vpack.c.bf16 %v4349_v46, %v4348_v63  ;;  %v17399_v47 = vmov 0.0  }
 0x61a   : > { %4791 = vmatmul.mubr.f32.gmra.mrb[18].mxu1 %v7402_v17  ;;  %v4345_v30 = vsel %vm17395_vm9, %v10653_v58, %v10648_v59  ;;  %4619 = vmatmul.mubr.f32.gmra.mrb[20].mxu0 %v7405_v19  ;;  %vm17396_vm7 = vmmov %vm17387_vm4 }
 0x61b   : > { %9156 = vmatpush1.bf16.msk.msra.mxu1 %vm17349_vm3, %v9154_v37  ;;  %4796 = vmatprep.mubr.f32.mxu1 %v7406_v1  ;;  %v4353_v15 = vsel %vm17396_vm7, %v10658_v34, %v10643_v18  ;;  %vm17397_vm2 = vmmov %vm17387_vm4  ;;  %v9057_v17 = vpack.c.bf16 %v4345_v30, %v4344_v49  ;;  %v7401_v37 = vld [vmem:[%s16450_s3 + $0xd0] sm:$0xff]  ;;  %v7404_v1 = vld [vmem:[%s16450_s3 + $0xe8] sm:$0xff] }
 0x61c   : > { %v4340_v55 = vsel %vm17397_vm2, %v10647_v10, %v10657_v62  ;;  %vm17398_vm11 = vmmov %vm17397_vm2  ;;  %4624 = vmatprep.mubr.f32.mxu0 %v7409_v33  ;;  %vm17400_vm2 = vcmask 261120   ;;  %v7407_v18 = vld [vmem:[%s16450_s3 + $0x100] sm:$0xff] }
 0x61d   : > { %v4352_v52 = vsel %vm17398_vm11, %v10657_v62, %v10642_v57  ;;  %v9160_v53 = vpack.c.bf16 %v4341_v26, %v4340_v55  ;;  %9059 = vmatprep.subr.msk.bf16.mxu0 %vm17389_vm0, %v9057_v17  ;;  %vm17401_vm7 = vmmov %vm17400_vm2  ;;  %v7410_v57 = vld [vmem:[%s16450_s3 + $0x118] sm:$0xff] }
 0x61e   : > { %4797 = vmatmul.mubr.f32.gmra.mrb[20].mxu1 %v7405_v19  ;;  %v9157_v42 = vpack.c.bf16 %v4353_v15, %v4352_v52  ;;  %4625 = vmatmul.mubr.f32.gmra.mrb[22].mxu0 %v7408_v27  ;;  %vm17402_vm8 = vmmov %vm17400_vm2 }
 0x61f   : > { %4802 = vmatprep.mubr.f32.mxu1 %v7409_v33  ;;  %9062 = vmatpush1.bf16.msk.msra.mxu0 %vm12793_vm12, %v9060_v38  ;;  %vm17403_vm6 = vmmov %vm17400_vm2 }
 0x620   : > { %9159 = vmatprep.subr.msk.bf16.mxu1 %vm17391_vm13, %v9157_v42  ;;  %4695 = vmatprep.mubr.f32.mxu0 %v17399_v47  ;;  %vm17404_vm9 = vmmov %vm17400_vm2 }
 0x621   : > { %9162 = vmatpush1.bf16.msk.msra.mxu1 %vm17349_vm3, %v9160_v53  ;;  %vm17405_vm4 = vmmov %vm17400_vm2 }
 0x622   : > { %4803 = vmatmul.mubr.f32.gmra.mrb[22].mxu1 %v7408_v27  ;;  %7411 = vmatmul.mubr.msk.f32.vlgmr.msra.gmra.mrb[16].mxu0 %vm17400_vm2, %v7401_v37  ;;  %vm17406_vm11 = vmmov %vm17400_vm2 }
 0x623   : > { %4873 = vmatprep.mubr.f32.mxu1 %v17399_v47  ;;  %4701 = vmatprep.mubr.f32.mxu0 %v17399_v47 }
 0x626   : > { %7415 = vmatmul.mubr.msk.f32.vlgmr.msra.gmra.mrb[16].mxu1 %vm17401_vm7, %v7401_v37  ;;  %7412 = vmatmul.mubr.msk.f32.gmra.mrb[18].mxu0 %vm17402_vm8, %v7404_v1 }
 0x627   : > { %4879 = vmatprep.mubr.f32.mxu1 %v17399_v47  ;;  %4707 = vmatprep.mubr.f32.mxu0 %v17399_v47 }
 0x62a   : > { %7416 = vmatmul.mubr.msk.f32.gmra.mrb[18].mxu1 %vm17403_vm6, %v7404_v1  ;;  %7413 = vmatmul.mubr.msk.f32.gmra.mrb[20].mxu0 %vm17404_vm9, %v7407_v18 }
 0x62b   : > { %4885 = vmatprep.mubr.f32.mxu1 %v17399_v47  ;;  %4713 = vmatprep.mubr.f32.mxu0 %v17399_v47 }
 0x62e   : > { %7417 = vmatmul.mubr.msk.f32.gmra.mrb[20].mxu1 %vm17405_vm4, %v7407_v18  ;;  %7414 = vmatmul.mubr.msk.f32.gmra.mrb[22].mxu0 %vm17406_vm11, %v7410_v57 }
 0x62f   : > { %4891 = vmatprep.mubr.f32.mxu1 %v17399_v47 }
 0x632   : > { %7418 = vmatmul.mubr.msk.f32.gmra.mrb[22].mxu1 %vm17400_vm2, %v7410_v57 }
 0x6f5   : > { %v4697_v58 = vpop.f32.mrb[16].mxu0 }
 0x6f6   : > { %v4914_v25 = vmul.f32 0.2, %v4697_v58  ;;  %v4699_v22 = vpop.f32.mrb[17].mxu0  ;;  %vm4898_vm7 = vcmp.ge.f32.partialorder %v4697_v58, 0.0 }
 0x6f7   : > { %v4915_v19 = vmul.f32 0.2, %v4699_v22  ;;  %vm4899_vm8 = vcmp.ge.f32.partialorder %v4699_v22, 0.0 }
 0x6f8   : > { %v14719_v62 = vsel %vm4898_vm7, %v4697_v58, %v4914_v25 }
 0x6f9   : > { %v4875_v59 = vpop.f32.mrb[16].mxu1  ;;  %v4703_v34 = vpop.f32.mrb[18].mxu0  ;;  %17407 = vst [vmem:[#allocation16_spill] sm:$0xff] %v14719_v62  ;;  %v14721_v49 = vsel %vm4899_vm8, %v4699_v22, %v4915_v19 }
 0x6fa   : > { %vm4900_vm6 = vcmp.ge.f32.partialorder %v4875_v59, 0.0  ;;  %v4916_v10 = vmul.f32 0.2, %v4875_v59  ;;  %v4877_v40 = vpop.f32.mrb[17].mxu1  ;;  %vm4902_vm4 = vcmp.ge.f32.partialorder %v4703_v34, 0.0  ;;  %v4705_v63 = vpop.f32.mrb[19].mxu0 }
 0x6fb   : > { %vm4901_vm9 = vcmp.ge.f32.partialorder %v4877_v40, 0.0  ;;  %v4917_v33 = vmul.f32 0.2, %v4877_v40  ;;  %v4918_v46 = vmul.f32 0.2, %v4703_v34  ;;  %vm4903_vm11 = vcmp.ge.f32.partialorder %v4705_v63, 0.0 }
 0x6fc   : > { %v14723_v30 = vsel %vm4900_vm6, %v4875_v59, %v4916_v10  ;;  %v4919_v26 = vmul.f32 0.2, %v4705_v63 }
 0x6fd   : > { %17408 = vst [vmem:[#allocation24_spill] sm:$0xff] %v14723_v30  ;;  %v4881_v15 = vpop.f32.mrb[18].mxu1  ;;  %v14725_v55 = vsel %vm4901_vm9, %v4877_v40, %v4917_v33  ;;  %v14727_v52 = vsel %vm4902_vm4, %v4703_v34, %v4918_v46  ;;  %v4709_v53 = vpop.f32.mrb[20].mxu0 }
 0x6fe   : > { %17409 = vst [vmem:[#allocation30_spill] sm:$0xff] %v14725_v55  ;;  %17410 = vst [vmem:[#allocation17_spill] sm:$0xff] %v14727_v52  ;;  %vm4904_vm2 = vcmp.ge.f32.partialorder %v4881_v15, 0.0  ;;  %v4920_v27 = vmul.f32 0.2, %v4881_v15  ;;  %v4883_v17 = vpop.f32.mrb[19].mxu1  ;;  %v14729_v42 = vsel %vm4903_vm11, %v4705_v63, %v4919_v26  ;;  %v14733_v37 = vpack.i.bf16 %v14727_v52, %v14719_v62 }
 0x6ff   : > { %vm4905_vm7 = vcmp.ge.f32.partialorder %v4883_v17, 0.0  ;;  %v4921_v38 = vmul.f32 0.2, %v4883_v17  ;;  %vm4906_vm8 = vcmp.ge.f32.partialorder %v4709_v53, 0.0  ;;  %v4922_v18 = vmul.f32 0.2, %v4709_v53 }
 0x700   : > { %v14735_v1 = vsel %vm4904_vm2, %v4881_v15, %v4920_v27  ;;  %v4711_v57 = vpop.f32.mrb[21].mxu0  ;;  %v14739_v58 = vpack.i.bf16 %v14729_v42, %v14721_v49  ;;  %10660 = vrot.lane.b32.xlu1 %v14733_v37, %s11330_s19 }
 0x701   : > { %17411 = vst [vmem:[#allocation29_spill] sm:$0xff] %v14735_v1  ;;  %v14741_v25 = vsel %vm4905_vm7, %v4883_v17, %v4921_v38  ;;  %vm4907_vm6 = vcmp.ge.f32.partialorder %v4711_v57, 0.0  ;;  %v4923_v22 = vmul.f32 0.2, %v4711_v57  ;;  %v4887_v19 = vpop.f32.mrb[20].mxu1  ;;  %v14747_v59 = vpack.i.bf16 %v14735_v1, %v14723_v30  ;;  %v4715_v26 = vpop.f32.mrb[22].mxu0 }
 0x702   : > { %17412 = vst [vmem:[#allocation18_spill] sm:$0xff] %v14741_v25  ;;  %v14749_v10 = vsel %vm4906_vm8, %v4709_v53, %v4922_v18  ;;  %vm4908_vm9 = vcmp.ge.f32.partialorder %v4887_v19, 0.0  ;;  %v4924_v40 = vmul.f32 0.2, %v4887_v19  ;;  %v4889_v33 = vpop.f32.mrb[21].mxu1  ;;  %10720 = vrot.lane.b32.xlu0 %v14739_v58, %s11330_s19  ;;  %v14755_v34 = vpack.i.bf16 %v14741_v25, %v14725_v55  ;;  %v4717_v17 = vpop.f32.mrb[23].mxu0 }
 0x703   : > { %17413 = vst [vmem:[#allocation27_spill] sm:$0xff] %v14749_v10  ;;  %v14757_v46 = vsel %vm4907_vm6, %v4711_v57, %v4923_v22  ;;  %vm4909_vm4 = vcmp.ge.f32.partialorder %v4889_v33, 0.0  ;;  %v4925_v63 = vmul.f32 0.2, %v4889_v33  ;;  %vm4910_vm11 = vcmp.ge.f32.partialorder %v4715_v26, 0.0 }
 0x704   : > { %17414 = vst [vmem:[#allocation28_spill] sm:$0xff] %v14757_v46  ;;  %v14759_v15 = vsel %vm4908_vm9, %v4887_v19, %v4924_v40  ;;  %v4926_v27 = vmul.f32 0.2, %v4715_v26  ;;  %vm4911_vm2 = vcmp.ge.f32.partialorder %v4717_v17, 0.0  ;;  %v4927_v53 = vmul.f32 0.2, %v4717_v17  ;;  %10665 = vrot.lane.b32.xlu1 %v14747_v59, %s11330_s19 }
 0x705   : > { %17415 = vst [vmem:[#allocation11_spill] sm:$0xff] %v14759_v15  ;;  %v14761_v38 = vsel %vm4909_vm4, %v4889_v33, %v4925_v63  ;;  %v4893_v18 = vpop.f32.mrb[22].mxu1  ;;  %vm17421_vm6 = vcmp.lt.s32.totalorder %v11635_v56, 17 }
 0x706   : > { %17416 = vst [vmem:[#allocation23_spill] sm:$0xff] %v14761_v38  ;;  %v14765_v8 = vsel %vm4910_vm11, %v4715_v26, %v4926_v27  ;;  %vm4912_vm7 = vcmp.ge.f32.partialorder %v4893_v18, 0.0  ;;  %v4928_v57 = vmul.f32 0.2, %v4893_v18  ;;  %v4895_v22 = vpop.f32.mrb[23].mxu1  ;;  %10725 = vrot.lane.b32.xlu0 %v14755_v34, %s11330_s19  ;;  %v14769_v19 = vsel %vm4911_vm2, %v4717_v17, %v4927_v53  ;;  %vm17422_vm9 = vmmov %vm17421_vm6 }
 0x707   : > { %17417 = vst [vmem:[#allocation26_spill] sm:$0xff] %v14765_v8  ;;  %17418 = vst [vmem:[#allocation9_spill] sm:$0xff] %v14769_v19  ;;  %vm4913_vm8 = vcmp.ge.f32.partialorder %v4895_v22, 0.0  ;;  %v4929_v40 = vmul.f32 0.2, %v4895_v22  ;;  %v14781_v26 = vpack.i.bf16 %v14765_v8, %v14749_v10  ;;  %v14785_v27 = vpack.i.bf16 %v14769_v19, %v14757_v46 }
 0x708   : > { %v14771_v33 = vsel %vm4912_vm7, %v4893_v18, %v4928_v57  ;;  %10670 = vrot.lane.b32.xlu1 %v14733_v37, %s11331_s20  ;;  %v7420_v18 = vld [vmem:[%s16450_s3 + $0x128] sm:$0xff]  ;;  %vm17423_vm4 = vmmov %vm17421_vm6 }
 0x709   : > { %17419 = vst [vmem:[#allocation12_spill] sm:$0xff] %v14771_v33  ;;  %v14773_v63 = vsel %vm4913_vm8, %v4895_v22, %v4929_v40  ;;  %v14789_v17 = vpack.i.bf16 %v14771_v33, %v14759_v15  ;;  %5835 = vmatprep.mubr.f32.mxu0 %v7420_v18  ;;  %6013 = vmatprep.mubr.f32.mxu1 %v7420_v18  ;;  %vm17424_vm11 = vmmov %vm17423_vm4 }
 0x70a   : > { %17420 = vst [vmem:[#allocation10_spill] sm:$0xff] %v14773_v63  ;;  %10730 = vrot.lane.b32.xlu0 %v14739_v58, %s11331_s20  ;;  %v14795_v53 = vpack.i.bf16 %v14773_v63, %v14761_v38  ;;  %vm17425_vm2 = vmmov %vm17423_vm4 }
 0x70b   : > { %vm17426_vm7 = vmmov %vm17425_vm2 }
 0x70c   : > { %10675 = vrot.lane.b32.xlu1 %v14747_v59, %s11331_s20  ;;  %vm17427_vm8 = vmmov %vm17425_vm2 }
 0x70e   : > { %10735 = vrot.lane.b32.xlu0 %v14755_v34, %s11331_s20 }
 0x710   : > { %10680 = vrot.lane.b32.xlu1 %v14733_v37, %s11332_s25 }
 0x712   : > { %10740 = vrot.lane.b32.xlu0 %v14739_v58, %s11332_s25 }
 0x714   : > { %10685 = vrot.lane.b32.xlu1 %v14747_v59, %s11332_s25 }
 0x716   : > { %10745 = vrot.lane.b32.xlu0 %v14755_v34, %s11332_s25 }
 0x718   : > { %10690 = vrot.lane.b32.xlu1 %v14733_v37, %s11334_s27 }
 0x71a   : > { %10750 = vrot.lane.b32.xlu0 %v14739_v58, %s11334_s27 }
 0x71c   : > { %10695 = vrot.lane.b32.xlu1 %v14747_v59, %s11334_s27 }
 0x71e   : > { %10755 = vrot.lane.b32.xlu0 %v14755_v34, %s11334_s27 }
 0x720   : > { %10700 = vrot.lane.b32.xlu1 %v14733_v37, %s11337_s28 }
 0x722   : > { %10760 = vrot.lane.b32.xlu0 %v14739_v58, %s11337_s28 }
 0x724   : > { %10705 = vrot.lane.b32.xlu1 %v14747_v59, %s11337_s28 }
 0x726   : > { %10765 = vrot.lane.b32.xlu0 %v14755_v34, %s11337_s28 }
 0x728   : > { %10710 = vrot.lane.b32.xlu1 %v14733_v37, %s11339_s29 }
 0x72a   : > { %10770 = vrot.lane.b32.xlu0 %v14739_v58, %s11339_s29 }
 0x72c   : > { %10715 = vrot.lane.b32.xlu1 %v14747_v59, %s11339_s29 }
 0x72e   : > { %10775 = vrot.lane.b32.xlu0 %v14755_v34, %s11339_s29 }
 0x730   : > { %10780 = vrot.lane.b32.xlu1 %v14781_v26, %s11330_s19 }
 0x732   : > { %10845 = vrot.lane.b32.xlu0 %v14785_v27, %s11330_s19 }
 0x734   : > { %10785 = vrot.lane.b32.xlu1 %v14789_v17, %s11330_s19 }
 0x736   : > { %10850 = vrot.lane.b32.xlu0 %v14795_v53, %s11330_s19 }
 0x738   : > { %10790 = vrot.lane.b32.xlu1 %v14781_v26, %s11331_s20 }
 0x73a   : > { %10855 = vrot.lane.b32.xlu0 %v14785_v27, %s11331_s20 }
 0x73c   : > { %10795 = vrot.lane.b32.xlu1 %v14789_v17, %s11331_s20 }
 0x73e   : > { %10860 = vrot.lane.b32.xlu0 %v14795_v53, %s11331_s20 }
 0x740   : > { %10800 = vrot.lane.b32.xlu1 %v14781_v26, %s11332_s25 }
 0x742   : > { %10865 = vrot.lane.b32.xlu0 %v14785_v27, %s11332_s25 }
 0x744   : > { %10805 = vrot.lane.b32.xlu1 %v14789_v17, %s11332_s25 }
 0x746   : > { %10870 = vrot.lane.b32.xlu0 %v14795_v53, %s11332_s25 }
 0x748   : > { %10810 = vrot.lane.b32.xlu1 %v14781_v26, %s11334_s27 }
 0x74a   : > { %10875 = vrot.lane.b32.xlu0 %v14785_v27, %s11334_s27 }
 0x74c   : > { %10815 = vrot.lane.b32.xlu1 %v14789_v17, %s11334_s27 }
 0x74e   : > { %10880 = vrot.lane.b32.xlu0 %v14795_v53, %s11334_s27 }
 0x750   : > { %10820 = vrot.lane.b32.xlu1 %v14733_v37, %s11340_s30 }
 0x752   : > { %10885 = vrot.lane.b32.xlu0 %v14739_v58, %s11340_s30 }
 0x754   : > { %10825 = vrot.lane.b32.xlu1 %v14781_v26, %s11337_s28 }
 0x756   : > { %10895 = vrot.lane.b32.xlu0 %v14755_v34, %s11340_s30 }
 0x758   : > { %10830 = vrot.lane.b32.xlu1 %v14789_v17, %s11337_s28 }
 0x75a   : > { %10915 = vrot.lane.b32.xlu0 %v14785_v27, %s11337_s28 }
 0x75c   : > { %10835 = vrot.lane.b32.xlu1 %v14781_v26, %s11339_s29 }
 0x75e   : > { %10920 = vrot.lane.b32.xlu0 %v14795_v53, %s11337_s28 }
 0x760   : > { %10840 = vrot.lane.b32.xlu1 %v14789_v17, %s11339_s29 }
 0x762   : > { %10925 = vrot.lane.b32.xlu0 %v14785_v27, %s11339_s29 }
 0x764   : > { %10890 = vrot.lane.b32.xlu1 %v14747_v59, %s11340_s30 }
 0x766   : > { %10930 = vrot.lane.b32.xlu0 %v14795_v53, %s11339_s29 }
 0x768   : > { %10900 = vrot.lane.b32.xlu1 %v14781_v26, %s11340_s30 }
 0x76a   : > { %10935 = vrot.lane.b32.xlu0 %v14785_v27, %s11340_s30 }
 0x76c   : > { %10905 = vrot.lane.b32.xlu1 %v14789_v17, %s11340_s30 }
 0x76e   : > { %10940 = vrot.lane.b32.xlu0 %v14795_v53, %s11340_s30 }
 0x770   : > { %10910 = vrot.lane.b32.xlu1 %v14733_v37, %s11343_s5 }
 0x772   : > { %10945 = vrot.lane.b32.xlu0 %v14739_v58, %s11343_s5  ;;  %v10661_v13 = vpop.permute.xlu1 %10660 }
 0x773   : > { %v10663_v54 = vunpack.i.h.bf16 %v10661_v13  ;;  %v10662_v32 = vunpack.i.l.bf16 %v10661_v13 }
 0x774   : > { %v10721_v40 = vpop.permute.xlu0 %10720  ;;  %10950 = vrot.lane.b32.xlu1 %v14747_v59, %s11343_s5 }
 0x775   : > { %v10723_v22 = vunpack.i.h.bf16 %v10721_v40  ;;  %v10722_v57 = vunpack.i.l.bf16 %v10721_v40 }
 0x776   : > { %10955 = vrot.lane.b32.xlu0 %v14755_v34, %s11343_s5  ;;  %v10666_v3 = vpop.permute.xlu1 %10665 }
 0x777   : > { %v5000_v18 = vsel %vm17421_vm6, %v10663_v54, %v10723_v22  ;;  %v4999_v37 = vsel %vm17422_vm9, %v10662_v32, %v10722_v57  ;;  %v10668_v58 = vunpack.i.h.bf16 %v10666_v3  ;;  %v10667_v35 = vunpack.i.l.bf16 %v10666_v3  ;;  %vm17428_vm6 = vmmov %vm17425_vm2 }
 0x778   : > { %v10726_v23 = vpop.permute.xlu0 %10725  ;;  %v9163_v13 = vpack.c.bf16 %v5000_v18, %v4999_v37  ;;  %10960 = vrot.lane.b32.xlu1 %v14781_v26, %s11343_s5  ;;  %vm17430_vm9 = vcmp.lt.s32.totalorder %v11635_v56, 16 }
 0x779   : > { %v10728_v12 = vunpack.i.h.bf16 %v10726_v23  ;;  %v10727_v51 = vunpack.i.l.bf16 %v10726_v23  ;;  %v4995_v59 = vsel %vm17423_vm4, %v10722_v57, %v10667_v35  ;;  %v4996_v34 = vsel %vm17424_vm11, %v10723_v22, %v10668_v58  ;;  %vm17431_vm4 = vmmov %vm17430_vm9 }
 0x77a   : > { %9165 = vmatprep.subr.msk.bf16.mxu0 %vm17040_vm14, %v9163_v13  ;;  %10970 = vrot.lane.b32.xlu0 %v14785_v27, %s11343_s5  ;;  %v10671_v40 = vpop.permute.xlu1 %10670  ;;  %v9266_v37 = vpack.c.bf16 %v4996_v34, %v4995_v59  ;;  %vm17432_vm11 = vmmov %vm17431_vm4 }
 0x77b   : > { %v4992_v3 = vsel %vm17425_vm2, %v10668_v58, %v10728_v12  ;;  %v5004_v23 = vsel %vm17426_vm7, %v10728_v12, %v10663_v54  ;;  %v4991_v26 = vsel %vm17427_vm8, %v10667_v35, %v10727_v51  ;;  %v5003_v57 = vsel %vm17428_vm6, %v10727_v51, %v10662_v32  ;;  %vm17433_vm2 = vmmov %vm17431_vm4 }
 0x77c   : > { %v10731_v22 = vpop.permute.xlu0 %10730  ;;  %v9263_v18 = vpack.c.bf16 %v4992_v3, %v4991_v26  ;;  %v9166_v13 = vpack.c.bf16 %v5004_v23, %v5003_v57  ;;  %10965 = vrot.lane.b32.xlu1 %v14789_v17, %s11343_s5  ;;  %vm17434_vm7 = vmmov %vm17433_vm2 }
 0x77d   : > { %v10733_v60 = vunpack.i.h.bf16 %v10731_v22  ;;  %v10732_v39 = vunpack.i.l.bf16 %v10731_v22  ;;  %vm17435_vm8 = vmmov %vm17433_vm2 }
 0x77e   : > { %9265 = vmatprep.subr.msk.bf16.mxu1 %vm17046_vm15, %v9263_v18  ;;  %10975 = vrot.lane.b32.xlu0 %v14795_v53, %s11343_s5  ;;  %v10676_v12 = vpop.permute.xlu1 %10675  ;;  %vm17436_vm6 = vmmov %vm17433_vm2 }
 0x77f   : > { %9168 = vmatpush1.bf16.msk.msra.mxu0 %vm17247_vm10, %v9166_v13  ;;  %9268 = vmatpush1.bf16.msk.msra.mxu1 %vm17248_vm1, %v9266_v37  ;;  %v10673_v37 = vunpack.i.h.bf16 %v10671_v40  ;;  %v10672_v13 = vunpack.i.l.bf16 %v10671_v40  ;;  %v10678_v48 = vunpack.i.h.bf16 %v10676_v12  ;;  %v10677_v11 = vunpack.i.l.bf16 %v10676_v12 }
 0x780   : > { %v10736_v32 = vpop.permute.xlu0 %10735 }
 0x781   : > { %v10738_v50 = vunpack.i.h.bf16 %v10736_v32  ;;  %v10737_v24 = vunpack.i.l.bf16 %v10736_v32  ;;  %v14988_v6 = vsel %vm17430_vm9, %v10672_v13, %v10732_v39  ;;  %v14992_v20 = vsel %vm17431_vm4, %v10673_v37, %v10733_v60 }
 0x782   : > { %v14954_v35 = vpop.permute.xlu1 %10680  ;;  %v14996_v40 = vsel %vm17432_vm11, %v10732_v39, %v10677_v11  ;;  %v15000_v22 = vsel %vm17433_vm2, %v10733_v60, %v10678_v48  ;;  %vm17437_vm9 = vcmp.lt.s32.totalorder %v11635_v56, 17  ;;  %vm17439_vm11 = vmmov %vm17433_vm2  ;;  %vm17440_vm2 = vcmp.lt.s32.totalorder %v11635_v56, 15 }
 0x783   : > { %v15004_v12 = vsel %vm17434_vm7, %v10738_v50, %v10673_v37  ;;  %v15008_v32 = vsel %vm17435_vm8, %v10737_v24, %v10672_v13  ;;  %v10683_v7 = vunpack.i.h.bf16 %v14954_v35  ;;  %v10682_v15 = vunpack.i.l.bf16 %v14954_v35  ;;  %vm17438_vm4 = vmmov %vm17437_vm9 }
 0x784   : > { %v14956_v51 = vpop.permute.xlu0 %10740  ;;  %v9175_v13 = vpack.c.bf16 %v14992_v20, %v14988_v6  ;;  %v5071_v8 = vsel %vm17436_vm6, %v10677_v11, %v10737_v24  ;;  %vm17441_vm7 = vmmov %vm17440_vm2 }
 0x785   : > { %v10743_v14 = vunpack.i.h.bf16 %v14956_v51  ;;  %v10742_v60 = vunpack.i.l.bf16 %v14956_v51  ;;  %vm17442_vm8 = vmmov %vm17438_vm4 }
 0x786   : > { %v14958_v54 = vpop.permute.xlu1 %10685  ;;  %vm17443_vm6 = vmmov %vm17438_vm4 }
 0x787   : > { %v15030_v37 = vsel %vm17440_vm2, %v10683_v7, %v10743_v14  ;;  %v15034_v38 = vsel %vm17441_vm7, %v10682_v15, %v10742_v60  ;;  %v10688_v63 = vunpack.i.h.bf16 %v14958_v54  ;;  %v10687_v46 = vunpack.i.l.bf16 %v14958_v54  ;;  %vm17446_vm2 = vmmov %vm17438_vm4 }
 0x788   : > { %v14960_v27 = vpop.permute.xlu0 %10745 }
 0x78a   : > { %v14962_v17 = vpop.permute.xlu1 %10690 }
 0x78c   : > { %v14964_v58 = vpop.permute.xlu0 %10750 }
 0x78e   : > { %v14966_v53 = vpop.permute.xlu1 %10695 }
 0x790   : > { %v14968_v59 = vpop.permute.xlu0 %10755 }
 0x792   : > { %v14970_v34 = vpop.permute.xlu1 %10700 }
 0x794   : > { %v14972_v3 = vpop.permute.xlu0 %10760 }
 0x796   : > { %v14974_v23 = vpop.permute.xlu1 %10705 }
 0x798   : > { %v14976_v26 = vpop.permute.xlu0 %10765 }
 0x79a   : > { %v14978_v57 = vpop.permute.xlu1 %10710 }
 0x79c   : > { %v14980_v18 = vpop.permute.xlu0 %10770 }
 0x79e   : > { %v14982_v47 = vpop.permute.xlu1 %10715 }
 0x7a0   : > { %v14984_v28 = vpop.permute.xlu0 %10775 }
 0x7a1   : > { %17429 = vst [vmem:[#allocation47_spill] sm:$0xff] %v14984_v28 }
 0x7a2   : > { %v10781_v43 = vpop.permute.xlu1 %10780 }
 0x7a3   : > { %v10783_v36 = vunpack.i.h.bf16 %v10781_v43  ;;  %v10782_v39 = vunpack.i.l.bf16 %v10781_v43 }
 0x7a4   : > { %v10846_v44 = vpop.permute.xlu0 %10845 }
 0x7a5   : > { %v10848_v33 = vunpack.i.h.bf16 %v10846_v44  ;;  %v10847_v10 = vunpack.i.l.bf16 %v10846_v44  ;;  %v5072_v44 = vsel %vm17439_vm11, %v10678_v48, %v10738_v50  ;;  %v10748_v50 = vunpack.i.h.bf16 %v14960_v27  ;;  %vm17445_vm11 = vmmov %vm17438_vm4 }
 0x7a6   : > { %v10786_v51 = vpop.permute.xlu1 %10785 }
 0x7a7   : > { %v5002_v43 = vsel %vm17437_vm9, %v10783_v36, %v10848_v33  ;;  %v5001_v35 = vsel %vm17438_vm4, %v10782_v39, %v10847_v10  ;;  %v10788_v20 = vunpack.i.h.bf16 %v10786_v51  ;;  %v10787_v6 = vunpack.i.l.bf16 %v10786_v51  ;;  %vm17444_vm9 = vmmov %vm17438_vm4 }
 0x7a8   : > { %v10851_v24 = vpop.permute.xlu0 %10850  ;;  %v9169_v11 = vpack.c.bf16 %v5002_v43, %v5001_v35  ;;  %v10747_v43 = vunpack.i.l.bf16 %v14960_v27 }
 0x7a9   : > { %v10853_v30 = vunpack.i.h.bf16 %v10851_v24  ;;  %v10852_v1 = vunpack.i.l.bf16 %v10851_v24  ;;  %v4997_v48 = vsel %vm17442_vm8, %v10847_v10, %v10787_v6  ;;  %v4998_v51 = vsel %vm17443_vm6, %v10848_v33, %v10788_v20  ;;  %vm17447_vm8 = vmmov %vm17441_vm7 }
 0x7aa   : > { %9171 = vmatprep.subr.msk.bf16.mxu0 %vm17040_vm14, %v9169_v11  ;;  %v10791_v19 = vpop.permute.xlu1 %10790  ;;  %v9272_v11 = vpack.c.bf16 %v4998_v51, %v4997_v48  ;;  %vm17448_vm6 = vmmov %vm17441_vm7  ;;  %v10693_v48 = vunpack.i.h.bf16 %v14962_v17  ;;  %v10692_v51 = vunpack.i.l.bf16 %v14962_v17 }
 0x7ab   : > { %v4994_v35 = vsel %vm17444_vm9, %v10788_v20, %v10853_v30  ;;  %v5006_v24 = vsel %vm17438_vm4, %v10853_v30, %v10783_v36  ;;  %v4993_v54 = vsel %vm17445_vm11, %v10787_v6, %v10852_v1  ;;  %v5005_v10 = vsel %vm17446_vm2, %v10852_v1, %v10782_v39  ;;  %vm17451_vm11 = vmmov %vm17448_vm6 }
 0x7ac   : > { %v10793_v62 = vunpack.i.h.bf16 %v10791_v19  ;;  %v10792_v33 = vunpack.i.l.bf16 %v10791_v19  ;;  %v10856_v52 = vpop.permute.xlu0 %10855  ;;  %v9269_v55 = vpack.c.bf16 %v4994_v35, %v4993_v54  ;;  %v9172_v25 = vpack.c.bf16 %v5006_v24, %v5005_v10  ;;  %vm17452_vm2 = vmmov %vm17448_vm6 }
 0x7ad   : > { %v10858_v27 = vunpack.i.h.bf16 %v10856_v52  ;;  %v10857_v28 = vunpack.i.l.bf16 %v10856_v52  ;;  %v15056_v20 = vsel %vm17441_vm7, %v10742_v60, %v10687_v46  ;;  %v15060_v36 = vsel %vm17447_vm8, %v10743_v14, %v10688_v63  ;;  %vm17453_vm7 = vmmov %vm17452_vm2 }
 0x7ae   : > { %9271 = vmatprep.subr.msk.bf16.mxu1 %vm17046_vm15, %v9269_v55  ;;  %v9275_v30 = vpack.c.bf16 %v5072_v44, %v5071_v8  ;;  %v9185_v1 = vpack.c.bf16 %v15030_v37, %v15034_v38  ;;  %v15068_v19 = vsel %vm17448_vm6, %v10688_v63, %v10748_v50  ;;  %9174 = vmatpush1.bf16.msk.msra.mxu0 %vm17247_vm10, %v9172_v25  ;;  %v10796_v52 = vpop.permute.xlu1 %10795  ;;  %vm17449_vm9 = vcmp.lt.s32.totalorder %v11635_v56, 16 }
 0x7af   : > { %9274 = vmatpush1.bf16.msk.msra.mxu1 %vm17248_vm1, %v9272_v11  ;;  %v5081_v14 = vsel %vm17449_vm9, %v10792_v33, %v10857_v28  ;;  %vm17450_vm4 = vmmov %vm17449_vm9  ;;  %v15080_v55 = vsel %vm17451_vm11, %v10748_v50, %v10683_v7  ;;  %v10798_v38 = vunpack.i.h.bf16 %v10796_v52  ;;  %v10797_v63 = vunpack.i.l.bf16 %v10796_v52  ;;  %9176 = vmatprep.subr.bf16.mxu0 %v9175_v13 }
 0x7b0   : > { %v5082_v8 = vsel %vm17450_vm4, %v10793_v62, %v10858_v27  ;;  %v10861_v39 = vpop.permute.xlu0 %10860  ;;  %9276 = vmatprep.subr.bf16.mxu1 %v9275_v30  ;;  %v5151_v60 = vsel %vm17452_vm2, %v10687_v46, %v10747_v43  ;;  %v5163_v37 = vsel %vm17453_vm7, %v10747_v43, %v10682_v15  ;;  %v10753_v7 = vunpack.i.h.bf16 %v14964_v58  ;;  %vm17454_vm8 = vmmov %vm17450_vm4 }
 0x7b1   : > { %v9180_v25 = vpack.c.bf16 %v5082_v8, %v5081_v14  ;;  %v10863_v44 = vunpack.i.h.bf16 %v10861_v39  ;;  %v10862_v6 = vunpack.i.l.bf16 %v10861_v39  ;;  %v5077_v13 = vsel %vm17454_vm8, %v10857_v28, %v10797_v63  ;;  %vm17455_vm6 = vmmov %vm17450_vm4 }
 0x7b2   : > { %v10752_v50 = vunpack.i.l.bf16 %v14964_v58  ;;  %v5078_v35 = vsel %vm17455_vm6, %v10858_v27, %v10798_v38  ;;  %vm17456_vm9 = vmmov %vm17450_vm4  ;;  %v17457_v43 = vpack.c.bf16 %v15004_v12, %v15008_v32  ;;  %vm17458_vm11 = vnez %v16869_v2  ;;  %v10801_v24 = vpop.permute.xlu1 %10800 }
 0x7b3   : > { %v5086_v46 = vsel %vm17456_vm9, %v10863_v44, %v10793_v62  ;;  %v5085_v15 = vsel %vm17450_vm4, %v10862_v6, %v10792_v33  ;;  %v17459_v28 = vpack.c.bf16 %v15000_v22, %v14996_v40  ;;  %vm17460_vm2 = vnez %v16876_v0  ;;  %vm17461_vm7 = vmmov %vm17450_vm4 }
 0x7b4   : > { %9179 = vmatpush1.bf16.msk.msra.mxu0 %vm17458_vm11, %v17457_v43  ;;  %v9182_v54 = vpack.c.bf16 %v5086_v46, %v5085_v15  ;;  %v10803_v10 = vunpack.i.h.bf16 %v10801_v24  ;;  %v10802_v11 = vunpack.i.l.bf16 %v10801_v24  ;;  %v10866_v62 = vpop.permute.xlu0 %10865  ;;  %v5073_v33 = vsel %vm17461_vm7, %v10797_v63, %v10862_v6  ;;  %vm17462_vm8 = vmmov %vm17450_vm4 }
 0x7b5   : > { %9279 = vmatpush1.bf16.msk.msra.mxu1 %vm17460_vm2, %v17459_v28  ;;  %9181 = vmatprep.subr.bf16.mxu0 %v9180_v25  ;;  %v10868_v27 = vunpack.i.h.bf16 %v10866_v62  ;;  %v10867_v12 = vunpack.i.l.bf16 %v10866_v62  ;;  %v5074_v32 = vsel %vm17462_vm8, %v10798_v38, %v10863_v44  ;;  %v9285_v30 = vpack.c.bf16 %v15068_v19, %v5151_v60 }
 0x7b6   : > { %vm17463_vm6 = vcmp.lt.s32.totalorder %v11635_v56, 1  ;;  %v10698_v22 = vunpack.i.h.bf16 %v14966_v53  ;;  %v10758_v52 = vunpack.i.h.bf16 %v14968_v59  ;;  %v9280_v14 = vpack.c.bf16 %v5074_v32, %v5073_v33  ;;  %v10806_v39 = vpop.permute.xlu1 %10805 }
 0x7b7   : > { %v5240_v40 = vsel %vm17463_vm6, %v10693_v48, %v10753_v7  ;;  %vm17464_vm9 = vmmov %vm17463_vm6  ;;  %v9282_v38 = vpack.c.bf16 %v5078_v35, %v5077_v13  ;;  %vm17465_vm4 = vcmp.lt.s32.totalorder %v11635_v56, 15  ;;  %v9188_v25 = vpack.c.bf16 %v15080_v55, %v5163_v37 }
 0x7b8   : > { %v5239_v8 = vsel %vm17464_vm9, %v10692_v51, %v10752_v50  ;;  %v5162_v19 = vsel %vm17465_vm4, %v10803_v10, %v10868_v27  ;;  %vm17466_vm7 = vmmov %vm17465_vm4  ;;  %9184 = vmatpush1.bf16.msk.msra.mxu0 %vm17458_vm11, %v9182_v54  ;;  %9281 = vmatprep.subr.bf16.mxu1 %v9280_v14  ;;  %v10808_v44 = vunpack.i.h.bf16 %v10806_v39  ;;  %v10807_v6 = vunpack.i.l.bf16 %v10806_v39  ;;  %v10871_v13 = vpop.permute.xlu0 %10870 }
 0x7b9   : > { %v5161_v63 = vsel %vm17466_vm7, %v10802_v11, %v10867_v12  ;;  %vm17467_vm8 = vnez %v16886_v31  ;;  %v10697_v35 = vunpack.i.l.bf16 %v14966_v53  ;;  %v10757_v46 = vunpack.i.l.bf16 %v14968_v59  ;;  %9284 = vmatpush1.bf16.msk.msra.mxu1 %vm17460_vm2, %v9282_v38  ;;  %vm17468_vm9 = vmmov %vm17465_vm4 }
 0x7ba   : > { %v9191_v60 = vpack.c.bf16 %v5162_v19, %v5161_v63  ;;  %9187 = vmatprep.subr.msk.bf16.mxu0 %vm17467_vm8, %v9185_v1  ;;  %v10873_v15 = vunpack.i.h.bf16 %v10871_v13  ;;  %v10872_v43 = vunpack.i.l.bf16 %v10871_v13  ;;  %v9288_v55 = vpack.c.bf16 %v15060_v36, %v15056_v20  ;;  %vm17470_vm2 = vmmov %vm17466_vm7  ;;  %v10811_v36 = vpop.permute.xlu1 %10810 }
 0x7bb   : > { %v5232_v37 = vsel %vm17463_vm6, %v10698_v22, %v10758_v52  ;;  %v5157_v24 = vsel %vm17468_vm9, %v10867_v12, %v10807_v6  ;;  %vm17469_vm4 = vnez %v16898_v45  ;;  %v9197_v53 = vpack.c.bf16 %v5240_v40, %v5239_v8  ;;  %vm17471_vm11 = vmmov %vm17470_vm2 }
 0x7bc   : > { %9287 = vmatprep.subr.msk.bf16.mxu1 %vm17469_vm4, %v9285_v30  ;;  %v5158_v59 = vsel %vm17466_vm7, %v10868_v27, %v10808_v44  ;;  %v5154_v1 = vsel %vm17470_vm2, %v10808_v44, %v10873_v15  ;;  %v5166_v28 = vsel %vm17471_vm11, %v10873_v15, %v10803_v10  ;;  %vm17472_vm1 = vmmov %vm17470_vm2  ;;  %vm17473_vm6 = vnez %v16890_v29  ;;  %v10876_v27 = vpop.permute.xlu0 %10875 }
 0x7bd   : > { %v5153_v20 = vsel %vm17472_vm1, %v10807_v6, %v10872_v43  ;;  %9190 = vmatpush1.bf16.msk.msra.mxu0 %vm17473_vm6, %v9188_v25  ;;  %vm17474_vm9 = vmmov %vm17472_vm1  ;;  %v10813_v33 = vunpack.i.h.bf16 %v10811_v36  ;;  %v10812_v12 = vunpack.i.l.bf16 %v10811_v36  ;;  %vm17475_vm2 = vcmp.lt.s32.totalorder %v11635_v56, 1 }
 0x7be   : > { %v5165_v54 = vsel %vm17474_vm9, %v10872_v43, %v10802_v11  ;;  %v9291_v62 = vpack.c.bf16 %v5154_v1, %v5153_v20  ;;  %9193 = vmatprep.subr.msk.bf16.mxu0 %vm17467_vm8, %v9191_v60  ;;  %v5231_v10 = vsel %vm17475_vm2, %v10697_v35, %v10757_v46  ;;  %vm17476_vm1 = vnez %v16900_v16  ;;  %vm17477_vm11 = vmmov %vm17475_vm2 }
 0x7bf   : > { %v9194_v32 = vpack.c.bf16 %v5166_v28, %v5165_v54  ;;  %9290 = vmatpush1.bf16.msk.msra.mxu1 %vm17476_vm1, %v9288_v55  ;;  %v10878_v30 = vunpack.i.h.bf16 %v10876_v27  ;;  %v10877_v40 = vunpack.i.l.bf16 %v10876_v27  ;;  %v5235_v14 = vsel %vm17477_vm11, %v10752_v50, %v10697_v35  ;;  %vm17478_vm7 = vmmov %vm17475_vm2  ;;  %v10816_v50 = vpop.permute.xlu1 %10815 }
 0x7c0   : > { %v5236_v11 = vsel %vm17478_vm7, %v10753_v7, %v10698_v22  ;;  %vm17479_vm9 = vmmov %vm17475_vm2  ;;  %v5243_v38 = vsel %vm17475_vm2, %v10757_v46, %v10692_v51  ;;  %9293 = vmatprep.subr.msk.bf16.mxu1 %vm17469_vm4, %v9291_v62  ;;  %v9294_v19 = vpack.c.bf16 %v5158_v59, %v5157_v24  ;;  %v10818_v22 = vunpack.i.h.bf16 %v10816_v50  ;;  %v10881_v51 = vpop.permute.xlu0 %10880 }
 0x7c1   : > { %v5244_v8 = vsel %vm17479_vm9, %v10758_v52, %v10693_v48  ;;  %vm17480_vm11 = vmmov %vm17475_vm2  ;;  %9196 = vmatpush1.bf16.msk.msra.mxu0 %vm17473_vm6, %v9194_v32  ;;  %v10817_v17 = vunpack.i.l.bf16 %v10816_v50  ;;  %v9297_v52 = vpack.c.bf16 %v5232_v37, %v5231_v10  ;;  %v9300_v63 = vpack.c.bf16 %v5236_v11, %v5235_v14  ;;  %v17494_v11 = vld [vmem:[#allocation47_spill] sm:$0xff] }
 0x7c2   : > { %v5242_v58 = vsel %vm17480_vm11, %v10813_v33, %v10878_v30  ;;  %vm17481_vm10 = vmmov %vm17475_vm2  ;;  %9199 = vmatprep.subr.msk.bf16.mxu0 %vm17040_vm14, %v9197_v53  ;;  %v9200_v39 = vpack.c.bf16 %v5244_v8, %v5243_v38  ;;  %v10883_v25 = vunpack.i.h.bf16 %v10881_v51  ;;  %v10882_v60 = vunpack.i.l.bf16 %v10881_v51  ;;  %v17503_v51 = vld [vmem:[#allocation16_spill] sm:$0xff] }
 0x7c3   : > { %v5241_v7 = vsel %vm17481_vm10, %v10812_v12, %v10877_v40  ;;  %9296 = vmatpush1.bf16.msk.msra.mxu1 %vm17476_vm1, %v9294_v19  ;;  %v10703_v44 = vunpack.i.h.bf16 %v14970_v34  ;;  %v10702_v6 = vunpack.i.l.bf16 %v14970_v34  ;;  %v10763_v13 = vunpack.i.h.bf16 %v14972_v3  ;;  %vm17482_vm10 = vmmov %vm17475_vm2  ;;  %v15205_v34 = vpop.permute.xlu1 %10820  ;;  %v17495_v19 = vld [vmem:[#allocation18_spill] sm:$0xff] }
 0x7c4   : > { %v9203_v48 = vpack.c.bf16 %v5242_v58, %v5241_v7  ;;  %v10762_v35 = vunpack.i.l.bf16 %v14972_v3  ;;  %9299 = vmatprep.subr.msk.bf16.mxu1 %vm17046_vm15, %v9297_v52  ;;  %v10708_v46 = vunpack.i.h.bf16 %v14974_v23  ;;  %v5234_v15 = vsel %vm17482_vm10, %v10818_v22, %v10883_v25  ;;  %vm17483_vm7 = vmmov %vm17475_vm2  ;;  %v15215_v59 = vpop.permute.xlu0 %10885  ;;  %v17496_v58 = vld [vmem:[#allocation30_spill] sm:$0xff] }
 0x7c5   : > { %v5246_v43 = vsel %vm17483_vm7, %v10883_v25, %v10813_v33  ;;  %vm17484_vm9 = vmmov %vm17475_vm2  ;;  %9202 = vmatpush1.bf16.msk.msra.mxu0 %vm12711_vm5, %v9200_v39  ;;  %v5237_v3 = vsel %vm17475_vm2, %v10877_v40, %v10817_v17  ;;  %v10707_v1 = vunpack.i.l.bf16 %v14974_v23  ;;  %v10768_v28 = vunpack.i.h.bf16 %v14976_v26 }
 0x7c6   : > { %v5233_v55 = vsel %vm17484_vm9, %v10817_v17, %v10882_v60  ;;  %vm17485_vm11 = vmmov %vm17475_vm2  ;;  %9205 = vmatprep.subr.msk.bf16.mxu0 %vm17040_vm14, %v9203_v48  ;;  %v10767_v20 = vunpack.i.l.bf16 %v14976_v26  ;;  %vm17487_vm10 = vnez %v16920_v41  ;;  %v10713_v54 = vunpack.i.h.bf16 %v14978_v57  ;;  %v17502_v17 = vld [vmem:[#allocation17_spill] sm:$0xff] }
 0x7c7   : > { %v5238_v37 = vsel %vm17485_vm11, %v10878_v30, %v10818_v22  ;;  %vm17486_vm1 = vmmov %vm17475_vm2  ;;  %v9303_v53 = vpack.c.bf16 %v5234_v15, %v5233_v55  ;;  %9302 = vmatpush1.bf16.msk.msra.mxu1 %vm17487_vm10, %v9300_v63  ;;  %v10712_v62 = vunpack.i.l.bf16 %v14978_v57  ;;  %v10773_v33 = vunpack.i.h.bf16 %v14980_v18  ;;  %v15230_v26 = vpop.permute.xlu1 %10825  ;;  %v17508_v15 = vld [vmem:[#allocation29_spill] sm:$0xff] }
 0x7c8   : > { %v5245_v24 = vsel %vm17486_vm1, %v10882_v60, %v10812_v12  ;;  %v10772_v12 = vunpack.i.l.bf16 %v14980_v18  ;;  %v9306_v23 = vpack.c.bf16 %v5238_v37, %v5237_v3  ;;  %vm17488_vm1 = vcmp.lt.s32.totalorder %v11635_v56, 127  ;;  %v15239_v57 = vpop.permute.xlu0 %10895 }
 0x7c9   : > { %v9206_v36 = vpack.c.bf16 %v5246_v43, %v5245_v24  ;;  %9305 = vmatprep.subr.msk.bf16.mxu1 %vm17046_vm15, %v9303_v53  ;;  %v5336_v27 = vsel %vm17488_vm1, %v10703_v44, %v10763_v13  ;;  %vm17489_vm7 = vmmov %vm17488_vm1  ;;  %v17490_v32 = vpack.c.bf16 %v14729_v42, %v14721_v49  ;;  %v15251_v14 = vsel %vm17488_vm1, %v10707_v1, %v10767_v20  ;;  %v17509_v43 = vld [vmem:[#allocation24_spill] sm:$0xff] }
 0x7ca   : > { %v5335_v10 = vsel %vm17489_vm7, %v10702_v6, %v10762_v35  ;;  %vm17491_vm9 = vmmov %vm17488_vm1  ;;  %v10718_v49 = vunpack.i.h.bf16 %v14982_v47  ;;  %v10717_v42 = vunpack.i.l.bf16 %v14982_v47  ;;  %v10778_v8 = vunpack.i.h.bf16 %v17494_v11 }
 0x7cb   : > { %9208 = vmatpush1.bf16.msk.msra.mxu0 %vm12711_vm5, %v9206_v36  ;;  %v5331_v18 = vsel %vm17491_vm9, %v10762_v35, %v10707_v1  ;;  %vm17492_vm2 = vmmov %vm17488_vm1  ;;  %9308 = vmatpush1.bf16.msk.msra.mxu1 %vm17487_vm10, %v9306_v23  ;;  %v10777_v38 = vunpack.i.l.bf16 %v17494_v11  ;;  %v17497_v7 = vpack.c.bf16 %v17495_v19, %v17496_v58  ;;  %v17504_v52 = vpack.c.bf16 %v17502_v17, %v17503_v51  ;;  %v10831_v63 = vpop.permute.xlu1 %10830  ;;  %v17514_v36 = vld [vmem:[#allocation23_spill] sm:$0xff] }
 0x7cc   : > { %9210 = vmatprep.subr.bf16.mxu0 %v17490_v32  ;;  %v5332_v30 = vsel %vm17492_vm2, %v10763_v13, %v10708_v46  ;;  %vm17493_vm11 = vmmov %vm17488_vm1  ;;  %vm17500_vm2 = vcmp.lt.s32.totalorder %v11635_v56, 113  ;;  %v9220_v39 = vpack.c.bf16 %v5336_v27, %v5335_v10  ;;  %v10833_v25 = vunpack.i.h.bf16 %v10831_v63  ;;  %v17506_v13 = vld [vmem:[#allocation28_spill] sm:$0xff]  ;;  %v17526_v17 = vld [vmem:[#allocation11_spill] sm:$0xff] }
 0x7cd   : > { %v15247_v40 = vsel %vm17493_vm11, %v10708_v46, %v10768_v28  ;;  %9310 = vmatprep.subr.bf16.mxu1 %v17497_v7  ;;  %vm17498_vm7 = vmmov %vm17488_vm1  ;;  %v15268_v22 = vsel %vm17500_vm2, %v10713_v54, %v10773_v33  ;;  %v10832_v60 = vunpack.i.l.bf16 %v10831_v63  ;;  %v17510_v55 = vpack.c.bf16 %v17508_v15, %v17509_v43 }
 0x7ce   : > { %v5340_v50 = vsel %vm17498_vm7, %v10768_v28, %v10703_v44  ;;  %vm17499_vm9 = vmmov %vm17488_vm1  ;;  %v17505_v44 = vld [vmem:[#allocation9_spill] sm:$0xff]  ;;  %v9320_v46 = vpack.c.bf16 %v15247_v40, %v15251_v14  ;;  %v9217_v24 = vpack.c.bf16 %v5332_v30, %v5331_v18  ;;  %v17520_v40 = vld [vmem:[#allocation26_spill] sm:$0xff]  ;;  %v10822_v43 = vunpack.i.l.bf16 %v15205_v34 }
 0x7cf   : > { %v5339_v48 = vsel %vm17499_vm9, %v10767_v20, %v10702_v6  ;;  %vm17501_vm11 = vmmov %vm17500_vm2  ;;  %9212 = vmatpush1.bf16.msra.mxu0 %v17504_v52  ;;  %v17507_v35 = vpack.c.bf16 %v17505_v44, %v17506_v13  ;;  %v10916_v6 = vpop.permute.xlu0 %10915  ;;  %9312 = vmatpush1.bf16.msra.mxu1 %v17510_v55  ;;  %v17513_v20 = vld [vmem:[#allocation10_spill] sm:$0xff]  ;;  %v17521_v14 = vld [vmem:[#allocation27_spill] sm:$0xff]  ;;  %v15309_v19 = vpop.permute.xlu1 %10835  ;;  %v10823_v52 = vunpack.i.h.bf16 %v15205_v34  ;;  %v10898_v34 = vunpack.i.h.bf16 %v15239_v57 }
 0x7d0   : > { %v15272_v47 = vsel %vm17501_vm11, %v10712_v62, %v10772_v12  ;;  %v10918_v3 = vunpack.i.h.bf16 %v10916_v6  ;;  %v10917_v37 = vunpack.i.l.bf16 %v10916_v6  ;;  %vm17511_vm1 = vmmov %vm17500_vm2  ;;  %v17515_v23 = vpack.c.bf16 %v17513_v20, %v17514_v36 }
 0x7d1   : > { %9214 = vmatprep.subr.bf16.mxu0 %v17507_v35  ;;  %v9232_v53 = vpack.c.bf16 %v15268_v22, %v15272_v47  ;;  %v15289_v1 = vsel %vm17511_vm1, %v10718_v49, %v10778_v8  ;;  %vm17512_vm7 = vmmov %vm17511_vm1  ;;  %v9317_v27 = vpack.c.bf16 %v5340_v50, %v5339_v48  ;;  %vm17518_vm11 = vcmp.lt.s32.totalorder %v11635_v56, 127  ;;  %v17525_v48 = vld [vmem:[#allocation12_spill] sm:$0xff] }
 0x7d2   : > { %v15293_v28 = vsel %vm17512_vm7, %v10717_v42, %v10777_v38  ;;  %9314 = vmatprep.subr.bf16.mxu1 %v17515_v23  ;;  %vm17516_vm9 = vmmov %vm17511_vm1  ;;  %v5334_v18 = vsel %vm17518_vm11, %v10918_v3, %v10833_v25  ;;  %v17522_v11 = vpack.c.bf16 %v17520_v40, %v17521_v14  ;;  %v17527_v51 = vpack.c.bf16 %v17525_v48, %v17526_v17 }
 0x7d3   : > { %v5411_v10 = vsel %vm17516_vm9, %v10772_v12, %v10717_v42  ;;  %vm17517_vm2 = vmmov %vm17511_vm1  ;;  %v10828_v12 = vunpack.i.h.bf16 %v15230_v26  ;;  %v10827_v42 = vunpack.i.l.bf16 %v15230_v26  ;;  %v9332_v50 = vpack.c.bf16 %v15289_v1, %v15293_v28  ;;  %v10841_v15 = vpop.permute.xlu1 %10840 }
 0x7d4   : > { %v5412_v32 = vsel %vm17517_vm2, %v10773_v33, %v10718_v49  ;;  %vm17519_vm1 = vmmov %vm17518_vm11  ;;  %9216 = vmatpush1.bf16.msra.mxu0 %v17522_v11  ;;  %v10921_v49 = vpop.permute.xlu0 %10920  ;;  %9316 = vmatpush1.bf16.msra.mxu1 %v17527_v51  ;;  %v17537_v11 = vld [vmem:[#allocation25_spill] sm:$0xff] }
 0x7d5   : > { %v5333_v30 = vsel %vm17519_vm1, %v10917_v37, %v10832_v60  ;;  %vm17523_vm7 = vmmov %vm17517_vm2  ;;  %9219 = vmatprep.subr.msk.bf16.mxu0 %vm17467_vm8, %v9217_v24  ;;  %9319 = vmatprep.subr.msk.bf16.mxu1 %vm17469_vm4, %v9317_v27  ;;  %v10888_v27 = vunpack.i.h.bf16 %v15215_v59 }
 0x7d6   : > { %v5420_v58 = vsel %vm17523_vm7, %v10778_v8, %v10713_v54  ;;  %v9223_v33 = vpack.c.bf16 %v5334_v18, %v5333_v30  ;;  %vm17524_vm9 = vmmov %vm17517_vm2  ;;  %v10923_v54 = vunpack.i.h.bf16 %v10921_v49  ;;  %v10922_v8 = vunpack.i.l.bf16 %v10921_v49 }
 0x7d7   : > { %v5419_v7 = vsel %vm17524_vm9, %v10777_v38, %v10712_v62  ;;  %vm17528_vm2 = vmmov %vm17519_vm1  ;;  %v9229_v62 = vpack.c.bf16 %v5412_v32, %v5411_v10  ;;  %v10897_v10 = vunpack.i.l.bf16 %v15239_v57  ;;  %v10838_v32 = vunpack.i.h.bf16 %v15309_v19 }
 0x7d8   : > { %v5338_v26 = vsel %vm17528_vm2, %v10828_v12, %v10918_v3  ;;  %vm17529_vm11 = vmmov %vm17519_vm1  ;;  %v5330_v38 = vsel %vm17519_vm1, %v10833_v25, %v10923_v54  ;;  %9222 = vmatpush1.bf16.msk.msra.mxu0 %vm12793_vm12, %v9220_v39  ;;  %v10843_v3 = vunpack.i.h.bf16 %v10841_v15  ;;  %v10926_v25 = vpop.permute.xlu0 %10925  ;;  %9322 = vmatpush1.bf16.msk.msra.mxu1 %vm17349_vm3, %v9320_v46  ;;  %v10887_v39 = vunpack.i.l.bf16 %v15215_v59  ;;  %v10891_v59 = vpop.permute.xlu1 %10890 }
 0x7d9   : > { %v5337_v63 = vsel %vm17529_vm11, %v10827_v42, %v10917_v37  ;;  %vm17530_vm7 = vmmov %vm17519_vm1  ;;  %v10842_v37 = vunpack.i.l.bf16 %v10841_v15  ;;  %9225 = vmatprep.subr.msk.bf16.mxu0 %vm17467_vm8, %v9223_v33  ;;  %v10927_v23 = vunpack.i.l.bf16 %v10926_v25  ;;  %v10837_v18 = vunpack.i.l.bf16 %v15309_v19 }
 0x7da   : > { %v5342_v44 = vsel %vm17530_vm7, %v10923_v54, %v10828_v12  ;;  %vm17531_vm9 = vmmov %vm17519_vm1  ;;  %v9226_v24 = vpack.c.bf16 %v5338_v26, %v5337_v63  ;;  %v10893_v14 = vunpack.i.h.bf16 %v10891_v59  ;;  %v10892_v57 = vunpack.i.l.bf16 %v10891_v59  ;;  %v17545_v54 = vld [vmem:[#allocation35_spill] sm:$0xff] }
 0x7db   : > { %v5329_v13 = vsel %vm17531_vm9, %v10832_v60, %v10922_v8  ;;  %vm17532_vm6 = vmmov %vm17519_vm1  ;;  %v10928_v60 = vunpack.i.h.bf16 %v10926_v25  ;;  %vm17538_vm11 = vnez %v17537_v11  ;;  %vm17541_vm9 = vcmp.lt.s32.totalorder %v11635_v56, 112 }
 0x7dc   : > { %v5341_v35 = vsel %vm17532_vm6, %v10922_v8, %v10827_v42  ;;  %v9326_v20 = vpack.c.bf16 %v5330_v38, %v5329_v13  ;;  %vm17535_vm6 = vcmp.lt.s32.totalorder %v11635_v56, 113  ;;  %9228 = vmatpush1.bf16.msk.msra.mxu0 %vm12793_vm12, %v9226_v24  ;;  %v10931_v12 = vpop.permute.xlu0 %10930  ;;  %v9329_v42 = vpack.c.bf16 %v5420_v58, %v5419_v7  ;;  %v10901_v38 = vpop.permute.xlu1 %10900 }
 0x7dd   : > { %v9323_v55 = vpack.c.bf16 %v5342_v44, %v5341_v35  ;;  %v5414_v46 = vsel %vm17535_vm6, %v10928_v60, %v10843_v3  ;;  %vm17536_vm2 = vmmov %vm17535_vm6  ;;  %9231 = vmatprep.subr.msk.bf16.mxu0 %vm17538_vm11, %v9229_v62  ;;  %v10933_v49 = vunpack.i.h.bf16 %v10931_v12  ;;  %v10932_v48 = vunpack.i.l.bf16 %v10931_v12 }
 0x7de   : > { %v5413_v30 = vsel %vm17536_vm2, %v10927_v23, %v10842_v37  ;;  %vm17539_vm1 = vmmov %vm17536_vm2  ;;  %v5496_v17 = vsel %vm17541_vm9, %v10823_v52, %v10888_v27 }
 0x7df   : > { %9325 = vmatprep.subr.msk.bf16.mxu1 %vm17469_vm4, %v9323_v55  ;;  %v9235_v40 = vpack.c.bf16 %v5414_v46, %v5413_v30  ;;  %v5418_v19 = vsel %vm17539_vm1, %v10838_v32, %v10928_v60  ;;  %vm17540_vm7 = vmmov %vm17539_vm1  ;;  %vm17546_vm1 = vnez %v17545_v54  ;;  %v10903_v55 = vunpack.i.h.bf16 %v10901_v38  ;;  %v17560_v30 = vld [vmem:[#allocation34_spill] sm:$0xff] }
 0x7e0   : > { %v5417_v33 = vsel %vm17540_vm7, %v10837_v18, %v10927_v23  ;;  %9328 = vmatpush1.bf16.msk.msra.mxu1 %vm17349_vm3, %v9326_v20  ;;  %vm17542_vm6 = vmmov %vm17541_vm9  ;;  %vm17549_vm9 = vcmp.lt.s32.totalorder %v11635_v56, 113  ;;  %9234 = vmatpush1.bf16.msk.msra.mxu0 %vm12711_vm5, %v9232_v53  ;;  %v10936_v15 = vpop.permute.xlu0 %10935  ;;  %v10906_v24 = vpop.permute.xlu1 %10905 }
 0x7e1   : > { %v5495_v51 = vsel %vm17542_vm6, %v10822_v43, %v10887_v39  ;;  %vm17543_vm2 = vmmov %vm17542_vm6  ;;  %9331 = vmatprep.subr.msk.bf16.mxu1 %vm17546_vm1, %v9329_v42  ;;  %v5410_v63 = vsel %vm17549_vm9, %v10843_v3, %v10933_v49  ;;  %v9238_v44 = vpack.c.bf16 %v5418_v19, %v5417_v33  ;;  %9237 = vmatprep.subr.msk.bf16.mxu0 %vm17538_vm11, %v9235_v40  ;;  %v10902_v3 = vunpack.i.l.bf16 %v10901_v38 }
 0x7e2   : > { %v5491_v58 = vsel %vm17543_vm2, %v10887_v39, %v10892_v57  ;;  %vm17544_vm4 = vmmov %vm17543_vm2  ;;  %v10937_v25 = vunpack.i.l.bf16 %v10936_v15  ;;  %v10908_v60 = vunpack.i.h.bf16 %v10906_v24  ;;  %v10907_v23 = vunpack.i.l.bf16 %v10906_v24 }
 0x7e3   : > { %v5492_v7 = vsel %vm17544_vm4, %v10888_v27, %v10893_v14  ;;  %vm17547_vm7 = vmmov %vm17543_vm2  ;;  %v17555_v27 = vld [vmem:[#allocation21_spill] sm:$0xff]  ;;  %v9244_v28 = vpack.c.bf16 %v5496_v17, %v5495_v51 }
 0x7e4   : > { %v5500_v8 = vsel %vm17547_vm7, %v10898_v34, %v10823_v52  ;;  %vm17548_vm8 = vmmov %vm17543_vm2  ;;  %v9241_v47 = vpack.c.bf16 %v5492_v7, %v5491_v58  ;;  %9334 = vmatpush1.bf16.msk.msra.mxu1 %vm17487_vm10, %v9332_v50  ;;  %9240 = vmatpush1.bf16.msk.msra.mxu0 %vm12711_vm5, %v9238_v44  ;;  %v10941_v1 = vpop.permute.xlu0 %10940  ;;  %v10911_v12 = vpop.permute.xlu1 %10910  ;;  %v7423_v44 = vld [vmem:[%s16450_s3 + $0x140] sm:$0xff] }
 0x7e5   : > { %v5499_v26 = vsel %vm17548_vm8, %v10897_v10, %v10822_v43  ;;  %vm17550_vm6 = vmmov %vm17549_vm9  ;;  %vm17556_vm9 = vnez %v17555_v27  ;;  %v10943_v39 = vunpack.i.h.bf16 %v10941_v1  ;;  %v10913_v17 = vunpack.i.h.bf16 %v10911_v12 }
 0x7e6   : > { %v5422_v62 = vsel %vm17550_vm6, %v10933_v49, %v10838_v32  ;;  %vm17551_vm4 = vmmov %vm17543_vm2  ;;  %v9341_v20 = vpack.c.bf16 %v5500_v8, %v5499_v26  ;;  %9243 = vmatprep.subr.msk.bf16.mxu0 %vm17556_vm9, %v9241_v47  ;;  %v10912_v51 = vunpack.i.l.bf16 %v10911_v12  ;;  %v7419_v26 = vld [vmem:[%s16450_s3 + $0x120] sm:$0xff]  ;;  %v7429_v12 = vld [vmem:[%s16450_s3 + $0x170] sm:$0xff] }
 0x7e7   : > { %v5487_v52 = vsel %vm17551_vm4, %v10892_v57, %v10897_v10  ;;  %vm17552_vm2 = vmmov %vm17550_vm6  ;;  %v5497_v32 = vsel %vm17551_vm4, %v10902_v3, %v10937_v25 }
 0x7e8   : > { %v5409_v13 = vsel %vm17552_vm2, %v10842_v37, %v10932_v48  ;;  %vm17553_vm8 = vmmov %vm17552_vm2  ;;  %v10938_v37 = vunpack.i.h.bf16 %v10936_v15  ;;  %9245 = vmatpush1.bf16.msra.mxu0 %v9244_v28  ;;  %v10946_v19 = vpop.permute.xlu0 %10945  ;;  %v10951_v8 = vpop.permute.xlu1 %10950 }
 0x7e9   : > { %v5421_v35 = vsel %vm17553_vm8, %v10932_v48, %v10837_v18  ;;  %vm17554_vm7 = vmmov %vm17551_vm4  ;;  %v9338_v43 = vpack.c.bf16 %v5410_v63, %v5409_v13  ;;  %v10948_v58 = vunpack.i.h.bf16 %v10946_v19  ;;  %v10947_v7 = vunpack.i.l.bf16 %v10946_v19 }
 0x7ea   : > { %v5488_v22 = vsel %vm17554_vm7, %v10893_v14, %v10898_v34  ;;  %v9335_v53 = vpack.c.bf16 %v5422_v62, %v5421_v35  ;;  %v10942_v34 = vunpack.i.l.bf16 %v10941_v1  ;;  %vm17557_vm6 = vmmov %vm17551_vm4  ;;  %vm17561_vm7 = vnez %v17560_v30 }
 0x7eb   : > { %v9344_v50 = vpack.c.bf16 %v5488_v22, %v5487_v52  ;;  %v5498_v10 = vsel %vm17557_vm6, %v10903_v55, %v10938_v37  ;;  %vm17558_vm2 = vmmov %vm17551_vm4  ;;  %v10953_v63 = vunpack.i.h.bf16 %v10951_v8  ;;  %v10952_v62 = vunpack.i.l.bf16 %v10951_v8 }
 0x7ec   : > { %9337 = vmatprep.subr.msk.bf16.mxu1 %vm17546_vm1, %v9335_v53  ;;  %v5493_v18 = vsel %vm17558_vm2, %v10937_v25, %v10907_v23  ;;  %vm17559_vm8 = vmmov %vm17558_vm2  ;;  %v9249_v33 = vpack.c.bf16 %v5498_v10, %v5497_v32  ;;  %v10956_v38 = vpop.permute.xlu0 %10955  ;;  %v7422_v25 = vld [vmem:[%s16450_s3 + $0x138] sm:$0xff] }
 0x7ed   : > { %9340 = vmatpush1.bf16.msk.msra.mxu1 %vm17487_vm10, %v9338_v43  ;;  %v5494_v46 = vsel %vm17559_vm8, %v10938_v37, %v10908_v60  ;;  %vm17562_vm1 = vmmov %vm17558_vm2  ;;  %v10958_v52 = vunpack.i.h.bf16 %v10956_v38  ;;  %v10957_v13 = vunpack.i.l.bf16 %v10956_v38  ;;  %v10961_v37 = vpop.permute.xlu1 %10960 }
 0x7ee   : > { %9343 = vmatprep.subr.msk.bf16.mxu1 %vm17561_vm7, %v9341_v20  ;;  %v9246_v59 = vpack.c.bf16 %v5494_v46, %v5493_v18  ;;  %v5490_v40 = vsel %vm17562_vm1, %v10908_v60, %v10943_v39  ;;  %vm17563_vm11 = vmmov %vm17562_vm1 }
 0x7ef   : > { %v5502_v14 = vsel %vm17563_vm11, %v10943_v39, %v10903_v55  ;;  %vm17564_vm6 = vmmov %vm17562_vm1  ;;  %vm17566_vm11 = vcmp.lt.s32.totalorder %v11635_v56, 111  ;;  %v10963_v39 = vunpack.i.h.bf16 %v10961_v37 }
 0x7f0   : > { %v5489_v57 = vsel %vm17564_vm6, %v10907_v23, %v10942_v34  ;;  %vm17565_vm4 = vmmov %vm17562_vm1  ;;  %9248 = vmatprep.subr.msk.bf16.mxu0 %vm17556_vm9, %v9246_v59  ;;  %v5576_v35 = vsel %vm17566_vm11, %v10913_v17, %v10948_v58  ;;  %v10971_v20 = vpop.permute.xlu0 %10970  ;;  %v7425_v59 = vld [vmem:[%s16450_s3 + $0x150] sm:$0xff] }
 0x7f1   : > { %v5501_v42 = vsel %vm17565_vm4, %v10942_v34, %v10902_v3  ;;  %v9349_v48 = vpack.c.bf16 %v5490_v40, %v5489_v57  ;;  %9345 = vmatpush1.bf16.msra.mxu1 %v9344_v50  ;;  %9250 = vmatpush1.bf16.msra.mxu0 %v9249_v33  ;;  %vm17567_vm1 = vmmov %vm17566_vm11  ;;  %v7426_v50 = vld [vmem:[%s16450_s3 + $0x158] sm:$0xff]  ;;  %v10962_v34 = vunpack.i.l.bf16 %v10961_v37  ;;  %v10973_v10 = vunpack.i.h.bf16 %v10971_v20  ;;  %v10966_v46 = vpop.permute.xlu1 %10965 }
 0x7f2   : > { %v9346_v49 = vpack.c.bf16 %v5502_v14, %v5501_v42  ;;  %v5575_v15 = vsel %vm17567_vm1, %v10912_v51, %v10947_v7  ;;  %vm17568_vm2 = vmmov %vm17567_vm1  ;;  %v10972_v32 = vunpack.i.l.bf16 %v10971_v20  ;;  %v10968_v40 = vunpack.i.h.bf16 %v10966_v46  ;;  %v17591_v37 = vld [vmem:[#allocation22_spill] sm:$0xff] }
 0x7f3   : > { %v5571_v22 = vsel %vm17568_vm2, %v10947_v7, %v10952_v62  ;;  %vm17569_vm8 = vmmov %vm17567_vm1  ;;  %v9254_v60 = vpack.c.bf16 %v5576_v35, %v5575_v15  ;;  %v10967_v14 = vunpack.i.l.bf16 %v10966_v46  ;;  %v7424_v35 = vld [vmem:[%s16450_s3 + $0x148] sm:$0xff]  ;;  %v7427_v15 = vld [vmem:[%s16450_s3 + $0x160] sm:$0xff] }
 0x7f4   : > { %9348 = vmatprep.subr.msk.bf16.mxu1 %vm17561_vm7, %v9346_v49  ;;  %v5572_v47 = vsel %vm17569_vm8, %v10948_v58, %v10953_v63  ;;  %5836 = vmatmul.mubr.f32.vlgmr.msra.gmra.mrb[24].mxu0 %v7419_v26  ;;  %vm17570_vm6 = vmmov %vm17567_vm1  ;;  %v10976_v57 = vpop.permute.xlu0 %10975  ;;  %v5577_v49 = vsel %vm17567_vm1, %v10962_v34, %v10972_v32 }
 0x7f5   : > { %9350 = vmatpush1.bf16.msra.mxu1 %v9349_v48  ;;  %v9251_v53 = vpack.c.bf16 %v5572_v47, %v5571_v22  ;;  %v5568_v43 = vsel %vm17570_vm6, %v10953_v63, %v10958_v52  ;;  %vm17571_vm4 = vmmov %vm17567_vm1  ;;  %5841 = vmatprep.mubr.f32.mxu0 %v7423_v44  ;;  %v10978_v42 = vunpack.i.h.bf16 %v10976_v57  ;;  %v10977_v19 = vunpack.i.l.bf16 %v10976_v57  ;;  %v7430_v22 = vld [vmem:[%s16450_s3 + $0x178] sm:$0xff] }
 0x7f6   : > { %v5580_v55 = vsel %vm17571_vm4, %v10958_v52, %v10913_v17  ;;  %vm17572_vm7 = vmmov %vm17567_vm1  ;;  %v7421_v52 = vld [vmem:[%s16450_s3 + $0x130] sm:$0xff] }
 0x7f7   : > { %v5567_v3 = vsel %vm17572_vm7, %v10952_v62, %v10957_v13  ;;  %vm17573_vm11 = vmmov %vm17567_vm1  ;;  %9253 = vmatprep.subr.msk.bf16.mxu0 %vm17389_vm0, %v9251_v53 }
 0x7f8   : > { %v5579_v24 = vsel %vm17573_vm11, %v10957_v13, %v10912_v51  ;;  %6014 = vmatmul.mubr.f32.vlgmr.msra.gmra.mrb[24].mxu1 %v7419_v26  ;;  %v9354_v1 = vpack.c.bf16 %v5568_v43, %v5567_v3  ;;  %5842 = vmatmul.mubr.f32.gmra.mrb[26].mxu0 %v7422_v25  ;;  %vm17576_vm7 = vmmov %vm17567_vm1  ;;  %v7428_v26 = vld [vmem:[%s16450_s3 + $0x168] sm:$0xff]  ;;  %v17583_v13 = vmov 0.0  }
 0x7f9   : > { %v9351_v23 = vpack.c.bf16 %v5580_v55, %v5579_v24  ;;  %6019 = vmatprep.mubr.f32.mxu1 %v7423_v44  ;;  %9256 = vmatpush1.bf16.msk.msra.mxu0 %vm12793_vm12, %v9254_v60  ;;  %v5578_v33 = vsel %vm17576_vm7, %v10963_v39, %v10973_v10  ;;  %vm17577_vm2 = vmmov %vm17567_vm1  ;;  %v17593_v24 = vld [vmem:[#allocation46_spill] sm:$0xff] }
 0x7fa   : > { %5847 = vmatprep.mubr.f32.mxu0 %v7426_v50  ;;  %v5573_v48 = vsel %vm17577_vm2, %v10972_v32, %v10967_v14  ;;  %vm17578_vm8 = vmmov %vm17567_vm1  ;;  %v9260_v62 = vpack.c.bf16 %v5578_v33, %v5577_v49  ;;  %v17600_v32 = vld [vmem:[#allocation33_spill] sm:$0xff] }
 0x7fb   : > { %9353 = vmatprep.subr.msk.bf16.mxu1 %vm17391_vm13, %v9351_v23  ;;  %v5574_v17 = vsel %vm17578_vm8, %v10973_v10, %v10968_v40  ;;  %vm17579_vm6 = vmmov %vm17567_vm1  ;;  %v17595_v23 = vld [vmem:[#allocation36_spill] sm:$0xff] }
 0x7fc   : > { %6020 = vmatmul.mubr.f32.gmra.mrb[26].mxu1 %v7422_v25  ;;  %5848 = vmatmul.mubr.f32.gmra.mrb[28].mxu0 %v7425_v59  ;;  %v9257_v51 = vpack.c.bf16 %v5574_v17, %v5573_v48  ;;  %v5570_v58 = vsel %vm17579_vm6, %v10968_v40, %v10978_v42  ;;  %vm17580_vm4 = vmmov %vm17567_vm1  ;;  %v17601_v40 = vld [vmem:[#allocation44_spill] sm:$0xff]  ;;  %v17605_v48 = vld [vmem:[#allocation42_spill] sm:$0xff] }
 0x7fd   : > { %9356 = vmatpush1.bf16.msk.msra.mxu1 %vm17349_vm3, %v9354_v1  ;;  %6025 = vmatprep.mubr.f32.mxu1 %v7426_v50  ;;  %v5582_v7 = vsel %vm17580_vm4, %v10978_v42, %v10963_v39  ;;  %vm17581_vm11 = vmmov %vm17567_vm1  ;;  %v17596_v50 = vld [vmem:[#allocation37_spill] sm:$0xff]  ;;  %v17603_v42 = vld [vmem:[#allocation40_spill] sm:$0xff] }
 0x7fe   : > { %v5569_v8 = vsel %vm17581_vm11, %v10967_v14, %v10977_v19  ;;  %5853 = vmatprep.mubr.f32.mxu0 %v7429_v12  ;;  %vm17582_vm7 = vmmov %vm17567_vm1  ;;  %9259 = vmatprep.subr.msk.bf16.mxu0 %vm17389_vm0, %v9257_v51  ;;  %vm17584_vm1 = vcmask 261120  }
 0x7ff   : > { %v5581_v63 = vsel %vm17582_vm7, %v10977_v19, %v10962_v34  ;;  %v9360_v44 = vpack.c.bf16 %v5570_v58, %v5569_v8  ;;  %9262 = vmatpush1.bf16.msk.msra.mxu0 %vm12793_vm12, %v9260_v62  ;;  %vm17585_vm2 = vmmov %vm17584_vm1  ;;  %v17598_v34 = vld [vmem:[#allocation20_spill] sm:$0xff]  ;;  %v17607_v8 = vld [vmem:[#allocation38_spill] sm:$0xff] }
 0x800   : > { %6026 = vmatmul.mubr.f32.gmra.mrb[28].mxu1 %v7425_v59  ;;  %v9357_v38 = vpack.c.bf16 %v5582_v7, %v5581_v63  ;;  %5854 = vmatmul.mubr.f32.gmra.mrb[30].mxu0 %v7428_v26  ;;  %vm17586_vm8 = vmmov %vm17584_vm1  ;;  %v17609_v62 = vld [vmem:[#allocation13_spill] sm:$0xff] }
 0x801   : > { %6031 = vmatprep.mubr.f32.mxu1 %v7429_v12  ;;  %5924 = vmatprep.mubr.f32.mxu0 %v17583_v13  ;;  %vm17587_vm6 = vmmov %vm17584_vm1 }
 0x802   : > { %9359 = vmatprep.subr.msk.bf16.mxu1 %vm17391_vm13, %v9357_v38  ;;  %vm17588_vm4 = vmmov %vm17584_vm1 }
 0x803   : > { %9362 = vmatpush1.bf16.msk.msra.mxu1 %vm17349_vm3, %v9360_v44  ;;  %vm17589_vm11 = vmmov %vm17584_vm1 }
 0x804   : > { %6032 = vmatmul.mubr.f32.gmra.mrb[30].mxu1 %v7428_v26  ;;  %7431 = vmatmul.mubr.msk.f32.vlgmr.msra.gmra.mrb[24].mxu0 %vm17584_vm1, %v7421_v52  ;;  %vm17590_vm7 = vmmov %vm17584_vm1 }
 0x805   : > { %6102 = vmatprep.mubr.f32.mxu1 %v17583_v13  ;;  %5930 = vmatprep.mubr.f32.mxu0 %v17583_v13 }
 0x808   : > { %7435 = vmatmul.mubr.msk.f32.vlgmr.msra.gmra.mrb[24].mxu1 %vm17585_vm2, %v7421_v52  ;;  %7432 = vmatmul.mubr.msk.f32.gmra.mrb[26].mxu0 %vm17586_vm8, %v7424_v35  ;;  %v17611_v52 = vld [vmem:[#allocation15_spill] sm:$0xff]  ;;  %vm17623_vm2 = vcmp.lt.s32.totalorder %v11635_v56, 17 }
 0x809   : > { %6108 = vmatprep.mubr.f32.mxu1 %v17583_v13  ;;  %5936 = vmatprep.mubr.f32.mxu0 %v17583_v13  ;;  %vm17624_vm8 = vmmov %vm17623_vm2 }
 0x80c   : > { %7436 = vmatmul.mubr.msk.f32.gmra.mrb[26].mxu1 %vm17587_vm6, %v7424_v35  ;;  %7433 = vmatmul.mubr.msk.f32.gmra.mrb[28].mxu0 %vm17588_vm4, %v7427_v15  ;;  %vm17625_vm6 = vmmov %vm17623_vm2 }
 0x80d   : > { %6114 = vmatprep.mubr.f32.mxu1 %v17583_v13  ;;  %5942 = vmatprep.mubr.f32.mxu0 %v17583_v13  ;;  %vm17626_vm4 = vmmov %vm17623_vm2 }
 0x810   : > { %7437 = vmatmul.mubr.msk.f32.gmra.mrb[28].mxu1 %vm17589_vm11, %v7427_v15  ;;  %7434 = vmatmul.mubr.msk.f32.gmra.mrb[30].mxu0 %vm17590_vm7, %v7430_v22  ;;  %vm17627_vm11 = vmmov %vm17623_vm2 }
 0x811   : > { %6120 = vmatprep.mubr.f32.mxu1 %v17583_v13  ;;  %vm17628_vm7 = vmmov %vm17623_vm2 }
 0x814   : > { %7438 = vmatmul.mubr.msk.f32.gmra.mrb[30].mxu1 %vm17584_vm1, %v7430_v22  ;;  %v17613_v22 = vld [vmem:[#allocation45_spill] sm:$0xff]  ;;  %vm17629_vm1 = vmmov %vm17623_vm2 }
 0x8d7   : > { %v5926_v47 = vpop.f32.mrb[24].mxu0 }
 0x8d8   : > { %v5928_v53 = vpop.f32.mrb[25].mxu0  ;;  %v15534_v25 = vadd.f32 %v5926_v47, %v17591_v37  ;;  %v17617_v37 = vld [vmem:[#allocation43_spill] sm:$0xff] }
 0x8d9   : > { %v15540_v1 = vadd.f32 %v5928_v53, %v17595_v23  ;;  %v17619_v23 = vld [vmem:[#allocation39_spill] sm:$0xff] }
 0x8da   : > { %17592 = vst [vmem:[#allocation47_spill] sm:$0xff] %v15534_v25 }
 0x8db   : > { %v6104_v43 = vpop.f32.mrb[24].mxu1  ;;  %v5932_v3 = vpop.f32.mrb[26].mxu0 }
 0x8dc   : > { %v6106_v55 = vpop.f32.mrb[25].mxu1  ;;  %v15537_v20 = vadd.f32 %v5932_v3, %v17593_v24  ;;  %v5934_v60 = vpop.f32.mrb[27].mxu0  ;;  %v15543_v39 = vadd.f32 %v6104_v43, %v17596_v50 }
 0x8dd   : > { %v15546_v10 = vadd.f32 %v6106_v55, %v17598_v34  ;;  %v15549_v46 = vadd.f32 %v5934_v60, %v17600_v32  ;;  %v17615_v55 = vld [vmem:[#allocation41_spill] sm:$0xff] }
 0x8de   : > { %17594 = vst [vmem:[#allocation18_spill] sm:$0xff] %v15537_v20  ;;  %17597 = vst [vmem:[#allocation30_spill] sm:$0xff] %v15543_v39  ;;  %v15556_v12 = vpack.i.bf16 %v15537_v20, %v15534_v25 }
 0x8df   : > { %17599 = vst [vmem:[#allocation17_spill] sm:$0xff] %v15546_v10  ;;  %v6110_v59 = vpop.f32.mrb[26].mxu1  ;;  %v5938_v33 = vpop.f32.mrb[28].mxu0  ;;  %v15563_v49 = vpack.i.bf16 %v15549_v46, %v15540_v1 }
 0x8e0   : > { %v15552_v14 = vadd.f32 %v6110_v59, %v17601_v40  ;;  %v6112_v57 = vpop.f32.mrb[27].mxu1  ;;  %v15566_v17 = vadd.f32 %v5938_v33, %v17605_v48  ;;  %10980 = vrot.lane.b32.xlu1 %v15556_v12, %s11330_s19  ;;  %v5940_v51 = vpop.f32.mrb[29].mxu0 }
 0x8e1   : > { %v15559_v19 = vadd.f32 %v6112_v57, %v17603_v42  ;;  %v15575_v26 = vadd.f32 %v5940_v51, %v17607_v8  ;;  %11050 = vrot.lane.b32.xlu0 %v15563_v49, %s11330_s19 }
 0x8e2   : > { %17602 = vst [vmem:[#allocation16_spill] sm:$0xff] %v15552_v14  ;;  %17606 = vst [vmem:[#allocation28_spill] sm:$0xff] %v15566_v17  ;;  %v15572_v58 = vpack.i.bf16 %v15552_v14, %v15543_v39 }
 0x8e3   : > { %17604 = vst [vmem:[#allocation9_spill] sm:$0xff] %v15559_v19  ;;  %v6116_v7 = vpop.f32.mrb[28].mxu1  ;;  %17608 = vst [vmem:[#allocation29_spill] sm:$0xff] %v15575_v26  ;;  %v15581_v63 = vpack.i.bf16 %v15559_v19, %v15546_v10  ;;  %v5944_v15 = vpop.f32.mrb[30].mxu0 }
 0x8e4   : > { %v15584_v38 = vadd.f32 %v6116_v7, %v17609_v62  ;;  %v6118_v44 = vpop.f32.mrb[29].mxu1  ;;  %v15590_v47 = vadd.f32 %v5944_v15, %v17613_v22  ;;  %10985 = vrot.lane.b32.xlu1 %v15572_v58, %s11330_s19  ;;  %v5946_v53 = vpop.f32.mrb[31].mxu0  ;;  %v17621_v15 = vld [vmem:[#allocation7_spill] sm:$0xff] }
 0x8e5   : > { %v15587_v35 = vadd.f32 %v6118_v44, %v17611_v52  ;;  %v15595_v3 = vadd.f32 %v5946_v53, %v17615_v55  ;;  %11055 = vrot.lane.b32.xlu0 %v15581_v63, %s11330_s19  ;;  %v17622_v22 = vsub.s32 1, %v17621_v15 }
 0x8e6   : > { %17610 = vst [vmem:[#allocation24_spill] sm:$0xff] %v15584_v38  ;;  %17614 = vst [vmem:[#allocation23_spill] sm:$0xff] %v15590_v47  ;;  %v15607_v34 = vpack.i.bf16 %v15590_v47, %v15566_v17 }
 0x8e7   : > { %17612 = vst [vmem:[#allocation10_spill] sm:$0xff] %v15587_v35  ;;  %v6122_v43 = vpop.f32.mrb[30].mxu1  ;;  %17616 = vst [vmem:[#allocation26_spill] sm:$0xff] %v15595_v3  ;;  %v15611_v32 = vpack.i.bf16 %v15595_v3, %v15575_v26 }
 0x8e8   : > { %v15600_v24 = vadd.f32 %v6122_v43, %v17617_v37  ;;  %v6124_v60 = vpop.f32.mrb[31].mxu1  ;;  %10990 = vrot.lane.b32.xlu1 %v15556_v12, %s11331_s20 }
 0x8e9   : > { %v15603_v50 = vadd.f32 %v6124_v60, %v17619_v23  ;;  %11060 = vrot.lane.b32.xlu0 %v15563_v49, %s11331_s20 }
 0x8ea   : > { %17618 = vst [vmem:[#allocation27_spill] sm:$0xff] %v15600_v24  ;;  %v15617_v59 = vpack.i.bf16 %v15600_v24, %v15584_v38 }
 0x8eb   : > { %17620 = vst [vmem:[#allocation12_spill] sm:$0xff] %v15603_v50  ;;  %v15623_v40 = vpack.i.bf16 %v15603_v50, %v15587_v35 }
 0x8ec   : > { %10995 = vrot.lane.b32.xlu1 %v15572_v58, %s11331_s20 }
 0x8ed   : > { %11065 = vrot.lane.b32.xlu0 %v15581_v63, %s11331_s20 }
 0x8f0   : > { %11000 = vrot.lane.b32.xlu1 %v15556_v12, %s11332_s25 }
 0x8f1   : > { %11070 = vrot.lane.b32.xlu0 %v15563_v49, %s11332_s25 }
 0x8f4   : > { %11005 = vrot.lane.b32.xlu1 %v15572_v58, %s11332_s25 }
 0x8f5   : > { %11075 = vrot.lane.b32.xlu0 %v15581_v63, %s11332_s25 }
 0x8f8   : > { %11010 = vrot.lane.b32.xlu1 %v15556_v12, %s11334_s27 }
 0x8f9   : > { %11080 = vrot.lane.b32.xlu0 %v15563_v49, %s11334_s27 }
 0x8fc   : > { %11015 = vrot.lane.b32.xlu1 %v15572_v58, %s11334_s27 }
 0x8fd   : > { %11085 = vrot.lane.b32.xlu0 %v15581_v63, %s11334_s27 }
 0x900   : > { %11020 = vrot.lane.b32.xlu1 %v15556_v12, %s11337_s28 }
 0x901   : > { %11090 = vrot.lane.b32.xlu0 %v15563_v49, %s11337_s28 }
 0x904   : > { %11025 = vrot.lane.b32.xlu1 %v15572_v58, %s11337_s28 }
 0x905   : > { %11095 = vrot.lane.b32.xlu0 %v15581_v63, %s11337_s28 }
 0x908   : > { %11030 = vrot.lane.b32.xlu1 %v15556_v12, %s11339_s29 }
 0x909   : > { %11100 = vrot.lane.b32.xlu0 %v15563_v49, %s11339_s29 }
 0x90c   : > { %11035 = vrot.lane.b32.xlu1 %v15572_v58, %s11339_s29 }
 0x90d   : > { %11105 = vrot.lane.b32.xlu0 %v15581_v63, %s11339_s29 }
 0x910   : > { %11040 = vrot.lane.b32.xlu1 %v15556_v12, %s11340_s30 }
 0x911   : > { %11110 = vrot.lane.b32.xlu0 %v15563_v49, %s11340_s30 }
 0x914   : > { %11045 = vrot.lane.b32.xlu1 %v15572_v58, %s11340_s30 }
 0x915   : > { %11115 = vrot.lane.b32.xlu0 %v15581_v63, %s11340_s30 }
 0x918   : > { %11120 = vrot.lane.b32.xlu1 %v15607_v34, %s11330_s19 }
 0x919   : > { %11195 = vrot.lane.b32.xlu0 %v15611_v32, %s11330_s19 }
 0x91c   : > { %11125 = vrot.lane.b32.xlu1 %v15617_v59, %s11330_s19 }
 0x91d   : > { %11200 = vrot.lane.b32.xlu0 %v15623_v40, %s11330_s19 }
 0x920   : > { %11130 = vrot.lane.b32.xlu1 %v15607_v34, %s11331_s20 }
 0x921   : > { %11205 = vrot.lane.b32.xlu0 %v15611_v32, %s11331_s20 }
 0x924   : > { %11135 = vrot.lane.b32.xlu1 %v15617_v59, %s11331_s20 }
 0x925   : > { %11210 = vrot.lane.b32.xlu0 %v15623_v40, %s11331_s20 }
 0x928   : > { %11140 = vrot.lane.b32.xlu1 %v15607_v34, %s11332_s25 }
 0x929   : > { %11215 = vrot.lane.b32.xlu0 %v15611_v32, %s11332_s25 }
 0x92c   : > { %11145 = vrot.lane.b32.xlu1 %v15617_v59, %s11332_s25 }
 0x92d   : > { %11220 = vrot.lane.b32.xlu0 %v15623_v40, %s11332_s25  ;;  %s7370_s25 = sld [smem:[#allocation4 + $0x1]] }
 0x930   : > { %11150 = vrot.lane.b32.xlu1 %v15607_v34, %s11334_s27 }
 0x931   : > { %11225 = vrot.lane.b32.xlu0 %v15611_v32, %s11334_s27 }
 0x934   : > { %11155 = vrot.lane.b32.xlu1 %v15617_v59, %s11334_s27 }
 0x935   : > { %11230 = vrot.lane.b32.xlu0 %v15623_v40, %s11334_s27 }
 0x938   : > { %11160 = vrot.lane.b32.xlu1 %v15556_v12, %s11343_s5 }
 0x939   : > { %11235 = vrot.lane.b32.xlu0 %v15563_v49, %s11343_s5  ;;  %v15748_v49 = vld [vmem:[%s16451_s4] sm:$0x7] }
 0x93a   : > { %v6962_v53 = vrot.slane %v15748_v49, %v17622_v22 }
 0x93c   : > { %11165 = vrot.lane.b32.xlu1 %v15607_v34, %s11337_s28  ;;  %7035 = vmatprep.mubr.f32.mxu0 %v6962_v53 }
 0x93d   : > { %11245 = vrot.lane.b32.xlu0 %v15581_v63, %s11343_s5  ;;  %7177 = vmatprep.mubr.f32.mxu1 %v6962_v53 }
 0x940   : > { %11170 = vrot.lane.b32.xlu1 %v15617_v59, %s11337_s28 }
 0x941   : > { %11260 = vrot.lane.b32.xlu0 %v15611_v32, %s11337_s28 }
 0x944   : > { %11175 = vrot.lane.b32.xlu1 %v15607_v34, %s11339_s29 }
 0x945   : > { %11265 = vrot.lane.b32.xlu0 %v15623_v40, %s11337_s28 }
 0x948   : > { %11180 = vrot.lane.b32.xlu1 %v15617_v59, %s11339_s29 }
 0x949   : > { %11270 = vrot.lane.b32.xlu0 %v15611_v32, %s11339_s29 }
 0x94c   : > { %11185 = vrot.lane.b32.xlu1 %v15607_v34, %s11340_s30 }
 0x94d   : > { %11275 = vrot.lane.b32.xlu0 %v15623_v40, %s11339_s29  ;;  %s291_s29 = scalar_lea.vmem %s16454_s7, %s17813_s13 }
 0x950   : > { %11190 = vrot.lane.b32.xlu1 %v15617_v59, %s11340_s30 }
 0x951   : > { %11280 = vrot.lane.b32.xlu0 %v15611_v32, %s11340_s30 }
 0x952   : > { %v10981_v12 = vpop.permute.xlu1 %10980 }
 0x953   : > { %v10983_v63 = vunpack.i.h.bf16 %v10981_v12  ;;  %v10982_v44 = vunpack.i.l.bf16 %v10981_v12  ;;  %v11051_v52 = vpop.permute.xlu0 %11050 }
 0x954   : > { %v11053_v43 = vunpack.i.h.bf16 %v11051_v52  ;;  %v11052_v55 = vunpack.i.l.bf16 %v11051_v52  ;;  %11240 = vrot.lane.b32.xlu1 %v15572_v58, %s11343_s5 }
 0x955   : > { %11285 = vrot.lane.b32.xlu0 %v15623_v40, %s11340_s30 }
 0x956   : > { %v6185_v37 = vsel %vm17623_vm2, %v10983_v63, %v11053_v43  ;;  %v6184_v60 = vsel %vm17624_vm8, %v10982_v44, %v11052_v55  ;;  %v10986_v23 = vpop.permute.xlu1 %10985  ;;  %vm17630_vm2 = vmmov %vm17629_vm1  ;;  %vm17631_vm8 = vnez %v16849_v4 }
 0x957   : > { %v9363_v12 = vpack.c.bf16 %v6185_v37, %v6184_v60  ;;  %v10988_v62 = vunpack.i.h.bf16 %v10986_v23  ;;  %v10987_v22 = vunpack.i.l.bf16 %v10986_v23  ;;  %v11056_v8 = vpop.permute.xlu0 %11055 }
 0x958   : > { %v11058_v52 = vunpack.i.h.bf16 %v11056_v8  ;;  %v11057_v7 = vunpack.i.l.bf16 %v11056_v8  ;;  %11250 = vrot.lane.b32.xlu1 %v15607_v34, %s11343_s5 }
 0x959   : > { %v6180_v58 = vsel %vm17625_vm6, %v11052_v55, %v10987_v22  ;;  %v6181_v51 = vsel %vm17626_vm4, %v11053_v43, %v10988_v62  ;;  %9365 = vmatprep.subr.msk.bf16.mxu0 %vm17040_vm14, %v9363_v12  ;;  %11290 = vrot.lane.b32.xlu0 %v15611_v32, %s11343_s5  ;;  %v6944_v32 = vld [vmem:[#allocation3] sm:$0x1]  ;;  %vm17632_vm6 = vnez %v16858_v61  ;;  %vm17638_vm4 = vcmp.lt.s32.totalorder %v11635_v56, 16 }
 0x95a   : > { %v6177_v53 = vsel %vm17627_vm11, %v10988_v62, %v11058_v52  ;;  %v6189_v8 = vsel %vm17628_vm7, %v11058_v52, %v10983_v63  ;;  %v6176_v34 = vsel %vm17629_vm1, %v10987_v22, %v11057_v7  ;;  %v10991_v37 = vpop.permute.xlu1 %10990  ;;  %v6188_v55 = vsel %vm17630_vm2, %v11057_v7, %v10982_v44  ;;  %vm17639_vm11 = vmmov %vm17638_vm4 }
 0x95b   : > { %v9463_v43 = vpack.c.bf16 %v6177_v53, %v6176_v34  ;;  %v11061_v60 = vpop.permute.xlu0 %11060  ;;  %v9466_v23 = vpack.c.bf16 %v6181_v51, %v6180_v58  ;;  %v9366_v12 = vpack.c.bf16 %v6189_v8, %v6188_v55  ;;  %v10993_v33 = vunpack.i.h.bf16 %v10991_v37  ;;  %vm17640_vm7 = vmmov %vm17638_vm4 }
 0x95c   : > { %11255 = vrot.lane.b32.xlu1 %v15617_v59, %s11343_s5  ;;  %v10992_v42 = vunpack.i.l.bf16 %v10991_v37  ;;  %v11063_v57 = vunpack.i.h.bf16 %v11061_v60  ;;  %v11062_v15 = vunpack.i.l.bf16 %v11061_v60  ;;  %vm17641_vm1 = vmmov %vm17638_vm4 }
 0x95d   : > { %9465 = vmatprep.subr.msk.bf16.mxu1 %vm17046_vm15, %v9463_v43  ;;  %11295 = vrot.lane.b32.xlu0 %v15623_v40, %s11343_s5  ;;  %vm17642_vm2 = vmmov %vm17641_vm1 }
 0x95e   : > { %9368 = vmatpush1.bf16.msk.msra.mxu0 %vm17631_vm8, %v9366_v12  ;;  %v10996_v62 = vpop.permute.xlu1 %10995  ;;  %9468 = vmatpush1.bf16.msk.msra.mxu1 %vm17632_vm6, %v9466_v23  ;;  %v15829_v36 = vsel %vm17638_vm4, %v10992_v42, %v11062_v15  ;;  %v15833_v6 = vsel %vm17639_vm11, %v10993_v33, %v11063_v57  ;;  %vm17643_vm4 = vmmov %vm17641_vm1 }
 0x95f   : > { %v11066_v7 = vpop.permute.xlu0 %11065  ;;  %v10998_v18 = vunpack.i.h.bf16 %v10996_v62  ;;  %v10997_v28 = vunpack.i.l.bf16 %v10996_v62  ;;  %vm17644_vm11 = vmmov %vm17641_vm1 }
 0x960   : > { %6947 = vperm.xlu1 %9697, %v6944_v32   ;;  %v11068_v30 = vunpack.i.h.bf16 %v11066_v7  ;;  %v11067_v27 = vunpack.i.l.bf16 %v11066_v7 }
 0x961   : > { %v15839_v7 = vsel %vm17640_vm7, %v11062_v15, %v10997_v28  ;;  %v15843_v24 = vsel %vm17641_vm1, %v11063_v57, %v10998_v18  ;;  %vm17645_vm7 = vmmov %vm17641_vm1  ;;  %vm17647_vm1 = vcmp.lt.s32.totalorder %v11635_v56, 15 }
 0x962   : > { %v15789_v51 = vpop.permute.xlu1 %11000  ;;  %v15851_v17 = vsel %vm17643_vm4, %v11067_v27, %v10992_v42  ;;  %v6256_v15 = vsel %vm17644_vm11, %v10997_v28, %v11067_v27  ;;  %v6257_v57 = vsel %vm17645_vm7, %v10998_v18, %v11068_v30  ;;  %v9375_v18 = vpack.c.bf16 %v15833_v6, %v15829_v36  ;;  %vm17650_vm4 = vmmov %vm17647_vm1 }
 0x963   : > { %v11071_v63 = vpop.permute.xlu0 %11070  ;;  %vm17651_vm11 = vmmov %vm17647_vm1  ;;  %vm17652_vm7 = vcmp.lt.s32.totalorder %v11635_v56, 17 }
 0x964   : > { %v11073_v38 = vunpack.i.h.bf16 %v11071_v63  ;;  %v11072_v62 = vunpack.i.l.bf16 %v11071_v63 }
 0x966   : > { %v15791_v59 = vpop.permute.xlu1 %11005 }
 0x967   : > { %v15793_v44 = vpop.permute.xlu0 %11075  ;;  %v11008_v60 = vunpack.i.h.bf16 %v15791_v59  ;;  %v11007_v63 = vunpack.i.l.bf16 %v15791_v59 }
 0x968   : > { %v11077_v26 = vunpack.i.l.bf16 %v15793_v44 }
 0x96a   : > { %v15795_v22 = vpop.permute.xlu1 %11010 }
 0x96b   : > { %v15797_v40 = vpop.permute.xlu0 %11080 }
 0x96e   : > { %v15799_v52 = vpop.permute.xlu1 %11015 }
 0x96f   : > { %v15801_v58 = vpop.permute.xlu0 %11085 }
 0x972   : > { %v15803_v53 = vpop.permute.xlu1 %11020 }
 0x973   : > { %v15805_v8 = vpop.permute.xlu0 %11090 }
 0x976   : > { %v15807_v34 = vpop.permute.xlu1 %11025 }
 0x977   : > { %v15809_v55 = vpop.permute.xlu0 %11095 }
 0x97a   : > { %v15811_v43 = vpop.permute.xlu1 %11030 }
 0x97b   : > { %v15813_v23 = vpop.permute.xlu0 %11100 }
 0x97e   : > { %v15815_v12 = vpop.permute.xlu1 %11035 }
 0x97f   : > { %v15817_v32 = vpop.permute.xlu0 %11105 }
 0x980   : > { %17633 = vst [vmem:[#allocation11_spill] sm:$0xff] %v15817_v32 }
 0x982   : > { %v15819_v48 = vpop.permute.xlu1 %11040 }
 0x983   : > { %17634 = vst [vmem:[#allocation22_spill] sm:$0xff] %v15819_v48  ;;  %v15821_v13 = vpop.permute.xlu0 %11110 }
 0x984   : > { %17635 = vst [vmem:[#allocation46_spill] sm:$0xff] %v15821_v13 }
 0x986   : > { %v15823_v54 = vpop.permute.xlu1 %11045 }
 0x987   : > { %17636 = vst [vmem:[#allocation36_spill] sm:$0xff] %v15823_v54  ;;  %v15825_v11 = vpop.permute.xlu0 %11115  ;;  %v17648_v54 = vunpack.i.l.bf16 %v15789_v51 }
 0x988   : > { %17637 = vst [vmem:[#allocation37_spill] sm:$0xff] %v15825_v11  ;;  %v15847_v11 = vsel %vm17642_vm2, %v11068_v30, %v10993_v33  ;;  %v17646_v33 = vunpack.i.h.bf16 %v15789_v51  ;;  %vm17649_vm2 = vmmov %vm17647_vm1 }
 0x989   : > { %v15869_v59 = vsel %vm17649_vm2, %v17648_v54, %v11072_v62  ;;  %v15883_v54 = vsel %vm17651_vm11, %v11073_v38, %v11008_v60 }
 0x98a   : > { %v11121_v37 = vpop.permute.xlu1 %11120  ;;  %v15863_v42 = vsel %vm17647_vm1, %v17646_v33, %v11073_v38  ;;  %v15879_v33 = vsel %vm17650_vm4, %v11072_v62, %v11007_v63  ;;  %vm17653_vm1 = vmmov %vm17652_vm7  ;;  %v11078_v62 = vunpack.i.h.bf16 %v15793_v44 }
 0x98b   : > { %v11123_v47 = vunpack.i.h.bf16 %v11121_v37  ;;  %v11122_v35 = vunpack.i.l.bf16 %v11121_v37  ;;  %v11196_v50 = vpop.permute.xlu0 %11195  ;;  %v9475_v37 = vpack.c.bf16 %v6257_v57, %v6256_v15  ;;  %vm17654_vm2 = vmmov %vm17653_vm1 }
 0x98c   : > { %v11198_v39 = vunpack.i.h.bf16 %v11196_v50  ;;  %v11197_v27 = vunpack.i.l.bf16 %v11196_v50  ;;  %vm17655_vm4 = vmmov %vm17653_vm1 }
 0x98d   : > { %vm17656_vm11 = vmmov %vm17653_vm1 }
 0x98e   : > { %v6187_v50 = vsel %vm17652_vm7, %v11123_v47, %v11198_v39  ;;  %v6186_v30 = vsel %vm17653_vm1, %v11122_v35, %v11197_v27  ;;  %v11126_v14 = vpop.permute.xlu1 %11125  ;;  %vm17657_vm7 = vmmov %vm17653_vm1 }
 0x98f   : > { %v9369_v6 = vpack.c.bf16 %v6187_v50, %v6186_v30  ;;  %v11128_v36 = vunpack.i.h.bf16 %v11126_v14  ;;  %v11127_v15 = vunpack.i.l.bf16 %v11126_v14  ;;  %v11201_v57 = vpop.permute.xlu0 %11200  ;;  %v11083_v14 = vunpack.i.h.bf16 %v15797_v40 }
 0x990   : > { %v11203_v38 = vunpack.i.h.bf16 %v11201_v57  ;;  %v11202_v3 = vunpack.i.l.bf16 %v11201_v57 }
 0x991   : > { %v6182_v13 = vsel %vm17654_vm2, %v11197_v27, %v11127_v15  ;;  %v6183_v30 = vsel %vm17655_vm4, %v11198_v39, %v11128_v36  ;;  %9371 = vmatprep.subr.msk.bf16.mxu0 %vm17040_vm14, %v9369_v6  ;;  %vm17658_vm2 = vmmov %vm17653_vm1  ;;  %vm17659_vm4 = vcmp.lt.s32.totalorder %v11635_v56, 15 }
 0x992   : > { %v6179_v44 = vsel %vm17656_vm11, %v11128_v36, %v11203_v38  ;;  %v6191_v50 = vsel %vm17657_vm7, %v11203_v38, %v11123_v47  ;;  %v6178_v57 = vsel %vm17653_vm1, %v11127_v15, %v11202_v3  ;;  %v11131_v25 = vpop.permute.xlu1 %11130  ;;  %v6190_v27 = vsel %vm17658_vm2, %v11202_v3, %v11122_v35  ;;  %vm17660_vm11 = vmmov %vm17659_vm4 }
 0x993   : > { %v9469_v28 = vpack.c.bf16 %v6179_v44, %v6178_v57  ;;  %v11133_v39 = vunpack.i.h.bf16 %v11131_v25  ;;  %v11132_v20 = vunpack.i.l.bf16 %v11131_v25  ;;  %v11206_v48 = vpop.permute.xlu0 %11205  ;;  %v9472_v6 = vpack.c.bf16 %v6183_v30, %v6182_v13  ;;  %vm17662_vm7 = vmmov %vm17659_vm4 }
 0x994   : > { %v9372_v10 = vpack.c.bf16 %v6191_v50, %v6190_v27  ;;  %v11208_v19 = vunpack.i.h.bf16 %v11206_v48  ;;  %v11207_v32 = vunpack.i.l.bf16 %v11206_v48  ;;  %v15913_v36 = vsel %vm17659_vm4, %v11008_v60, %v11078_v62 }
 0x995   : > { %v15917_v47 = vsel %vm17660_vm11, %v11007_v63, %v11077_v26  ;;  %v11012_v15 = vunpack.i.l.bf16 %v15795_v22  ;;  %v11082_v35 = vunpack.i.l.bf16 %v15797_v40  ;;  %9471 = vmatprep.subr.msk.bf16.mxu1 %vm17046_vm15, %v9469_v28  ;;  %v17661_v13 = vunpack.i.h.bf16 %v15789_v51 }
 0x996   : > { %9374 = vmatpush1.bf16.msk.msra.mxu0 %vm17631_vm8, %v9372_v10  ;;  %v11136_v3 = vpop.permute.xlu1 %11135  ;;  %9474 = vmatpush1.bf16.msk.msra.mxu1 %vm17632_vm6, %v9472_v6  ;;  %vm17663_vm1 = vcmp.lt.s32.totalorder %v11635_v56, 16  ;;  %v17665_v60 = vunpack.i.l.bf16 %v15789_v51  ;;  %v9485_v61 = vpack.c.bf16 %v15913_v36, %v15917_v47  ;;  %v17666_v38 = vunpack.i.h.bf16 %v15795_v22 }
 0x997   : > { %v15927_v25 = vsel %vm17662_vm7, %v11078_v62, %v17661_v13  ;;  %v6266_v48 = vsel %vm17663_vm1, %v11132_v20, %v11207_v32  ;;  %vm17664_vm2 = vmmov %vm17663_vm1  ;;  %v11138_v28 = vunpack.i.h.bf16 %v11136_v3  ;;  %v11137_v62 = vunpack.i.l.bf16 %v11136_v3  ;;  %9376 = vmatprep.subr.bf16.mxu0 %v9375_v18  ;;  %v11211_v4 = vpop.permute.xlu0 %11210  ;;  %9476 = vmatprep.subr.bf16.mxu1 %v9475_v37 }
 0x998   : > { %v6267_v40 = vsel %vm17664_vm2, %v11133_v39, %v11208_v19  ;;  %v15941_v63 = vsel %vm17659_vm4, %v11077_v26, %v17665_v60  ;;  %vm17667_vm8 = vcmp.lt.s32.totalorder %v11635_v56, 1  ;;  %v11213_v51 = vunpack.i.h.bf16 %v11211_v4  ;;  %vm17669_vm11 = vmmov %vm17663_vm1 }
 0x999   : > { %v9380_v10 = vpack.c.bf16 %v6267_v40, %v6266_v48  ;;  %v15949_v30 = vsel %vm17667_vm8, %v17666_v38, %v11083_v14  ;;  %v11212_v44 = vunpack.i.l.bf16 %v11211_v4  ;;  %vm17668_vm6 = vmmov %vm17667_vm8  ;;  %v11018_v18 = vunpack.i.h.bf16 %v15799_v52 }
 0x99a   : > { %v15955_v26 = vsel %vm17668_vm6, %v11012_v15, %v11082_v35  ;;  %v11017_v37 = vunpack.i.l.bf16 %v15799_v52  ;;  %v6262_v50 = vsel %vm17669_vm11, %v11207_v32, %v11137_v62  ;;  %vm17670_vm7 = vmmov %vm17663_vm1  ;;  %v6271_v27 = vsel %vm17663_vm1, %v11213_v51, %v11133_v39  ;;  %v11141_v47 = vpop.permute.xlu1 %11140 }
 0x99b   : > { %v6263_v57 = vsel %vm17670_vm7, %v11208_v19, %v11138_v28  ;;  %vm17671_vm2 = vmmov %vm17663_vm1  ;;  %v17672_v36 = vpack.c.bf16 %v15847_v11, %v15851_v17  ;;  %vm17673_vm4 = vnez %v16869_v2  ;;  %v17674_v52 = vpack.c.bf16 %v15843_v24, %v15839_v7  ;;  %v11216_v39 = vpop.permute.xlu0 %11215 }
 0x99c   : > { %v6270_v6 = vsel %vm17671_vm2, %v11212_v44, %v11132_v20  ;;  %vm17675_vm8 = vnez %v16876_v0  ;;  %v11143_v32 = vunpack.i.h.bf16 %v11141_v47  ;;  %v11142_v13 = vunpack.i.l.bf16 %v11141_v47  ;;  %vm17676_vm6 = vmmov %vm17663_vm1 }
 0x99d   : > { %9379 = vmatpush1.bf16.msk.msra.mxu0 %vm17673_vm4, %v17672_v36  ;;  %9479 = vmatpush1.bf16.msk.msra.mxu1 %vm17675_vm8, %v17674_v52  ;;  %v9382_v19 = vpack.c.bf16 %v6271_v27, %v6270_v6  ;;  %v6258_v20 = vsel %vm17676_vm6, %v11137_v62, %v11212_v44  ;;  %v11088_v11 = vunpack.i.h.bf16 %v15801_v58  ;;  %v11218_v17 = vunpack.i.h.bf16 %v11216_v39  ;;  %vm17677_vm11 = vmmov %vm17663_vm1 }
 0x99e   : > { %9381 = vmatprep.subr.bf16.mxu0 %v9380_v10  ;;  %v11217_v3 = vunpack.i.l.bf16 %v11216_v39  ;;  %v6259_v48 = vsel %vm17677_vm11, %v11138_v28, %v11213_v51  ;;  %vm17678_vm7 = vcmp.lt.s32.totalorder %v11635_v56, 1  ;;  %v11087_v40 = vunpack.i.l.bf16 %v15801_v58 }
 0x99f   : > { %v15984_v24 = vsel %vm17678_vm7, %v11082_v35, %v11017_v37  ;;  %vm17679_vm1 = vmmov %vm17678_vm7  ;;  %v9480_v60 = vpack.c.bf16 %v6259_v48, %v6258_v20  ;;  %v9388_v62 = vpack.c.bf16 %v15927_v25, %v15941_v63  ;;  %v9482_v4 = vpack.c.bf16 %v6263_v57, %v6262_v50  ;;  %v11146_v35 = vpop.permute.xlu1 %11145  ;;  %v11221_v63 = vpop.permute.xlu0 %11220 }
 0x9a0   : > { %v15988_v7 = vsel %vm17679_vm1, %v11083_v14, %v11018_v18  ;;  %vm17680_vm2 = vcmp.lt.s32.totalorder %v11635_v56, 15  ;;  %v9397_v14 = vpack.c.bf16 %v15949_v30, %v15955_v26  ;;  %v11148_v58 = vunpack.i.h.bf16 %v11146_v35  ;;  %vm17686_vm7 = vmmov %vm17679_vm1 }
 0x9a1   : > { %v6347_v10 = vsel %vm17680_vm2, %v11143_v32, %v11218_v17  ;;  %vm17681_vm6 = vmmov %vm17680_vm2  ;;  %9384 = vmatpush1.bf16.msk.msra.mxu0 %vm17673_vm4, %v9382_v19  ;;  %9481 = vmatprep.subr.bf16.mxu1 %v9480_v60  ;;  %v11147_v51 = vunpack.i.l.bf16 %v11146_v35  ;;  %v17682_v25 = vpack.c.bf16 %v15863_v42, %v15869_v59  ;;  %vm17683_vm11 = vnez %v16886_v31 }
 0x9a2   : > { %v6346_v28 = vsel %vm17681_vm6, %v11142_v13, %v11217_v3  ;;  %v9500_v44 = vpack.c.bf16 %v15988_v7, %v15984_v24  ;;  %vm17684_vm4 = vmmov %vm17679_vm1  ;;  %9484 = vmatpush1.bf16.msk.msra.mxu1 %vm17675_vm8, %v9482_v4  ;;  %v11223_v30 = vunpack.i.h.bf16 %v11221_v63  ;;  %v11222_v26 = vunpack.i.l.bf16 %v11221_v63 }
 0x9a3   : > { %v9391_v38 = vpack.c.bf16 %v6347_v10, %v6346_v28  ;;  %9387 = vmatprep.subr.msk.bf16.mxu0 %vm17683_vm11, %v17682_v25  ;;  %v6417_v2 = vsel %vm17684_vm4, %v11018_v18, %v11088_v11  ;;  %v17685_v50 = vunpack.i.h.bf16 %v15795_v22  ;;  %v6416_v59 = vsel %vm17679_vm1, %v11017_v37, %v11087_v40  ;;  %vm17687_vm2 = vmmov %vm17679_vm1  ;;  %v11226_v52 = vpop.permute.xlu0 %11225 }
 0x9a4   : > { %v6428_v57 = vsel %vm17687_vm2, %v11087_v40, %v11012_v15  ;;  %v6342_v18 = vsel %vm17681_vm6, %v11217_v3, %v11147_v51  ;;  %vm17688_vm8 = vnez %v16898_v45  ;;  %vm17689_vm4 = vmmov %vm17681_vm6  ;;  %vm17693_vm2 = vnez %v16890_v29  ;;  %v11151_v15 = vpop.permute.xlu1 %11150 }
 0x9a5   : > { %v6429_v42 = vsel %vm17686_vm7, %v11088_v11, %v17685_v50  ;;  %9487 = vmatprep.subr.msk.bf16.mxu1 %vm17688_vm8, %v9485_v61  ;;  %v6343_v0 = vsel %vm17689_vm4, %v11218_v17, %v11148_v58  ;;  %vm17690_vm13 = vmmov %vm17689_vm4  ;;  %9390 = vmatpush1.bf16.msk.msra.mxu0 %vm17693_vm2, %v9388_v62  ;;  %v11153_v36 = vunpack.i.h.bf16 %v11151_v15  ;;  %v11152_v47 = vunpack.i.l.bf16 %v11151_v15 }
 0x9a6   : > { %v6339_v27 = vsel %vm17690_vm13, %v11148_v58, %v11223_v30  ;;  %vm17691_vm7 = vmmov %vm17689_vm4  ;;  %9393 = vmatprep.subr.msk.bf16.mxu0 %vm17683_vm11, %v9391_v38  ;;  %v9497_v19 = vpack.c.bf16 %v6417_v2, %v6416_v59  ;;  %vm17696_vm13 = vnez %v16900_v16  ;;  %v11228_v20 = vunpack.i.h.bf16 %v11226_v52 }
 0x9a7   : > { %v6351_v37 = vsel %vm17691_vm7, %v11223_v30, %v11143_v32  ;;  %vm17692_vm1 = vmmov %vm17689_vm4  ;;  %v17695_v32 = vpack.c.bf16 %v15883_v54, %v15879_v33  ;;  %v11227_v11 = vunpack.i.l.bf16 %v11226_v52  ;;  %v9400_v17 = vpack.c.bf16 %v6429_v42, %v6428_v57 }
 0x9a8   : > { %v6338_v22 = vsel %vm17692_vm1, %v11147_v51, %v11222_v26  ;;  %vm17694_vm6 = vmmov %vm17692_vm1  ;;  %v11022_v3 = vunpack.i.l.bf16 %v15803_v53  ;;  %v11093_v48 = vunpack.i.h.bf16 %v15805_v8  ;;  %v11092_v40 = vunpack.i.l.bf16 %v15805_v8  ;;  %v11156_v62 = vpop.permute.xlu1 %11155  ;;  %v11231_v8 = vpop.permute.xlu0 %11230 }
 0x9a9   : > { %v6350_v6 = vsel %vm17694_vm6, %v11222_v26, %v11142_v13  ;;  %v9491_v61 = vpack.c.bf16 %v6339_v27, %v6338_v22  ;;  %9490 = vmatpush1.bf16.msk.msra.mxu1 %vm17696_vm13, %v17695_v32  ;;  %v11023_v13 = vunpack.i.h.bf16 %v15803_v53  ;;  %v9494_v60 = vpack.c.bf16 %v6343_v0, %v6342_v18 }
 0x9aa   : > { %v9394_v39 = vpack.c.bf16 %v6351_v37, %v6350_v6  ;;  %vm17697_vm4 = vcmp.lt.s32.totalorder %v11635_v56, 1  ;;  %v11028_v53 = vunpack.i.h.bf16 %v15807_v34  ;;  %v11158_v10 = vunpack.i.h.bf16 %v11156_v62 }
 0x9ab   : > { %9493 = vmatprep.subr.msk.bf16.mxu1 %vm17688_vm8, %v9491_v61  ;;  %v6427_v33 = vsel %vm17697_vm4, %v11153_v36, %v11228_v20  ;;  %vm17698_vm7 = vmmov %vm17697_vm4  ;;  %v11157_v28 = vunpack.i.l.bf16 %v11156_v62  ;;  %v11027_v35 = vunpack.i.l.bf16 %v15807_v34  ;;  %v11098_v38 = vunpack.i.h.bf16 %v15809_v55 }
 0x9ac   : > { %v6426_v54 = vsel %vm17698_vm7, %v11152_v47, %v11227_v11  ;;  %9396 = vmatpush1.bf16.msk.msra.mxu0 %vm17693_vm2, %v9394_v39  ;;  %v11233_v58 = vunpack.i.h.bf16 %v11231_v8  ;;  %v11232_v29 = vunpack.i.l.bf16 %v11231_v8  ;;  %v11097_v51 = vunpack.i.l.bf16 %v15809_v55  ;;  %vm17699_vm1 = vmmov %vm17697_vm4  ;;  %v16079_v30 = vpop.permute.xlu1 %11160  ;;  %v16089_v59 = vpop.permute.xlu0 %11235  ;;  %v17715_v39 = vld [vmem:[#allocation8_spill] sm:$0xff] }
 0x9ad   : > { %v9403_v4 = vpack.c.bf16 %v6427_v33, %v6426_v54  ;;  %9399 = vmatprep.subr.msk.bf16.mxu0 %vm17040_vm14, %v9397_v14  ;;  %9496 = vmatpush1.bf16.msk.msra.mxu1 %vm17696_vm13, %v9494_v60  ;;  %v11033_v25 = vunpack.i.h.bf16 %v15811_v43  ;;  %v11032_v63 = vunpack.i.l.bf16 %v15811_v43  ;;  %v11103_v2 = vunpack.i.h.bf16 %v15813_v23  ;;  %vm17700_vm2 = vmmov %vm17699_vm1  ;;  %v17720_v60 = vld [vmem:[#allocation22_spill] sm:$0xff] }
 0x9ae   : > { %9499 = vmatprep.subr.msk.bf16.mxu1 %vm17046_vm15, %v9497_v19  ;;  %v11102_v34 = vunpack.i.l.bf16 %v15813_v23  ;;  %v6419_v14 = vsel %vm17699_vm1, %v11158_v10, %v11233_v58  ;;  %v6431_v16 = vsel %vm17700_vm2, %v11233_v58, %v11153_v36  ;;  %vm17701_vm6 = vmmov %vm17699_vm1  ;;  %v11038_v61 = vunpack.i.h.bf16 %v15815_v12  ;;  %v17721_v54 = vld [vmem:[#allocation46_spill] sm:$0xff] }
 0x9af   : > { %v6418_v55 = vsel %vm17701_vm6, %v11157_v28, %v11232_v29  ;;  %vm17702_vm13 = vmmov %vm17699_vm1  ;;  %v11037_v36 = vunpack.i.l.bf16 %v15815_v12  ;;  %v16153_v32 = vrot.slane %v15748_v49, %v17715_v39  ;;  %v11043_v33 = vunpack.i.h.bf16 %v17720_v60 }
 0x9b0   : > { %9402 = vmatpush1.bf16.msk.msra.mxu0 %vm12711_vm5, %v9400_v17  ;;  %v6422_v26 = vsel %vm17702_vm13, %v11227_v11, %v11157_v28  ;;  %vm17703_vm4 = vmmov %vm17699_vm1  ;;  %v9503_v42 = vpack.c.bf16 %v6419_v14, %v6418_v55  ;;  %v16126_v15 = vpop.permute.xlu1 %11165  ;;  %v16145_v52 = vpop.permute.xlu0 %11245  ;;  %v17716_v11 = vld [vmem:[#allocation11_spill] sm:$0xff]  ;;  %v11113_v62 = vunpack.i.h.bf16 %v17721_v54  ;;  %v11042_v55 = vunpack.i.l.bf16 %v17720_v60 }
 0x9b1   : > { %v6423_v23 = vsel %vm17703_vm4, %v11228_v20, %v11158_v10  ;;  %vm17704_vm7 = vmmov %vm17699_vm1  ;;  %9405 = vmatprep.subr.msk.bf16.mxu0 %vm17040_vm14, %v9403_v4  ;;  %vm17705_vm1 = vcmp.lt.s32.totalorder %v11635_v56, 127  ;;  %9502 = vmatpush1.bf16.msk.msra.mxu1 %vm17487_vm10, %v9500_v44  ;;  %v11108_v17 = vunpack.i.h.bf16 %v17716_v11  ;;  %v17723_v4 = vld [vmem:[#allocation47_spill] sm:$0xff] }
 0x9b2   : > { %v6430_v50 = vsel %vm17704_vm7, %v11232_v29, %v11152_v47  ;;  %v16093_v57 = vsel %vm17705_vm1, %v11023_v13, %v11093_v48  ;;  %vm17706_vm2 = vmmov %vm17705_vm1  ;;  %9505 = vmatprep.subr.msk.bf16.mxu1 %vm17046_vm15, %v9503_v42  ;;  %v6524_v44 = vsel %vm17705_vm1, %v11097_v51, %v11022_v3  ;;  %v9506_v22 = vpack.c.bf16 %v6423_v23, %v6422_v26  ;;  %v17727_v29 = vld [vmem:[#allocation26_spill] sm:$0xff]  ;;  %v17730_v23 = vld [vmem:[#allocation16_spill] sm:$0xff] }
 0x9b3   : > { %v9406_v18 = vpack.c.bf16 %v6431_v16, %v6430_v50  ;;  %v16102_v0 = vsel %vm17706_vm2, %v11022_v3, %v11092_v40  ;;  %vm17707_vm6 = vmmov %vm17705_vm1  ;;  %vm17712_vm15 = vcmp.lt.s32.totalorder %v11635_v56, 113  ;;  %v17714_v47 = vpack.c.bf16 %v15549_v46, %v15540_v1  ;;  %v17717_v46 = vld [vmem:[#allocation9_spill] sm:$0xff]  ;;  %v17731_v50 = vld [vmem:[#allocation30_spill] sm:$0xff] }
 0x9b4   : > { %v6516_v9 = vsel %vm17707_vm6, %v11092_v40, %v11027_v35  ;;  %vm17708_vm14 = vmmov %vm17705_vm1  ;;  %v16132_v5 = vsel %vm17712_vm15, %v11033_v25, %v11103_v2  ;;  %v9420_v19 = vpack.c.bf16 %v16093_v57, %v16102_v0  ;;  %v11107_v1 = vunpack.i.l.bf16 %v17716_v11  ;;  %v11171_v28 = vpop.permute.xlu1 %11170  ;;  %v11261_v16 = vpop.permute.xlu0 %11260  ;;  %v17772_v60 = vld [vmem:[#allocation35_spill] sm:$0xff] }
 0x9b5   : > { %v6517_v27 = vsel %vm17708_vm14, %v11093_v48, %v11028_v53  ;;  %vm17709_vm13 = vmmov %vm17705_vm1  ;;  %9408 = vmatpush1.bf16.msk.msra.mxu0 %vm12711_vm5, %v9406_v18  ;;  %9508 = vmatpush1.bf16.msk.msra.mxu1 %vm17487_vm10, %v9506_v22  ;;  %v11172_v58 = vunpack.i.l.bf16 %v11171_v28  ;;  %v11112_v26 = vunpack.i.l.bf16 %v17721_v54  ;;  %v17732_v42 = vpack.c.bf16 %v17730_v23, %v17731_v50  ;;  %v17748_v54 = vld [vmem:[#allocation37_spill] sm:$0xff] }
 0x9b6   : > { %v16110_v37 = vsel %vm17709_vm13, %v11028_v53, %v11098_v38  ;;  %vm17710_vm4 = vmmov %vm17705_vm1  ;;  %9410 = vmatprep.subr.bf16.mxu0 %v17714_v47  ;;  %v9417_v20 = vpack.c.bf16 %v6517_v27, %v6516_v9  ;;  %v17722_v53 = vld [vmem:[#allocation18_spill] sm:$0xff]  ;;  %v11262_v57 = vunpack.i.l.bf16 %v11261_v16  ;;  %v17736_v9 = vld [vmem:[#allocation36_spill] sm:$0xff] }
 0x9b7   : > { %v16116_v24 = vsel %vm17710_vm4, %v11098_v38, %v11023_v13  ;;  %vm17711_vm7 = vmmov %vm17705_vm1  ;;  %v17718_v13 = vld [vmem:[#allocation17_spill] sm:$0xff]  ;;  %v17724_v10 = vpack.c.bf16 %v17722_v53, %v17723_v4  ;;  %v11173_v38 = vunpack.i.h.bf16 %v11171_v28  ;;  %v11047_v27 = vunpack.i.l.bf16 %v17736_v9  ;;  %v17745_v47 = vld [vmem:[#allocation28_spill] sm:$0xff] }
 0x9b8   : > { %v16120_v7 = vsel %vm17711_vm7, %v11027_v35, %v11097_v51  ;;  %vm17713_vm2 = vmmov %vm17712_vm15  ;;  %v17719_v3 = vpack.c.bf16 %v17717_v46, %v17718_v13  ;;  %v9517_v48 = vpack.c.bf16 %v16116_v24, %v6524_v44  ;;  %v17728_v51 = vld [vmem:[#allocation29_spill] sm:$0xff]  ;;  %v17738_v24 = vld [vmem:[#allocation10_spill] sm:$0xff]  ;;  %vm17741_vm15 = vcmp.lt.s32.totalorder %v11635_v56, 112  ;;  %v16223_v43 = vpop.permute.xlu1 %11175  ;;  %v11266_v13 = vpop.permute.xlu0 %11265 }
 0x9b9   : > { %v16138_v6 = vsel %vm17713_vm2, %v11032_v63, %v11102_v34  ;;  %v9520_v12 = vpack.c.bf16 %v16110_v37, %v16120_v7  ;;  %9412 = vmatpush1.bf16.msra.mxu0 %v17724_v10  ;;  %vm17725_vm6 = vmmov %vm17713_vm2  ;;  %v17729_v14 = vpack.c.bf16 %v17727_v29, %v17728_v51  ;;  %v17737_v37 = vld [vmem:[#allocation12_spill] sm:$0xff]  ;;  %v11118_v53 = vunpack.i.h.bf16 %v17748_v54  ;;  %v17749_v4 = vld [vmem:[#allocation27_spill] sm:$0xff] }
 0x9ba   : > { %9510 = vmatprep.subr.bf16.mxu1 %v17719_v3  ;;  %v9432_v40 = vpack.c.bf16 %v16132_v5, %v16138_v6  ;;  %v16172_v8 = vsel %vm17725_vm6, %v11102_v34, %v11037_v36  ;;  %vm17726_vm14 = vmmov %vm17713_vm2  ;;  %v11263_v34 = vunpack.i.h.bf16 %v11261_v16  ;;  %v17739_v7 = vpack.c.bf16 %v17737_v37, %v17738_v24  ;;  %v17750_v10 = vld [vmem:[#allocation24_spill] sm:$0xff] }
 0x9bb   : > { %v16176_v35 = vsel %vm17726_vm14, %v11103_v2, %v11038_v61  ;;  %9414 = vmatprep.subr.bf16.mxu0 %v17729_v14  ;;  %9512 = vmatpush1.bf16.msra.mxu1 %v17732_v42  ;;  %vm17733_vm13 = vmmov %vm17713_vm2  ;;  %v17751_v28 = vpack.c.bf16 %v17749_v4, %v17750_v10  ;;  %v11268_v29 = vunpack.i.h.bf16 %v11266_v13  ;;  %v11267_v51 = vunpack.i.l.bf16 %v11266_v13 }
 0x9bc   : > { %v16188_v2 = vsel %vm17733_vm13, %v11038_v61, %v11108_v17  ;;  %vm17734_vm4 = vmmov %vm17713_vm2  ;;  %9514 = vmatprep.subr.bf16.mxu1 %v17739_v7  ;;  %v11271_v24 = vpop.permute.xlu0 %11270  ;;  %v11238_v6 = vunpack.i.h.bf16 %v16089_v59 }
 0x9bd   : > { %v16194_v18 = vsel %vm17734_vm4, %v11108_v17, %v11033_v25  ;;  %vm17735_vm7 = vmmov %vm17713_vm2  ;;  %v16214_v25 = vsel %vm17741_vm15, %v11043_v33, %v11113_v62  ;;  %v11168_v17 = vunpack.i.h.bf16 %v16126_v15 }
 0x9be   : > { %v16198_v0 = vsel %vm17735_vm7, %v11037_v36, %v11107_v1  ;;  %vm17740_vm1 = vmmov %vm17713_vm2  ;;  %vm17742_vm2 = vcmp.lt.s32.totalorder %v11635_v56, 127  ;;  %v17744_v36 = vld [vmem:[#allocation23_spill] sm:$0xff] }
 0x9bf   : > { %v16208_v44 = vsel %vm17740_vm1, %v11107_v1, %v11032_v63  ;;  %v6519_v22 = vsel %vm17742_vm2, %v11263_v34, %v11173_v38  ;;  %vm17743_vm6 = vmmov %vm17742_vm2  ;;  %v17746_v11 = vpack.c.bf16 %v17744_v36, %v17745_v47  ;;  %v11048_v63 = vunpack.i.h.bf16 %v17736_v9  ;;  %9516 = vmatpush1.bf16.msra.mxu1 %v17751_v28 }
 0x9c0   : > { %v6518_v61 = vsel %vm17743_vm6, %v11262_v57, %v11172_v58  ;;  %v11167_v1 = vunpack.i.l.bf16 %v16126_v15  ;;  %vm17747_vm14 = vmmov %vm17741_vm15  ;;  %9519 = vmatprep.subr.msk.bf16.mxu1 %vm17688_vm8, %v9517_v48  ;;  %v11272_v36 = vunpack.i.l.bf16 %v11271_v24  ;;  %v9532_v47 = vpack.c.bf16 %v16188_v2, %v16198_v0 }
 0x9c1   : > { %9416 = vmatpush1.bf16.msra.mxu0 %v17746_v11  ;;  %v9423_v46 = vpack.c.bf16 %v6519_v22, %v6518_v61  ;;  %v16234_v3 = vsel %vm17747_vm14, %v11042_v55, %v11112_v26  ;;  %vm17752_vm13 = vmmov %vm17747_vm14  ;;  %v11273_v61 = vunpack.i.h.bf16 %v11271_v24  ;;  %v11177_v0 = vunpack.i.l.bf16 %v16223_v43 }
 0x9c2   : > { %9419 = vmatprep.subr.msk.bf16.mxu0 %vm17683_vm11, %v9417_v20  ;;  %v16242_v15 = vsel %vm17752_vm13, %v11112_v26, %v11047_v27  ;;  %v11117_v20 = vunpack.i.l.bf16 %v17748_v54  ;;  %vm17753_vm4 = vmmov %vm17742_vm2  ;;  %v9444_v31 = vpack.c.bf16 %v16214_v25, %v16234_v3  ;;  %v11163_v54 = vunpack.i.h.bf16 %v16079_v30 }
 0x9c3   : > { %v6523_v14 = vsel %vm17753_vm4, %v11168_v17, %v11263_v34  ;;  %vm17754_vm7 = vmmov %vm17742_vm2  ;;  %v11181_v34 = vpop.permute.xlu1 %11180  ;;  %9522 = vmatpush1.bf16.msk.msra.mxu1 %vm17349_vm3, %v9520_v12  ;;  %vm17764_vm4 = vcmp.lt.s32.totalorder %v11635_v56, 113 }
 0x9c4   : > { %v6522_v16 = vsel %vm17754_vm7, %v11167_v1, %v11262_v57  ;;  %vm17755_vm1 = vmmov %vm17742_vm2  ;;  %v11183_v37 = vunpack.i.h.bf16 %v11181_v34 }
 0x9c5   : > { %v6515_v23 = vsel %vm17755_vm1, %v11173_v38, %v11268_v29  ;;  %vm17756_vm15 = vmmov %vm17755_vm1  ;;  %9422 = vmatpush1.bf16.msk.msra.mxu0 %vm12793_vm12, %v9420_v19  ;;  %v11182_v38 = vunpack.i.l.bf16 %v11181_v34  ;;  %v9426_v7 = vpack.c.bf16 %v6523_v14, %v6522_v16  ;;  %v9429_v19 = vpack.c.bf16 %v16176_v35, %v16172_v8 }
 0x9c6   : > { %v6527_v50 = vsel %vm17756_vm15, %v11268_v29, %v11168_v17  ;;  %vm17757_vm2 = vmmov %vm17755_vm1  ;;  %9425 = vmatprep.subr.msk.bf16.mxu0 %vm17683_vm11, %v9423_v46  ;;  %v6599_v8 = vsel %vm17764_vm4, %v11273_v61, %v11183_v37 }
 0x9c7   : > { %v6514_v26 = vsel %vm17757_vm2, %v11172_v58, %v11267_v51  ;;  %vm17758_vm6 = vmmov %vm17755_vm1  ;;  %v16293_v2 = vpop.permute.xlu1 %11185 }
 0x9c8   : > { %v6526_v42 = vsel %vm17758_vm6, %v11267_v51, %v11167_v1  ;;  %vm17760_vm14 = vmmov %vm17752_vm13  ;;  %v9526_v58 = vpack.c.bf16 %v6515_v23, %v6514_v26  ;;  %v11162_v51 = vunpack.i.l.bf16 %v16079_v30  ;;  %v11248_v30 = vunpack.i.h.bf16 %v16145_v52 }
 0x9c9   : > { %v16263_v57 = vsel %vm17760_vm14, %v11113_v62, %v11048_v63  ;;  %v9523_v48 = vpack.c.bf16 %v6527_v50, %v6526_v42  ;;  %v9529_v62 = vpack.c.bf16 %v16194_v18, %v16208_v44  ;;  %vm17762_vm11 = vmmov %vm17752_vm13  ;;  %9428 = vmatpush1.bf16.msk.msra.mxu0 %vm12793_vm12, %v9426_v7  ;;  %v11178_v18 = vunpack.i.h.bf16 %v16223_v43  ;;  %v17766_v44 = vld [vmem:[#allocation25_spill] sm:$0xff] }
 0x9ca   : > { %v16281_v12 = vsel %vm17762_vm11, %v11048_v63, %v11118_v53  ;;  %vm17763_vm13 = vmmov %vm17762_vm11  ;;  %v9441_v45 = vpack.c.bf16 %v16263_v57, %v16242_v15  ;;  %v11276_v63 = vpop.permute.xlu0 %11275  ;;  %vm17773_vm14 = vnez %v17772_v60  ;;  %v11247_v42 = vunpack.i.l.bf16 %v16145_v52 }
 0x9cb   : > { %9525 = vmatprep.subr.msk.bf16.mxu1 %vm17688_vm8, %v9523_v48  ;;  %v16285_v11 = vsel %vm17763_vm13, %v11047_v27, %v11117_v20  ;;  %vm17765_vm7 = vmmov %vm17764_vm4  ;;  %vm17767_vm8 = vnez %v17766_v44  ;;  %v11278_v46 = vunpack.i.h.bf16 %v11276_v63  ;;  %v11277_v43 = vunpack.i.l.bf16 %v11276_v63  ;;  %v11191_v29 = vpop.permute.xlu1 %11190 }
 0x9cc   : > { %v6598_v35 = vsel %vm17765_vm7, %v11272_v36, %v11182_v38  ;;  %9431 = vmatprep.subr.msk.bf16.mxu0 %vm17767_vm8, %v9429_v19  ;;  %vm17768_vm1 = vmmov %vm17762_vm11  ;;  %9528 = vmatpush1.bf16.msk.msra.mxu1 %vm17349_vm3, %v9526_v58  ;;  %v9544_v13 = vpack.c.bf16 %v16281_v12, %v16285_v11  ;;  %v11192_v14 = vunpack.i.l.bf16 %v11191_v29  ;;  %v11188_v34 = vunpack.i.h.bf16 %v16293_v2 }
 0x9cd   : > { %v9435_v27 = vpack.c.bf16 %v6599_v8, %v6598_v35  ;;  %v6685_v17 = vsel %vm17768_vm1, %v11118_v53, %v11043_v33  ;;  %vm17769_vm15 = vmmov %vm17768_vm1  ;;  %9531 = vmatprep.subr.msk.bf16.mxu1 %vm17773_vm14, %v9529_v62  ;;  %9434 = vmatpush1.bf16.msk.msra.mxu0 %vm12711_vm5, %v9432_v40  ;;  %v11237_v40 = vunpack.i.l.bf16 %v16089_v59  ;;  %v11187_v57 = vunpack.i.l.bf16 %v16293_v2 }
 0x9ce   : > { %v6684_v1 = vsel %vm17769_vm15, %v11117_v20, %v11042_v55  ;;  %vm17770_vm2 = vmmov %vm17764_vm4  ;;  %v11193_v20 = vunpack.i.h.bf16 %v11191_v29  ;;  %v11281_v16 = vpop.permute.xlu0 %11280  ;;  %v7259_v58 = vstv %s7370_s25 }
 0x9cf   : > { %v6603_v4 = vsel %vm17770_vm2, %v11178_v18, %v11273_v61  ;;  %vm17771_vm6 = vmmov %vm17770_vm2  ;;  %9437 = vmatprep.subr.msk.bf16.mxu0 %vm17767_vm8, %v9435_v27  ;;  %v11283_v26 = vunpack.i.h.bf16 %v11281_v16  ;;  %v11282_v5 = vunpack.i.l.bf16 %v11281_v16  ;;  %v11241_v59 = vpop.permute.xlu1 %11240 }
 0x9d0   : > { %v6602_v33 = vsel %vm17771_vm6, %v11177_v0, %v11272_v36  ;;  %vm17774_vm11 = vmmov %vm17770_vm2  ;;  %9534 = vmatpush1.bf16.msk.msra.mxu1 %vm17487_vm10, %v9532_v47  ;;  %v11243_v52 = vunpack.i.h.bf16 %v11241_v59  ;;  %v11242_v7 = vunpack.i.l.bf16 %v11241_v59  ;;  %v17807_v59 = vld [vmem:[#allocation7_spill] sm:$0xff] }
 0x9d1   : > { %v6595_v55 = vsel %vm17774_vm11, %v11183_v37, %v11278_v46  ;;  %vm17775_vm13 = vmmov %vm17770_vm2  ;;  %v9438_v23 = vpack.c.bf16 %v6603_v4, %v6602_v33  ;;  %v6678_v37 = vsel %vm17768_vm1, %v11282_v5, %v11192_v14 }
 0x9d2   : > { %v6607_v53 = vsel %vm17775_vm13, %v11278_v46, %v11178_v18  ;;  %vm17776_vm4 = vmmov %vm17770_vm2  ;;  %v11286_v61 = vpop.permute.xlu0 %11285 }
 0x9d3   : > { %v6594_v10 = vsel %vm17776_vm4, %v11182_v38, %v11277_v43  ;;  %vm17777_vm7 = vmmov %vm17770_vm2  ;;  %9440 = vmatpush1.bf16.msk.msra.mxu0 %vm12711_vm5, %v9438_v23  ;;  %v9541_v38 = vpack.c.bf16 %v6685_v17, %v6684_v1  ;;  %v11288_v21 = vunpack.i.h.bf16 %v11286_v61  ;;  %v11287_v62 = vunpack.i.l.bf16 %v11286_v61  ;;  %v11251_v44 = vpop.permute.xlu1 %11250 }
 0x9d4   : > { %v6606_v28 = vsel %vm17777_vm7, %v11277_v43, %v11177_v0  ;;  %v9538_v50 = vpack.c.bf16 %v6595_v55, %v6594_v10  ;;  %vm17778_vm8 = vmmov %vm17768_vm1  ;;  %9443 = vmatprep.subr.msk.bf16.mxu0 %vm17556_vm9, %v9441_v45  ;;  %vm17782_vm5 = vcmp.lt.s32.totalorder %v11635_v56, 111  ;;  %v17786_v45 = vld [vmem:[#allocation34_spill] sm:$0xff]  ;;  %v11253_v33 = vunpack.i.h.bf16 %v11251_v44 }
 0x9d5   : > { %v9535_v15 = vpack.c.bf16 %v6607_v53, %v6606_v28  ;;  %v6679_v48 = vsel %vm17778_vm8, %v11283_v26, %v11193_v20  ;;  %vm17780_vm15 = vmmov %vm17768_vm1  ;;  %v6761_v47 = vsel %vm17782_vm5, %v11163_v54, %v11238_v6  ;;  %vm17787_vm13 = vnez %v17786_v45 }
 0x9d6   : > { %v9446_v24 = vpack.c.bf16 %v6679_v48, %v6678_v37  ;;  %v6683_v36 = vsel %vm17780_vm15, %v11188_v34, %v11283_v26  ;;  %vm17781_vm2 = vmmov %vm17768_vm1  ;;  %v11291_v43 = vpop.permute.xlu0 %11290  ;;  %v11252_v60 = vunpack.i.l.bf16 %v11251_v44  ;;  %v17800_v26 = vld [vmem:[#allocation31_spill] sm:$0xff] }
 0x9d7   : > { %9537 = vmatprep.subr.msk.bf16.mxu1 %vm17773_vm14, %v9535_v15  ;;  %v6682_v19 = vsel %vm17781_vm2, %v11187_v57, %v11282_v5  ;;  %vm17783_vm6 = vmmov %vm17782_vm5  ;;  %9445 = vmatpush1.bf16.msra.mxu0 %v9444_v31  ;;  %v6686_v46 = vsel %vm17781_vm2, %v11287_v62, %v11187_v57  ;;  %v11293_v25 = vunpack.i.h.bf16 %v11291_v43  ;;  %v11292_v55 = vunpack.i.l.bf16 %v11291_v43  ;;  %v11256_v53 = vpop.permute.xlu1 %11255 }
 0x9d8   : > { %9540 = vmatpush1.bf16.msk.msra.mxu1 %vm17487_vm10, %v9538_v50  ;;  %v6760_v8 = vsel %vm17783_vm6, %v11162_v51, %v11237_v40  ;;  %vm17784_vm14 = vmmov %vm17782_vm5  ;;  %v9449_v63 = vpack.c.bf16 %v6683_v36, %v6682_v19  ;;  %9448 = vmatprep.subr.msk.bf16.mxu0 %vm17556_vm9, %v9446_v24  ;;  %v11258_v29 = vunpack.i.h.bf16 %v11256_v53  ;;  %v17811_v43 = vlaneseq }
 0x9d9   : > { %v6765_v35 = vsel %vm17784_vm14, %v11248_v30, %v11163_v54  ;;  %vm17785_vm11 = vmmov %vm17782_vm5  ;;  %9543 = vmatprep.subr.msk.bf16.mxu1 %vm17787_vm13, %v9541_v38  ;;  %v9454_v10 = vpack.c.bf16 %v6761_v47, %v6760_v8  ;;  %v17808_v38 = vsub.s32 2, %v17807_v59 }
 0x9da   : > { %v6764_v2 = vsel %vm17785_vm11, %v11247_v42, %v11162_v51  ;;  %vm17788_vm4 = vmmov %vm17782_vm5  ;;  %v11257_v51 = vunpack.i.l.bf16 %v11256_v53  ;;  %v11296_v12 = vpop.permute.xlu0 %11295 }
 0x9db   : > { %v6756_v41 = vsel %vm17788_vm4, %v11237_v40, %v11242_v7  ;;  %vm17789_vm10 = vmmov %vm17788_vm4  ;;  %9450 = vmatpush1.bf16.msra.mxu0 %v9449_v63  ;;  %v9551_v28 = vpack.c.bf16 %v6765_v35, %v6764_v2  ;;  %v6966_v24 = vrot.slane %v15748_v49, %v17808_v38 }
 0x9dc   : > { %v6757_v18 = vsel %vm17789_vm10, %v11238_v6, %v11243_v52  ;;  %vm17790_vm7 = vmmov %vm17768_vm1  ;;  %9545 = vmatpush1.bf16.msra.mxu1 %v9544_v13 }
 0x9dd   : > { %v6675_v0 = vsel %vm17790_vm7, %v11193_v20, %v11288_v21  ;;  %vm17791_vm8 = vmmov %vm17768_vm1  ;;  %v9451_v31 = vpack.c.bf16 %v6757_v18, %v6756_v41  ;;  %v11298_v20 = vunpack.i.h.bf16 %v11296_v12 }
 0x9de   : > { %v6687_v27 = vsel %vm17791_vm8, %v11288_v21, %v11188_v34  ;;  %vm17792_vm1 = vmmov %vm17788_vm4  ;;  %7036 = vmatmul.mubr.f32.vlgmr.msra.gmra.mrb[32].mxu0 %v16153_v32  ;;  %v17806_v34 = vmov 0.0  }
 0x9df   : > { %v6752_v17 = vsel %vm17792_vm1, %v11242_v7, %v11247_v42  ;;  %vm17793_vm15 = vmmov %vm17781_vm2  ;;  %v9546_v54 = vpack.c.bf16 %v6687_v27, %v6686_v46  ;;  %9453 = vmatprep.subr.msk.bf16.mxu0 %vm17389_vm0, %v9451_v31  ;;  %7106 = vmatprep.mubr.f32.mxu0 %v17806_v34  ;;  %v6948_v56 = vpop.permute.xlu1 %6947 }
 0x9e0   : > { %v6674_v1 = vsel %vm17793_vm15, %v11192_v14, %v11287_v62  ;;  %vm17794_vm5 = vmmov %vm17792_vm1  ;;  %v11297_v14 = vunpack.i.l.bf16 %v11296_v12  ;;  %9456 = vmatpush1.bf16.msk.msra.mxu0 %vm12793_vm12, %v9454_v10  ;;  %v6953_v49 = vrot.slane %v6948_v56, %v17715_v39 }
 0x9e1   : > { %v9549_v4 = vpack.c.bf16 %v6675_v0, %v6674_v1  ;;  %v6753_v3 = vsel %vm17794_vm5, %v11243_v52, %v11248_v30  ;;  %9548 = vmatprep.subr.msk.bf16.mxu1 %vm17787_vm13, %v9546_v54  ;;  %vm17796_vm9 = vmmov %vm17792_vm1  ;;  %vm17801_vm13 = vnez %v17800_v26  ;;  %vm7299_vm5 = vcmp.lt.s32.totalorder %v17811_v43, 512 }
 0x9e2   : > { %v9554_v11 = vpack.c.bf16 %v6753_v3, %v6752_v17  ;;  %v6763_v13 = vsel %vm17796_vm9, %v11253_v33, %v11293_v25  ;;  %vm17797_vm6 = vmmov %vm17792_vm1 }
 0x9e3   : > { %9550 = vmatpush1.bf16.msra.mxu1 %v9549_v4  ;;  %v6762_v16 = vsel %vm17797_vm6, %v11252_v60, %v11292_v55  ;;  %vm17798_vm14 = vmmov %vm17792_vm1 }
 0x9e4   : > { %v6758_v23 = vsel %vm17798_vm14, %v11292_v55, %v11257_v51  ;;  %vm17799_vm11 = vmmov %vm17792_vm1  ;;  %9553 = vmatprep.subr.msk.bf16.mxu1 %vm17801_vm13, %v9551_v28  ;;  %v9460_v57 = vpack.c.bf16 %v6763_v13, %v6762_v16 }
 0x9e5   : > { %v6759_v50 = vsel %vm17799_vm11, %v11293_v25, %v11258_v29  ;;  %vm17802_vm4 = vmmov %vm17792_vm1 }
 0x9e6   : > { %v9457_v5 = vpack.c.bf16 %v6759_v50, %v6758_v23  ;;  %v6755_v6 = vsel %vm17802_vm4, %v11258_v29, %v11298_v20  ;;  %vm17803_vm10 = vmmov %vm17792_vm1  ;;  %7178 = vmatmul.mubr.f32.vlgmr.msra.gmra.mrb[32].mxu1 %v16153_v32  ;;  %v11345_v32 = vmov 1966171168  }
 0x9e7   : > { %v6767_v40 = vsel %vm17803_vm10, %v11298_v20, %v11253_v33  ;;  %vm17804_vm7 = vmmov %vm17792_vm1  ;;  %9556 = vmatpush1.bf16.msk.msra.mxu1 %vm17349_vm3, %v9554_v11  ;;  %7248 = vmatprep.mubr.f32.mxu1 %v17806_v34  ;;  %v7275_v52 = vunpack.c.l.s4 %v11345_v32 }
 0x9e8   : > { %v6754_v30 = vsel %vm17804_vm7, %v11257_v51, %v11297_v14  ;;  %vm17805_vm8 = vmmov %vm17792_vm1  ;;  %9459 = vmatprep.subr.msk.bf16.mxu0 %vm17389_vm0, %v9457_v5  ;;  %vm17809_vm1 = vcmask 261120  }
 0x9e9   : > { %v6766_v42 = vsel %vm17805_vm8, %v11297_v14, %v11252_v60  ;;  %v9560_v37 = vpack.c.bf16 %v6755_v6, %v6754_v30  ;;  %9462 = vmatpush1.bf16.msk.msra.mxu0 %vm12793_vm12, %v9460_v57  ;;  %vm17810_vm15 = vmmov %vm17809_vm1  ;;  %v7276_v36 = vunpack.c.0.s8 %v7275_v52 }
 0x9ea   : > { %v9557_v48 = vpack.c.bf16 %v6767_v40, %v6766_v42 }
 0x9eb   : > { %v7279_v45 = vsub.s32 %v7276_v36, %v17807_v59 }
 0x9ec   : > { %9559 = vmatprep.subr.msk.bf16.mxu1 %vm17801_vm13, %v9557_v48  ;;  %7439 = vmatmul.mubr.msk.f32.vlgmr.msra.gmra.mrb[32].mxu0 %vm17809_vm1, %v6966_v24 }
 0x9ed   : > { %9562 = vmatpush1.bf16.msk.msra.mxu1 %vm17349_vm3, %v9560_v37 }
 0x9f0   : > { %7440 = vmatmul.mubr.msk.f32.vlgmr.msra.gmra.mrb[32].mxu1 %vm17810_vm15, %v6966_v24 }
 0xabf   : > { %v7108_v7 = vpop.f32.mrb[32].mxu0 }
 0xac0   : > { %v9563_v9 = vadd.f32 %v7108_v7, %v6953_v49  ;;  %v7110_v61 = vpop.f32.mrb[33].mxu0 }
 0xac1   : > { %v9564_v19 = vadd.f32 %v7110_v61, %v6953_v49 }
 0xac2   : > { %vm7255_vm12 = vcmp.ge.f32.partialorder %v9563_v9, 0.0  ;;  %v7260_v22 = vmul.f32 %v9563_v9, %v7259_v58 }
 0xac3   : > { %v7250_v21 = vpop.f32.mrb[32].mxu1  ;;  %vm7256_vm3 = vcmp.ge.f32.partialorder %v9564_v19, 0.0  ;;  %v7261_v8 = vmul.f32 %v9564_v19, %v7259_v58 }
 0xac4   : > { %v9565_v62 = vadd.f32 %v7250_v21, %v6953_v49  ;;  %v7252_v47 = vpop.f32.mrb[33].mxu1  ;;  %v7264_v2 = vsel %vm7255_vm12, %v9563_v9, %v7260_v22 }
 0xac5   : > { %v9566_v35 = vadd.f32 %v7252_v47, %v6953_v49  ;;  %v7265_v41 = vsel %vm7256_vm3, %v9564_v19, %v7261_v8 }
 0xac6   : > { %vm7257_vm0 = vcmp.ge.f32.partialorder %v9565_v62, 0.0  ;;  %v7262_v39 = vmul.f32 %v9565_v62, %v7259_v58  ;;  %v7272_v0 = vcombine.low %v7264_v2, %v7265_v41 }
 0xac7   : > { %vm7258_vm2 = vcmp.ge.f32.partialorder %v9566_v35, 0.0  ;;  %v7263_v18 = vmul.f32 %v9566_v35, %v7259_v58 }
 0xac8   : > { %v7266_v27 = vsel %vm7257_vm0, %v9565_v62, %v7262_v39  ;;  %v7280_v63 = vrot.slane %v7272_v0, %v7279_v45 }
 0xac9   : > { %v7267_v44 = vsel %vm7258_vm2, %v9566_v35, %v7263_v18 }
 0xaca   : > { %v7273_v17 = vcombine.low %v7266_v27, %v7267_v44 }
 0xacc   : > { %v7287_v1 = vrot.slane %v7273_v17, %v7279_v45 }
 0xace   : > { %v7288_v46 = vcombine.low %v7280_v63, %v7287_v1 }
 0xad0   : > { %v7295_v54 = vrot.slane %v7288_v46, %v7279_v45 }
 0xad2   : > { %7301 = vst.msk [vmem:[%s291_s29] sm:$0xf] %vm7299_vm5, %v7295_v54 }
 0xad3 PF: > { %s20_s26 = sadd.s32 1, %s11324_s26  }
 0xad4   : > { %p17_p1 = scmp.ge.s32.totalorder %s20_s26, 4  }
 0xad6   :  { %19 = sbr.rel (!%p17_p1) target bundleno = 4 (0x4), region = 86 }
 0xadd   :  { %7322 = vsyncpa [#allocation5], 1 }
 0xade   :  { %7324 = vsyncpa [#allocation5 + $0x1], 1 }

</bundles_post_ra>
